<compile_context>
chip_gen: v7x
topology: tpu7x:2x2x1
jax: 0.10.0
libtpu: 0.0.40
codegen_flags: <defaults>
</compile_context>

<pallas_src>
import numpy as np
import jax
import jax.numpy as jnp
from jax.experimental import pallas as pl
from jax.experimental.pallas import tpu as pltpu

# ----- hyperparameters (small, consistent with the module) -----
INPUT_SIZE = 32
HIDDEN = 128          # forced by Linear(416, num_classes)
NUM_LAYERS = 2
NUM_CLASSES = 5
BATCH = 2             # B * INPUT_SIZE must equal 64
SEQ = 8               # T
CONV_OUT_CH = 10
CONV_K = 9
CONV_LEN = 32         # (64 + 2*4 - 9)//2 + 1
POOL_LEN = 16         # after MaxPool1d(2, 2)
BN_EPS = 1e-5
FC_IN = CONV_OUT_CH * POOL_LEN + 2 * HIDDEN   # 416


# ---------------------------------------------------------------------------
# Single fused Pallas kernel
# ---------------------------------------------------------------------------
def _fused_forward_kernel(
        x_seq_ref, x_tm_ref,
        a_even_ref, a_odd_ref, cnn_scale_ref, cnn_shift_ref,
        w0_ref, bih0_ref, whh0f_ref, whh0b_ref, bhh0f_ref, bhh0b_ref,
        w1_ref, bih1_ref, whh1f_ref, whh1b_ref, bhh1f_ref, bhh1b_ref,
        fcw_cnn_ref, fcw_f_ref, fcw_b_ref, fcb_ref,
        o_ref,
        gx_scr, l1_scr, hf_scr, hb_scr):
    f32 = jnp.float32
    H, T, B = HIDDEN, SEQ, BATCH

    # ---- CNN branch: conv1d(k=9, s=2, p=4) + maxpool(2,2) + BN(eval) + relu.
    # The conv weight is pre-expanded into two (64, 160) matrices (even / odd
    # conv positions); their output columns are already the channel-major
    # flattened layout col = c*16 + p, so the result is lane-dense and feeds
    # the FC directly (no transpose, no narrow masked stores).
    xs = x_seq_ref[...]                                               # (T, 64)
    ce = jnp.dot(xs, a_even_ref[...], preferred_element_type=f32)     # (T, 160)
    co = jnp.dot(xs, a_odd_ref[...], preferred_element_type=f32)      # (T, 160)
    x1 = jnp.maximum(jnp.maximum(ce, co) * cnn_scale_ref[...]
                     + cnn_shift_ref[...], 0.0)                       # (T, 160)

    # ---- one bidirectional GRU layer, fully unrolled over time.
    # gx for both directions is computed with one matmul; inside the loop the
    # fwd direction consumes time step s and the bwd direction consumes time
    # step T-1-s (in-kernel index reversal instead of jnp.flip).
    def bigru_layer(layer_in, w_ref, bih_ref, whhf_ref, whhb_ref,
                    bhhf_ref, bhhb_ref, emit):
        # cols [0:3H] = fwd gates (r, z, n); cols [3H:6H] = bwd gates.
        gx_scr[...] = (jnp.dot(layer_in, w_ref[...],
                               preferred_element_type=f32) + bih_ref[...])
        h_f = jnp.zeros((B, H), f32)
        h_b = jnp.zeros((B, H), f32)
        for s in range(T):                      # static unroll: T = 8
            tb = T - 1 - s
            gxf = gx_scr[2 * s:2 * s + 2, 0:3 * H]         # (B, 3H), time s
            gxb = gx_scr[2 * tb:2 * tb + 2, 3 * H:6 * H]   # (B, 3H), time T-1-s
            ghf = jnp.dot(h_f, whhf_ref[...],
                          preferred_element_type=f32) + bhhf_ref[...]
            ghb = jnp.dot(h_b, whhb_ref[...],
                          preferred_element_type=f32) + bhhb_ref[...]
            rf = jax.nn.sigmoid(gxf[:, :H] + ghf[:, :H])
            zf = jax.nn.sigmoid(gxf[:, H:2 * H] + ghf[:, H:2 * H])
            nf = jnp.tanh(gxf[:, 2 * H:] + rf * ghf[:, 2 * H:])
            h_f = (1.0 - zf) * nf + zf * h_f
            rb = jax.nn.sigmoid(gxb[:, :H] + ghb[:, :H])
            zb = jax.nn.sigmoid(gxb[:, H:2 * H] + ghb[:, H:2 * H])
            nb = jnp.tanh(gxb[:, 2 * H:] + rb * ghb[:, 2 * H:])
            h_b = (1.0 - zb) * nb + zb * h_b
            emit(s, tb, h_f, h_b)

    # layer 0: keep the full time-major output (rows t*B + b) for layer 1.
    def emit_l0(s, tb, h_f, h_b):
        l1_scr[2 * s:2 * s + 2, 0:H] = h_f           # fwd half, time s
        l1_scr[2 * tb:2 * tb + 2, H:2 * H] = h_b     # bwd half, time T-1-s

    bigru_layer(x_tm_ref[...], w0_ref, bih0_ref, whh0f_ref, whh0b_ref,
                bhh0f_ref, bhh0b_ref, emit_l0)

    # layer 1: only store the rows the readout needs
    #   out1[-1, :, :] -> fwd hidden of batch element B-1 at every time step
    #   out2[0,  :, :] -> bwd hidden of batch element 0   at every time step
    def emit_l1(s, tb, h_f, h_b):
        hf_scr[s:s + 1, :] = h_f[B - 1:B, :]
        hb_scr[tb:tb + 1, :] = h_b[0:1, :]

    bigru_layer(l1_scr[...], w1_ref, bih1_ref, whh1f_ref, whh1b_ref,
                bhh1f_ref, bhh1b_ref, emit_l1)

    # ---- final Linear(416, C): the feature concat is folded into three
    # partial matmuls summed in VMEM.
    o_ref[...] = (jnp.dot(x1, fcw_cnn_ref[...], preferred_element_type=f32)
                  + jnp.dot(hf_scr[...], fcw_f_ref[...],
                            preferred_element_type=f32)
                  + jnp.dot(hb_scr[...], fcw_b_ref[...],
                            preferred_element_type=f32)
                  + fcb_ref[...])

    # TODO(synk): on v7x the fwd/bwd recurrences could run on the two
    # TensorCores (core_map / parallel leading axis); kept single-core here
    # because the per-layer output exchange would need a cross-core barrier.


def cnn_bigru_forward(x, fp):
    """x: (B, T, F) float32; fp: prepared (fused) parameters."""
    b, t, f = x.shape
    # Only data-path glue left: two tiny reshapes of the 2 KB input.
    x_seq = x.reshape(t, b * f)                        # torch x.reshape(T,1,64)
    x_tm = jnp.swapaxes(x, 0, 1).reshape(t * b, f)     # time-major rows t*B + b
    return pl.pallas_call(
        _fused_forward_kernel,
        out_shape=jax.ShapeDtypeStruct((t, NUM_CLASSES), jnp.float32),
        scratch_shapes=[
            pltpu.VMEM((t * b, 6 * HIDDEN), jnp.float32),   # gx (both dirs)
            pltpu.VMEM((t * b, 2 * HIDDEN), jnp.float32),   # layer-0 output
            pltpu.VMEM((t, HIDDEN), jnp.float32),           # fwd readout rows
            pltpu.VMEM((t, HIDDEN), jnp.float32),           # bwd readout rows
        ],
    )(x_seq, x_tm,
      fp['a_even'], fp['a_odd'], fp['cnn_scale'], fp['cnn_shift'],
      fp['w0'], fp['bih0'], fp['whh0f'], fp['whh0b'], fp['bhh0f'], fp['bhh0b'],
      fp['w1'], fp['bih1'], fp['whh1f'], fp['whh1b'], fp['bhh1f'], fp['bhh1b'],
      fp['fcw_cnn'], fp['fcw_f'], fp['fcw_b'], fp['fcb'])


# ---------------------------------------------------------------------------
# One-time weight repacking for the fused kernel (outside the hot path)
# ---------------------------------------------------------------------------
def prepare_params(params):
    fp = {}
    n_in = BATCH * INPUT_SIZE  # 64
    # Expand conv1d(k=9, stride=2, pad=4) into (64, 160) matrices for the even
    # and odd conv positions of each maxpool pair; columns are channel-major
    # flattened (col = c*POOL_LEN + p).  Conv bias is folded into the BN shift.
    sel_e = np.zeros((n_in, POOL_LEN, CONV_K), np.float32)
    sel_o = np.zeros((n_in, POOL_LEN, CONV_K), np.float32)
    for p in range(POOL_LEN):
        for k in range(CONV_K):
            je = 4 * p + k - 4          # conv output position 2p
            jo = 4 * p + 2 + k - 4      # conv output position 2p + 1
            if 0 <= je < n_in:
                sel_e[je, p, k] = 1.0
            if 0 <= jo < n_in:
                sel_o[jo, p, k] = 1.0
    w = params['conv_w']                                     # (10, 9)
    fp['a_even'] = jnp.einsum('jpk,ck->jcp', jnp.asarray(sel_e), w).reshape(
        n_in, CONV_OUT_CH * POOL_LEN)
    fp['a_odd'] = jnp.einsum('jpk,ck->jcp', jnp.asarray(sel_o), w).reshape(
        n_in, CONV_OUT_CH * POOL_LEN)
    scale = params['bn_gamma'] / jnp.sqrt(params['bn_var'] + BN_EPS)
    shift = scale * (params['conv_b'] - params['bn_mean']) + params['bn_beta']
    fp['cnn_scale'] = jnp.repeat(scale, POOL_LEN).reshape(1, -1)   # (1, 160)
    fp['cnn_shift'] = jnp.repeat(shift, POOL_LEN).reshape(1, -1)   # (1, 160)

    # GRU: transpose recurrent weights, concat fwd/bwd input projections.
    for l in range(NUM_LAYERS):
        pf, pb = params['gru'][l]['fwd'], params['gru'][l]['bwd']
        fp[f'w{l}'] = jnp.concatenate([pf['Wih'].T, pb['Wih'].T], axis=1)
        fp[f'bih{l}'] = jnp.concatenate([pf['bih'], pb['bih']]).reshape(1, -1)
        fp[f'whh{l}f'] = pf['Whh'].T
        fp[f'whh{l}b'] = pb['Whh'].T
        fp[f'bhh{l}f'] = pf['bhh'].reshape(1, -1)
        fp[f'bhh{l}b'] = pb['bhh'].reshape(1, -1)

    # FC: split Linear(416, C) weight by feature group (CNN | fwd-h | bwd-h).
    c = CONV_OUT_CH * POOL_LEN
    fp['fcw_cnn'] = params['fc_w'][:, :c].T                    # (160, C)
    fp['fcw_f'] = params['fc_w'][:, c:c + HIDDEN].T            # (128, C)
    fp['fcw_b'] = params['fc_w'][:, c + HIDDEN:].T             # (128, C)
    fp['fcb'] = params['fc_b'].reshape(1, -1)
    return fp


# ---------------------------------------------------------------------------
# Pure-JAX reference (for numerical self-check only)
# ---------------------------------------------------------------------------
def reference_forward(x, params):
    b, t, f = x.shape
    x_seq = x.reshape(t, b * f)
    x_pad = jnp.pad(x_seq, ((0, 0), (4, 4)))
    gather = 2 * jnp.arange(CONV_LEN)[:, None] + jnp.arange(CONV_K)[None, :]
    patches = x_pad[:, gather]
    conv = jnp.einsum('tlk,ck->tcl', patches, params['conv_w']) \
        + params['conv_b'][None, :, None]
    pooled = jnp.max(conv.reshape(t, CONV_OUT_CH, POOL_LEN, 2), axis=-1)
    scale = params['bn_gamma'] / jnp.sqrt(params['bn_var'] + BN_EPS)
    shift = params['bn_beta'] - params['bn_mean'] * scale
    y = jnp.maximum(pooled * scale[None, :, None] + shift[None, :, None], 0.0)
    x1 = y.reshape(t, CONV_OUT_CH * POOL_LEN)

    def run_dir(x_btf, p, reverse):
        h_dim = HIDDEN
        xs = jnp.flip(x_btf, axis=1) if reverse else x_btf
        gx = jnp.einsum('btf,gf->btg', xs, p['Wih']) + p['bih']

        def step(h, gx_t):
            gh = h @ p['Whh'].T + p['bhh']
            r = jax.nn.sigmoid(gx_t[:, :h_dim] + gh[:, :h_dim])
            z = jax.nn.sigmoid(gx_t[:, h_dim:2 * h_dim] + gh[:, h_dim:2 * h_dim])
            n = jnp.tanh(gx_t[:, 2 * h_dim:] + r * gh[:, 2 * h_dim:])
            h_new = (1.0 - z) * n + z * h
            return h_new, h_new

        h0 = jnp.zeros((x_btf.shape[0], h_dim), jnp.float32)
        _, outs = jax.lax.scan(step, h0, jnp.transpose(gx, (1, 0, 2)))
        outs = jnp.transpose(outs, (1, 0, 2))
        return jnp.flip(outs, axis=1) if reverse else outs

    layer_in = x
    for l in range(NUM_LAYERS):
        fwd = run_dir(layer_in, params['gru'][l]['fwd'], False)
        bwd = run_dir(layer_in, params['gru'][l]['bwd'], True)
        layer_in = jnp.concatenate([fwd, bwd], axis=-1)
    out = layer_in
    out_cat = jnp.concatenate([out[-1, :, :HIDDEN], out[0, :, HIDDEN:]], axis=1)
    out_cat = jnp.concatenate([x1, out_cat], axis=1)
    return out_cat @ params['fc_w'].T + params['fc_b']


# ---------------------------------------------------------------------------
# Deterministic parameter init (shapes from the module's __init__)
# ---------------------------------------------------------------------------
def init_params(key):
    ks = iter(jax.random.split(key, 32))

    def u(shape, scale):
        return jax.random.uniform(next(ks), shape, jnp.float32, -scale, scale)

    params = {}
    cs = 1.0 / (CONV_K ** 0.5)
    params['conv_w'] = u((CONV_OUT_CH, CONV_K), cs)    # squeezed from (10, 1, 9)
    params['conv_b'] = u((CONV_OUT_CH,), cs)
    params['bn_gamma'] = jax.random.uniform(next(ks), (CONV_OUT_CH,), jnp.float32, 0.5, 1.5)
    params['bn_beta'] = u((CONV_OUT_CH,), 0.1)
    params['bn_mean'] = u((CONV_OUT_CH,), 0.1)
    params['bn_var'] = jax.random.uniform(next(ks), (CONV_OUT_CH,), jnp.float32, 0.5, 1.5)

    hs = 1.0 / (HIDDEN ** 0.5)
    gru = []
    for l in range(NUM_LAYERS):
        in_dim = INPUT_SIZE if l == 0 else 2 * HIDDEN
        layer = {}
        for d in ('fwd', 'bwd'):
            layer[d] = dict(
                Wih=u((3 * HIDDEN, in_dim), hs),
                Whh=u((3 * HIDDEN, HIDDEN), hs),
                bih=u((3 * HIDDEN,), hs),
                bhh=u((3 * HIDDEN,), hs),
            )
        gru.append(layer)
    params['gru'] = gru

    fs = 1.0 / (FC_IN ** 0.5)
    params['fc_w'] = u((NUM_CLASSES, FC_IN), fs)
    params['fc_b'] = u((NUM_CLASSES,), fs)
    # TODO(synk): fc1 (Linear(input_size,128)) and dropout exist in __init__ but
    # are unused in forward(); intentionally not materialized.
    return params


if __name__ == "__main__":
    key = jax.random.PRNGKey(0)
    pkey, xkey = jax.random.split(key)
    params = init_params(pkey)
    x = jax.random.normal(xkey, (BATCH, SEQ, INPUT_SIZE), jnp.float32)

    fused = prepare_params(params)              # one-time weight repacking
    out = jax.jit(cnn_bigru_forward)(x, fused)
    out = jax.block_until_ready(out)
    assert out.shape == (SEQ, NUM_CLASSES)

    ref = reference_forward(x, params)
    err = float(jnp.max(jnp.abs(out - ref)))
    if err > 5e-3:
        raise AssertionError(f"kernel/reference mismatch: max abs err = {err}")

    print("KERNEL_OK")
</pallas_src>

<mosaic_0001>
module attributes {stable_mosaic.version = 11 : i64} {
  func.func @_fused_forward_kernel(%arg0: memref<8x64xf32, #tpu.memory_space<vmem>>, %arg1: memref<16x32xf32, #tpu.memory_space<vmem>>, %arg2: memref<64x160xf32, #tpu.memory_space<vmem>>, %arg3: memref<64x160xf32, #tpu.memory_space<vmem>>, %arg4: memref<1x160xf32, #tpu.memory_space<vmem>>, %arg5: memref<1x160xf32, #tpu.memory_space<vmem>>, %arg6: memref<32x768xf32, #tpu.memory_space<vmem>>, %arg7: memref<1x768xf32, #tpu.memory_space<vmem>>, %arg8: memref<128x384xf32, #tpu.memory_space<vmem>>, %arg9: memref<128x384xf32, #tpu.memory_space<vmem>>, %arg10: memref<1x384xf32, #tpu.memory_space<vmem>>, %arg11: memref<1x384xf32, #tpu.memory_space<vmem>>, %arg12: memref<256x768xf32, #tpu.memory_space<vmem>>, %arg13: memref<1x768xf32, #tpu.memory_space<vmem>>, %arg14: memref<128x384xf32, #tpu.memory_space<vmem>>, %arg15: memref<128x384xf32, #tpu.memory_space<vmem>>, %arg16: memref<1x384xf32, #tpu.memory_space<vmem>>, %arg17: memref<1x384xf32, #tpu.memory_space<vmem>>, %arg18: memref<160x5xf32, #tpu.memory_space<vmem>>, %arg19: memref<128x5xf32, #tpu.memory_space<vmem>>, %arg20: memref<128x5xf32, #tpu.memory_space<vmem>>, %arg21: memref<1x5xf32, #tpu.memory_space<vmem>>, %arg22: memref<8x5xf32, #tpu.memory_space<vmem>>, %arg23: memref<16x768xf32, #tpu.memory_space<vmem>>, %arg24: memref<16x256xf32, #tpu.memory_space<vmem>>, %arg25: memref<8x128xf32, #tpu.memory_space<vmem>>, %arg26: memref<8x128xf32, #tpu.memory_space<vmem>>) attributes {dimension_semantics = [], scalar_prefetch = 0 : i64, scratch_operands = 4 : i64, tpu.core_type = #tpu.core_type<tc>} {
    %c0 = arith.constant 0 : index
    %c0_0 = arith.constant 0 : index
    %0 = vector.load %arg0[%c0, %c0_0] : memref<8x64xf32, #tpu.memory_space<vmem>>, vector<8x64xf32>
    %c0_1 = arith.constant 0 : index
    %c0_2 = arith.constant 0 : index
    %1 = vector.load %arg2[%c0_1, %c0_2] : memref<64x160xf32, #tpu.memory_space<vmem>>, vector<64x160xf32>
    %cst = arith.constant dense<0.000000e+00> : vector<8x160xf32>
    %2 = tpu.matmul %0, %1, %cst {dimension_numbers = #tpu.dot_dimension_numbers<[1], [0], [0], [1], [0, 0, 1, 1], [], []>} : vector<8x64xf32>, vector<64x160xf32>, vector<8x160xf32> -> vector<8x160xf32>
    %c0_3 = arith.constant 0 : index
    %c0_4 = arith.constant 0 : index
    %3 = vector.load %arg3[%c0_3, %c0_4] : memref<64x160xf32, #tpu.memory_space<vmem>>, vector<64x160xf32>
    %cst_5 = arith.constant dense<0.000000e+00> : vector<8x160xf32>
    %4 = tpu.matmul %0, %3, %cst_5 {dimension_numbers = #tpu.dot_dimension_numbers<[1], [0], [0], [1], [0, 0, 1, 1], [], []>} : vector<8x64xf32>, vector<64x160xf32>, vector<8x160xf32> -> vector<8x160xf32>
    %5 = arith.maximumf %2, %4 : vector<8x160xf32>
    %c0_6 = arith.constant 0 : index
    %c0_7 = arith.constant 0 : index
    %6 = vector.load %arg4[%c0_6, %c0_7] : memref<1x160xf32, #tpu.memory_space<vmem>>, vector<1x160xf32>
    %7 = vector.broadcast %6 : vector<1x160xf32> to vector<8x160xf32>
    %8 = arith.mulf %5, %7 : vector<8x160xf32>
    %c0_8 = arith.constant 0 : index
    %c0_9 = arith.constant 0 : index
    %9 = vector.load %arg5[%c0_8, %c0_9] : memref<1x160xf32, #tpu.memory_space<vmem>>, vector<1x160xf32>
    %10 = vector.broadcast %9 : vector<1x160xf32> to vector<8x160xf32>
    %11 = arith.addf %8, %10 : vector<8x160xf32>
    %cst_10 = arith.constant 0.000000e+00 : f32
    %12 = vector.broadcast %cst_10 : f32 to vector<8x160xf32>
    %13 = arith.maximumf %11, %12 : vector<8x160xf32>
    %c0_11 = arith.constant 0 : index
    %c0_12 = arith.constant 0 : index
    %14 = vector.load %arg1[%c0_11, %c0_12] : memref<16x32xf32, #tpu.memory_space<vmem>>, vector<16x32xf32>
    %c0_13 = arith.constant 0 : index
    %c0_14 = arith.constant 0 : index
    %15 = vector.load %arg6[%c0_13, %c0_14] : memref<32x768xf32, #tpu.memory_space<vmem>>, vector<32x768xf32>
    %cst_15 = arith.constant dense<0.000000e+00> : vector<16x768xf32>
    %16 = tpu.matmul %14, %15, %cst_15 {dimension_numbers = #tpu.dot_dimension_numbers<[1], [0], [0], [1], [0, 0, 1, 1], [], []>} : vector<16x32xf32>, vector<32x768xf32>, vector<16x768xf32> -> vector<16x768xf32>
    %c0_16 = arith.constant 0 : index
    %c0_17 = arith.constant 0 : index
    %17 = vector.load %arg7[%c0_16, %c0_17] : memref<1x768xf32, #tpu.memory_space<vmem>>, vector<1x768xf32>
    %18 = vector.broadcast %17 : vector<1x768xf32> to vector<16x768xf32>
    %19 = arith.addf %16, %18 : vector<16x768xf32>
    %c0_18 = arith.constant 0 : index
    %c0_19 = arith.constant 0 : index
    %20 = vector.load %arg23[%c0_18, %c0_19] : memref<16x768xf32, #tpu.memory_space<vmem>>, vector<16x768xf32>
    tpu.vector_store %arg23[%c0_18, %c0_19], %19 {strides = array<i32>} : memref<16x768xf32, #tpu.memory_space<vmem>>, vector<16x768xf32>,
    %cst_20 = arith.constant 0.000000e+00 : f32
    %21 = vector.broadcast %cst_20 : f32 to vector<2x128xf32>
    %cst_21 = arith.constant 0.000000e+00 : f32
    %22 = vector.broadcast %cst_21 : f32 to vector<2x128xf32>
    %c0_22 = arith.constant 0 : index
    %c0_23 = arith.constant 0 : index
    %23 = vector.load %arg23[%c0_22, %c0_23] : memref<16x768xf32, #tpu.memory_space<vmem>>, vector<2x384xf32>
    %c14 = arith.constant 14 : index
    %c384 = arith.constant 384 : index
    %24 = vector.load %arg23[%c14, %c384] : memref<16x768xf32, #tpu.memory_space<vmem>>, vector<2x384xf32>
    %c0_24 = arith.constant 0 : index
    %c0_25 = arith.constant 0 : index
    %25 = vector.load %arg8[%c0_24, %c0_25] : memref<128x384xf32, #tpu.memory_space<vmem>>, vector<128x384xf32>
    %cst_26 = arith.constant dense<0.000000e+00> : vector<2x384xf32>
    %26 = tpu.matmul %21, %25, %cst_26 {dimension_numbers = #tpu.dot_dimension_numbers<[1], [0], [0], [1], [0, 0, 1, 1], [], []>} : vector<2x128xf32>, vector<128x384xf32>, vector<2x384xf32> -> vector<2x384xf32>
    %c0_27 = arith.constant 0 : index
    %c0_28 = arith.constant 0 : index
    %27 = vector.load %arg10[%c0_27, %c0_28] : memref<1x384xf32, #tpu.memory_space<vmem>>, vector<1x384xf32>
    %28 = vector.broadcast %27 : vector<1x384xf32> to vector<2x384xf32>
    %29 = arith.addf %26, %28 : vector<2x384xf32>
    %c0_29 = arith.constant 0 : index
    %c0_30 = arith.constant 0 : index
    %30 = vector.load %arg9[%c0_29, %c0_30] : memref<128x384xf32, #tpu.memory_space<vmem>>, vector<128x384xf32>
    %cst_31 = arith.constant dense<0.000000e+00> : vector<2x384xf32>
    %31 = tpu.matmul %22, %30, %cst_31 {dimension_numbers = #tpu.dot_dimension_numbers<[1], [0], [0], [1], [0, 0, 1, 1], [], []>} : vector<2x128xf32>, vector<128x384xf32>, vector<2x384xf32> -> vector<2x384xf32>
    %c0_32 = arith.constant 0 : index
    %c0_33 = arith.constant 0 : index
    %32 = vector.load %arg11[%c0_32, %c0_33] : memref<1x384xf32, #tpu.memory_space<vmem>>, vector<1x384xf32>
    %33 = vector.broadcast %32 : vector<1x384xf32> to vector<2x384xf32>
    %34 = arith.addf %31, %33 : vector<2x384xf32>
    %35 = vector.extract_strided_slice %23 {offsets = [0, 0], sizes = [2, 128], strides = [1, 1]} : vector<2x384xf32> to vector<2x128xf32>
    %36 = vector.extract_strided_slice %29 {offsets = [0, 0], sizes = [2, 128], strides = [1, 1]} : vector<2x384xf32> to vector<2x128xf32>
    %37 = arith.addf %35, %36 : vector<2x128xf32>
    %38 = arith.negf %37 : vector<2x128xf32>
    %39 = math.exp %38 : vector<2x128xf32>
    %cst_34 = arith.constant 1.000000e+00 : f32
    %40 = vector.broadcast %cst_34 : f32 to vector<2x128xf32>
    %41 = arith.addf %40, %39 : vector<2x128xf32>
    %42 = arith.divf %40, %41 : vector<2x128xf32>
    %43 = vector.extract_strided_slice %23 {offsets = [0, 128], sizes = [2, 128], strides = [1, 1]} : vector<2x384xf32> to vector<2x128xf32>
    %44 = vector.extract_strided_slice %29 {offsets = [0, 128], sizes = [2, 128], strides = [1, 1]} : vector<2x384xf32> to vector<2x128xf32>
    %45 = arith.addf %43, %44 : vector<2x128xf32>
    %46 = arith.negf %45 : vector<2x128xf32>
    %47 = math.exp %46 : vector<2x128xf32>
    %cst_35 = arith.constant 1.000000e+00 : f32
    %48 = vector.broadcast %cst_35 : f32 to vector<2x128xf32>
    %49 = arith.addf %48, %47 : vector<2x128xf32>
    %50 = arith.divf %48, %49 : vector<2x128xf32>
    %51 = vector.extract_strided_slice %23 {offsets = [0, 256], sizes = [2, 128], strides = [1, 1]} : vector<2x384xf32> to vector<2x128xf32>
    %52 = vector.extract_strided_slice %29 {offsets = [0, 256], sizes = [2, 128], strides = [1, 1]} : vector<2x384xf32> to vector<2x128xf32>
    %53 = arith.mulf %42, %52 : vector<2x128xf32>
    %54 = arith.addf %51, %53 : vector<2x128xf32>
    %55 = math.tanh %54 : vector<2x128xf32>
    %cst_36 = arith.constant 1.000000e+00 : f32
    %56 = vector.broadcast %cst_36 : f32 to vector<2x128xf32>
    %57 = arith.subf %56, %50 : vector<2x128xf32>
    %58 = arith.mulf %57, %55 : vector<2x128xf32>
    %59 = arith.mulf %50, %21 : vector<2x128xf32>
    %60 = arith.addf %58, %59 : vector<2x128xf32>
    %61 = vector.extract_strided_slice %24 {offsets = [0, 0], sizes = [2, 128], strides = [1, 1]} : vector<2x384xf32> to vector<2x128xf32>
    %62 = vector.extract_strided_slice %34 {offsets = [0, 0], sizes = [2, 128], strides = [1, 1]} : vector<2x384xf32> to vector<2x128xf32>
    %63 = arith.addf %61, %62 : vector<2x128xf32>
    %64 = arith.negf %63 : vector<2x128xf32>
    %65 = math.exp %64 : vector<2x128xf32>
    %cst_37 = arith.constant 1.000000e+00 : f32
    %66 = vector.broadcast %cst_37 : f32 to vector<2x128xf32>
    %67 = arith.addf %66, %65 : vector<2x128xf32>
    %68 = arith.divf %66, %67 : vector<2x128xf32>
    %69 = vector.extract_strided_slice %24 {offsets = [0, 128], sizes = [2, 128], strides = [1, 1]} : vector<2x384xf32> to vector<2x128xf32>
    %70 = vector.extract_strided_slice %34 {offsets = [0, 128], sizes = [2, 128], strides = [1, 1]} : vector<2x384xf32> to vector<2x128xf32>
    %71 = arith.addf %69, %70 : vector<2x128xf32>
    %72 = arith.negf %71 : vector<2x128xf32>
    %73 = math.exp %72 : vector<2x128xf32>
    %cst_38 = arith.constant 1.000000e+00 : f32
    %74 = vector.broadcast %cst_38 : f32 to vector<2x128xf32>
    %75 = arith.addf %74, %73 : vector<2x128xf32>
    %76 = arith.divf %74, %75 : vector<2x128xf32>
    %77 = vector.extract_strided_slice %24 {offsets = [0, 256], sizes = [2, 128], strides = [1, 1]} : vector<2x384xf32> to vector<2x128xf32>
    %78 = vector.extract_strided_slice %34 {offsets = [0, 256], sizes = [2, 128], strides = [1, 1]} : vector<2x384xf32> to vector<2x128xf32>
    %79 = arith.mulf %68, %78 : vector<2x128xf32>
    %80 = arith.addf %77, %79 : vector<2x128xf32>
    %81 = math.tanh %80 : vector<2x128xf32>
    %cst_39 = arith.constant 1.000000e+00 : f32
    %82 = vector.broadcast %cst_39 : f32 to vector<2x128xf32>
    %83 = arith.subf %82, %76 : vector<2x128xf32>
    %84 = arith.mulf %83, %81 : vector<2x128xf32>
    %85 = arith.mulf %76, %22 : vector<2x128xf32>
    %86 = arith.addf %84, %85 : vector<2x128xf32>
    %c0_40 = arith.constant 0 : index
    %c0_41 = arith.constant 0 : index
    %87 = vector.load %arg24[%c0_40, %c0_41] : memref<16x256xf32, #tpu.memory_space<vmem>>, vector<2x128xf32>
    tpu.vector_store %arg24[%c0_40, %c0_41], %60 {strides = array<i32>} : memref<16x256xf32, #tpu.memory_space<vmem>>, vector<2x128xf32>,
    %c14_42 = arith.constant 14 : index
    %c128 = arith.constant 128 : index
    %88 = vector.load %arg24[%c14_42, %c128] : memref<16x256xf32, #tpu.memory_space<vmem>>, vector<2x128xf32>
    tpu.vector_store %arg24[%c14_42, %c128], %86 {strides = array<i32>} : memref<16x256xf32, #tpu.memory_space<vmem>>, vector<2x128xf32>,
    %c2 = arith.constant 2 : index
    %c0_43 = arith.constant 0 : index
    %89 = vector.load %arg23[%c2, %c0_43] : memref<16x768xf32, #tpu.memory_space<vmem>>, vector<2x384xf32>
    %c12 = arith.constant 12 : index
    %c384_44 = arith.constant 384 : index
    %90 = vector.load %arg23[%c12, %c384_44] : memref<16x768xf32, #tpu.memory_space<vmem>>, vector<2x384xf32>
    %c0_45 = arith.constant 0 : index
    %c0_46 = arith.constant 0 : index
    %91 = vector.load %arg8[%c0_45, %c0_46] : memref<128x384xf32, #tpu.memory_space<vmem>>, vector<128x384xf32>
    %cst_47 = arith.constant dense<0.000000e+00> : vector<2x384xf32>
    %92 = tpu.matmul %60, %91, %cst_47 {dimension_numbers = #tpu.dot_dimension_numbers<[1], [0], [0], [1], [0, 0, 1, 1], [], []>} : vector<2x128xf32>, vector<128x384xf32>, vector<2x384xf32> -> vector<2x384xf32>
    %c0_48 = arith.constant 0 : index
    %c0_49 = arith.constant 0 : index
    %93 = vector.load %arg10[%c0_48, %c0_49] : memref<1x384xf32, #tpu.memory_space<vmem>>, vector<1x384xf32>
    %94 = vector.broadcast %93 : vector<1x384xf32> to vector<2x384xf32>
    %95 = arith.addf %92, %94 : vector<2x384xf32>
    %c0_50 = arith.constant 0 : index
    %c0_51 = arith.constant 0 : index
    %96 = vector.load %arg9[%c0_50, %c0_51] : memref<128x384xf32, #tpu.memory_space<vmem>>, vector<128x384xf32>
    %cst_52 = arith.constant dense<0.000000e+00> : vector<2x384xf32>
    %97 = tpu.matmul %86, %96, %cst_52 {dimension_numbers = #tpu.dot_dimension_numbers<[1], [0], [0], [1], [0, 0, 1, 1], [], []>} : vector<2x128xf32>, vector<128x384xf32>, vector<2x384xf32> -> vector<2x384xf32>
    %c0_53 = arith.constant 0 : index
    %c0_54 = arith.constant 0 : index
    %98 = vector.load %arg11[%c0_53, %c0_54] : memref<1x384xf32, #tpu.memory_space<vmem>>, vector<1x384xf32>
    %99 = vector.broadcast %98 : vector<1x384xf32> to vector<2x384xf32>
    %100 = arith.addf %97, %99 : vector<2x384xf32>
    %101 = vector.extract_strided_slice %89 {offsets = [0, 0], sizes = [2, 128], strides = [1, 1]} : vector<2x384xf32> to vector<2x128xf32>
    %102 = vector.extract_strided_slice %95 {offsets = [0, 0], sizes = [2, 128], strides = [1, 1]} : vector<2x384xf32> to vector<2x128xf32>
    %103 = arith.addf %101, %102 : vector<2x128xf32>
    %104 = arith.negf %103 : vector<2x128xf32>
    %105 = math.exp %104 : vector<2x128xf32>
    %cst_55 = arith.constant 1.000000e+00 : f32
    %106 = vector.broadcast %cst_55 : f32 to vector<2x128xf32>
    %107 = arith.addf %106, %105 : vector<2x128xf32>
    %108 = arith.divf %106, %107 : vector<2x128xf32>
    %109 = vector.extract_strided_slice %89 {offsets = [0, 128], sizes = [2, 128], strides = [1, 1]} : vector<2x384xf32> to vector<2x128xf32>
    %110 = vector.extract_strided_slice %95 {offsets = [0, 128], sizes = [2, 128], strides = [1, 1]} : vector<2x384xf32> to vector<2x128xf32>
    %111 = arith.addf %109, %110 : vector<2x128xf32>
    %112 = arith.negf %111 : vector<2x128xf32>
    %113 = math.exp %112 : vector<2x128xf32>
    %cst_56 = arith.constant 1.000000e+00 : f32
    %114 = vector.broadcast %cst_56 : f32 to vector<2x128xf32>
    %115 = arith.addf %114, %113 : vector<2x128xf32>
    %116 = arith.divf %114, %115 : vector<2x128xf32>
    %117 = vector.extract_strided_slice %89 {offsets = [0, 256], sizes = [2, 128], strides = [1, 1]} : vector<2x384xf32> to vector<2x128xf32>
    %118 = vector.extract_strided_slice %95 {offsets = [0, 256], sizes = [2, 128], strides = [1, 1]} : vector<2x384xf32> to vector<2x128xf32>
    %119 = arith.mulf %108, %118 : vector<2x128xf32>
    %120 = arith.addf %117, %119 : vector<2x128xf32>
    %121 = math.tanh %120 : vector<2x128xf32>
    %cst_57 = arith.constant 1.000000e+00 : f32
    %122 = vector.broadcast %cst_57 : f32 to vector<2x128xf32>
    %123 = arith.subf %122, %116 : vector<2x128xf32>
    %124 = arith.mulf %123, %121 : vector<2x128xf32>
    %125 = arith.mulf %116, %60 : vector<2x128xf32>
    %126 = arith.addf %124, %125 : vector<2x128xf32>
    %127 = vector.extract_strided_slice %90 {offsets = [0, 0], sizes = [2, 128], strides = [1, 1]} : vector<2x384xf32> to vector<2x128xf32>
    %128 = vector.extract_strided_slice %100 {offsets = [0, 0], sizes = [2, 128], strides = [1, 1]} : vector<2x384xf32> to vector<2x128xf32>
    %129 = arith.addf %127, %128 : vector<2x128xf32>
    %130 = arith.negf %129 : vector<2x128xf32>
    %131 = math.exp %130 : vector<2x128xf32>
    %cst_58 = arith.constant 1.000000e+00 : f32
    %132 = vector.broadcast %cst_58 : f32 to vector<2x128xf32>
    %133 = arith.addf %132, %131 : vector<2x128xf32>
    %134 = arith.divf %132, %133 : vector<2x128xf32>
    %135 = vector.extract_strided_slice %90 {offsets = [0, 128], sizes = [2, 128], strides = [1, 1]} : vector<2x384xf32> to vector<2x128xf32>
    %136 = vector.extract_strided_slice %100 {offsets = [0, 128], sizes = [2, 128], strides = [1, 1]} : vector<2x384xf32> to vector<2x128xf32>
    %137 = arith.addf %135, %136 : vector<2x128xf32>
    %138 = arith.negf %137 : vector<2x128xf32>
    %139 = math.exp %138 : vector<2x128xf32>
    %cst_59 = arith.constant 1.000000e+00 : f32
    %140 = vector.broadcast %cst_59 : f32 to vector<2x128xf32>
    %141 = arith.addf %140, %139 : vector<2x128xf32>
    %142 = arith.divf %140, %141 : vector<2x128xf32>
    %143 = vector.extract_strided_slice %90 {offsets = [0, 256], sizes = [2, 128], strides = [1, 1]} : vector<2x384xf32> to vector<2x128xf32>
    %144 = vector.extract_strided_slice %100 {offsets = [0, 256], sizes = [2, 128], strides = [1, 1]} : vector<2x384xf32> to vector<2x128xf32>
    %145 = arith.mulf %134, %144 : vector<2x128xf32>
    %146 = arith.addf %143, %145 : vector<2x128xf32>
    %147 = math.tanh %146 : vector<2x128xf32>
    %cst_60 = arith.constant 1.000000e+00 : f32
    %148 = vector.broadcast %cst_60 : f32 to vector<2x128xf32>
    %149 = arith.subf %148, %142 : vector<2x128xf32>
    %150 = arith.mulf %149, %147 : vector<2x128xf32>
    %151 = arith.mulf %142, %86 : vector<2x128xf32>
    %152 = arith.addf %150, %151 : vector<2x128xf32>
    %c2_61 = arith.constant 2 : index
    %c0_62 = arith.constant 0 : index
    %153 = vector.load %arg24[%c2_61, %c0_62] : memref<16x256xf32, #tpu.memory_space<vmem>>, vector<2x128xf32>
    tpu.vector_store %arg24[%c2_61, %c0_62], %126 {strides = array<i32>} : memref<16x256xf32, #tpu.memory_space<vmem>>, vector<2x128xf32>,
    %c12_63 = arith.constant 12 : index
    %c128_64 = arith.constant 128 : index
    %154 = vector.load %arg24[%c12_63, %c128_64] : memref<16x256xf32, #tpu.memory_space<vmem>>, vector<2x128xf32>
    tpu.vector_store %arg24[%c12_63, %c128_64], %152 {strides = array<i32>} : memref<16x256xf32, #tpu.memory_space<vmem>>, vector<2x128xf32>,
    %c4 = arith.constant 4 : index
    %c0_65 = arith.constant 0 : index
    %155 = vector.load %arg23[%c4, %c0_65] : memref<16x768xf32, #tpu.memory_space<vmem>>, vector<2x384xf32>
    %c10 = arith.constant 10 : index
    %c384_66 = arith.constant 384 : index
    %156 = vector.load %arg23[%c10, %c384_66] : memref<16x768xf32, #tpu.memory_space<vmem>>, vector<2x384xf32>
    %c0_67 = arith.constant 0 : index
    %c0_68 = arith.constant 0 : index
    %157 = vector.load %arg8[%c0_67, %c0_68] : memref<128x384xf32, #tpu.memory_space<vmem>>, vector<128x384xf32>
    %cst_69 = arith.constant dense<0.000000e+00> : vector<2x384xf32>
    %158 = tpu.matmul %126, %157, %cst_69 {dimension_numbers = #tpu.dot_dimension_numbers<[1], [0], [0], [1], [0, 0, 1, 1], [], []>} : vector<2x128xf32>, vector<128x384xf32>, vector<2x384xf32> -> vector<2x384xf32>
    %c0_70 = arith.constant 0 : index
    %c0_71 = arith.constant 0 : index
    %159 = vector.load %arg10[%c0_70, %c0_71] : memref<1x384xf32, #tpu.memory_space<vmem>>, vector<1x384xf32>
    %160 = vector.broadcast %159 : vector<1x384xf32> to vector<2x384xf32>
    %161 = arith.addf %158, %160 : vector<2x384xf32>
    %c0_72 = arith.constant 0 : index
    %c0_73 = arith.constant 0 : index
    %162 = vector.load %arg9[%c0_72, %c0_73] : memref<128x384xf32, #tpu.memory_space<vmem>>, vector<128x384xf32>
    %cst_74 = arith.constant dense<0.000000e+00> : vector<2x384xf32>
    %163 = tpu.matmul %152, %162, %cst_74 {dimension_numbers = #tpu.dot_dimension_numbers<[1], [0], [0], [1], [0, 0, 1, 1], [], []>} : vector<2x128xf32>, vector<128x384xf32>, vector<2x384xf32> -> vector<2x384xf32>
    %c0_75 = arith.constant 0 : index
    %c0_76 = arith.constant 0 : index
    %164 = vector.load %arg11[%c0_75, %c0_76] : memref<1x384xf32, #tpu.memory_space<vmem>>, vector<1x384xf32>
    %165 = vector.broadcast %164 : vector<1x384xf32> to vector<2x384xf32>
    %166 = arith.addf %163, %165 : vector<2x384xf32>
    %167 = vector.extract_strided_slice %155 {offsets = [0, 0], sizes = [2, 128], strides = [1, 1]} : vector<2x384xf32> to vector<2x128xf32>
    %168 = vector.extract_strided_slice %161 {offsets = [0, 0], sizes = [2, 128], strides = [1, 1]} : vector<2x384xf32> to vector<2x128xf32>
    %169 = arith.addf %167, %168 : vector<2x128xf32>
    %170 = arith.negf %169 : vector<2x128xf32>
    %171 = math.exp %170 : vector<2x128xf32>
    %cst_77 = arith.constant 1.000000e+00 : f32
    %172 = vector.broadcast %cst_77 : f32 to vector<2x128xf32>
    %173 = arith.addf %172, %171 : vector<2x128xf32>
    %174 = arith.divf %172, %173 : vector<2x128xf32>
    %175 = vector.extract_strided_slice %155 {offsets = [0, 128], sizes = [2, 128], strides = [1, 1]} : vector<2x384xf32> to vector<2x128xf32>
    %176 = vector.extract_strided_slice %161 {offsets = [0, 128], sizes = [2, 128], strides = [1, 1]} : vector<2x384xf32> to vector<2x128xf32>
    %177 = arith.addf %175, %176 : vector<2x128xf32>
    %178 = arith.negf %177 : vector<2x128xf32>
    %179 = math.exp %178 : vector<2x128xf32>
    %cst_78 = arith.constant 1.000000e+00 : f32
    %180 = vector.broadcast %cst_78 : f32 to vector<2x128xf32>
    %181 = arith.addf %180, %179 : vector<2x128xf32>
    %182 = arith.divf %180, %181 : vector<2x128xf32>
    %183 = vector.extract_strided_slice %155 {offsets = [0, 256], sizes = [2, 128], strides = [1, 1]} : vector<2x384xf32> to vector<2x128xf32>
    %184 = vector.extract_strided_slice %161 {offsets = [0, 256], sizes = [2, 128], strides = [1, 1]} : vector<2x384xf32> to vector<2x128xf32>
    %185 = arith.mulf %174, %184 : vector<2x128xf32>
    %186 = arith.addf %183, %185 : vector<2x128xf32>
    %187 = math.tanh %186 : vector<2x128xf32>
    %cst_79 = arith.constant 1.000000e+00 : f32
    %188 = vector.broadcast %cst_79 : f32 to vector<2x128xf32>
    %189 = arith.subf %188, %182 : vector<2x128xf32>
    %190 = arith.mulf %189, %187 : vector<2x128xf32>
    %191 = arith.mulf %182, %126 : vector<2x128xf32>
    %192 = arith.addf %190, %191 : vector<2x128xf32>
    %193 = vector.extract_strided_slice %156 {offsets = [0, 0], sizes = [2, 128], strides = [1, 1]} : vector<2x384xf32> to vector<2x128xf32>
    %194 = vector.extract_strided_slice %166 {offsets = [0, 0], sizes = [2, 128], strides = [1, 1]} : vector<2x384xf32> to vector<2x128xf32>
    %195 = arith.addf %193, %194 : vector<2x128xf32>
    %196 = arith.negf %195 : vector<2x128xf32>
    %197 = math.exp %196 : vector<2x128xf32>
    %cst_80 = arith.constant 1.000000e+00 : f32
    %198 = vector.broadcast %cst_80 : f32 to vector<2x128xf32>
    %199 = arith.addf %198, %197 : vector<2x128xf32>
    %200 = arith.divf %198, %199 : vector<2x128xf32>
    %201 = vector.extract_strided_slice %156 {offsets = [0, 128], sizes = [2, 128], strides = [1, 1]} : vector<2x384xf32> to vector<2x128xf32>
    %202 = vector.extract_strided_slice %166 {offsets = [0, 128], sizes = [2, 128], strides = [1, 1]} : vector<2x384xf32> to vector<2x128xf32>
    %203 = arith.addf %201, %202 : vector<2x128xf32>
    %204 = arith.negf %203 : vector<2x128xf32>
    %205 = math.exp %204 : vector<2x128xf32>
    %cst_81 = arith.constant 1.000000e+00 : f32
    %206 = vector.broadcast %cst_81 : f32 to vector<2x128xf32>
    %207 = arith.addf %206, %205 : vector<2x128xf32>
    %208 = arith.divf %206, %207 : vector<2x128xf32>
    %209 = vector.extract_strided_slice %156 {offsets = [0, 256], sizes = [2, 128], strides = [1, 1]} : vector<2x384xf32> to vector<2x128xf32>
    %210 = vector.extract_strided_slice %166 {offsets = [0, 256], sizes = [2, 128], strides = [1, 1]} : vector<2x384xf32> to vector<2x128xf32>
    %211 = arith.mulf %200, %210 : vector<2x128xf32>
    %212 = arith.addf %209, %211 : vector<2x128xf32>
    %213 = math.tanh %212 : vector<2x128xf32>
    %cst_82 = arith.constant 1.000000e+00 : f32
    %214 = vector.broadcast %cst_82 : f32 to vector<2x128xf32>
    %215 = arith.subf %214, %208 : vector<2x128xf32>
    %216 = arith.mulf %215, %213 : vector<2x128xf32>
    %217 = arith.mulf %208, %152 : vector<2x128xf32>
    %218 = arith.addf %216, %217 : vector<2x128xf32>
    %c4_83 = arith.constant 4 : index
    %c0_84 = arith.constant 0 : index
    %219 = vector.load %arg24[%c4_83, %c0_84] : memref<16x256xf32, #tpu.memory_space<vmem>>, vector<2x128xf32>
    tpu.vector_store %arg24[%c4_83, %c0_84], %192 {strides = array<i32>} : memref<16x256xf32, #tpu.memory_space<vmem>>, vector<2x128xf32>,
    %c10_85 = arith.constant 10 : index
    %c128_86 = arith.constant 128 : index
    %220 = vector.load %arg24[%c10_85, %c128_86] : memref<16x256xf32, #tpu.memory_space<vmem>>, vector<2x128xf32>
    tpu.vector_store %arg24[%c10_85, %c128_86], %218 {strides = array<i32>} : memref<16x256xf32, #tpu.memory_space<vmem>>, vector<2x128xf32>,
    %c6 = arith.constant 6 : index
    %c0_87 = arith.constant 0 : index
    %221 = vector.load %arg23[%c6, %c0_87] : memref<16x768xf32, #tpu.memory_space<vmem>>, vector<2x384xf32>
    %c8 = arith.constant 8 : index
    %c384_88 = arith.constant 384 : index
    %222 = vector.load %arg23[%c8, %c384_88] : memref<16x768xf32, #tpu.memory_space<vmem>>, vector<2x384xf32>
    %c0_89 = arith.constant 0 : index
    %c0_90 = arith.constant 0 : index
    %223 = vector.load %arg8[%c0_89, %c0_90] : memref<128x384xf32, #tpu.memory_space<vmem>>, vector<128x384xf32>
    %cst_91 = arith.constant dense<0.000000e+00> : vector<2x384xf32>
    %224 = tpu.matmul %192, %223, %cst_91 {dimension_numbers = #tpu.dot_dimension_numbers<[1], [0], [0], [1], [0, 0, 1, 1], [], []>} : vector<2x128xf32>, vector<128x384xf32>, vector<2x384xf32> -> vector<2x384xf32>
    %c0_92 = arith.constant 0 : index
    %c0_93 = arith.constant 0 : index
    %225 = vector.load %arg10[%c0_92, %c0_93] : memref<1x384xf32, #tpu.memory_space<vmem>>, vector<1x384xf32>
    %226 = vector.broadcast %225 : vector<1x384xf32> to vector<2x384xf32>
    %227 = arith.addf %224, %226 : vector<2x384xf32>
    %c0_94 = arith.constant 0 : index
    %c0_95 = arith.constant 0 : index
    %228 = vector.load %arg9[%c0_94, %c0_95] : memref<128x384xf32, #tpu.memory_space<vmem>>, vector<128x384xf32>
    %cst_96 = arith.constant dense<0.000000e+00> : vector<2x384xf32>
    %229 = tpu.matmul %218, %228, %cst_96 {dimension_numbers = #tpu.dot_dimension_numbers<[1], [0], [0], [1], [0, 0, 1, 1], [], []>} : vector<2x128xf32>, vector<128x384xf32>, vector<2x384xf32> -> vector<2x384xf32>
    %c0_97 = arith.constant 0 : index
    %c0_98 = arith.constant 0 : index
    %230 = vector.load %arg11[%c0_97, %c0_98] : memref<1x384xf32, #tpu.memory_space<vmem>>, vector<1x384xf32>
    %231 = vector.broadcast %230 : vector<1x384xf32> to vector<2x384xf32>
    %232 = arith.addf %229, %231 : vector<2x384xf32>
    %233 = vector.extract_strided_slice %221 {offsets = [0, 0], sizes = [2, 128], strides = [1, 1]} : vector<2x384xf32> to vector<2x128xf32>
    %234 = vector.extract_strided_slice %227 {offsets = [0, 0], sizes = [2, 128], strides = [1, 1]} : vector<2x384xf32> to vector<2x128xf32>
    %235 = arith.addf %233, %234 : vector<2x128xf32>
    %236 = arith.negf %235 : vector<2x128xf32>
    %237 = math.exp %236 : vector<2x128xf32>
    %cst_99 = arith.constant 1.000000e+00 : f32
    %238 = vector.broadcast %cst_99 : f32 to vector<2x128xf32>
    %239 = arith.addf %238, %237 : vector<2x128xf32>
    %240 = arith.divf %238, %239 : vector<2x128xf32>
    %241 = vector.extract_strided_slice %221 {offsets = [0, 128], sizes = [2, 128], strides = [1, 1]} : vector<2x384xf32> to vector<2x128xf32>
    %242 = vector.extract_strided_slice %227 {offsets = [0, 128], sizes = [2, 128], strides = [1, 1]} : vector<2x384xf32> to vector<2x128xf32>
    %243 = arith.addf %241, %242 : vector<2x128xf32>
    %244 = arith.negf %243 : vector<2x128xf32>
    %245 = math.exp %244 : vector<2x128xf32>
    %cst_100 = arith.constant 1.000000e+00 : f32
    %246 = vector.broadcast %cst_100 : f32 to vector<2x128xf32>
    %247 = arith.addf %246, %245 : vector<2x128xf32>
    %248 = arith.divf %246, %247 : vector<2x128xf32>
    %249 = vector.extract_strided_slice %221 {offsets = [0, 256], sizes = [2, 128], strides = [1, 1]} : vector<2x384xf32> to vector<2x128xf32>
    %250 = vector.extract_strided_slice %227 {offsets = [0, 256], sizes = [2, 128], strides = [1, 1]} : vector<2x384xf32> to vector<2x128xf32>
    %251 = arith.mulf %240, %250 : vector<2x128xf32>
    %252 = arith.addf %249, %251 : vector<2x128xf32>
    %253 = math.tanh %252 : vector<2x128xf32>
    %cst_101 = arith.constant 1.000000e+00 : f32
    %254 = vector.broadcast %cst_101 : f32 to vector<2x128xf32>
    %255 = arith.subf %254, %248 : vector<2x128xf32>
    %256 = arith.mulf %255, %253 : vector<2x128xf32>
    %257 = arith.mulf %248, %192 : vector<2x128xf32>
    %258 = arith.addf %256, %257 : vector<2x128xf32>
    %259 = vector.extract_strided_slice %222 {offsets = [0, 0], sizes = [2, 128], strides = [1, 1]} : vector<2x384xf32> to vector<2x128xf32>
    %260 = vector.extract_strided_slice %232 {offsets = [0, 0], sizes = [2, 128], strides = [1, 1]} : vector<2x384xf32> to vector<2x128xf32>
    %261 = arith.addf %259, %260 : vector<2x128xf32>
    %262 = arith.negf %261 : vector<2x128xf32>
    %263 = math.exp %262 : vector<2x128xf32>
    %cst_102 = arith.constant 1.000000e+00 : f32
    %264 = vector.broadcast %cst_102 : f32 to vector<2x128xf32>
    %265 = arith.addf %264, %263 : vector<2x128xf32>
    %266 = arith.divf %264, %265 : vector<2x128xf32>
    %267 = vector.extract_strided_slice %222 {offsets = [0, 128], sizes = [2, 128], strides = [1, 1]} : vector<2x384xf32> to vector<2x128xf32>
    %268 = vector.extract_strided_slice %232 {offsets = [0, 128], sizes = [2, 128], strides = [1, 1]} : vector<2x384xf32> to vector<2x128xf32>
    %269 = arith.addf %267, %268 : vector<2x128xf32>
    %270 = arith.negf %269 : vector<2x128xf32>
    %271 = math.exp %270 : vector<2x128xf32>
    %cst_103 = arith.constant 1.000000e+00 : f32
    %272 = vector.broadcast %cst_103 : f32 to vector<2x128xf32>
    %273 = arith.addf %272, %271 : vector<2x128xf32>
    %274 = arith.divf %272, %273 : vector<2x128xf32>
    %275 = vector.extract_strided_slice %222 {offsets = [0, 256], sizes = [2, 128], strides = [1, 1]} : vector<2x384xf32> to vector<2x128xf32>
    %276 = vector.extract_strided_slice %232 {offsets = [0, 256], sizes = [2, 128], strides = [1, 1]} : vector<2x384xf32> to vector<2x128xf32>
    %277 = arith.mulf %266, %276 : vector<2x128xf32>
    %278 = arith.addf %275, %277 : vector<2x128xf32>
    %279 = math.tanh %278 : vector<2x128xf32>
    %cst_104 = arith.constant 1.000000e+00 : f32
    %280 = vector.broadcast %cst_104 : f32 to vector<2x128xf32>
    %281 = arith.subf %280, %274 : vector<2x128xf32>
    %282 = arith.mulf %281, %279 : vector<2x128xf32>
    %283 = arith.mulf %274, %218 : vector<2x128xf32>
    %284 = arith.addf %282, %283 : vector<2x128xf32>
    %c6_105 = arith.constant 6 : index
    %c0_106 = arith.constant 0 : index
    %285 = vector.load %arg24[%c6_105, %c0_106] : memref<16x256xf32, #tpu.memory_space<vmem>>, vector<2x128xf32>
    tpu.vector_store %arg24[%c6_105, %c0_106], %258 {strides = array<i32>} : memref<16x256xf32, #tpu.memory_space<vmem>>, vector<2x128xf32>,
    %c8_107 = arith.constant 8 : index
    %c128_108 = arith.constant 128 : index
    %286 = vector.load %arg24[%c8_107, %c128_108] : memref<16x256xf32, #tpu.memory_space<vmem>>, vector<2x128xf32>
    tpu.vector_store %arg24[%c8_107, %c128_108], %284 {strides = array<i32>} : memref<16x256xf32, #tpu.memory_space<vmem>>, vector<2x128xf32>,
    %c8_109 = arith.constant 8 : index
    %c0_110 = arith.constant 0 : index
    %287 = vector.load %arg23[%c8_109, %c0_110] : memref<16x768xf32, #tpu.memory_space<vmem>>, vector<2x384xf32>
    %c6_111 = arith.constant 6 : index
    %c384_112 = arith.constant 384 : index
    %288 = vector.load %arg23[%c6_111, %c384_112] : memref<16x768xf32, #tpu.memory_space<vmem>>, vector<2x384xf32>
    %c0_113 = arith.constant 0 : index
    %c0_114 = arith.constant 0 : index
    %289 = vector.load %arg8[%c0_113, %c0_114] : memref<128x384xf32, #tpu.memory_space<vmem>>, vector<128x384xf32>
    %cst_115 = arith.constant dense<0.000000e+00> : vector<2x384xf32>
    %290 = tpu.matmul %258, %289, %cst_115 {dimension_numbers = #tpu.dot_dimension_numbers<[1], [0], [0], [1], [0, 0, 1, 1], [], []>} : vector<2x128xf32>, vector<128x384xf32>, vector<2x384xf32> -> vector<2x384xf32>
    %c0_116 = arith.constant 0 : index
    %c0_117 = arith.constant 0 : index
    %291 = vector.load %arg10[%c0_116, %c0_117] : memref<1x384xf32, #tpu.memory_space<vmem>>, vector<1x384xf32>
    %292 = vector.broadcast %291 : vector<1x384xf32> to vector<2x384xf32>
    %293 = arith.addf %290, %292 : vector<2x384xf32>
    %c0_118 = arith.constant 0 : index
    %c0_119 = arith.constant 0 : index
    %294 = vector.load %arg9[%c0_118, %c0_119] : memref<128x384xf32, #tpu.memory_space<vmem>>, vector<128x384xf32>
    %cst_120 = arith.constant dense<0.000000e+00> : vector<2x384xf32>
    %295 = tpu.matmul %284, %294, %cst_120 {dimension_numbers = #tpu.dot_dimension_numbers<[1], [0], [0], [1], [0, 0, 1, 1], [], []>} : vector<2x128xf32>, vector<128x384xf32>, vector<2x384xf32> -> vector<2x384xf32>
    %c0_121 = arith.constant 0 : index
    %c0_122 = arith.constant 0 : index
    %296 = vector.load %arg11[%c0_121, %c0_122] : memref<1x384xf32, #tpu.memory_space<vmem>>, vector<1x384xf32>
    %297 = vector.broadcast %296 : vector<1x384xf32> to vector<2x384xf32>
    %298 = arith.addf %295, %297 : vector<2x384xf32>
    %299 = vector.extract_strided_slice %287 {offsets = [0, 0], sizes = [2, 128], strides = [1, 1]} : vector<2x384xf32> to vector<2x128xf32>
    %300 = vector.extract_strided_slice %293 {offsets = [0, 0], sizes = [2, 128], strides = [1, 1]} : vector<2x384xf32> to vector<2x128xf32>
    %301 = arith.addf %299, %300 : vector<2x128xf32>
    %302 = arith.negf %301 : vector<2x128xf32>
    %303 = math.exp %302 : vector<2x128xf32>
    %cst_123 = arith.constant 1.000000e+00 : f32
    %304 = vector.broadcast %cst_123 : f32 to vector<2x128xf32>
    %305 = arith.addf %304, %303 : vector<2x128xf32>
    %306 = arith.divf %304, %305 : vector<2x128xf32>
    %307 = vector.extract_strided_slice %287 {offsets = [0, 128], sizes = [2, 128], strides = [1, 1]} : vector<2x384xf32> to vector<2x128xf32>
    %308 = vector.extract_strided_slice %293 {offsets = [0, 128], sizes = [2, 128], strides = [1, 1]} : vector<2x384xf32> to vector<2x128xf32>
    %309 = arith.addf %307, %308 : vector<2x128xf32>
    %310 = arith.negf %309 : vector<2x128xf32>
    %311 = math.exp %310 : vector<2x128xf32>
    %cst_124 = arith.constant 1.000000e+00 : f32
    %312 = vector.broadcast %cst_124 : f32 to vector<2x128xf32>
    %313 = arith.addf %312, %311 : vector<2x128xf32>
    %314 = arith.divf %312, %313 : vector<2x128xf32>
    %315 = vector.extract_strided_slice %287 {offsets = [0, 256], sizes = [2, 128], strides = [1, 1]} : vector<2x384xf32> to vector<2x128xf32>
    %316 = vector.extract_strided_slice %293 {offsets = [0, 256], sizes = [2, 128], strides = [1, 1]} : vector<2x384xf32> to vector<2x128xf32>
    %317 = arith.mulf %306, %316 : vector<2x128xf32>
    %318 = arith.addf %315, %317 : vector<2x128xf32>
    %319 = math.tanh %318 : vector<2x128xf32>
    %cst_125 = arith.constant 1.000000e+00 : f32
    %320 = vector.broadcast %cst_125 : f32 to vector<2x128xf32>
    %321 = arith.subf %320, %314 : vector<2x128xf32>
    %322 = arith.mulf %321, %319 : vector<2x128xf32>
    %323 = arith.mulf %314, %258 : vector<2x128xf32>
    %324 = arith.addf %322, %323 : vector<2x128xf32>
    %325 = vector.extract_strided_slice %288 {offsets = [0, 0], sizes = [2, 128], strides = [1, 1]} : vector<2x384xf32> to vector<2x128xf32>
    %326 = vector.extract_strided_slice %298 {offsets = [0, 0], sizes = [2, 128], strides = [1, 1]} : vector<2x384xf32> to vector<2x128xf32>
    %327 = arith.addf %325, %326 : vector<2x128xf32>
    %328 = arith.negf %327 : vector<2x128xf32>
    %329 = math.exp %328 : vector<2x128xf32>
    %cst_126 = arith.constant 1.000000e+00 : f32
    %330 = vector.broadcast %cst_126 : f32 to vector<2x128xf32>
    %331 = arith.addf %330, %329 : vector<2x128xf32>
    %332 = arith.divf %330, %331 : vector<2x128xf32>
    %333 = vector.extract_strided_slice %288 {offsets = [0, 128], sizes = [2, 128], strides = [1, 1]} : vector<2x384xf32> to vector<2x128xf32>
    %334 = vector.extract_strided_slice %298 {offsets = [0, 128], sizes = [2, 128], strides = [1, 1]} : vector<2x384xf32> to vector<2x128xf32>
    %335 = arith.addf %333, %334 : vector<2x128xf32>
    %336 = arith.negf %335 : vector<2x128xf32>
    %337 = math.exp %336 : vector<2x128xf32>
    %cst_127 = arith.constant 1.000000e+00 : f32
    %338 = vector.broadcast %cst_127 : f32 to vector<2x128xf32>
    %339 = arith.addf %338, %337 : vector<2x128xf32>
    %340 = arith.divf %338, %339 : vector<2x128xf32>
    %341 = vector.extract_strided_slice %288 {offsets = [0, 256], sizes = [2, 128], strides = [1, 1]} : vector<2x384xf32> to vector<2x128xf32>
    %342 = vector.extract_strided_slice %298 {offsets = [0, 256], sizes = [2, 128], strides = [1, 1]} : vector<2x384xf32> to vector<2x128xf32>
    %343 = arith.mulf %332, %342 : vector<2x128xf32>
    %344 = arith.addf %341, %343 : vector<2x128xf32>
    %345 = math.tanh %344 : vector<2x128xf32>
    %cst_128 = arith.constant 1.000000e+00 : f32
    %346 = vector.broadcast %cst_128 : f32 to vector<2x128xf32>
    %347 = arith.subf %346, %340 : vector<2x128xf32>
    %348 = arith.mulf %347, %345 : vector<2x128xf32>
    %349 = arith.mulf %340, %284 : vector<2x128xf32>
    %350 = arith.addf %348, %349 : vector<2x128xf32>
    %c8_129 = arith.constant 8 : index
    %c0_130 = arith.constant 0 : index
    %351 = vector.load %arg24[%c8_129, %c0_130] : memref<16x256xf32, #tpu.memory_space<vmem>>, vector<2x128xf32>
    tpu.vector_store %arg24[%c8_129, %c0_130], %324 {strides = array<i32>} : memref<16x256xf32, #tpu.memory_space<vmem>>, vector<2x128xf32>,
    %c6_131 = arith.constant 6 : index
    %c128_132 = arith.constant 128 : index
    %352 = vector.load %arg24[%c6_131, %c128_132] : memref<16x256xf32, #tpu.memory_space<vmem>>, vector<2x128xf32>
    tpu.vector_store %arg24[%c6_131, %c128_132], %350 {strides = array<i32>} : memref<16x256xf32, #tpu.memory_space<vmem>>, vector<2x128xf32>,
    %c10_133 = arith.constant 10 : index
    %c0_134 = arith.constant 0 : index
    %353 = vector.load %arg23[%c10_133, %c0_134] : memref<16x768xf32, #tpu.memory_space<vmem>>, vector<2x384xf32>
    %c4_135 = arith.constant 4 : index
    %c384_136 = arith.constant 384 : index
    %354 = vector.load %arg23[%c4_135, %c384_136] : memref<16x768xf32, #tpu.memory_space<vmem>>, vector<2x384xf32>
    %c0_137 = arith.constant 0 : index
    %c0_138 = arith.constant 0 : index
    %355 = vector.load %arg8[%c0_137, %c0_138] : memref<128x384xf32, #tpu.memory_space<vmem>>, vector<128x384xf32>
    %cst_139 = arith.constant dense<0.000000e+00> : vector<2x384xf32>
    %356 = tpu.matmul %324, %355, %cst_139 {dimension_numbers = #tpu.dot_dimension_numbers<[1], [0], [0], [1], [0, 0, 1, 1], [], []>} : vector<2x128xf32>, vector<128x384xf32>, vector<2x384xf32> -> vector<2x384xf32>
    %c0_140 = arith.constant 0 : index
    %c0_141 = arith.constant 0 : index
    %357 = vector.load %arg10[%c0_140, %c0_141] : memref<1x384xf32, #tpu.memory_space<vmem>>, vector<1x384xf32>
    %358 = vector.broadcast %357 : vector<1x384xf32> to vector<2x384xf32>
    %359 = arith.addf %356, %358 : vector<2x384xf32>
    %c0_142 = arith.constant 0 : index
    %c0_143 = arith.constant 0 : index
    %360 = vector.load %arg9[%c0_142, %c0_143] : memref<128x384xf32, #tpu.memory_space<vmem>>, vector<128x384xf32>
    %cst_144 = arith.constant dense<0.000000e+00> : vector<2x384xf32>
    %361 = tpu.matmul %350, %360, %cst_144 {dimension_numbers = #tpu.dot_dimension_numbers<[1], [0], [0], [1], [0, 0, 1, 1], [], []>} : vector<2x128xf32>, vector<128x384xf32>, vector<2x384xf32> -> vector<2x384xf32>
    %c0_145 = arith.constant 0 : index
    %c0_146 = arith.constant 0 : index
    %362 = vector.load %arg11[%c0_145, %c0_146] : memref<1x384xf32, #tpu.memory_space<vmem>>, vector<1x384xf32>
    %363 = vector.broadcast %362 : vector<1x384xf32> to vector<2x384xf32>
    %364 = arith.addf %361, %363 : vector<2x384xf32>
    %365 = vector.extract_strided_slice %353 {offsets = [0, 0], sizes = [2, 128], strides = [1, 1]} : vector<2x384xf32> to vector<2x128xf32>
    %366 = vector.extract_strided_slice %359 {offsets = [0, 0], sizes = [2, 128], strides = [1, 1]} : vector<2x384xf32> to vector<2x128xf32>
    %367 = arith.addf %365, %366 : vector<2x128xf32>
    %368 = arith.negf %367 : vector<2x128xf32>
    %369 = math.exp %368 : vector<2x128xf32>
    %cst_147 = arith.constant 1.000000e+00 : f32
    %370 = vector.broadcast %cst_147 : f32 to vector<2x128xf32>
    %371 = arith.addf %370, %369 : vector<2x128xf32>
    %372 = arith.divf %370, %371 : vector<2x128xf32>
    %373 = vector.extract_strided_slice %353 {offsets = [0, 128], sizes = [2, 128], strides = [1, 1]} : vector<2x384xf32> to vector<2x128xf32>
    %374 = vector.extract_strided_slice %359 {offsets = [0, 128], sizes = [2, 128], strides = [1, 1]} : vector<2x384xf32> to vector<2x128xf32>
    %375 = arith.addf %373, %374 : vector<2x128xf32>
    %376 = arith.negf %375 : vector<2x128xf32>
    %377 = math.exp %376 : vector<2x128xf32>
    %cst_148 = arith.constant 1.000000e+00 : f32
    %378 = vector.broadcast %cst_148 : f32 to vector<2x128xf32>
    %379 = arith.addf %378, %377 : vector<2x128xf32>
    %380 = arith.divf %378, %379 : vector<2x128xf32>
    %381 = vector.extract_strided_slice %353 {offsets = [0, 256], sizes = [2, 128], strides = [1, 1]} : vector<2x384xf32> to vector<2x128xf32>
    %382 = vector.extract_strided_slice %359 {offsets = [0, 256], sizes = [2, 128], strides = [1, 1]} : vector<2x384xf32> to vector<2x128xf32>
    %383 = arith.mulf %372, %382 : vector<2x128xf32>
    %384 = arith.addf %381, %383 : vector<2x128xf32>
    %385 = math.tanh %384 : vector<2x128xf32>
    %cst_149 = arith.constant 1.000000e+00 : f32
    %386 = vector.broadcast %cst_149 : f32 to vector<2x128xf32>
    %387 = arith.subf %386, %380 : vector<2x128xf32>
    %388 = arith.mulf %387, %385 : vector<2x128xf32>
    %389 = arith.mulf %380, %324 : vector<2x128xf32>
    %390 = arith.addf %388, %389 : vector<2x128xf32>
    %391 = vector.extract_strided_slice %354 {offsets = [0, 0], sizes = [2, 128], strides = [1, 1]} : vector<2x384xf32> to vector<2x128xf32>
    %392 = vector.extract_strided_slice %364 {offsets = [0, 0], sizes = [2, 128], strides = [1, 1]} : vector<2x384xf32> to vector<2x128xf32>
    %393 = arith.addf %391, %392 : vector<2x128xf32>
    %394 = arith.negf %393 : vector<2x128xf32>
    %395 = math.exp %394 : vector<2x128xf32>
    %cst_150 = arith.constant 1.000000e+00 : f32
    %396 = vector.broadcast %cst_150 : f32 to vector<2x128xf32>
    %397 = arith.addf %396, %395 : vector<2x128xf32>
    %398 = arith.divf %396, %397 : vector<2x128xf32>
    %399 = vector.extract_strided_slice %354 {offsets = [0, 128], sizes = [2, 128], strides = [1, 1]} : vector<2x384xf32> to vector<2x128xf32>
    %400 = vector.extract_strided_slice %364 {offsets = [0, 128], sizes = [2, 128], strides = [1, 1]} : vector<2x384xf32> to vector<2x128xf32>
    %401 = arith.addf %399, %400 : vector<2x128xf32>
    %402 = arith.negf %401 : vector<2x128xf32>
    %403 = math.exp %402 : vector<2x128xf32>
    %cst_151 = arith.constant 1.000000e+00 : f32
    %404 = vector.broadcast %cst_151 : f32 to vector<2x128xf32>
    %405 = arith.addf %404, %403 : vector<2x128xf32>
    %406 = arith.divf %404, %405 : vector<2x128xf32>
    %407 = vector.extract_strided_slice %354 {offsets = [0, 256], sizes = [2, 128], strides = [1, 1]} : vector<2x384xf32> to vector<2x128xf32>
    %408 = vector.extract_strided_slice %364 {offsets = [0, 256], sizes = [2, 128], strides = [1, 1]} : vector<2x384xf32> to vector<2x128xf32>
    %409 = arith.mulf %398, %408 : vector<2x128xf32>
    %410 = arith.addf %407, %409 : vector<2x128xf32>
    %411 = math.tanh %410 : vector<2x128xf32>
    %cst_152 = arith.constant 1.000000e+00 : f32
    %412 = vector.broadcast %cst_152 : f32 to vector<2x128xf32>
    %413 = arith.subf %412, %406 : vector<2x128xf32>
    %414 = arith.mulf %413, %411 : vector<2x128xf32>
    %415 = arith.mulf %406, %350 : vector<2x128xf32>
    %416 = arith.addf %414, %415 : vector<2x128xf32>
    %c10_153 = arith.constant 10 : index
    %c0_154 = arith.constant 0 : index
    %417 = vector.load %arg24[%c10_153, %c0_154] : memref<16x256xf32, #tpu.memory_space<vmem>>, vector<2x128xf32>
    tpu.vector_store %arg24[%c10_153, %c0_154], %390 {strides = array<i32>} : memref<16x256xf32, #tpu.memory_space<vmem>>, vector<2x128xf32>,
    %c4_155 = arith.constant 4 : index
    %c128_156 = arith.constant 128 : index
    %418 = vector.load %arg24[%c4_155, %c128_156] : memref<16x256xf32, #tpu.memory_space<vmem>>, vector<2x128xf32>
    tpu.vector_store %arg24[%c4_155, %c128_156], %416 {strides = array<i32>} : memref<16x256xf32, #tpu.memory_space<vmem>>, vector<2x128xf32>,
    %c12_157 = arith.constant 12 : index
    %c0_158 = arith.constant 0 : index
    %419 = vector.load %arg23[%c12_157, %c0_158] : memref<16x768xf32, #tpu.memory_space<vmem>>, vector<2x384xf32>
    %c2_159 = arith.constant 2 : index
    %c384_160 = arith.constant 384 : index
    %420 = vector.load %arg23[%c2_159, %c384_160] : memref<16x768xf32, #tpu.memory_space<vmem>>, vector<2x384xf32>
    %c0_161 = arith.constant 0 : index
    %c0_162 = arith.constant 0 : index
    %421 = vector.load %arg8[%c0_161, %c0_162] : memref<128x384xf32, #tpu.memory_space<vmem>>, vector<128x384xf32>
    %cst_163 = arith.constant dense<0.000000e+00> : vector<2x384xf32>
    %422 = tpu.matmul %390, %421, %cst_163 {dimension_numbers = #tpu.dot_dimension_numbers<[1], [0], [0], [1], [0, 0, 1, 1], [], []>} : vector<2x128xf32>, vector<128x384xf32>, vector<2x384xf32> -> vector<2x384xf32>
    %c0_164 = arith.constant 0 : index
    %c0_165 = arith.constant 0 : index
    %423 = vector.load %arg10[%c0_164, %c0_165] : memref<1x384xf32, #tpu.memory_space<vmem>>, vector<1x384xf32>
    %424 = vector.broadcast %423 : vector<1x384xf32> to vector<2x384xf32>
    %425 = arith.addf %422, %424 : vector<2x384xf32>
    %c0_166 = arith.constant 0 : index
    %c0_167 = arith.constant 0 : index
    %426 = vector.load %arg9[%c0_166, %c0_167] : memref<128x384xf32, #tpu.memory_space<vmem>>, vector<128x384xf32>
    %cst_168 = arith.constant dense<0.000000e+00> : vector<2x384xf32>
    %427 = tpu.matmul %416, %426, %cst_168 {dimension_numbers = #tpu.dot_dimension_numbers<[1], [0], [0], [1], [0, 0, 1, 1], [], []>} : vector<2x128xf32>, vector<128x384xf32>, vector<2x384xf32> -> vector<2x384xf32>
    %c0_169 = arith.constant 0 : index
    %c0_170 = arith.constant 0 : index
    %428 = vector.load %arg11[%c0_169, %c0_170] : memref<1x384xf32, #tpu.memory_space<vmem>>, vector<1x384xf32>
    %429 = vector.broadcast %428 : vector<1x384xf32> to vector<2x384xf32>
    %430 = arith.addf %427, %429 : vector<2x384xf32>
    %431 = vector.extract_strided_slice %419 {offsets = [0, 0], sizes = [2, 128], strides = [1, 1]} : vector<2x384xf32> to vector<2x128xf32>
    %432 = vector.extract_strided_slice %425 {offsets = [0, 0], sizes = [2, 128], strides = [1, 1]} : vector<2x384xf32> to vector<2x128xf32>
    %433 = arith.addf %431, %432 : vector<2x128xf32>
    %434 = arith.negf %433 : vector<2x128xf32>
    %435 = math.exp %434 : vector<2x128xf32>
    %cst_171 = arith.constant 1.000000e+00 : f32
    %436 = vector.broadcast %cst_171 : f32 to vector<2x128xf32>
    %437 = arith.addf %436, %435 : vector<2x128xf32>
    %438 = arith.divf %436, %437 : vector<2x128xf32>
    %439 = vector.extract_strided_slice %419 {offsets = [0, 128], sizes = [2, 128], strides = [1, 1]} : vector<2x384xf32> to vector<2x128xf32>
    %440 = vector.extract_strided_slice %425 {offsets = [0, 128], sizes = [2, 128], strides = [1, 1]} : vector<2x384xf32> to vector<2x128xf32>
    %441 = arith.addf %439, %440 : vector<2x128xf32>
    %442 = arith.negf %441 : vector<2x128xf32>
    %443 = math.exp %442 : vector<2x128xf32>
    %cst_172 = arith.constant 1.000000e+00 : f32
    %444 = vector.broadcast %cst_172 : f32 to vector<2x128xf32>
    %445 = arith.addf %444, %443 : vector<2x128xf32>
    %446 = arith.divf %444, %445 : vector<2x128xf32>
    %447 = vector.extract_strided_slice %419 {offsets = [0, 256], sizes = [2, 128], strides = [1, 1]} : vector<2x384xf32> to vector<2x128xf32>
    %448 = vector.extract_strided_slice %425 {offsets = [0, 256], sizes = [2, 128], strides = [1, 1]} : vector<2x384xf32> to vector<2x128xf32>
    %449 = arith.mulf %438, %448 : vector<2x128xf32>
    %450 = arith.addf %447, %449 : vector<2x128xf32>
    %451 = math.tanh %450 : vector<2x128xf32>
    %cst_173 = arith.constant 1.000000e+00 : f32
    %452 = vector.broadcast %cst_173 : f32 to vector<2x128xf32>
    %453 = arith.subf %452, %446 : vector<2x128xf32>
    %454 = arith.mulf %453, %451 : vector<2x128xf32>
    %455 = arith.mulf %446, %390 : vector<2x128xf32>
    %456 = arith.addf %454, %455 : vector<2x128xf32>
    %457 = vector.extract_strided_slice %420 {offsets = [0, 0], sizes = [2, 128], strides = [1, 1]} : vector<2x384xf32> to vector<2x128xf32>
    %458 = vector.extract_strided_slice %430 {offsets = [0, 0], sizes = [2, 128], strides = [1, 1]} : vector<2x384xf32> to vector<2x128xf32>
    %459 = arith.addf %457, %458 : vector<2x128xf32>
    %460 = arith.negf %459 : vector<2x128xf32>
    %461 = math.exp %460 : vector<2x128xf32>
    %cst_174 = arith.constant 1.000000e+00 : f32
    %462 = vector.broadcast %cst_174 : f32 to vector<2x128xf32>
    %463 = arith.addf %462, %461 : vector<2x128xf32>
    %464 = arith.divf %462, %463 : vector<2x128xf32>
    %465 = vector.extract_strided_slice %420 {offsets = [0, 128], sizes = [2, 128], strides = [1, 1]} : vector<2x384xf32> to vector<2x128xf32>
    %466 = vector.extract_strided_slice %430 {offsets = [0, 128], sizes = [2, 128], strides = [1, 1]} : vector<2x384xf32> to vector<2x128xf32>
    %467 = arith.addf %465, %466 : vector<2x128xf32>
    %468 = arith.negf %467 : vector<2x128xf32>
    %469 = math.exp %468 : vector<2x128xf32>
    %cst_175 = arith.constant 1.000000e+00 : f32
    %470 = vector.broadcast %cst_175 : f32 to vector<2x128xf32>
    %471 = arith.addf %470, %469 : vector<2x128xf32>
    %472 = arith.divf %470, %471 : vector<2x128xf32>
    %473 = vector.extract_strided_slice %420 {offsets = [0, 256], sizes = [2, 128], strides = [1, 1]} : vector<2x384xf32> to vector<2x128xf32>
    %474 = vector.extract_strided_slice %430 {offsets = [0, 256], sizes = [2, 128], strides = [1, 1]} : vector<2x384xf32> to vector<2x128xf32>
    %475 = arith.mulf %464, %474 : vector<2x128xf32>
    %476 = arith.addf %473, %475 : vector<2x128xf32>
    %477 = math.tanh %476 : vector<2x128xf32>
    %cst_176 = arith.constant 1.000000e+00 : f32
    %478 = vector.broadcast %cst_176 : f32 to vector<2x128xf32>
    %479 = arith.subf %478, %472 : vector<2x128xf32>
    %480 = arith.mulf %479, %477 : vector<2x128xf32>
    %481 = arith.mulf %472, %416 : vector<2x128xf32>
    %482 = arith.addf %480, %481 : vector<2x128xf32>
    %c12_177 = arith.constant 12 : index
    %c0_178 = arith.constant 0 : index
    %483 = vector.load %arg24[%c12_177, %c0_178] : memref<16x256xf32, #tpu.memory_space<vmem>>, vector<2x128xf32>
    tpu.vector_store %arg24[%c12_177, %c0_178], %456 {strides = array<i32>} : memref<16x256xf32, #tpu.memory_space<vmem>>, vector<2x128xf32>,
    %c2_179 = arith.constant 2 : index
    %c128_180 = arith.constant 128 : index
    %484 = vector.load %arg24[%c2_179, %c128_180] : memref<16x256xf32, #tpu.memory_space<vmem>>, vector<2x128xf32>
    tpu.vector_store %arg24[%c2_179, %c128_180], %482 {strides = array<i32>} : memref<16x256xf32, #tpu.memory_space<vmem>>, vector<2x128xf32>,
    %c14_181 = arith.constant 14 : index
    %c0_182 = arith.constant 0 : index
    %485 = vector.load %arg23[%c14_181, %c0_182] : memref<16x768xf32, #tpu.memory_space<vmem>>, vector<2x384xf32>
    %c0_183 = arith.constant 0 : index
    %c384_184 = arith.constant 384 : index
    %486 = vector.load %arg23[%c0_183, %c384_184] : memref<16x768xf32, #tpu.memory_space<vmem>>, vector<2x384xf32>
    %c0_185 = arith.constant 0 : index
    %c0_186 = arith.constant 0 : index
    %487 = vector.load %arg8[%c0_185, %c0_186] : memref<128x384xf32, #tpu.memory_space<vmem>>, vector<128x384xf32>
    %cst_187 = arith.constant dense<0.000000e+00> : vector<2x384xf32>
    %488 = tpu.matmul %456, %487, %cst_187 {dimension_numbers = #tpu.dot_dimension_numbers<[1], [0], [0], [1], [0, 0, 1, 1], [], []>} : vector<2x128xf32>, vector<128x384xf32>, vector<2x384xf32> -> vector<2x384xf32>
    %c0_188 = arith.constant 0 : index
    %c0_189 = arith.constant 0 : index
    %489 = vector.load %arg10[%c0_188, %c0_189] : memref<1x384xf32, #tpu.memory_space<vmem>>, vector<1x384xf32>
    %490 = vector.broadcast %489 : vector<1x384xf32> to vector<2x384xf32>
    %491 = arith.addf %488, %490 : vector<2x384xf32>
    %c0_190 = arith.constant 0 : index
    %c0_191 = arith.constant 0 : index
    %492 = vector.load %arg9[%c0_190, %c0_191] : memref<128x384xf32, #tpu.memory_space<vmem>>, vector<128x384xf32>
    %cst_192 = arith.constant dense<0.000000e+00> : vector<2x384xf32>
    %493 = tpu.matmul %482, %492, %cst_192 {dimension_numbers = #tpu.dot_dimension_numbers<[1], [0], [0], [1], [0, 0, 1, 1], [], []>} : vector<2x128xf32>, vector<128x384xf32>, vector<2x384xf32> -> vector<2x384xf32>
    %c0_193 = arith.constant 0 : index
    %c0_194 = arith.constant 0 : index
    %494 = vector.load %arg11[%c0_193, %c0_194] : memref<1x384xf32, #tpu.memory_space<vmem>>, vector<1x384xf32>
    %495 = vector.broadcast %494 : vector<1x384xf32> to vector<2x384xf32>
    %496 = arith.addf %493, %495 : vector<2x384xf32>
    %497 = vector.extract_strided_slice %485 {offsets = [0, 0], sizes = [2, 128], strides = [1, 1]} : vector<2x384xf32> to vector<2x128xf32>
    %498 = vector.extract_strided_slice %491 {offsets = [0, 0], sizes = [2, 128], strides = [1, 1]} : vector<2x384xf32> to vector<2x128xf32>
    %499 = arith.addf %497, %498 : vector<2x128xf32>
    %500 = arith.negf %499 : vector<2x128xf32>
    %501 = math.exp %500 : vector<2x128xf32>
    %cst_195 = arith.constant 1.000000e+00 : f32
    %502 = vector.broadcast %cst_195 : f32 to vector<2x128xf32>
    %503 = arith.addf %502, %501 : vector<2x128xf32>
    %504 = arith.divf %502, %503 : vector<2x128xf32>
    %505 = vector.extract_strided_slice %485 {offsets = [0, 128], sizes = [2, 128], strides = [1, 1]} : vector<2x384xf32> to vector<2x128xf32>
    %506 = vector.extract_strided_slice %491 {offsets = [0, 128], sizes = [2, 128], strides = [1, 1]} : vector<2x384xf32> to vector<2x128xf32>
    %507 = arith.addf %505, %506 : vector<2x128xf32>
    %508 = arith.negf %507 : vector<2x128xf32>
    %509 = math.exp %508 : vector<2x128xf32>
    %cst_196 = arith.constant 1.000000e+00 : f32
    %510 = vector.broadcast %cst_196 : f32 to vector<2x128xf32>
    %511 = arith.addf %510, %509 : vector<2x128xf32>
    %512 = arith.divf %510, %511 : vector<2x128xf32>
    %513 = vector.extract_strided_slice %485 {offsets = [0, 256], sizes = [2, 128], strides = [1, 1]} : vector<2x384xf32> to vector<2x128xf32>
    %514 = vector.extract_strided_slice %491 {offsets = [0, 256], sizes = [2, 128], strides = [1, 1]} : vector<2x384xf32> to vector<2x128xf32>
    %515 = arith.mulf %504, %514 : vector<2x128xf32>
    %516 = arith.addf %513, %515 : vector<2x128xf32>
    %517 = math.tanh %516 : vector<2x128xf32>
    %cst_197 = arith.constant 1.000000e+00 : f32
    %518 = vector.broadcast %cst_197 : f32 to vector<2x128xf32>
    %519 = arith.subf %518, %512 : vector<2x128xf32>
    %520 = arith.mulf %519, %517 : vector<2x128xf32>
    %521 = arith.mulf %512, %456 : vector<2x128xf32>
    %522 = arith.addf %520, %521 : vector<2x128xf32>
    %523 = vector.extract_strided_slice %486 {offsets = [0, 0], sizes = [2, 128], strides = [1, 1]} : vector<2x384xf32> to vector<2x128xf32>
    %524 = vector.extract_strided_slice %496 {offsets = [0, 0], sizes = [2, 128], strides = [1, 1]} : vector<2x384xf32> to vector<2x128xf32>
    %525 = arith.addf %523, %524 : vector<2x128xf32>
    %526 = arith.negf %525 : vector<2x128xf32>
    %527 = math.exp %526 : vector<2x128xf32>
    %cst_198 = arith.constant 1.000000e+00 : f32
    %528 = vector.broadcast %cst_198 : f32 to vector<2x128xf32>
    %529 = arith.addf %528, %527 : vector<2x128xf32>
    %530 = arith.divf %528, %529 : vector<2x128xf32>
    %531 = vector.extract_strided_slice %486 {offsets = [0, 128], sizes = [2, 128], strides = [1, 1]} : vector<2x384xf32> to vector<2x128xf32>
    %532 = vector.extract_strided_slice %496 {offsets = [0, 128], sizes = [2, 128], strides = [1, 1]} : vector<2x384xf32> to vector<2x128xf32>
    %533 = arith.addf %531, %532 : vector<2x128xf32>
    %534 = arith.negf %533 : vector<2x128xf32>
    %535 = math.exp %534 : vector<2x128xf32>
    %cst_199 = arith.constant 1.000000e+00 : f32
    %536 = vector.broadcast %cst_199 : f32 to vector<2x128xf32>
    %537 = arith.addf %536, %535 : vector<2x128xf32>
    %538 = arith.divf %536, %537 : vector<2x128xf32>
    %539 = vector.extract_strided_slice %486 {offsets = [0, 256], sizes = [2, 128], strides = [1, 1]} : vector<2x384xf32> to vector<2x128xf32>
    %540 = vector.extract_strided_slice %496 {offsets = [0, 256], sizes = [2, 128], strides = [1, 1]} : vector<2x384xf32> to vector<2x128xf32>
    %541 = arith.mulf %530, %540 : vector<2x128xf32>
    %542 = arith.addf %539, %541 : vector<2x128xf32>
    %543 = math.tanh %542 : vector<2x128xf32>
    %cst_200 = arith.constant 1.000000e+00 : f32
    %544 = vector.broadcast %cst_200 : f32 to vector<2x128xf32>
    %545 = arith.subf %544, %538 : vector<2x128xf32>
    %546 = arith.mulf %545, %543 : vector<2x128xf32>
    %547 = arith.mulf %538, %482 : vector<2x128xf32>
    %548 = arith.addf %546, %547 : vector<2x128xf32>
    %c14_201 = arith.constant 14 : index
    %c0_202 = arith.constant 0 : index
    %549 = vector.load %arg24[%c14_201, %c0_202] : memref<16x256xf32, #tpu.memory_space<vmem>>, vector<2x128xf32>
    tpu.vector_store %arg24[%c14_201, %c0_202], %522 {strides = array<i32>} : memref<16x256xf32, #tpu.memory_space<vmem>>, vector<2x128xf32>,
    %c0_203 = arith.constant 0 : index
    %c128_204 = arith.constant 128 : index
    %550 = vector.load %arg24[%c0_203, %c128_204] : memref<16x256xf32, #tpu.memory_space<vmem>>, vector<2x128xf32>
    tpu.vector_store %arg24[%c0_203, %c128_204], %548 {strides = array<i32>} : memref<16x256xf32, #tpu.memory_space<vmem>>, vector<2x128xf32>,
    %c0_205 = arith.constant 0 : index
    %c0_206 = arith.constant 0 : index
    %551 = vector.load %arg24[%c0_205, %c0_206] : memref<16x256xf32, #tpu.memory_space<vmem>>, vector<16x256xf32>
    %c0_207 = arith.constant 0 : index
    %c0_208 = arith.constant 0 : index
    %552 = vector.load %arg12[%c0_207, %c0_208] : memref<256x768xf32, #tpu.memory_space<vmem>>, vector<256x768xf32>
    %cst_209 = arith.constant dense<0.000000e+00> : vector<16x768xf32>
    %553 = tpu.matmul %551, %552, %cst_209 {dimension_numbers = #tpu.dot_dimension_numbers<[1], [0], [0], [1], [0, 0, 1, 1], [], []>} : vector<16x256xf32>, vector<256x768xf32>, vector<16x768xf32> -> vector<16x768xf32>
    %c0_210 = arith.constant 0 : index
    %c0_211 = arith.constant 0 : index
    %554 = vector.load %arg13[%c0_210, %c0_211] : memref<1x768xf32, #tpu.memory_space<vmem>>, vector<1x768xf32>
    %555 = vector.broadcast %554 : vector<1x768xf32> to vector<16x768xf32>
    %556 = arith.addf %553, %555 : vector<16x768xf32>
    %c0_212 = arith.constant 0 : index
    %c0_213 = arith.constant 0 : index
    %557 = vector.load %arg23[%c0_212, %c0_213] : memref<16x768xf32, #tpu.memory_space<vmem>>, vector<16x768xf32>
    tpu.vector_store %arg23[%c0_212, %c0_213], %556 {strides = array<i32>} : memref<16x768xf32, #tpu.memory_space<vmem>>, vector<16x768xf32>,
    %cst_214 = arith.constant 0.000000e+00 : f32
    %558 = vector.broadcast %cst_214 : f32 to vector<2x128xf32>
    %cst_215 = arith.constant 0.000000e+00 : f32
    %559 = vector.broadcast %cst_215 : f32 to vector<2x128xf32>
    %c0_216 = arith.constant 0 : index
    %c0_217 = arith.constant 0 : index
    %560 = vector.load %arg23[%c0_216, %c0_217] : memref<16x768xf32, #tpu.memory_space<vmem>>, vector<2x384xf32>
    %c14_218 = arith.constant 14 : index
    %c384_219 = arith.constant 384 : index
    %561 = vector.load %arg23[%c14_218, %c384_219] : memref<16x768xf32, #tpu.memory_space<vmem>>, vector<2x384xf32>
    %c0_220 = arith.constant 0 : index
    %c0_221 = arith.constant 0 : index
    %562 = vector.load %arg14[%c0_220, %c0_221] : memref<128x384xf32, #tpu.memory_space<vmem>>, vector<128x384xf32>
    %cst_222 = arith.constant dense<0.000000e+00> : vector<2x384xf32>
    %563 = tpu.matmul %558, %562, %cst_222 {dimension_numbers = #tpu.dot_dimension_numbers<[1], [0], [0], [1], [0, 0, 1, 1], [], []>} : vector<2x128xf32>, vector<128x384xf32>, vector<2x384xf32> -> vector<2x384xf32>
    %c0_223 = arith.constant 0 : index
    %c0_224 = arith.constant 0 : index
    %564 = vector.load %arg16[%c0_223, %c0_224] : memref<1x384xf32, #tpu.memory_space<vmem>>, vector<1x384xf32>
    %565 = vector.broadcast %564 : vector<1x384xf32> to vector<2x384xf32>
    %566 = arith.addf %563, %565 : vector<2x384xf32>
    %c0_225 = arith.constant 0 : index
    %c0_226 = arith.constant 0 : index
    %567 = vector.load %arg15[%c0_225, %c0_226] : memref<128x384xf32, #tpu.memory_space<vmem>>, vector<128x384xf32>
    %cst_227 = arith.constant dense<0.000000e+00> : vector<2x384xf32>
    %568 = tpu.matmul %559, %567, %cst_227 {dimension_numbers = #tpu.dot_dimension_numbers<[1], [0], [0], [1], [0, 0, 1, 1], [], []>} : vector<2x128xf32>, vector<128x384xf32>, vector<2x384xf32> -> vector<2x384xf32>
    %c0_228 = arith.constant 0 : index
    %c0_229 = arith.constant 0 : index
    %569 = vector.load %arg17[%c0_228, %c0_229] : memref<1x384xf32, #tpu.memory_space<vmem>>, vector<1x384xf32>
    %570 = vector.broadcast %569 : vector<1x384xf32> to vector<2x384xf32>
    %571 = arith.addf %568, %570 : vector<2x384xf32>
    %572 = vector.extract_strided_slice %560 {offsets = [0, 0], sizes = [2, 128], strides = [1, 1]} : vector<2x384xf32> to vector<2x128xf32>
    %573 = vector.extract_strided_slice %566 {offsets = [0, 0], sizes = [2, 128], strides = [1, 1]} : vector<2x384xf32> to vector<2x128xf32>
    %574 = arith.addf %572, %573 : vector<2x128xf32>
    %575 = arith.negf %574 : vector<2x128xf32>
    %576 = math.exp %575 : vector<2x128xf32>
    %cst_230 = arith.constant 1.000000e+00 : f32
    %577 = vector.broadcast %cst_230 : f32 to vector<2x128xf32>
    %578 = arith.addf %577, %576 : vector<2x128xf32>
    %579 = arith.divf %577, %578 : vector<2x128xf32>
    %580 = vector.extract_strided_slice %560 {offsets = [0, 128], sizes = [2, 128], strides = [1, 1]} : vector<2x384xf32> to vector<2x128xf32>
    %581 = vector.extract_strided_slice %566 {offsets = [0, 128], sizes = [2, 128], strides = [1, 1]} : vector<2x384xf32> to vector<2x128xf32>
    %582 = arith.addf %580, %581 : vector<2x128xf32>
    %583 = arith.negf %582 : vector<2x128xf32>
    %584 = math.exp %583 : vector<2x128xf32>
    %cst_231 = arith.constant 1.000000e+00 : f32
    %585 = vector.broadcast %cst_231 : f32 to vector<2x128xf32>
    %586 = arith.addf %585, %584 : vector<2x128xf32>
    %587 = arith.divf %585, %586 : vector<2x128xf32>
    %588 = vector.extract_strided_slice %560 {offsets = [0, 256], sizes = [2, 128], strides = [1, 1]} : vector<2x384xf32> to vector<2x128xf32>
    %589 = vector.extract_strided_slice %566 {offsets = [0, 256], sizes = [2, 128], strides = [1, 1]} : vector<2x384xf32> to vector<2x128xf32>
    %590 = arith.mulf %579, %589 : vector<2x128xf32>
    %591 = arith.addf %588, %590 : vector<2x128xf32>
    %592 = math.tanh %591 : vector<2x128xf32>
    %cst_232 = arith.constant 1.000000e+00 : f32
    %593 = vector.broadcast %cst_232 : f32 to vector<2x128xf32>
    %594 = arith.subf %593, %587 : vector<2x128xf32>
    %595 = arith.mulf %594, %592 : vector<2x128xf32>
    %596 = arith.mulf %587, %558 : vector<2x128xf32>
    %597 = arith.addf %595, %596 : vector<2x128xf32>
    %598 = vector.extract_strided_slice %561 {offsets = [0, 0], sizes = [2, 128], strides = [1, 1]} : vector<2x384xf32> to vector<2x128xf32>
    %599 = vector.extract_strided_slice %571 {offsets = [0, 0], sizes = [2, 128], strides = [1, 1]} : vector<2x384xf32> to vector<2x128xf32>
    %600 = arith.addf %598, %599 : vector<2x128xf32>
    %601 = arith.negf %600 : vector<2x128xf32>
    %602 = math.exp %601 : vector<2x128xf32>
    %cst_233 = arith.constant 1.000000e+00 : f32
    %603 = vector.broadcast %cst_233 : f32 to vector<2x128xf32>
    %604 = arith.addf %603, %602 : vector<2x128xf32>
    %605 = arith.divf %603, %604 : vector<2x128xf32>
    %606 = vector.extract_strided_slice %561 {offsets = [0, 128], sizes = [2, 128], strides = [1, 1]} : vector<2x384xf32> to vector<2x128xf32>
    %607 = vector.extract_strided_slice %571 {offsets = [0, 128], sizes = [2, 128], strides = [1, 1]} : vector<2x384xf32> to vector<2x128xf32>
    %608 = arith.addf %606, %607 : vector<2x128xf32>
    %609 = arith.negf %608 : vector<2x128xf32>
    %610 = math.exp %609 : vector<2x128xf32>
    %cst_234 = arith.constant 1.000000e+00 : f32
    %611 = vector.broadcast %cst_234 : f32 to vector<2x128xf32>
    %612 = arith.addf %611, %610 : vector<2x128xf32>
    %613 = arith.divf %611, %612 : vector<2x128xf32>
    %614 = vector.extract_strided_slice %561 {offsets = [0, 256], sizes = [2, 128], strides = [1, 1]} : vector<2x384xf32> to vector<2x128xf32>
    %615 = vector.extract_strided_slice %571 {offsets = [0, 256], sizes = [2, 128], strides = [1, 1]} : vector<2x384xf32> to vector<2x128xf32>
    %616 = arith.mulf %605, %615 : vector<2x128xf32>
    %617 = arith.addf %614, %616 : vector<2x128xf32>
    %618 = math.tanh %617 : vector<2x128xf32>
    %cst_235 = arith.constant 1.000000e+00 : f32
    %619 = vector.broadcast %cst_235 : f32 to vector<2x128xf32>
    %620 = arith.subf %619, %613 : vector<2x128xf32>
    %621 = arith.mulf %620, %618 : vector<2x128xf32>
    %622 = arith.mulf %613, %559 : vector<2x128xf32>
    %623 = arith.addf %621, %622 : vector<2x128xf32>
    %624 = vector.extract_strided_slice %597 {offsets = [1, 0], sizes = [1, 128], strides = [1, 1]} : vector<2x128xf32> to vector<1x128xf32>
    %c0_236 = arith.constant 0 : index
    %c0_237 = arith.constant 0 : index
    %625 = vector.load %arg25[%c0_236, %c0_237] : memref<8x128xf32, #tpu.memory_space<vmem>>, vector<1x128xf32>
    tpu.vector_store %arg25[%c0_236, %c0_237], %624 {strides = array<i32>} : memref<8x128xf32, #tpu.memory_space<vmem>>, vector<1x128xf32>,
    %626 = vector.extract_strided_slice %623 {offsets = [0, 0], sizes = [1, 128], strides = [1, 1]} : vector<2x128xf32> to vector<1x128xf32>
    %c7 = arith.constant 7 : index
    %c0_238 = arith.constant 0 : index
    %627 = vector.load %arg26[%c7, %c0_238] : memref<8x128xf32, #tpu.memory_space<vmem>>, vector<1x128xf32>
    tpu.vector_store %arg26[%c7, %c0_238], %626 {strides = array<i32>} : memref<8x128xf32, #tpu.memory_space<vmem>>, vector<1x128xf32>,
    %c2_239 = arith.constant 2 : index
    %c0_240 = arith.constant 0 : index
    %628 = vector.load %arg23[%c2_239, %c0_240] : memref<16x768xf32, #tpu.memory_space<vmem>>, vector<2x384xf32>
    %c12_241 = arith.constant 12 : index
    %c384_242 = arith.constant 384 : index
    %629 = vector.load %arg23[%c12_241, %c384_242] : memref<16x768xf32, #tpu.memory_space<vmem>>, vector<2x384xf32>
    %c0_243 = arith.constant 0 : index
    %c0_244 = arith.constant 0 : index
    %630 = vector.load %arg14[%c0_243, %c0_244] : memref<128x384xf32, #tpu.memory_space<vmem>>, vector<128x384xf32>
    %cst_245 = arith.constant dense<0.000000e+00> : vector<2x384xf32>
    %631 = tpu.matmul %597, %630, %cst_245 {dimension_numbers = #tpu.dot_dimension_numbers<[1], [0], [0], [1], [0, 0, 1, 1], [], []>} : vector<2x128xf32>, vector<128x384xf32>, vector<2x384xf32> -> vector<2x384xf32>
    %c0_246 = arith.constant 0 : index
    %c0_247 = arith.constant 0 : index
    %632 = vector.load %arg16[%c0_246, %c0_247] : memref<1x384xf32, #tpu.memory_space<vmem>>, vector<1x384xf32>
    %633 = vector.broadcast %632 : vector<1x384xf32> to vector<2x384xf32>
    %634 = arith.addf %631, %633 : vector<2x384xf32>
    %c0_248 = arith.constant 0 : index
    %c0_249 = arith.constant 0 : index
    %635 = vector.load %arg15[%c0_248, %c0_249] : memref<128x384xf32, #tpu.memory_space<vmem>>, vector<128x384xf32>
    %cst_250 = arith.constant dense<0.000000e+00> : vector<2x384xf32>
    %636 = tpu.matmul %623, %635, %cst_250 {dimension_numbers = #tpu.dot_dimension_numbers<[1], [0], [0], [1], [0, 0, 1, 1], [], []>} : vector<2x128xf32>, vector<128x384xf32>, vector<2x384xf32> -> vector<2x384xf32>
    %c0_251 = arith.constant 0 : index
    %c0_252 = arith.constant 0 : index
    %637 = vector.load %arg17[%c0_251, %c0_252] : memref<1x384xf32, #tpu.memory_space<vmem>>, vector<1x384xf32>
    %638 = vector.broadcast %637 : vector<1x384xf32> to vector<2x384xf32>
    %639 = arith.addf %636, %638 : vector<2x384xf32>
    %640 = vector.extract_strided_slice %628 {offsets = [0, 0], sizes = [2, 128], strides = [1, 1]} : vector<2x384xf32> to vector<2x128xf32>
    %641 = vector.extract_strided_slice %634 {offsets = [0, 0], sizes = [2, 128], strides = [1, 1]} : vector<2x384xf32> to vector<2x128xf32>
    %642 = arith.addf %640, %641 : vector<2x128xf32>
    %643 = arith.negf %642 : vector<2x128xf32>
    %644 = math.exp %643 : vector<2x128xf32>
    %cst_253 = arith.constant 1.000000e+00 : f32
    %645 = vector.broadcast %cst_253 : f32 to vector<2x128xf32>
    %646 = arith.addf %645, %644 : vector<2x128xf32>
    %647 = arith.divf %645, %646 : vector<2x128xf32>
    %648 = vector.extract_strided_slice %628 {offsets = [0, 128], sizes = [2, 128], strides = [1, 1]} : vector<2x384xf32> to vector<2x128xf32>
    %649 = vector.extract_strided_slice %634 {offsets = [0, 128], sizes = [2, 128], strides = [1, 1]} : vector<2x384xf32> to vector<2x128xf32>
    %650 = arith.addf %648, %649 : vector<2x128xf32>
    %651 = arith.negf %650 : vector<2x128xf32>
    %652 = math.exp %651 : vector<2x128xf32>
    %cst_254 = arith.constant 1.000000e+00 : f32
    %653 = vector.broadcast %cst_254 : f32 to vector<2x128xf32>
    %654 = arith.addf %653, %652 : vector<2x128xf32>
    %655 = arith.divf %653, %654 : vector<2x128xf32>
    %656 = vector.extract_strided_slice %628 {offsets = [0, 256], sizes = [2, 128], strides = [1, 1]} : vector<2x384xf32> to vector<2x128xf32>
    %657 = vector.extract_strided_slice %634 {offsets = [0, 256], sizes = [2, 128], strides = [1, 1]} : vector<2x384xf32> to vector<2x128xf32>
    %658 = arith.mulf %647, %657 : vector<2x128xf32>
    %659 = arith.addf %656, %658 : vector<2x128xf32>
    %660 = math.tanh %659 : vector<2x128xf32>
    %cst_255 = arith.constant 1.000000e+00 : f32
    %661 = vector.broadcast %cst_255 : f32 to vector<2x128xf32>
    %662 = arith.subf %661, %655 : vector<2x128xf32>
    %663 = arith.mulf %662, %660 : vector<2x128xf32>
    %664 = arith.mulf %655, %597 : vector<2x128xf32>
    %665 = arith.addf %663, %664 : vector<2x128xf32>
    %666 = vector.extract_strided_slice %629 {offsets = [0, 0], sizes = [2, 128], strides = [1, 1]} : vector<2x384xf32> to vector<2x128xf32>
    %667 = vector.extract_strided_slice %639 {offsets = [0, 0], sizes = [2, 128], strides = [1, 1]} : vector<2x384xf32> to vector<2x128xf32>
    %668 = arith.addf %666, %667 : vector<2x128xf32>
    %669 = arith.negf %668 : vector<2x128xf32>
    %670 = math.exp %669 : vector<2x128xf32>
    %cst_256 = arith.constant 1.000000e+00 : f32
    %671 = vector.broadcast %cst_256 : f32 to vector<2x128xf32>
    %672 = arith.addf %671, %670 : vector<2x128xf32>
    %673 = arith.divf %671, %672 : vector<2x128xf32>
    %674 = vector.extract_strided_slice %629 {offsets = [0, 128], sizes = [2, 128], strides = [1, 1]} : vector<2x384xf32> to vector<2x128xf32>
    %675 = vector.extract_strided_slice %639 {offsets = [0, 128], sizes = [2, 128], strides = [1, 1]} : vector<2x384xf32> to vector<2x128xf32>
    %676 = arith.addf %674, %675 : vector<2x128xf32>
    %677 = arith.negf %676 : vector<2x128xf32>
    %678 = math.exp %677 : vector<2x128xf32>
    %cst_257 = arith.constant 1.000000e+00 : f32
    %679 = vector.broadcast %cst_257 : f32 to vector<2x128xf32>
    %680 = arith.addf %679, %678 : vector<2x128xf32>
    %681 = arith.divf %679, %680 : vector<2x128xf32>
    %682 = vector.extract_strided_slice %629 {offsets = [0, 256], sizes = [2, 128], strides = [1, 1]} : vector<2x384xf32> to vector<2x128xf32>
    %683 = vector.extract_strided_slice %639 {offsets = [0, 256], sizes = [2, 128], strides = [1, 1]} : vector<2x384xf32> to vector<2x128xf32>
    %684 = arith.mulf %673, %683 : vector<2x128xf32>
    %685 = arith.addf %682, %684 : vector<2x128xf32>
    %686 = math.tanh %685 : vector<2x128xf32>
    %cst_258 = arith.constant 1.000000e+00 : f32
    %687 = vector.broadcast %cst_258 : f32 to vector<2x128xf32>
    %688 = arith.subf %687, %681 : vector<2x128xf32>
    %689 = arith.mulf %688, %686 : vector<2x128xf32>
    %690 = arith.mulf %681, %623 : vector<2x128xf32>
    %691 = arith.addf %689, %690 : vector<2x128xf32>
    %692 = vector.extract_strided_slice %665 {offsets = [1, 0], sizes = [1, 128], strides = [1, 1]} : vector<2x128xf32> to vector<1x128xf32>
    %c1 = arith.constant 1 : index
    %c0_259 = arith.constant 0 : index
    %693 = vector.load %arg25[%c1, %c0_259] : memref<8x128xf32, #tpu.memory_space<vmem>>, vector<1x128xf32>
    tpu.vector_store %arg25[%c1, %c0_259], %692 {strides = array<i32>} : memref<8x128xf32, #tpu.memory_space<vmem>>, vector<1x128xf32>,
    %694 = vector.extract_strided_slice %691 {offsets = [0, 0], sizes = [1, 128], strides = [1, 1]} : vector<2x128xf32> to vector<1x128xf32>
    %c6_260 = arith.constant 6 : index
    %c0_261 = arith.constant 0 : index
    %695 = vector.load %arg26[%c6_260, %c0_261] : memref<8x128xf32, #tpu.memory_space<vmem>>, vector<1x128xf32>
    tpu.vector_store %arg26[%c6_260, %c0_261], %694 {strides = array<i32>} : memref<8x128xf32, #tpu.memory_space<vmem>>, vector<1x128xf32>,
    %c4_262 = arith.constant 4 : index
    %c0_263 = arith.constant 0 : index
    %696 = vector.load %arg23[%c4_262, %c0_263] : memref<16x768xf32, #tpu.memory_space<vmem>>, vector<2x384xf32>
    %c10_264 = arith.constant 10 : index
    %c384_265 = arith.constant 384 : index
    %697 = vector.load %arg23[%c10_264, %c384_265] : memref<16x768xf32, #tpu.memory_space<vmem>>, vector<2x384xf32>
    %c0_266 = arith.constant 0 : index
    %c0_267 = arith.constant 0 : index
    %698 = vector.load %arg14[%c0_266, %c0_267] : memref<128x384xf32, #tpu.memory_space<vmem>>, vector<128x384xf32>
    %cst_268 = arith.constant dense<0.000000e+00> : vector<2x384xf32>
    %699 = tpu.matmul %665, %698, %cst_268 {dimension_numbers = #tpu.dot_dimension_numbers<[1], [0], [0], [1], [0, 0, 1, 1], [], []>} : vector<2x128xf32>, vector<128x384xf32>, vector<2x384xf32> -> vector<2x384xf32>
    %c0_269 = arith.constant 0 : index
    %c0_270 = arith.constant 0 : index
    %700 = vector.load %arg16[%c0_269, %c0_270] : memref<1x384xf32, #tpu.memory_space<vmem>>, vector<1x384xf32>
    %701 = vector.broadcast %700 : vector<1x384xf32> to vector<2x384xf32>
    %702 = arith.addf %699, %701 : vector<2x384xf32>
    %c0_271 = arith.constant 0 : index
    %c0_272 = arith.constant 0 : index
    %703 = vector.load %arg15[%c0_271, %c0_272] : memref<128x384xf32, #tpu.memory_space<vmem>>, vector<128x384xf32>
    %cst_273 = arith.constant dense<0.000000e+00> : vector<2x384xf32>
    %704 = tpu.matmul %691, %703, %cst_273 {dimension_numbers = #tpu.dot_dimension_numbers<[1], [0], [0], [1], [0, 0, 1, 1], [], []>} : vector<2x128xf32>, vector<128x384xf32>, vector<2x384xf32> -> vector<2x384xf32>
    %c0_274 = arith.constant 0 : index
    %c0_275 = arith.constant 0 : index
    %705 = vector.load %arg17[%c0_274, %c0_275] : memref<1x384xf32, #tpu.memory_space<vmem>>, vector<1x384xf32>
    %706 = vector.broadcast %705 : vector<1x384xf32> to vector<2x384xf32>
    %707 = arith.addf %704, %706 : vector<2x384xf32>
    %708 = vector.extract_strided_slice %696 {offsets = [0, 0], sizes = [2, 128], strides = [1, 1]} : vector<2x384xf32> to vector<2x128xf32>
    %709 = vector.extract_strided_slice %702 {offsets = [0, 0], sizes = [2, 128], strides = [1, 1]} : vector<2x384xf32> to vector<2x128xf32>
    %710 = arith.addf %708, %709 : vector<2x128xf32>
    %711 = arith.negf %710 : vector<2x128xf32>
    %712 = math.exp %711 : vector<2x128xf32>
    %cst_276 = arith.constant 1.000000e+00 : f32
    %713 = vector.broadcast %cst_276 : f32 to vector<2x128xf32>
    %714 = arith.addf %713, %712 : vector<2x128xf32>
    %715 = arith.divf %713, %714 : vector<2x128xf32>
    %716 = vector.extract_strided_slice %696 {offsets = [0, 128], sizes = [2, 128], strides = [1, 1]} : vector<2x384xf32> to vector<2x128xf32>
    %717 = vector.extract_strided_slice %702 {offsets = [0, 128], sizes = [2, 128], strides = [1, 1]} : vector<2x384xf32> to vector<2x128xf32>
    %718 = arith.addf %716, %717 : vector<2x128xf32>
    %719 = arith.negf %718 : vector<2x128xf32>
    %720 = math.exp %719 : vector<2x128xf32>
    %cst_277 = arith.constant 1.000000e+00 : f32
    %721 = vector.broadcast %cst_277 : f32 to vector<2x128xf32>
    %722 = arith.addf %721, %720 : vector<2x128xf32>
    %723 = arith.divf %721, %722 : vector<2x128xf32>
    %724 = vector.extract_strided_slice %696 {offsets = [0, 256], sizes = [2, 128], strides = [1, 1]} : vector<2x384xf32> to vector<2x128xf32>
    %725 = vector.extract_strided_slice %702 {offsets = [0, 256], sizes = [2, 128], strides = [1, 1]} : vector<2x384xf32> to vector<2x128xf32>
    %726 = arith.mulf %715, %725 : vector<2x128xf32>
    %727 = arith.addf %724, %726 : vector<2x128xf32>
    %728 = math.tanh %727 : vector<2x128xf32>
    %cst_278 = arith.constant 1.000000e+00 : f32
    %729 = vector.broadcast %cst_278 : f32 to vector<2x128xf32>
    %730 = arith.subf %729, %723 : vector<2x128xf32>
    %731 = arith.mulf %730, %728 : vector<2x128xf32>
    %732 = arith.mulf %723, %665 : vector<2x128xf32>
    %733 = arith.addf %731, %732 : vector<2x128xf32>
    %734 = vector.extract_strided_slice %697 {offsets = [0, 0], sizes = [2, 128], strides = [1, 1]} : vector<2x384xf32> to vector<2x128xf32>
    %735 = vector.extract_strided_slice %707 {offsets = [0, 0], sizes = [2, 128], strides = [1, 1]} : vector<2x384xf32> to vector<2x128xf32>
    %736 = arith.addf %734, %735 : vector<2x128xf32>
    %737 = arith.negf %736 : vector<2x128xf32>
    %738 = math.exp %737 : vector<2x128xf32>
    %cst_279 = arith.constant 1.000000e+00 : f32
    %739 = vector.broadcast %cst_279 : f32 to vector<2x128xf32>
    %740 = arith.addf %739, %738 : vector<2x128xf32>
    %741 = arith.divf %739, %740 : vector<2x128xf32>
    %742 = vector.extract_strided_slice %697 {offsets = [0, 128], sizes = [2, 128], strides = [1, 1]} : vector<2x384xf32> to vector<2x128xf32>
    %743 = vector.extract_strided_slice %707 {offsets = [0, 128], sizes = [2, 128], strides = [1, 1]} : vector<2x384xf32> to vector<2x128xf32>
    %744 = arith.addf %742, %743 : vector<2x128xf32>
    %745 = arith.negf %744 : vector<2x128xf32>
    %746 = math.exp %745 : vector<2x128xf32>
    %cst_280 = arith.constant 1.000000e+00 : f32
    %747 = vector.broadcast %cst_280 : f32 to vector<2x128xf32>
    %748 = arith.addf %747, %746 : vector<2x128xf32>
    %749 = arith.divf %747, %748 : vector<2x128xf32>
    %750 = vector.extract_strided_slice %697 {offsets = [0, 256], sizes = [2, 128], strides = [1, 1]} : vector<2x384xf32> to vector<2x128xf32>
    %751 = vector.extract_strided_slice %707 {offsets = [0, 256], sizes = [2, 128], strides = [1, 1]} : vector<2x384xf32> to vector<2x128xf32>
    %752 = arith.mulf %741, %751 : vector<2x128xf32>
    %753 = arith.addf %750, %752 : vector<2x128xf32>
    %754 = math.tanh %753 : vector<2x128xf32>
    %cst_281 = arith.constant 1.000000e+00 : f32
    %755 = vector.broadcast %cst_281 : f32 to vector<2x128xf32>
    %756 = arith.subf %755, %749 : vector<2x128xf32>
    %757 = arith.mulf %756, %754 : vector<2x128xf32>
    %758 = arith.mulf %749, %691 : vector<2x128xf32>
    %759 = arith.addf %757, %758 : vector<2x128xf32>
    %760 = vector.extract_strided_slice %733 {offsets = [1, 0], sizes = [1, 128], strides = [1, 1]} : vector<2x128xf32> to vector<1x128xf32>
    %c2_282 = arith.constant 2 : index
    %c0_283 = arith.constant 0 : index
    %761 = vector.load %arg25[%c2_282, %c0_283] : memref<8x128xf32, #tpu.memory_space<vmem>>, vector<1x128xf32>
    tpu.vector_store %arg25[%c2_282, %c0_283], %760 {strides = array<i32>} : memref<8x128xf32, #tpu.memory_space<vmem>>, vector<1x128xf32>,
    %762 = vector.extract_strided_slice %759 {offsets = [0, 0], sizes = [1, 128], strides = [1, 1]} : vector<2x128xf32> to vector<1x128xf32>
    %c5 = arith.constant 5 : index
    %c0_284 = arith.constant 0 : index
    %763 = vector.load %arg26[%c5, %c0_284] : memref<8x128xf32, #tpu.memory_space<vmem>>, vector<1x128xf32>
    tpu.vector_store %arg26[%c5, %c0_284], %762 {strides = array<i32>} : memref<8x128xf32, #tpu.memory_space<vmem>>, vector<1x128xf32>,
    %c6_285 = arith.constant 6 : index
    %c0_286 = arith.constant 0 : index
    %764 = vector.load %arg23[%c6_285, %c0_286] : memref<16x768xf32, #tpu.memory_space<vmem>>, vector<2x384xf32>
    %c8_287 = arith.constant 8 : index
    %c384_288 = arith.constant 384 : index
    %765 = vector.load %arg23[%c8_287, %c384_288] : memref<16x768xf32, #tpu.memory_space<vmem>>, vector<2x384xf32>
    %c0_289 = arith.constant 0 : index
    %c0_290 = arith.constant 0 : index
    %766 = vector.load %arg14[%c0_289, %c0_290] : memref<128x384xf32, #tpu.memory_space<vmem>>, vector<128x384xf32>
    %cst_291 = arith.constant dense<0.000000e+00> : vector<2x384xf32>
    %767 = tpu.matmul %733, %766, %cst_291 {dimension_numbers = #tpu.dot_dimension_numbers<[1], [0], [0], [1], [0, 0, 1, 1], [], []>} : vector<2x128xf32>, vector<128x384xf32>, vector<2x384xf32> -> vector<2x384xf32>
    %c0_292 = arith.constant 0 : index
    %c0_293 = arith.constant 0 : index
    %768 = vector.load %arg16[%c0_292, %c0_293] : memref<1x384xf32, #tpu.memory_space<vmem>>, vector<1x384xf32>
    %769 = vector.broadcast %768 : vector<1x384xf32> to vector<2x384xf32>
    %770 = arith.addf %767, %769 : vector<2x384xf32>
    %c0_294 = arith.constant 0 : index
    %c0_295 = arith.constant 0 : index
    %771 = vector.load %arg15[%c0_294, %c0_295] : memref<128x384xf32, #tpu.memory_space<vmem>>, vector<128x384xf32>
    %cst_296 = arith.constant dense<0.000000e+00> : vector<2x384xf32>
    %772 = tpu.matmul %759, %771, %cst_296 {dimension_numbers = #tpu.dot_dimension_numbers<[1], [0], [0], [1], [0, 0, 1, 1], [], []>} : vector<2x128xf32>, vector<128x384xf32>, vector<2x384xf32> -> vector<2x384xf32>
    %c0_297 = arith.constant 0 : index
    %c0_298 = arith.constant 0 : index
    %773 = vector.load %arg17[%c0_297, %c0_298] : memref<1x384xf32, #tpu.memory_space<vmem>>, vector<1x384xf32>
    %774 = vector.broadcast %773 : vector<1x384xf32> to vector<2x384xf32>
    %775 = arith.addf %772, %774 : vector<2x384xf32>
    %776 = vector.extract_strided_slice %764 {offsets = [0, 0], sizes = [2, 128], strides = [1, 1]} : vector<2x384xf32> to vector<2x128xf32>
    %777 = vector.extract_strided_slice %770 {offsets = [0, 0], sizes = [2, 128], strides = [1, 1]} : vector<2x384xf32> to vector<2x128xf32>
    %778 = arith.addf %776, %777 : vector<2x128xf32>
    %779 = arith.negf %778 : vector<2x128xf32>
    %780 = math.exp %779 : vector<2x128xf32>
    %cst_299 = arith.constant 1.000000e+00 : f32
    %781 = vector.broadcast %cst_299 : f32 to vector<2x128xf32>
    %782 = arith.addf %781, %780 : vector<2x128xf32>
    %783 = arith.divf %781, %782 : vector<2x128xf32>
    %784 = vector.extract_strided_slice %764 {offsets = [0, 128], sizes = [2, 128], strides = [1, 1]} : vector<2x384xf32> to vector<2x128xf32>
    %785 = vector.extract_strided_slice %770 {offsets = [0, 128], sizes = [2, 128], strides = [1, 1]} : vector<2x384xf32> to vector<2x128xf32>
    %786 = arith.addf %784, %785 : vector<2x128xf32>
    %787 = arith.negf %786 : vector<2x128xf32>
    %788 = math.exp %787 : vector<2x128xf32>
    %cst_300 = arith.constant 1.000000e+00 : f32
    %789 = vector.broadcast %cst_300 : f32 to vector<2x128xf32>
    %790 = arith.addf %789, %788 : vector<2x128xf32>
    %791 = arith.divf %789, %790 : vector<2x128xf32>
    %792 = vector.extract_strided_slice %764 {offsets = [0, 256], sizes = [2, 128], strides = [1, 1]} : vector<2x384xf32> to vector<2x128xf32>
    %793 = vector.extract_strided_slice %770 {offsets = [0, 256], sizes = [2, 128], strides = [1, 1]} : vector<2x384xf32> to vector<2x128xf32>
    %794 = arith.mulf %783, %793 : vector<2x128xf32>
    %795 = arith.addf %792, %794 : vector<2x128xf32>
    %796 = math.tanh %795 : vector<2x128xf32>
    %cst_301 = arith.constant 1.000000e+00 : f32
    %797 = vector.broadcast %cst_301 : f32 to vector<2x128xf32>
    %798 = arith.subf %797, %791 : vector<2x128xf32>
    %799 = arith.mulf %798, %796 : vector<2x128xf32>
    %800 = arith.mulf %791, %733 : vector<2x128xf32>
    %801 = arith.addf %799, %800 : vector<2x128xf32>
    %802 = vector.extract_strided_slice %765 {offsets = [0, 0], sizes = [2, 128], strides = [1, 1]} : vector<2x384xf32> to vector<2x128xf32>
    %803 = vector.extract_strided_slice %775 {offsets = [0, 0], sizes = [2, 128], strides = [1, 1]} : vector<2x384xf32> to vector<2x128xf32>
    %804 = arith.addf %802, %803 : vector<2x128xf32>
    %805 = arith.negf %804 : vector<2x128xf32>
    %806 = math.exp %805 : vector<2x128xf32>
    %cst_302 = arith.constant 1.000000e+00 : f32
    %807 = vector.broadcast %cst_302 : f32 to vector<2x128xf32>
    %808 = arith.addf %807, %806 : vector<2x128xf32>
    %809 = arith.divf %807, %808 : vector<2x128xf32>
    %810 = vector.extract_strided_slice %765 {offsets = [0, 128], sizes = [2, 128], strides = [1, 1]} : vector<2x384xf32> to vector<2x128xf32>
    %811 = vector.extract_strided_slice %775 {offsets = [0, 128], sizes = [2, 128], strides = [1, 1]} : vector<2x384xf32> to vector<2x128xf32>
    %812 = arith.addf %810, %811 : vector<2x128xf32>
    %813 = arith.negf %812 : vector<2x128xf32>
    %814 = math.exp %813 : vector<2x128xf32>
    %cst_303 = arith.constant 1.000000e+00 : f32
    %815 = vector.broadcast %cst_303 : f32 to vector<2x128xf32>
    %816 = arith.addf %815, %814 : vector<2x128xf32>
    %817 = arith.divf %815, %816 : vector<2x128xf32>
    %818 = vector.extract_strided_slice %765 {offsets = [0, 256], sizes = [2, 128], strides = [1, 1]} : vector<2x384xf32> to vector<2x128xf32>
    %819 = vector.extract_strided_slice %775 {offsets = [0, 256], sizes = [2, 128], strides = [1, 1]} : vector<2x384xf32> to vector<2x128xf32>
    %820 = arith.mulf %809, %819 : vector<2x128xf32>
    %821 = arith.addf %818, %820 : vector<2x128xf32>
    %822 = math.tanh %821 : vector<2x128xf32>
    %cst_304 = arith.constant 1.000000e+00 : f32
    %823 = vector.broadcast %cst_304 : f32 to vector<2x128xf32>
    %824 = arith.subf %823, %817 : vector<2x128xf32>
    %825 = arith.mulf %824, %822 : vector<2x128xf32>
    %826 = arith.mulf %817, %759 : vector<2x128xf32>
    %827 = arith.addf %825, %826 : vector<2x128xf32>
    %828 = vector.extract_strided_slice %801 {offsets = [1, 0], sizes = [1, 128], strides = [1, 1]} : vector<2x128xf32> to vector<1x128xf32>
    %c3 = arith.constant 3 : index
    %c0_305 = arith.constant 0 : index
    %829 = vector.load %arg25[%c3, %c0_305] : memref<8x128xf32, #tpu.memory_space<vmem>>, vector<1x128xf32>
    tpu.vector_store %arg25[%c3, %c0_305], %828 {strides = array<i32>} : memref<8x128xf32, #tpu.memory_space<vmem>>, vector<1x128xf32>,
    %830 = vector.extract_strided_slice %827 {offsets = [0, 0], sizes = [1, 128], strides = [1, 1]} : vector<2x128xf32> to vector<1x128xf32>
    %c4_306 = arith.constant 4 : index
    %c0_307 = arith.constant 0 : index
    %831 = vector.load %arg26[%c4_306, %c0_307] : memref<8x128xf32, #tpu.memory_space<vmem>>, vector<1x128xf32>
    tpu.vector_store %arg26[%c4_306, %c0_307], %830 {strides = array<i32>} : memref<8x128xf32, #tpu.memory_space<vmem>>, vector<1x128xf32>,
    %c8_308 = arith.constant 8 : index
    %c0_309 = arith.constant 0 : index
    %832 = vector.load %arg23[%c8_308, %c0_309] : memref<16x768xf32, #tpu.memory_space<vmem>>, vector<2x384xf32>
    %c6_310 = arith.constant 6 : index
    %c384_311 = arith.constant 384 : index
    %833 = vector.load %arg23[%c6_310, %c384_311] : memref<16x768xf32, #tpu.memory_space<vmem>>, vector<2x384xf32>
    %c0_312 = arith.constant 0 : index
    %c0_313 = arith.constant 0 : index
    %834 = vector.load %arg14[%c0_312, %c0_313] : memref<128x384xf32, #tpu.memory_space<vmem>>, vector<128x384xf32>
    %cst_314 = arith.constant dense<0.000000e+00> : vector<2x384xf32>
    %835 = tpu.matmul %801, %834, %cst_314 {dimension_numbers = #tpu.dot_dimension_numbers<[1], [0], [0], [1], [0, 0, 1, 1], [], []>} : vector<2x128xf32>, vector<128x384xf32>, vector<2x384xf32> -> vector<2x384xf32>
    %c0_315 = arith.constant 0 : index
    %c0_316 = arith.constant 0 : index
    %836 = vector.load %arg16[%c0_315, %c0_316] : memref<1x384xf32, #tpu.memory_space<vmem>>, vector<1x384xf32>
    %837 = vector.broadcast %836 : vector<1x384xf32> to vector<2x384xf32>
    %838 = arith.addf %835, %837 : vector<2x384xf32>
    %c0_317 = arith.constant 0 : index
    %c0_318 = arith.constant 0 : index
    %839 = vector.load %arg15[%c0_317, %c0_318] : memref<128x384xf32, #tpu.memory_space<vmem>>, vector<128x384xf32>
    %cst_319 = arith.constant dense<0.000000e+00> : vector<2x384xf32>
    %840 = tpu.matmul %827, %839, %cst_319 {dimension_numbers = #tpu.dot_dimension_numbers<[1], [0], [0], [1], [0, 0, 1, 1], [], []>} : vector<2x128xf32>, vector<128x384xf32>, vector<2x384xf32> -> vector<2x384xf32>
    %c0_320 = arith.constant 0 : index
    %c0_321 = arith.constant 0 : index
    %841 = vector.load %arg17[%c0_320, %c0_321] : memref<1x384xf32, #tpu.memory_space<vmem>>, vector<1x384xf32>
    %842 = vector.broadcast %841 : vector<1x384xf32> to vector<2x384xf32>
    %843 = arith.addf %840, %842 : vector<2x384xf32>
    %844 = vector.extract_strided_slice %832 {offsets = [0, 0], sizes = [2, 128], strides = [1, 1]} : vector<2x384xf32> to vector<2x128xf32>
    %845 = vector.extract_strided_slice %838 {offsets = [0, 0], sizes = [2, 128], strides = [1, 1]} : vector<2x384xf32> to vector<2x128xf32>
    %846 = arith.addf %844, %845 : vector<2x128xf32>
    %847 = arith.negf %846 : vector<2x128xf32>
    %848 = math.exp %847 : vector<2x128xf32>
    %cst_322 = arith.constant 1.000000e+00 : f32
    %849 = vector.broadcast %cst_322 : f32 to vector<2x128xf32>
    %850 = arith.addf %849, %848 : vector<2x128xf32>
    %851 = arith.divf %849, %850 : vector<2x128xf32>
    %852 = vector.extract_strided_slice %832 {offsets = [0, 128], sizes = [2, 128], strides = [1, 1]} : vector<2x384xf32> to vector<2x128xf32>
    %853 = vector.extract_strided_slice %838 {offsets = [0, 128], sizes = [2, 128], strides = [1, 1]} : vector<2x384xf32> to vector<2x128xf32>
    %854 = arith.addf %852, %853 : vector<2x128xf32>
    %855 = arith.negf %854 : vector<2x128xf32>
    %856 = math.exp %855 : vector<2x128xf32>
    %cst_323 = arith.constant 1.000000e+00 : f32
    %857 = vector.broadcast %cst_323 : f32 to vector<2x128xf32>
    %858 = arith.addf %857, %856 : vector<2x128xf32>
    %859 = arith.divf %857, %858 : vector<2x128xf32>
    %860 = vector.extract_strided_slice %832 {offsets = [0, 256], sizes = [2, 128], strides = [1, 1]} : vector<2x384xf32> to vector<2x128xf32>
    %861 = vector.extract_strided_slice %838 {offsets = [0, 256], sizes = [2, 128], strides = [1, 1]} : vector<2x384xf32> to vector<2x128xf32>
    %862 = arith.mulf %851, %861 : vector<2x128xf32>
    %863 = arith.addf %860, %862 : vector<2x128xf32>
    %864 = math.tanh %863 : vector<2x128xf32>
    %cst_324 = arith.constant 1.000000e+00 : f32
    %865 = vector.broadcast %cst_324 : f32 to vector<2x128xf32>
    %866 = arith.subf %865, %859 : vector<2x128xf32>
    %867 = arith.mulf %866, %864 : vector<2x128xf32>
    %868 = arith.mulf %859, %801 : vector<2x128xf32>
    %869 = arith.addf %867, %868 : vector<2x128xf32>
    %870 = vector.extract_strided_slice %833 {offsets = [0, 0], sizes = [2, 128], strides = [1, 1]} : vector<2x384xf32> to vector<2x128xf32>
    %871 = vector.extract_strided_slice %843 {offsets = [0, 0], sizes = [2, 128], strides = [1, 1]} : vector<2x384xf32> to vector<2x128xf32>
    %872 = arith.addf %870, %871 : vector<2x128xf32>
    %873 = arith.negf %872 : vector<2x128xf32>
    %874 = math.exp %873 : vector<2x128xf32>
    %cst_325 = arith.constant 1.000000e+00 : f32
    %875 = vector.broadcast %cst_325 : f32 to vector<2x128xf32>
    %876 = arith.addf %875, %874 : vector<2x128xf32>
    %877 = arith.divf %875, %876 : vector<2x128xf32>
    %878 = vector.extract_strided_slice %833 {offsets = [0, 128], sizes = [2, 128], strides = [1, 1]} : vector<2x384xf32> to vector<2x128xf32>
    %879 = vector.extract_strided_slice %843 {offsets = [0, 128], sizes = [2, 128], strides = [1, 1]} : vector<2x384xf32> to vector<2x128xf32>
    %880 = arith.addf %878, %879 : vector<2x128xf32>
    %881 = arith.negf %880 : vector<2x128xf32>
    %882 = math.exp %881 : vector<2x128xf32>
    %cst_326 = arith.constant 1.000000e+00 : f32
    %883 = vector.broadcast %cst_326 : f32 to vector<2x128xf32>
    %884 = arith.addf %883, %882 : vector<2x128xf32>
    %885 = arith.divf %883, %884 : vector<2x128xf32>
    %886 = vector.extract_strided_slice %833 {offsets = [0, 256], sizes = [2, 128], strides = [1, 1]} : vector<2x384xf32> to vector<2x128xf32>
    %887 = vector.extract_strided_slice %843 {offsets = [0, 256], sizes = [2, 128], strides = [1, 1]} : vector<2x384xf32> to vector<2x128xf32>
    %888 = arith.mulf %877, %887 : vector<2x128xf32>
    %889 = arith.addf %886, %888 : vector<2x128xf32>
    %890 = math.tanh %889 : vector<2x128xf32>
    %cst_327 = arith.constant 1.000000e+00 : f32
    %891 = vector.broadcast %cst_327 : f32 to vector<2x128xf32>
    %892 = arith.subf %891, %885 : vector<2x128xf32>
    %893 = arith.mulf %892, %890 : vector<2x128xf32>
    %894 = arith.mulf %885, %827 : vector<2x128xf32>
    %895 = arith.addf %893, %894 : vector<2x128xf32>
    %896 = vector.extract_strided_slice %869 {offsets = [1, 0], sizes = [1, 128], strides = [1, 1]} : vector<2x128xf32> to vector<1x128xf32>
    %c4_328 = arith.constant 4 : index
    %c0_329 = arith.constant 0 : index
    %897 = vector.load %arg25[%c4_328, %c0_329] : memref<8x128xf32, #tpu.memory_space<vmem>>, vector<1x128xf32>
    tpu.vector_store %arg25[%c4_328, %c0_329], %896 {strides = array<i32>} : memref<8x128xf32, #tpu.memory_space<vmem>>, vector<1x128xf32>,
    %898 = vector.extract_strided_slice %895 {offsets = [0, 0], sizes = [1, 128], strides = [1, 1]} : vector<2x128xf32> to vector<1x128xf32>
    %c3_330 = arith.constant 3 : index
    %c0_331 = arith.constant 0 : index
    %899 = vector.load %arg26[%c3_330, %c0_331] : memref<8x128xf32, #tpu.memory_space<vmem>>, vector<1x128xf32>
    tpu.vector_store %arg26[%c3_330, %c0_331], %898 {strides = array<i32>} : memref<8x128xf32, #tpu.memory_space<vmem>>, vector<1x128xf32>,
    %c10_332 = arith.constant 10 : index
    %c0_333 = arith.constant 0 : index
    %900 = vector.load %arg23[%c10_332, %c0_333] : memref<16x768xf32, #tpu.memory_space<vmem>>, vector<2x384xf32>
    %c4_334 = arith.constant 4 : index
    %c384_335 = arith.constant 384 : index
    %901 = vector.load %arg23[%c4_334, %c384_335] : memref<16x768xf32, #tpu.memory_space<vmem>>, vector<2x384xf32>
    %c0_336 = arith.constant 0 : index
    %c0_337 = arith.constant 0 : index
    %902 = vector.load %arg14[%c0_336, %c0_337] : memref<128x384xf32, #tpu.memory_space<vmem>>, vector<128x384xf32>
    %cst_338 = arith.constant dense<0.000000e+00> : vector<2x384xf32>
    %903 = tpu.matmul %869, %902, %cst_338 {dimension_numbers = #tpu.dot_dimension_numbers<[1], [0], [0], [1], [0, 0, 1, 1], [], []>} : vector<2x128xf32>, vector<128x384xf32>, vector<2x384xf32> -> vector<2x384xf32>
    %c0_339 = arith.constant 0 : index
    %c0_340 = arith.constant 0 : index
    %904 = vector.load %arg16[%c0_339, %c0_340] : memref<1x384xf32, #tpu.memory_space<vmem>>, vector<1x384xf32>
    %905 = vector.broadcast %904 : vector<1x384xf32> to vector<2x384xf32>
    %906 = arith.addf %903, %905 : vector<2x384xf32>
    %c0_341 = arith.constant 0 : index
    %c0_342 = arith.constant 0 : index
    %907 = vector.load %arg15[%c0_341, %c0_342] : memref<128x384xf32, #tpu.memory_space<vmem>>, vector<128x384xf32>
    %cst_343 = arith.constant dense<0.000000e+00> : vector<2x384xf32>
    %908 = tpu.matmul %895, %907, %cst_343 {dimension_numbers = #tpu.dot_dimension_numbers<[1], [0], [0], [1], [0, 0, 1, 1], [], []>} : vector<2x128xf32>, vector<128x384xf32>, vector<2x384xf32> -> vector<2x384xf32>
    %c0_344 = arith.constant 0 : index
    %c0_345 = arith.constant 0 : index
    %909 = vector.load %arg17[%c0_344, %c0_345] : memref<1x384xf32, #tpu.memory_space<vmem>>, vector<1x384xf32>
    %910 = vector.broadcast %909 : vector<1x384xf32> to vector<2x384xf32>
    %911 = arith.addf %908, %910 : vector<2x384xf32>
    %912 = vector.extract_strided_slice %900 {offsets = [0, 0], sizes = [2, 128], strides = [1, 1]} : vector<2x384xf32> to vector<2x128xf32>
    %913 = vector.extract_strided_slice %906 {offsets = [0, 0], sizes = [2, 128], strides = [1, 1]} : vector<2x384xf32> to vector<2x128xf32>
    %914 = arith.addf %912, %913 : vector<2x128xf32>
    %915 = arith.negf %914 : vector<2x128xf32>
    %916 = math.exp %915 : vector<2x128xf32>
    %cst_346 = arith.constant 1.000000e+00 : f32
    %917 = vector.broadcast %cst_346 : f32 to vector<2x128xf32>
    %918 = arith.addf %917, %916 : vector<2x128xf32>
    %919 = arith.divf %917, %918 : vector<2x128xf32>
    %920 = vector.extract_strided_slice %900 {offsets = [0, 128], sizes = [2, 128], strides = [1, 1]} : vector<2x384xf32> to vector<2x128xf32>
    %921 = vector.extract_strided_slice %906 {offsets = [0, 128], sizes = [2, 128], strides = [1, 1]} : vector<2x384xf32> to vector<2x128xf32>
    %922 = arith.addf %920, %921 : vector<2x128xf32>
    %923 = arith.negf %922 : vector<2x128xf32>
    %924 = math.exp %923 : vector<2x128xf32>
    %cst_347 = arith.constant 1.000000e+00 : f32
    %925 = vector.broadcast %cst_347 : f32 to vector<2x128xf32>
    %926 = arith.addf %925, %924 : vector<2x128xf32>
    %927 = arith.divf %925, %926 : vector<2x128xf32>
    %928 = vector.extract_strided_slice %900 {offsets = [0, 256], sizes = [2, 128], strides = [1, 1]} : vector<2x384xf32> to vector<2x128xf32>
    %929 = vector.extract_strided_slice %906 {offsets = [0, 256], sizes = [2, 128], strides = [1, 1]} : vector<2x384xf32> to vector<2x128xf32>
    %930 = arith.mulf %919, %929 : vector<2x128xf32>
    %931 = arith.addf %928, %930 : vector<2x128xf32>
    %932 = math.tanh %931 : vector<2x128xf32>
    %cst_348 = arith.constant 1.000000e+00 : f32
    %933 = vector.broadcast %cst_348 : f32 to vector<2x128xf32>
    %934 = arith.subf %933, %927 : vector<2x128xf32>
    %935 = arith.mulf %934, %932 : vector<2x128xf32>
    %936 = arith.mulf %927, %869 : vector<2x128xf32>
    %937 = arith.addf %935, %936 : vector<2x128xf32>
    %938 = vector.extract_strided_slice %901 {offsets = [0, 0], sizes = [2, 128], strides = [1, 1]} : vector<2x384xf32> to vector<2x128xf32>
    %939 = vector.extract_strided_slice %911 {offsets = [0, 0], sizes = [2, 128], strides = [1, 1]} : vector<2x384xf32> to vector<2x128xf32>
    %940 = arith.addf %938, %939 : vector<2x128xf32>
    %941 = arith.negf %940 : vector<2x128xf32>
    %942 = math.exp %941 : vector<2x128xf32>
    %cst_349 = arith.constant 1.000000e+00 : f32
    %943 = vector.broadcast %cst_349 : f32 to vector<2x128xf32>
    %944 = arith.addf %943, %942 : vector<2x128xf32>
    %945 = arith.divf %943, %944 : vector<2x128xf32>
    %946 = vector.extract_strided_slice %901 {offsets = [0, 128], sizes = [2, 128], strides = [1, 1]} : vector<2x384xf32> to vector<2x128xf32>
    %947 = vector.extract_strided_slice %911 {offsets = [0, 128], sizes = [2, 128], strides = [1, 1]} : vector<2x384xf32> to vector<2x128xf32>
    %948 = arith.addf %946, %947 : vector<2x128xf32>
    %949 = arith.negf %948 : vector<2x128xf32>
    %950 = math.exp %949 : vector<2x128xf32>
    %cst_350 = arith.constant 1.000000e+00 : f32
    %951 = vector.broadcast %cst_350 : f32 to vector<2x128xf32>
    %952 = arith.addf %951, %950 : vector<2x128xf32>
    %953 = arith.divf %951, %952 : vector<2x128xf32>
    %954 = vector.extract_strided_slice %901 {offsets = [0, 256], sizes = [2, 128], strides = [1, 1]} : vector<2x384xf32> to vector<2x128xf32>
    %955 = vector.extract_strided_slice %911 {offsets = [0, 256], sizes = [2, 128], strides = [1, 1]} : vector<2x384xf32> to vector<2x128xf32>
    %956 = arith.mulf %945, %955 : vector<2x128xf32>
    %957 = arith.addf %954, %956 : vector<2x128xf32>
    %958 = math.tanh %957 : vector<2x128xf32>
    %cst_351 = arith.constant 1.000000e+00 : f32
    %959 = vector.broadcast %cst_351 : f32 to vector<2x128xf32>
    %960 = arith.subf %959, %953 : vector<2x128xf32>
    %961 = arith.mulf %960, %958 : vector<2x128xf32>
    %962 = arith.mulf %953, %895 : vector<2x128xf32>
    %963 = arith.addf %961, %962 : vector<2x128xf32>
    %964 = vector.extract_strided_slice %937 {offsets = [1, 0], sizes = [1, 128], strides = [1, 1]} : vector<2x128xf32> to vector<1x128xf32>
    %c5_352 = arith.constant 5 : index
    %c0_353 = arith.constant 0 : index
    %965 = vector.load %arg25[%c5_352, %c0_353] : memref<8x128xf32, #tpu.memory_space<vmem>>, vector<1x128xf32>
    tpu.vector_store %arg25[%c5_352, %c0_353], %964 {strides = array<i32>} : memref<8x128xf32, #tpu.memory_space<vmem>>, vector<1x128xf32>,
    %966 = vector.extract_strided_slice %963 {offsets = [0, 0], sizes = [1, 128], strides = [1, 1]} : vector<2x128xf32> to vector<1x128xf32>
    %c2_354 = arith.constant 2 : index
    %c0_355 = arith.constant 0 : index
    %967 = vector.load %arg26[%c2_354, %c0_355] : memref<8x128xf32, #tpu.memory_space<vmem>>, vector<1x128xf32>
    tpu.vector_store %arg26[%c2_354, %c0_355], %966 {strides = array<i32>} : memref<8x128xf32, #tpu.memory_space<vmem>>, vector<1x128xf32>,
    %c12_356 = arith.constant 12 : index
    %c0_357 = arith.constant 0 : index
    %968 = vector.load %arg23[%c12_356, %c0_357] : memref<16x768xf32, #tpu.memory_space<vmem>>, vector<2x384xf32>
    %c2_358 = arith.constant 2 : index
    %c384_359 = arith.constant 384 : index
    %969 = vector.load %arg23[%c2_358, %c384_359] : memref<16x768xf32, #tpu.memory_space<vmem>>, vector<2x384xf32>
    %c0_360 = arith.constant 0 : index
    %c0_361 = arith.constant 0 : index
    %970 = vector.load %arg14[%c0_360, %c0_361] : memref<128x384xf32, #tpu.memory_space<vmem>>, vector<128x384xf32>
    %cst_362 = arith.constant dense<0.000000e+00> : vector<2x384xf32>
    %971 = tpu.matmul %937, %970, %cst_362 {dimension_numbers = #tpu.dot_dimension_numbers<[1], [0], [0], [1], [0, 0, 1, 1], [], []>} : vector<2x128xf32>, vector<128x384xf32>, vector<2x384xf32> -> vector<2x384xf32>
    %c0_363 = arith.constant 0 : index
    %c0_364 = arith.constant 0 : index
    %972 = vector.load %arg16[%c0_363, %c0_364] : memref<1x384xf32, #tpu.memory_space<vmem>>, vector<1x384xf32>
    %973 = vector.broadcast %972 : vector<1x384xf32> to vector<2x384xf32>
    %974 = arith.addf %971, %973 : vector<2x384xf32>
    %c0_365 = arith.constant 0 : index
    %c0_366 = arith.constant 0 : index
    %975 = vector.load %arg15[%c0_365, %c0_366] : memref<128x384xf32, #tpu.memory_space<vmem>>, vector<128x384xf32>
    %cst_367 = arith.constant dense<0.000000e+00> : vector<2x384xf32>
    %976 = tpu.matmul %963, %975, %cst_367 {dimension_numbers = #tpu.dot_dimension_numbers<[1], [0], [0], [1], [0, 0, 1, 1], [], []>} : vector<2x128xf32>, vector<128x384xf32>, vector<2x384xf32> -> vector<2x384xf32>
    %c0_368 = arith.constant 0 : index
    %c0_369 = arith.constant 0 : index
    %977 = vector.load %arg17[%c0_368, %c0_369] : memref<1x384xf32, #tpu.memory_space<vmem>>, vector<1x384xf32>
    %978 = vector.broadcast %977 : vector<1x384xf32> to vector<2x384xf32>
    %979 = arith.addf %976, %978 : vector<2x384xf32>
    %980 = vector.extract_strided_slice %968 {offsets = [0, 0], sizes = [2, 128], strides = [1, 1]} : vector<2x384xf32> to vector<2x128xf32>
    %981 = vector.extract_strided_slice %974 {offsets = [0, 0], sizes = [2, 128], strides = [1, 1]} : vector<2x384xf32> to vector<2x128xf32>
    %982 = arith.addf %980, %981 : vector<2x128xf32>
    %983 = arith.negf %982 : vector<2x128xf32>
    %984 = math.exp %983 : vector<2x128xf32>
    %cst_370 = arith.constant 1.000000e+00 : f32
    %985 = vector.broadcast %cst_370 : f32 to vector<2x128xf32>
    %986 = arith.addf %985, %984 : vector<2x128xf32>
    %987 = arith.divf %985, %986 : vector<2x128xf32>
    %988 = vector.extract_strided_slice %968 {offsets = [0, 128], sizes = [2, 128], strides = [1, 1]} : vector<2x384xf32> to vector<2x128xf32>
    %989 = vector.extract_strided_slice %974 {offsets = [0, 128], sizes = [2, 128], strides = [1, 1]} : vector<2x384xf32> to vector<2x128xf32>
    %990 = arith.addf %988, %989 : vector<2x128xf32>
    %991 = arith.negf %990 : vector<2x128xf32>
    %992 = math.exp %991 : vector<2x128xf32>
    %cst_371 = arith.constant 1.000000e+00 : f32
    %993 = vector.broadcast %cst_371 : f32 to vector<2x128xf32>
    %994 = arith.addf %993, %992 : vector<2x128xf32>
    %995 = arith.divf %993, %994 : vector<2x128xf32>
    %996 = vector.extract_strided_slice %968 {offsets = [0, 256], sizes = [2, 128], strides = [1, 1]} : vector<2x384xf32> to vector<2x128xf32>
    %997 = vector.extract_strided_slice %974 {offsets = [0, 256], sizes = [2, 128], strides = [1, 1]} : vector<2x384xf32> to vector<2x128xf32>
    %998 = arith.mulf %987, %997 : vector<2x128xf32>
    %999 = arith.addf %996, %998 : vector<2x128xf32>
    %1000 = math.tanh %999 : vector<2x128xf32>
    %cst_372 = arith.constant 1.000000e+00 : f32
    %1001 = vector.broadcast %cst_372 : f32 to vector<2x128xf32>
    %1002 = arith.subf %1001, %995 : vector<2x128xf32>
    %1003 = arith.mulf %1002, %1000 : vector<2x128xf32>
    %1004 = arith.mulf %995, %937 : vector<2x128xf32>
    %1005 = arith.addf %1003, %1004 : vector<2x128xf32>
    %1006 = vector.extract_strided_slice %969 {offsets = [0, 0], sizes = [2, 128], strides = [1, 1]} : vector<2x384xf32> to vector<2x128xf32>
    %1007 = vector.extract_strided_slice %979 {offsets = [0, 0], sizes = [2, 128], strides = [1, 1]} : vector<2x384xf32> to vector<2x128xf32>
    %1008 = arith.addf %1006, %1007 : vector<2x128xf32>
    %1009 = arith.negf %1008 : vector<2x128xf32>
    %1010 = math.exp %1009 : vector<2x128xf32>
    %cst_373 = arith.constant 1.000000e+00 : f32
    %1011 = vector.broadcast %cst_373 : f32 to vector<2x128xf32>
    %1012 = arith.addf %1011, %1010 : vector<2x128xf32>
    %1013 = arith.divf %1011, %1012 : vector<2x128xf32>
    %1014 = vector.extract_strided_slice %969 {offsets = [0, 128], sizes = [2, 128], strides = [1, 1]} : vector<2x384xf32> to vector<2x128xf32>
    %1015 = vector.extract_strided_slice %979 {offsets = [0, 128], sizes = [2, 128], strides = [1, 1]} : vector<2x384xf32> to vector<2x128xf32>
    %1016 = arith.addf %1014, %1015 : vector<2x128xf32>
    %1017 = arith.negf %1016 : vector<2x128xf32>
    %1018 = math.exp %1017 : vector<2x128xf32>
    %cst_374 = arith.constant 1.000000e+00 : f32
    %1019 = vector.broadcast %cst_374 : f32 to vector<2x128xf32>
    %1020 = arith.addf %1019, %1018 : vector<2x128xf32>
    %1021 = arith.divf %1019, %1020 : vector<2x128xf32>
    %1022 = vector.extract_strided_slice %969 {offsets = [0, 256], sizes = [2, 128], strides = [1, 1]} : vector<2x384xf32> to vector<2x128xf32>
    %1023 = vector.extract_strided_slice %979 {offsets = [0, 256], sizes = [2, 128], strides = [1, 1]} : vector<2x384xf32> to vector<2x128xf32>
    %1024 = arith.mulf %1013, %1023 : vector<2x128xf32>
    %1025 = arith.addf %1022, %1024 : vector<2x128xf32>
    %1026 = math.tanh %1025 : vector<2x128xf32>
    %cst_375 = arith.constant 1.000000e+00 : f32
    %1027 = vector.broadcast %cst_375 : f32 to vector<2x128xf32>
    %1028 = arith.subf %1027, %1021 : vector<2x128xf32>
    %1029 = arith.mulf %1028, %1026 : vector<2x128xf32>
    %1030 = arith.mulf %1021, %963 : vector<2x128xf32>
    %1031 = arith.addf %1029, %1030 : vector<2x128xf32>
    %1032 = vector.extract_strided_slice %1005 {offsets = [1, 0], sizes = [1, 128], strides = [1, 1]} : vector<2x128xf32> to vector<1x128xf32>
    %c6_376 = arith.constant 6 : index
    %c0_377 = arith.constant 0 : index
    %1033 = vector.load %arg25[%c6_376, %c0_377] : memref<8x128xf32, #tpu.memory_space<vmem>>, vector<1x128xf32>
    tpu.vector_store %arg25[%c6_376, %c0_377], %1032 {strides = array<i32>} : memref<8x128xf32, #tpu.memory_space<vmem>>, vector<1x128xf32>,
    %1034 = vector.extract_strided_slice %1031 {offsets = [0, 0], sizes = [1, 128], strides = [1, 1]} : vector<2x128xf32> to vector<1x128xf32>
    %c1_378 = arith.constant 1 : index
    %c0_379 = arith.constant 0 : index
    %1035 = vector.load %arg26[%c1_378, %c0_379] : memref<8x128xf32, #tpu.memory_space<vmem>>, vector<1x128xf32>
    tpu.vector_store %arg26[%c1_378, %c0_379], %1034 {strides = array<i32>} : memref<8x128xf32, #tpu.memory_space<vmem>>, vector<1x128xf32>,
    %c14_380 = arith.constant 14 : index
    %c0_381 = arith.constant 0 : index
    %1036 = vector.load %arg23[%c14_380, %c0_381] : memref<16x768xf32, #tpu.memory_space<vmem>>, vector<2x384xf32>
    %c0_382 = arith.constant 0 : index
    %c384_383 = arith.constant 384 : index
    %1037 = vector.load %arg23[%c0_382, %c384_383] : memref<16x768xf32, #tpu.memory_space<vmem>>, vector<2x384xf32>
    %c0_384 = arith.constant 0 : index
    %c0_385 = arith.constant 0 : index
    %1038 = vector.load %arg14[%c0_384, %c0_385] : memref<128x384xf32, #tpu.memory_space<vmem>>, vector<128x384xf32>
    %cst_386 = arith.constant dense<0.000000e+00> : vector<2x384xf32>
    %1039 = tpu.matmul %1005, %1038, %cst_386 {dimension_numbers = #tpu.dot_dimension_numbers<[1], [0], [0], [1], [0, 0, 1, 1], [], []>} : vector<2x128xf32>, vector<128x384xf32>, vector<2x384xf32> -> vector<2x384xf32>
    %c0_387 = arith.constant 0 : index
    %c0_388 = arith.constant 0 : index
    %1040 = vector.load %arg16[%c0_387, %c0_388] : memref<1x384xf32, #tpu.memory_space<vmem>>, vector<1x384xf32>
    %1041 = vector.broadcast %1040 : vector<1x384xf32> to vector<2x384xf32>
    %1042 = arith.addf %1039, %1041 : vector<2x384xf32>
    %c0_389 = arith.constant 0 : index
    %c0_390 = arith.constant 0 : index
    %1043 = vector.load %arg15[%c0_389, %c0_390] : memref<128x384xf32, #tpu.memory_space<vmem>>, vector<128x384xf32>
    %cst_391 = arith.constant dense<0.000000e+00> : vector<2x384xf32>
    %1044 = tpu.matmul %1031, %1043, %cst_391 {dimension_numbers = #tpu.dot_dimension_numbers<[1], [0], [0], [1], [0, 0, 1, 1], [], []>} : vector<2x128xf32>, vector<128x384xf32>, vector<2x384xf32> -> vector<2x384xf32>
    %c0_392 = arith.constant 0 : index
    %c0_393 = arith.constant 0 : index
    %1045 = vector.load %arg17[%c0_392, %c0_393] : memref<1x384xf32, #tpu.memory_space<vmem>>, vector<1x384xf32>
    %1046 = vector.broadcast %1045 : vector<1x384xf32> to vector<2x384xf32>
    %1047 = arith.addf %1044, %1046 : vector<2x384xf32>
    %1048 = vector.extract_strided_slice %1036 {offsets = [0, 0], sizes = [2, 128], strides = [1, 1]} : vector<2x384xf32> to vector<2x128xf32>
    %1049 = vector.extract_strided_slice %1042 {offsets = [0, 0], sizes = [2, 128], strides = [1, 1]} : vector<2x384xf32> to vector<2x128xf32>
    %1050 = arith.addf %1048, %1049 : vector<2x128xf32>
    %1051 = arith.negf %1050 : vector<2x128xf32>
    %1052 = math.exp %1051 : vector<2x128xf32>
    %cst_394 = arith.constant 1.000000e+00 : f32
    %1053 = vector.broadcast %cst_394 : f32 to vector<2x128xf32>
    %1054 = arith.addf %1053, %1052 : vector<2x128xf32>
    %1055 = arith.divf %1053, %1054 : vector<2x128xf32>
    %1056 = vector.extract_strided_slice %1036 {offsets = [0, 128], sizes = [2, 128], strides = [1, 1]} : vector<2x384xf32> to vector<2x128xf32>
    %1057 = vector.extract_strided_slice %1042 {offsets = [0, 128], sizes = [2, 128], strides = [1, 1]} : vector<2x384xf32> to vector<2x128xf32>
    %1058 = arith.addf %1056, %1057 : vector<2x128xf32>
    %1059 = arith.negf %1058 : vector<2x128xf32>
    %1060 = math.exp %1059 : vector<2x128xf32>
    %cst_395 = arith.constant 1.000000e+00 : f32
    %1061 = vector.broadcast %cst_395 : f32 to vector<2x128xf32>
    %1062 = arith.addf %1061, %1060 : vector<2x128xf32>
    %1063 = arith.divf %1061, %1062 : vector<2x128xf32>
    %1064 = vector.extract_strided_slice %1036 {offsets = [0, 256], sizes = [2, 128], strides = [1, 1]} : vector<2x384xf32> to vector<2x128xf32>
    %1065 = vector.extract_strided_slice %1042 {offsets = [0, 256], sizes = [2, 128], strides = [1, 1]} : vector<2x384xf32> to vector<2x128xf32>
    %1066 = arith.mulf %1055, %1065 : vector<2x128xf32>
    %1067 = arith.addf %1064, %1066 : vector<2x128xf32>
    %1068 = math.tanh %1067 : vector<2x128xf32>
    %cst_396 = arith.constant 1.000000e+00 : f32
    %1069 = vector.broadcast %cst_396 : f32 to vector<2x128xf32>
    %1070 = arith.subf %1069, %1063 : vector<2x128xf32>
    %1071 = arith.mulf %1070, %1068 : vector<2x128xf32>
    %1072 = arith.mulf %1063, %1005 : vector<2x128xf32>
    %1073 = arith.addf %1071, %1072 : vector<2x128xf32>
    %1074 = vector.extract_strided_slice %1037 {offsets = [0, 0], sizes = [2, 128], strides = [1, 1]} : vector<2x384xf32> to vector<2x128xf32>
    %1075 = vector.extract_strided_slice %1047 {offsets = [0, 0], sizes = [2, 128], strides = [1, 1]} : vector<2x384xf32> to vector<2x128xf32>
    %1076 = arith.addf %1074, %1075 : vector<2x128xf32>
    %1077 = arith.negf %1076 : vector<2x128xf32>
    %1078 = math.exp %1077 : vector<2x128xf32>
    %cst_397 = arith.constant 1.000000e+00 : f32
    %1079 = vector.broadcast %cst_397 : f32 to vector<2x128xf32>
    %1080 = arith.addf %1079, %1078 : vector<2x128xf32>
    %1081 = arith.divf %1079, %1080 : vector<2x128xf32>
    %1082 = vector.extract_strided_slice %1037 {offsets = [0, 128], sizes = [2, 128], strides = [1, 1]} : vector<2x384xf32> to vector<2x128xf32>
    %1083 = vector.extract_strided_slice %1047 {offsets = [0, 128], sizes = [2, 128], strides = [1, 1]} : vector<2x384xf32> to vector<2x128xf32>
    %1084 = arith.addf %1082, %1083 : vector<2x128xf32>
    %1085 = arith.negf %1084 : vector<2x128xf32>
    %1086 = math.exp %1085 : vector<2x128xf32>
    %cst_398 = arith.constant 1.000000e+00 : f32
    %1087 = vector.broadcast %cst_398 : f32 to vector<2x128xf32>
    %1088 = arith.addf %1087, %1086 : vector<2x128xf32>
    %1089 = arith.divf %1087, %1088 : vector<2x128xf32>
    %1090 = vector.extract_strided_slice %1037 {offsets = [0, 256], sizes = [2, 128], strides = [1, 1]} : vector<2x384xf32> to vector<2x128xf32>
    %1091 = vector.extract_strided_slice %1047 {offsets = [0, 256], sizes = [2, 128], strides = [1, 1]} : vector<2x384xf32> to vector<2x128xf32>
    %1092 = arith.mulf %1081, %1091 : vector<2x128xf32>
    %1093 = arith.addf %1090, %1092 : vector<2x128xf32>
    %1094 = math.tanh %1093 : vector<2x128xf32>
    %cst_399 = arith.constant 1.000000e+00 : f32
    %1095 = vector.broadcast %cst_399 : f32 to vector<2x128xf32>
    %1096 = arith.subf %1095, %1089 : vector<2x128xf32>
    %1097 = arith.mulf %1096, %1094 : vector<2x128xf32>
    %1098 = arith.mulf %1089, %1031 : vector<2x128xf32>
    %1099 = arith.addf %1097, %1098 : vector<2x128xf32>
    %1100 = vector.extract_strided_slice %1073 {offsets = [1, 0], sizes = [1, 128], strides = [1, 1]} : vector<2x128xf32> to vector<1x128xf32>
    %c7_400 = arith.constant 7 : index
    %c0_401 = arith.constant 0 : index
    %1101 = vector.load %arg25[%c7_400, %c0_401] : memref<8x128xf32, #tpu.memory_space<vmem>>, vector<1x128xf32>
    tpu.vector_store %arg25[%c7_400, %c0_401], %1100 {strides = array<i32>} : memref<8x128xf32, #tpu.memory_space<vmem>>, vector<1x128xf32>,
    %1102 = vector.extract_strided_slice %1099 {offsets = [0, 0], sizes = [1, 128], strides = [1, 1]} : vector<2x128xf32> to vector<1x128xf32>
    %c0_402 = arith.constant 0 : index
    %c0_403 = arith.constant 0 : index
    %1103 = vector.load %arg26[%c0_402, %c0_403] : memref<8x128xf32, #tpu.memory_space<vmem>>, vector<1x128xf32>
    tpu.vector_store %arg26[%c0_402, %c0_403], %1102 {strides = array<i32>} : memref<8x128xf32, #tpu.memory_space<vmem>>, vector<1x128xf32>,
    %c0_404 = arith.constant 0 : index
    %c0_405 = arith.constant 0 : index
    %1104 = vector.load %arg18[%c0_404, %c0_405] : memref<160x5xf32, #tpu.memory_space<vmem>>, vector<160x5xf32>
    %cst_406 = arith.constant dense<0.000000e+00> : vector<8x5xf32>
    %1105 = tpu.matmul %13, %1104, %cst_406 {dimension_numbers = #tpu.dot_dimension_numbers<[1], [0], [0], [1], [0, 0, 1, 1], [], []>} : vector<8x160xf32>, vector<160x5xf32>, vector<8x5xf32> -> vector<8x5xf32>
    %c0_407 = arith.constant 0 : index
    %c0_408 = arith.constant 0 : index
    %1106 = vector.load %arg25[%c0_407, %c0_408] : memref<8x128xf32, #tpu.memory_space<vmem>>, vector<8x128xf32>
    %c0_409 = arith.constant 0 : index
    %c0_410 = arith.constant 0 : index
    %1107 = vector.load %arg19[%c0_409, %c0_410] : memref<128x5xf32, #tpu.memory_space<vmem>>, vector<128x5xf32>
    %cst_411 = arith.constant dense<0.000000e+00> : vector<8x5xf32>
    %1108 = tpu.matmul %1106, %1107, %cst_411 {dimension_numbers = #tpu.dot_dimension_numbers<[1], [0], [0], [1], [0, 0, 1, 1], [], []>} : vector<8x128xf32>, vector<128x5xf32>, vector<8x5xf32> -> vector<8x5xf32>
    %1109 = arith.addf %1105, %1108 : vector<8x5xf32>
    %c0_412 = arith.constant 0 : index
    %c0_413 = arith.constant 0 : index
    %1110 = vector.load %arg26[%c0_412, %c0_413] : memref<8x128xf32, #tpu.memory_space<vmem>>, vector<8x128xf32>
    %c0_414 = arith.constant 0 : index
    %c0_415 = arith.constant 0 : index
    %1111 = vector.load %arg20[%c0_414, %c0_415] : memref<128x5xf32, #tpu.memory_space<vmem>>, vector<128x5xf32>
    %cst_416 = arith.constant dense<0.000000e+00> : vector<8x5xf32>
    %1112 = tpu.matmul %1110, %1111, %cst_416 {dimension_numbers = #tpu.dot_dimension_numbers<[1], [0], [0], [1], [0, 0, 1, 1], [], []>} : vector<8x128xf32>, vector<128x5xf32>, vector<8x5xf32> -> vector<8x5xf32>
    %1113 = arith.addf %1109, %1112 : vector<8x5xf32>
    %c0_417 = arith.constant 0 : index
    %c0_418 = arith.constant 0 : index
    %1114 = vector.load %arg21[%c0_417, %c0_418] : memref<1x5xf32, #tpu.memory_space<vmem>>, vector<1x5xf32>
    %1115 = vector.broadcast %1114 : vector<1x5xf32> to vector<8x5xf32>
    %1116 = arith.addf %1113, %1115 : vector<8x5xf32>
    %c0_419 = arith.constant 0 : index
    %c0_420 = arith.constant 0 : index
    %1117 = vector.load %arg22[%c0_419, %c0_420] : memref<8x5xf32, #tpu.memory_space<vmem>>, vector<8x5xf32>
    tpu.vector_store %arg22[%c0_419, %c0_420], %1116 {strides = array<i32>} : memref<8x5xf32, #tpu.memory_space<vmem>>, vector<8x5xf32>,
    return
  }
}

</mosaic_0001>

<bundles_post_ra>
// kernel: cnn_bigru_forward.1
= control target key start
LH: loop header
LB: loop body
LE: loop exit
PB: predicated region body
PF: predicated region fallthrough
CT: control target
= control target key end

     0   :  { %s17076_s0 = inlined_call_operand.vmem [shape: f32[8,64], index: 0, kind: input, shape index: {}]   ;;  %s17077_s1 = inlined_call_operand.vmem [shape: f32[16,32], index: 1, kind: input, shape index: {}]   ;;  %s17078_s2 = inlined_call_operand.vmem [shape: f32[64,160], index: 2, kind: input, shape index: {}]   ;;  %s17079_s3 = inlined_call_operand.hbm [shape: f32[64,160], index: 3, kind: input, shape index: {}]   ;;  %s17080_s4 = inlined_call_operand.vmem [shape: f32[1,160], index: 4, kind: input, shape index: {}]   ;;  %s17081_s5 = inlined_call_operand.vmem [shape: f32[1,160], index: 5, kind: input, shape index: {}]   ;;  %s17082_s6 = inlined_call_operand.hbm [shape: f32[32,768], index: 6, kind: input, shape index: {}]   ;;  %s17083_s7 = inlined_call_operand.vmem [shape: f32[1,768], index: 7, kind: input, shape index: {}]   ;;  %s17084_s8 = inlined_call_operand.vmem [shape: f32[128,384], index: 8, kind: input, shape index: {}]   ;;  %s17085_s9 = inlined_call_operand.hbm [shape: f32[128,384], index: 9, kind: input, shape index: {}]   ;;  %s17086_s10 = inlined_call_operand.vmem [shape: f32[1,384], index: 10, kind: input, shape index: {}]   ;;  %s17087_s11 = inlined_call_operand.vmem [shape: f32[1,384], index: 11, kind: input, shape index: {}]   ;;  %s17088_s12 = inlined_call_operand.hbm [shape: f32[256,768], index: 12, kind: input, shape index: {}]   ;;  %s17089_s13 = inlined_call_operand.vmem [shape: f32[1,768], index: 13, kind: input, shape index: {}]   ;;  %s17090_s14 = inlined_call_operand.hbm [shape: f32[128,384], index: 14, kind: input, shape index: {}]   ;;  %s17091_s15 = inlined_call_operand.hbm [shape: f32[128,384], index: 15, kind: input, shape index: {}]   ;;  %s17092_s16 = inlined_call_operand.vmem [shape: f32[1,384], index: 16, kind: input, shape index: {}]   ;;  %s17093_s17 = inlined_call_operand.vmem [shape: f32[1,384], index: 17, kind: input, shape index: {}]   ;;  %s17094_s18 = inlined_call_operand.vmem [shape: f32[160,5], index: 18, kind: input, shape index: {}]   ;;  %s17095_s19 = inlined_call_operand.vmem [shape: f32[128,5], index: 19, kind: input, shape index: {}]   ;;  %s17096_s20 = inlined_call_operand.vmem [shape: f32[128,5], index: 20, kind: input, shape index: {}]   ;;  %s17097_s21 = inlined_call_operand.vmem [shape: f32[1,5], index: 21, kind: input, shape index: {}]   ;;  %s17098_s22 = inlined_call_operand.hbm [shape: f32[8,5], index: 22, kind: output, shape index: {}]  }
   0x1   :  { %17139 = sst [smem:[#allocation34_spill]] %s17076_s0 }
   0x2   :  { %17140 = sst [smem:[#allocation35_spill]] %s17077_s1 }
   0x3   :  { %17141 = sst [smem:[#allocation36_spill]] %s17078_s2 }
   0x4   :  { %17142 = sst [smem:[#allocation37_spill]] %s17079_s3 }
   0x5   :  { %17143 = sst [smem:[#allocation38_spill]] %s17080_s4 }
   0x6   :  { %17144 = sst [smem:[#allocation39_spill]] %s17081_s5 }
   0x7   :  { %17145 = sst [smem:[#allocation40_spill]] %s17082_s6 }
   0x8   :  { %17146 = sst [smem:[#allocation41_spill]] %s17097_s21 }
   0x9   :  { %17147 = sst [smem:[#allocation42_spill]] %s17098_s22 }
   0xa   :  { %27 = vsyncpa [#allocation7], 0 }
   0xb   :  { %28 = vsyncpa [#allocation10], 0 }
   0xc   :  { %29 = vsyncpa [#allocation13], 0 }
   0xd   :  { %30 = vsyncpa [#allocation16], 0 }
   0xe   :  { %31 = vsyncpa [#allocation8], 0  ;;  %s13624_s3 = smov [#allocation9]   ;;  %s17148_s4 = sld [smem:[#allocation40_spill]] }
   0xf   :  { %s59_s28 = sshll.u32 %s13624_s3, 4  ;;  %s60_s28 = int_to_ptr.vmem [resolvable:$true] %s59_s28 }
  0x14   :  { %s13460_s0 = scalar_lea.hbm %s17148_s4, 3072 }
  0x15   :  { %p13461_p0 = scmp.ne.s32.totalorder %s17148_s4, %s13460_s0  ;;  %p13464_p1 = scmp.lt.u32.totalorder %s13460_s0, %s17148_s4 }
  0x17   :  { %p13466_p2 = pnand %p13464_p1, %p13461_p0 }
  0x19   :  { %13469 = shalt.err (!%p13466_p2)
}
  0x1a   :  { %s13470_s6 = scalar_lea.vmem %s60_s28, 3072  ;;  %p13475_p4 = scmp.lt.s32.totalorder %s60_s28, %s60_s28 }
  0x1b   :  { %p13471_p3 = scmp.ne.s32.totalorder %s60_s28, %s13470_s6  ;;  %p13476_p5 = scmp.lt.s32.totalorder %s13470_s6, %s13470_s6 }
  0x1d   :  { %p13477_p6 = por %p13476_p5, %p13475_p4 }
  0x1f   :  { %p13478_p7 = pnand %p13477_p6, %p13471_p3 }
  0x21   :  { %13481 = shalt.err (!%p13478_p7)
}
  0x22   :  { %s13625_s25 = smov 768   ;;  %s13626_s26 = smov 48  }
  0x23   :  { %65 = dma.hbm_to_vmem [thread:$0]  %s17148_s4, 3072, %s60_s28, [#allocation10], %s13625_s25, %s13625_s25, %s13626_s26  }
  0x24   :  { %s13627_s3 = smov [#allocation12]   ;;  %s13628_s30 = smov [#allocation6]  }
  0x25   :  { %s91_s29 = sshll.u32 %s13627_s3, 4  ;;  %s43_s0 = sshll.u32 %s13628_s30, 4  ;;  %s92_s29 = int_to_ptr.vmem [resolvable:$true] %s91_s29  ;;  %s44_s0 = int_to_ptr.vmem [resolvable:$true] %s43_s0 }
  0x26   :  { %s13482_s5 = scalar_lea.hbm %s17088_s12, 24576 }
  0x27   :  { %p13483_p8 = scmp.ne.s32.totalorder %s17088_s12, %s13482_s5  ;;  %p13486_p9 = scmp.lt.u32.totalorder %s13482_s5, %s17088_s12 }
  0x29   :  { %p13488_p10 = pnand %p13486_p9, %p13483_p8 }
  0x2b   :  { %13491 = shalt.err (!%p13488_p10)
}
  0x2c   :  { %s13492_s28 = scalar_lea.vmem %s92_s29, 24576  ;;  %p13497_p12 = scmp.lt.s32.totalorder %s92_s29, %s92_s29 }
  0x2d   :  { %p13493_p11 = scmp.ne.s32.totalorder %s92_s29, %s13492_s28  ;;  %p13498_p13 = scmp.lt.s32.totalorder %s13492_s28, %s13492_s28 }
  0x2f   :  { %p13499_p0 = por %p13498_p13, %p13497_p12 }
  0x31   :  { %p13500_p1 = pnand %p13499_p0, %p13493_p11 }
  0x33   :  { %13503 = shalt.err (!%p13500_p1)
}
  0x34   :  { %97 = dma.hbm_to_vmem [thread:$0]  %s17088_s12, 24576, %s92_s29, [#allocation13], %s13625_s25, %s13625_s25, %s13626_s26  }
  0x35   :  { %s17149_s30 = sld [smem:[#allocation37_spill]] }
  0x3b   :  { %s13504_s23 = scalar_lea.hbm %s17149_s30, 2048 }
  0x3c   :  { %p13505_p2 = scmp.ne.s32.totalorder %s17149_s30, %s13504_s23  ;;  %p13508_p3 = scmp.lt.u32.totalorder %s13504_s23, %s17149_s30 }
  0x3e   :  { %p13510_p4 = pnand %p13508_p3, %p13505_p2 }
  0x40   :  { %13513 = shalt.err (!%p13510_p4)
}
  0x41   :  { %s13514_s24 = scalar_lea.vmem %s44_s0, 2048  ;;  %p13519_p6 = scmp.lt.s32.totalorder %s44_s0, %s44_s0 }
  0x42   :  { %p13515_p5 = scmp.ne.s32.totalorder %s44_s0, %s13514_s24  ;;  %p13520_p7 = scmp.lt.s32.totalorder %s13514_s24, %s13514_s24 }
  0x44   :  { %p13521_p8 = por %p13520_p7, %p13519_p6 }
  0x46   :  { %p13522_p9 = pnand %p13521_p8, %p13515_p5 }
  0x48   :  { %13525 = shalt.err (!%p13522_p9)
}
  0x49   :  { %s13629_s12 = smov 256   ;;  %s13630_s25 = smov 16  }
  0x4a   :  { %49 = dma.hbm_to_vmem [thread:$0]  %s17149_s30, 2048, %s44_s0, [#allocation7], %s13629_s12, %s13629_s12, %s13630_s25  }
  0x4b   :  { %s13631_s6 = smov [#allocation11]   ;;  %s13526_s27 = scalar_lea.hbm %s17085_s9, 6144 }
  0x4c   :  { %s75_s28 = sshll.u32 %s13631_s6, 4  ;;  %p13527_p10 = scmp.ne.s32.totalorder %s17085_s9, %s13526_s27  ;;  %s76_s28 = int_to_ptr.vmem [resolvable:$true] %s75_s28 }
  0x4d   :  { %p13530_p11 = scmp.lt.u32.totalorder %s13526_s27, %s17085_s9 }
  0x4f   :  { %p13532_p12 = pnand %p13530_p11, %p13527_p10 }
  0x51   :  { %13535 = shalt.err (!%p13532_p12)
}
  0x52   :  { %s13536_s1 = scalar_lea.vmem %s76_s28, 6144  ;;  %p13541_p0 = scmp.lt.s32.totalorder %s76_s28, %s76_s28 }
  0x53   :  { %p13537_p13 = scmp.ne.s32.totalorder %s76_s28, %s13536_s1  ;;  %p13542_p1 = scmp.lt.s32.totalorder %s13536_s1, %s13536_s1 }
  0x55   :  { %p13543_p2 = por %p13542_p1, %p13541_p0 }
  0x57   :  { %p13544_p3 = pnand %p13543_p2, %p13537_p13 }
  0x59   :  { %13547 = shalt.err (!%p13544_p3)
}
  0x5a   :  { %s13632_s0 = smov 384   ;;  %s13633_s30 = smov 24  }
  0x5b   :  { %81 = dma.hbm_to_vmem [thread:$0]  %s17085_s9, 6144, %s76_s28, [#allocation10], %s13632_s0, %s13632_s0, %s13633_s30  }
  0x5c   :  { %s13634_s12 = smov [#allocation14]   ;;  %s13635_s26 = smov [#allocation15]  }
  0x5d   :  { %s105_s25 = sshll.u32 %s13634_s12, 4  ;;  %s117_s29 = sshll.u32 %s13635_s26, 4  ;;  %s106_s25 = int_to_ptr.vmem [resolvable:$true] %s105_s25  ;;  %s13806_s29 = int_to_ptr.vmem [resolvable:$true] %s117_s29 }
  0x5e   :  { %s13548_s2 = scalar_lea.hbm %s17090_s14, 6144 }
  0x5f   :  { %p13549_p4 = scmp.ne.s32.totalorder %s17090_s14, %s13548_s2  ;;  %p13552_p5 = scmp.lt.u32.totalorder %s13548_s2, %s17090_s14 }
  0x61   :  { %p13554_p6 = pnand %p13552_p5, %p13549_p4 }
  0x63   :  { %13557 = shalt.err (!%p13554_p6)
}
  0x64   :  { %s13558_s9 = scalar_lea.vmem %s106_s25, 6144  ;;  %p13563_p8 = scmp.lt.s32.totalorder %s106_s25, %s106_s25 }
  0x65   :  { %p13559_p7 = scmp.ne.s32.totalorder %s106_s25, %s13558_s9  ;;  %p13564_p9 = scmp.lt.s32.totalorder %s13558_s9, %s13558_s9 }
  0x67   :  { %p13565_p10 = por %p13564_p9, %p13563_p8 }
  0x69   :  { %p13566_p11 = pnand %p13565_p10, %p13559_p7 }
  0x6b   :  { %13569 = shalt.err (!%p13566_p11)
}
  0x6c   :  { %111 = dma.hbm_to_vmem [thread:$0]  %s17090_s14, 6144, %s106_s25, [#allocation13], %s13632_s0, %s13632_s0, %s13633_s30  }
  0x6d   :  { %s13570_s24 = scalar_lea.hbm %s17091_s15, 6144 }
  0x6e   :  { %p13571_p12 = scmp.ne.s32.totalorder %s17091_s15, %s13570_s24  ;;  %p13574_p13 = scmp.lt.u32.totalorder %s13570_s24, %s17091_s15 }
  0x70   :  { %p13576_p0 = pnand %p13574_p13, %p13571_p12 }
  0x72   :  { %13579 = shalt.err (!%p13576_p0)
}
  0x73   :  { %s13580_s2 = scalar_lea.vmem %s13806_s29, 6144  ;;  %p13585_p2 = scmp.lt.s32.totalorder %s13806_s29, %s13806_s29 }
  0x74   :  { %p13581_p1 = scmp.ne.s32.totalorder %s13806_s29, %s13580_s2  ;;  %p13586_p3 = scmp.lt.s32.totalorder %s13580_s2, %s13580_s2 }
  0x76   :  { %p13587_p4 = por %p13586_p3, %p13585_p2 }
  0x78   :  { %p13588_p5 = pnand %p13587_p4, %p13581_p1 }
  0x7a   :  { %13591 = shalt.err (!%p13588_p5)
}
  0x7b   :  { %123 = dma.hbm_to_vmem [thread:$0]  %s17091_s15, 6144, %s13806_s29, [#allocation16], %s13632_s0, %s13632_s0, %s13633_s30  }
  0x7c   :  { %13614 = dma.done.wait [#allocation7], 2048  }
  0x7d   :  { %13615 = vsyncadd [#allocation7], 4294965248 }
  0x7e   :  { %13616 = dma.done.wait [#allocation10], 9216  }
  0x7f   :  { %13617 = vsyncadd [#allocation10], 4294958080 }
  0x80   :  { %13618 = dma.done.wait [#allocation13], 30720  }
  0x81   :  { %13619 = vsyncadd [#allocation13], 4294936576 }
  0x82   :  { %13620 = dma.done.wait [#allocation16], 6144  }
  0x83   :  { %13621 = vsyncadd [#allocation16], 4294961152  ;;  %v17107_v0 = vmov 0.0   ;;  %s17150_s23 = sld [smem:[#allocation36_spill]]  ;;  %v247_v3 = vld [vmem:[#allocation6 + $0x8] sm:$0xff]  ;;  %v249_v5 = vld [vmem:[#allocation6 + $0x18] sm:$0xff] }
  0x84   :  { %239 = vmatprep.mubr.f32.mxu0 %v17107_v0  ;;  %326 = vmatprep.mubr.f32.mxu1 %v17107_v0  ;;  %v11022_v8 = vpack.c.bf16 %v249_v5, %v247_v3  ;;  %v246_v10 = vld [vmem:[#allocation6] sm:$0xff]  ;;  %v248_v11 = vld [vmem:[#allocation6 + $0x10] sm:$0xff]  ;;  %v251_v15 = vld [vmem:[#allocation6 + $0x28] sm:$0xff]  ;;  %s17151_s0 = sld [smem:[#allocation34_spill]]  ;;  %vm171_vm0 = vcmask 523264   ;;  %s17152_s9 = sld [smem:[#allocation35_spill]] }
  0x85   :  { %v11024_v13 = vpack.c.bf16 %v248_v11, %v246_v10  ;;  %v253_v16 = vld [vmem:[#allocation6 + $0x38] sm:$0xff]  ;;  %v250_v21 = vld [vmem:[#allocation6 + $0x20] sm:$0xff]  ;;  %v252_v23 = vld [vmem:[#allocation6 + $0x30] sm:$0xff]  ;;  %vm423_vm1 = vcmask 261120   ;;  %vm13638_vm2 = vmmov 0   ;;  %s17209_s28 = sld [smem:[#allocation39_spill]] }
  0x86   :  { %11023 = vmatprep.subr.bf16.mxu1 %v11022_v8  ;;  %v11026_v18 = vpack.c.bf16 %v253_v16, %v251_v15  ;;  %v11028_v26 = vpack.c.bf16 %v252_v23, %v250_v21  ;;  %v255_v28 = vld [vmem:[#allocation6 + $0x48] sm:$0xff]  ;;  %v257_v29 = vld [vmem:[#allocation6 + $0x58] sm:$0xff]  ;;  %v254_v33 = vld [vmem:[#allocation6 + $0x40] sm:$0xff]  ;;  %s17216_s30 = sld [smem:[#allocation41_spill]]  ;;  %s13639_s29 = smov [#allocation17]   ;;  %vm9144_vm3 = vcmask 39936  }
  0x87   :  { %11025 = vmatpush1.bf16.msra.mxu1 %v11024_v13  ;;  %v11030_v31 = vpack.c.bf16 %v257_v29, %v255_v28  ;;  %v256_v34 = vld [vmem:[#allocation6 + $0x50] sm:$0xff]  ;;  %v259_v38 = vld [vmem:[#allocation6 + $0x68] sm:$0xff]  ;;  %v261_v41 = vld [vmem:[#allocation6 + $0x78] sm:$0xff] }
  0x88   :  { %11027 = vmatprep.subr.bf16.mxu1 %v11026_v18  ;;  %v11032_v39 = vpack.c.bf16 %v256_v34, %v254_v33  ;;  %v11034_v44 = vpack.c.bf16 %v261_v41, %v259_v38  ;;  %v258_v45 = vld [vmem:[#allocation6 + $0x60] sm:$0xff]  ;;  %v260_v46 = vld [vmem:[#allocation6 + $0x70] sm:$0xff]  ;;  %v680_v47 = vld [vmem:[%s17084_s8 + $0x8] sm:$0xff] }
  0x89   :  { %v156_v1 = vld [vmem:[%s17150_s23 + $0x8] sm:$0xff]  ;;  %v158_v2 = vld [vmem:[%s17150_s23 + $0x18] sm:$0xff]  ;;  %v155_v6 = vld [vmem:[%s17150_s23] sm:$0xff]  ;;  %v11036_v52 = vpack.c.bf16 %v260_v46, %v258_v45 }
  0x8a   :  { %v11006_v4 = vpack.c.bf16 %v158_v2, %v156_v1  ;;  %v157_v7 = vld [vmem:[%s17150_s23 + $0x10] sm:$0xff]  ;;  %v160_v12 = vld [vmem:[%s17150_s23 + $0x28] sm:$0xff]  ;;  %v162_v14 = vld [vmem:[%s17150_s23 + $0x38] sm:$0xff] }
  0x8b   :  { %v11008_v9 = vpack.c.bf16 %v157_v7, %v155_v6  ;;  %v11010_v17 = vpack.c.bf16 %v162_v14, %v160_v12  ;;  %v159_v19 = vld [vmem:[%s17150_s23 + $0x20] sm:$0xff]  ;;  %v161_v20 = vld [vmem:[%s17150_s23 + $0x30] sm:$0xff]  ;;  %v164_v24 = vld [vmem:[%s17150_s23 + $0x48] sm:$0xff]  ;;  %11029 = vmatpush1.bf16.msra.mxu1 %v11028_v26 }
  0x8c   :  { %11007 = vmatprep.subr.bf16.mxu0 %v11006_v4  ;;  %v11012_v22 = vpack.c.bf16 %v161_v20, %v159_v19  ;;  %v166_v25 = vld [vmem:[%s17150_s23 + $0x58] sm:$0xff]  ;;  %v163_v30 = vld [vmem:[%s17150_s23 + $0x40] sm:$0xff]  ;;  %v165_v32 = vld [vmem:[%s17150_s23 + $0x50] sm:$0xff]  ;;  %11031 = vmatprep.subr.bf16.mxu1 %v11030_v31 }
  0x8d   :  { %11009 = vmatpush1.bf16.msra.mxu0 %v11008_v9  ;;  %v11014_v27 = vpack.c.bf16 %v166_v25, %v164_v24  ;;  %v11016_v35 = vpack.c.bf16 %v165_v32, %v163_v30  ;;  %v168_v36 = vld [vmem:[%s17150_s23 + $0x68] sm:$0xff]  ;;  %v170_v37 = vld [vmem:[%s17150_s23 + $0x78] sm:$0xff]  ;;  %v167_v42 = vld [vmem:[%s17150_s23 + $0x60] sm:$0xff] }
  0x8e   :  { %11011 = vmatprep.subr.bf16.mxu0 %v11010_v17  ;;  %v11018_v40 = vpack.c.bf16 %v170_v37, %v168_v36  ;;  %v169_v43 = vld [vmem:[%s17150_s23 + $0x70] sm:$0xff]  ;;  %v683_v48 = vld [vmem:[%s17084_s8 + $0x20] sm:$0xff]  ;;  %v368_v50 = vld [vmem:[#allocation9 + $0x8] sm:$0xff] }
  0x8f   :  { %v11020_v49 = vpack.c.bf16 %v169_v43, %v167_v42  ;;  %v374_v51 = vld [vmem:[#allocation9 + $0x38] sm:$0xff]  ;;  %11033 = vmatpush1.bf16.msra.mxu1 %v11032_v39  ;;  %v367_v54 = vld [vmem:[#allocation9] sm:$0xff]  ;;  %v373_v55 = vld [vmem:[#allocation9 + $0x30] sm:$0xff]  ;;  %v13899_v56 = vpack.c.bf16 %v683_v48, %v680_v47 }
  0x90   :  { %v11038_v53 = vpack.c.bf16 %v374_v51, %v368_v50  ;;  %11035 = vmatprep.subr.bf16.mxu1 %v11034_v44  ;;  %v679_v57 = vld [vmem:[%s17084_s8] sm:$0xff]  ;;  %v682_v58 = vld [vmem:[%s17084_s8 + $0x18] sm:$0xff]  ;;  %v689_v60 = vld [vmem:[%s17084_s8 + $0x50] sm:$0xff]  ;;  %v11040_v1 = vpack.c.bf16 %v373_v55, %v367_v54 }
  0x91   :  { %11013 = vmatpush1.bf16.msra.mxu0 %v11012_v22  ;;  %v686_v59 = vld [vmem:[%s17084_s8 + $0x38] sm:$0xff]  ;;  %v386_v62 = vld [vmem:[#allocation9 + $0x98] sm:$0xff]  ;;  %v154_v63 = vld [vmem:[%s17151_s0] sm:$0xff]  ;;  %v13916_v2 = vpack.c.bf16 %v682_v58, %v679_v57  ;;  %s17208_s0 = sld [smem:[#allocation38_spill]] }
  0x92   :  { %11015 = vmatprep.subr.bf16.mxu0 %v11014_v27  ;;  %v380_v61 = vld [vmem:[#allocation9 + $0x68] sm:$0xff]  ;;  %v685_v3 = vld [vmem:[%s17084_s8 + $0x30] sm:$0xff]  ;;  %v385_v6 = vld [vmem:[#allocation9 + $0x90] sm:$0xff]  ;;  %v13922_v7 = vpack.c.bf16 %v689_v60, %v686_v59 }
  0x93   :  { %11037 = vmatpush1.bf16.msra.mxu1 %v11036_v52  ;;  %v11042_v4 = vpack.c.bf16 %v386_v62, %v380_v61  ;;  %v379_v5 = vld [vmem:[#allocation9 + $0x60] sm:$0xff]  ;;  %v688_v8 = vld [vmem:[%s17084_s8 + $0x48] sm:$0xff]  ;;  %v376_v10 = vld [vmem:[#allocation9 + $0x48] sm:$0xff] }
  0x94   :  { %11063 = vmatprep.subr.bf16.mxu1 %v13899_v56  ;;  %v370_v9 = vld [vmem:[#allocation9 + $0x18] sm:$0xff]  ;;  %v695_v12 = vld [vmem:[%s17084_s8 + $0x80] sm:$0xff]  ;;  %v11044_v13 = vpack.c.bf16 %v385_v6, %v379_v5  ;;  %v13936_v14 = vpack.c.bf16 %v688_v8, %v685_v3  ;;  %v375_v18 = vld [vmem:[#allocation9 + $0x40] sm:$0xff] }
  0x95   :  { %11017 = vmatpush1.bf16.msra.mxu0 %v11016_v35  ;;  %v692_v11 = vld [vmem:[%s17084_s8 + $0x68] sm:$0xff]  ;;  %v691_v15 = vld [vmem:[%s17084_s8 + $0x60] sm:$0xff]  ;;  %v11046_v16 = vpack.c.bf16 %v376_v10, %v370_v9  ;;  %v694_v20 = vld [vmem:[%s17084_s8 + $0x78] sm:$0xff] }
  0x96   :  { %11019 = vmatprep.subr.bf16.mxu0 %v11018_v40  ;;  %9165 = vmatmul.mubr.msk.f32.vlgmr.msra.gmra.mrb[0].mxu1 %vm171_vm0, %v154_v63  ;;  %v369_v17 = vld [vmem:[#allocation9 + $0x10] sm:$0xff]  ;;  %v13942_v19 = vpack.c.bf16 %v695_v12, %v692_v11  ;;  %v382_v21 = vld [vmem:[#allocation9 + $0x78] sm:$0xff]  ;;  %v388_v22 = vld [vmem:[#allocation9 + $0xa8] sm:$0xff]  ;;  %v13961_v27 = vpack.c.bf16 %v694_v20, %v691_v15  ;;  %v17117_v12 = vmov 0.0|0.0  }
  0x97   :  { %11065 = vmatpush1.bf16.msra.mxu1 %v13916_v2  ;;  %v698_v23 = vld [vmem:[%s17084_s8 + $0x98] sm:$0xff]  ;;  %v701_v24 = vld [vmem:[%s17084_s8 + $0xb0] sm:$0xff]  ;;  %808 = vmatprep.mubr.f32.mxu1 %v17107_v0  ;;  %v13958_v25 = vld [vmem:[%s17152_s9] sm:$0xff]  ;;  %v11048_v26 = vpack.c.bf16 %v375_v18, %v369_v17  ;;  %v11050_v29 = vpack.c.bf16 %v388_v22, %v382_v21 }
  0x98   :  { %11067 = vmatprep.subr.bf16.mxu1 %v13922_v7  ;;  %v697_v28 = vld [vmem:[%s17084_s8 + $0x90] sm:$0xff]  ;;  %v381_v30 = vld [vmem:[#allocation9 + $0x70] sm:$0xff]  ;;  %v13967_v32 = vpack.c.bf16 %v701_v24, %v698_v23  ;;  %v700_v33 = vld [vmem:[%s17084_s8 + $0xa8] sm:$0xff] }
  0x99   :  { %11021 = vmatpush1.bf16.msra.mxu0 %v11020_v49  ;;  %v387_v31 = vld [vmem:[#allocation9 + $0xa0] sm:$0xff]  ;;  %v372_v34 = vld [vmem:[#allocation9 + $0x28] sm:$0xff]  ;;  %v378_v35 = vld [vmem:[#allocation9 + $0x58] sm:$0xff]  ;;  %v13987_v40 = vpack.c.bf16 %v700_v33, %v697_v28 }
  0x9a   :  { %11039 = vmatprep.subr.bf16.mxu0 %v11038_v53  ;;  %v704_v36 = vld [vmem:[%s17084_s8 + $0xc8] sm:$0xff]  ;;  %v707_v37 = vld [vmem:[%s17084_s8 + $0xe0] sm:$0xff]  ;;  %v11052_v39 = vpack.c.bf16 %v387_v31, %v381_v30  ;;  %v11054_v42 = vpack.c.bf16 %v378_v35, %v372_v34  ;;  %v371_v43 = vld [vmem:[#allocation9 + $0x20] sm:$0xff] }
  0x9b   :  { %11069 = vmatpush1.bf16.msra.mxu1 %v13936_v14  ;;  %v13984_v38 = vld [vmem:[%s17152_s9 + $0x8] sm:$0xff]  ;;  %v703_v41 = vld [vmem:[%s17084_s8 + $0xc0] sm:$0xff]  ;;  %v13993_v45 = vpack.c.bf16 %v707_v37, %v704_v36  ;;  %v706_v46 = vld [vmem:[%s17084_s8 + $0xd8] sm:$0xff] }
  0x9c   :  { %9164 = vmatmul.mubr.msk.f32.vlgmr.msra.gmra.mrb[0].mxu0 %vm171_vm0, %v154_v63  ;;  %11071 = vmatprep.subr.bf16.mxu1 %v13942_v19  ;;  %v377_v44 = vld [vmem:[#allocation9 + $0x50] sm:$0xff]  ;;  %v384_v47 = vld [vmem:[#allocation9 + $0x88] sm:$0xff]  ;;  %v390_v48 = vld [vmem:[#allocation9 + $0xb8] sm:$0xff]  ;;  %v14008_v52 = vpack.c.bf16 %v706_v46, %v703_v41 }
  0x9d   :  { %11041 = vmatpush1.bf16.msra.mxu0 %v11040_v1  ;;  %494 = vmatprep.mubr.f32.mxu0 %v17107_v0  ;;  %v710_v49 = vld [vmem:[%s17084_s8 + $0xf8] sm:$0xff]  ;;  %v713_v50 = vld [vmem:[%s17084_s8 + $0x110] sm:$0xff]  ;;  %v11056_v51 = vpack.c.bf16 %v377_v44, %v371_v43  ;;  %v11058_v53 = vpack.c.bf16 %v390_v48, %v384_v47  ;;  %v389_v55 = vld [vmem:[#allocation9 + $0xb0] sm:$0xff] }
  0x9e   :  { %11043 = vmatprep.subr.bf16.mxu0 %v11042_v4  ;;  %v383_v54 = vld [vmem:[#allocation9 + $0x80] sm:$0xff]  ;;  %v14011_v57 = vpack.c.bf16 %v713_v50, %v710_v49  ;;  %v712_v59 = vld [vmem:[%s17084_s8 + $0x108] sm:$0xff]  ;;  %v719_v61 = vld [vmem:[%s17084_s8 + $0x140] sm:$0xff] }
  0x9f   :  { %11073 = vmatpush1.bf16.msra.mxu1 %v13961_v27  ;;  %v709_v58 = vld [vmem:[%s17084_s8 + $0xf0] sm:$0xff]  ;;  %v716_v60 = vld [vmem:[%s17084_s8 + $0x128] sm:$0xff]  ;;  %v11060_v62 = vpack.c.bf16 %v389_v55, %v383_v54  ;;  %v715_v5 = vld [vmem:[%s17084_s8 + $0x120] sm:$0xff] }
  0xa0   :  { %11075 = vmatprep.subr.bf16.mxu1 %v13967_v32  ;;  %v14029_v63 = vpack.c.bf16 %v712_v59, %v709_v58  ;;  %v681_v1 = vld [vmem:[%s17084_s8 + $0x10] sm:$0xff]  ;;  %v684_v3 = vld [vmem:[%s17084_s8 + $0x28] sm:$0xff]  ;;  %v14038_v4 = vpack.c.bf16 %v719_v61, %v716_v60  ;;  %v718_v6 = vld [vmem:[%s17084_s8 + $0x138] sm:$0xff] }
  0xa1   :  { %11045 = vmatpush1.bf16.msra.mxu0 %v11044_v13  ;;  %v722_v8 = vld [vmem:[%s17084_s8 + $0x158] sm:$0xff]  ;;  %v725_v9 = vld [vmem:[%s17084_s8 + $0x170] sm:$0xff]  ;;  %v14055_v10 = vpack.c.bf16 %v684_v3, %v681_v1  ;;  %v14058_v11 = vpack.c.bf16 %v718_v6, %v715_v5  ;;  %v687_v13 = vld [vmem:[%s17084_s8 + $0x40] sm:$0xff] }
  0xa2   :  { %11047 = vmatprep.subr.bf16.mxu0 %v11046_v16  ;;  %v690_v15 = vld [vmem:[%s17084_s8 + $0x58] sm:$0xff]  ;;  %v14068_v16 = vpack.c.bf16 %v725_v9, %v722_v8  ;;  %v721_v17 = vld [vmem:[%s17084_s8 + $0x150] sm:$0xff]  ;;  %v724_v18 = vld [vmem:[%s17084_s8 + $0x168] sm:$0xff] }
  0xa3   :  { %11077 = vmatpush1.bf16.msra.mxu1 %v13987_v40  ;;  %v886_v20 = vld [vmem:[#allocation11 + $0x8] sm:$0xff]  ;;  %v889_v21 = vld [vmem:[#allocation11 + $0x20] sm:$0xff]  ;;  %v14079_v22 = vpack.c.bf16 %v690_v15, %v687_v13  ;;  %v14083_v23 = vpack.c.bf16 %v724_v18, %v721_v17  ;;  %v892_v30 = vld [vmem:[#allocation11 + $0x38] sm:$0xff] }
  0xa4   :  { %9166 = vmatmul.mubr.msk.f32.vlgmr.msra.gmra.mrb[2].mxu0 %vm423_vm1, %v13958_v25  ;;  %11079 = vmatprep.subr.bf16.mxu1 %v13993_v45  ;;  %v693_v24 = vld [vmem:[%s17084_s8 + $0x70] sm:$0xff]  ;;  %v895_v31 = vld [vmem:[#allocation11 + $0x50] sm:$0xff]  ;;  %v702_v36 = vld [vmem:[%s17084_s8 + $0xb8] sm:$0xff] }
  0xa5   :  { %11049 = vmatpush1.bf16.msra.mxu0 %v11048_v26  ;;  %500 = vmatprep.mubr.f32.mxu0 %v17107_v0  ;;  %v14093_v26 = vpack.c.bf16 %v889_v21, %v886_v20  ;;  %v885_v28 = vld [vmem:[#allocation11] sm:$0xff]  ;;  %v699_v35 = vld [vmem:[%s17084_s8 + $0xa0] sm:$0xff]  ;;  %v14113_v37 = vpack.c.bf16 %v895_v31, %v892_v30  ;;  %v898_v41 = vld [vmem:[#allocation11 + $0x68] sm:$0xff] }
  0xa6   :  { %11051 = vmatprep.subr.bf16.mxu0 %v11050_v29  ;;  %v888_v29 = vld [vmem:[#allocation11 + $0x18] sm:$0xff]  ;;  %v14117_v43 = vpack.c.bf16 %v702_v36, %v699_v35  ;;  %v705_v46 = vld [vmem:[%s17084_s8 + $0xd0] sm:$0xff]  ;;  %v711_v58 = vld [vmem:[%s17084_s8 + $0x100] sm:$0xff] }
  0xa7   :  { %11081 = vmatpush1.bf16.msra.mxu1 %v14008_v52  ;;  %v14103_v34 = vpack.c.bf16 %v888_v29, %v885_v28  ;;  %v708_v47 = vld [vmem:[%s17084_s8 + $0xe8] sm:$0xff]  ;;  %v897_v49 = vld [vmem:[#allocation11 + $0x60] sm:$0xff]  ;;  %v714_v59 = vld [vmem:[%s17084_s8 + $0x118] sm:$0xff] }
  0xa8   :  { %9167 = vmatmul.mubr.msk.f32.gmra.mrb[4].mxu0 %vm423_vm1, %v13984_v38  ;;  %11083 = vmatprep.subr.bf16.mxu1 %v14011_v57  ;;  %v900_v50 = vld [vmem:[#allocation11 + $0x78] sm:$0xff]  ;;  %v14134_v54 = vpack.c.bf16 %v708_v47, %v705_v46  ;;  %v903_v61 = vld [vmem:[#allocation11 + $0x90] sm:$0xff]  ;;  %v910_v1 = vld [vmem:[#allocation11 + $0xc8] sm:$0xff]  ;;  %v14150_v5 = vpack.c.bf16 %v714_v59, %v711_v58 }
  0xa9   :  { %11053 = vmatpush1.bf16.msra.mxu0 %v11052_v39  ;;  %571 = vmatprep.mubr.f32.mxu0 %v17107_v0  ;;  %v894_v39 = vld [vmem:[#allocation11 + $0x48] sm:$0xff]  ;;  %v14137_v55 = vpack.c.bf16 %v900_v50, %v897_v49  ;;  %v913_v3 = vld [vmem:[#allocation11 + $0xe0] sm:$0xff]  ;;  %v720_v9 = vld [vmem:[%s17084_s8 + $0x148] sm:$0xff] }
  0xaa   :  { %11055 = vmatprep.subr.bf16.mxu0 %v11054_v42  ;;  %v901_v42 = vld [vmem:[#allocation11 + $0x80] sm:$0xff]  ;;  %v14163_v13 = vpack.c.bf16 %v913_v3, %v910_v1  ;;  %v912_v17 = vld [vmem:[#allocation11 + $0xd8] sm:$0xff]  ;;  %v919_v20 = vld [vmem:[#allocation11 + $0x110] sm:$0xff] }
  0xab   :  { %11085 = vmatpush1.bf16.msra.mxu1 %v14029_v63  ;;  %v14130_v48 = vpack.c.bf16 %v901_v42, %v898_v41  ;;  %v717_v8 = vld [vmem:[%s17084_s8 + $0x130] sm:$0xff]  ;;  %v916_v18 = vld [vmem:[#allocation11 + $0xf8] sm:$0xff]  ;;  %v726_v28 = vld [vmem:[%s17084_s8 + $0x178] sm:$0xff] }
  0xac   :  { %9168 = vmatmul.mubr.msk.f32.vlgmr.msra.gmra.mrb[6].mxu0 %vm423_vm1, %v13958_v25  ;;  %11087 = vmatprep.subr.bf16.mxu1 %v14038_v4  ;;  %v909_v15 = vld [vmem:[#allocation11 + $0xc0] sm:$0xff]  ;;  %v14166_v21 = vpack.c.bf16 %v720_v9, %v717_v8  ;;  %v14179_v29 = vpack.c.bf16 %v919_v20, %v916_v18  ;;  %v915_v30 = vld [vmem:[#allocation11 + $0xf0] sm:$0xff]  ;;  %v918_v31 = vld [vmem:[#allocation11 + $0x108] sm:$0xff] }
  0xad   :  { %11057 = vmatpush1.bf16.msra.mxu0 %v11056_v51  ;;  %577 = vmatprep.mubr.f32.mxu0 %v17107_v0  ;;  %v904_v51 = vld [vmem:[#allocation11 + $0x98] sm:$0xff]  ;;  %v922_v35 = vld [vmem:[#allocation11 + $0x128] sm:$0xff]  ;;  %v925_v36 = vld [vmem:[#allocation11 + $0x140] sm:$0xff] }
  0xae   :  { %11059 = vmatprep.subr.bf16.mxu0 %v11058_v53  ;;  %v907_v53 = vld [vmem:[#allocation11 + $0xb0] sm:$0xff]  ;;  %v890_v42 = vld [vmem:[#allocation11 + $0x28] sm:$0xff]  ;;  %v14189_v46 = vpack.c.bf16 %v925_v36, %v922_v35  ;;  %v921_v47 = vld [vmem:[#allocation11 + $0x120] sm:$0xff] }
  0xaf   :  { %11089 = vmatpush1.bf16.msra.mxu1 %v14058_v11  ;;  %v14147_v60 = vpack.c.bf16 %v907_v53, %v904_v51  ;;  %v887_v41 = vld [vmem:[#allocation11 + $0x10] sm:$0xff]  ;;  %v924_v49 = vld [vmem:[#allocation11 + $0x138] sm:$0xff]  ;;  %v893_v59 = vld [vmem:[#allocation11 + $0x40] sm:$0xff] }
  0xb0   :  { %9169 = vmatmul.mubr.msk.f32.gmra.mrb[8].mxu0 %vm423_vm1, %v13984_v38  ;;  %11091 = vmatprep.subr.bf16.mxu1 %v14068_v16  ;;  %v928_v50 = vld [vmem:[#allocation11 + $0x158] sm:$0xff]  ;;  %v931_v51 = vld [vmem:[#allocation11 + $0x170] sm:$0xff]  ;;  %v14192_v53 = vpack.c.bf16 %v890_v42, %v887_v41  ;;  %v14195_v58 = vpack.c.bf16 %v924_v49, %v921_v47  ;;  %v930_v3 = vld [vmem:[#allocation11 + $0x168] sm:$0xff] }
  0xb1   :  { %11061 = vmatpush1.bf16.msra.mxu0 %v11060_v62  ;;  %648 = vmatprep.mubr.f32.mxu0 %v17107_v0  ;;  %v906_v62 = vld [vmem:[#allocation11 + $0xa8] sm:$0xff]  ;;  %v927_v1 = vld [vmem:[#allocation11 + $0x150] sm:$0xff]  ;;  %v905_v20 = vld [vmem:[#allocation11 + $0xa0] sm:$0xff] }
  0xb2   :  { %11094 = vmatprep.subr.bf16.mxu0 %v17117_v12  ;;  %v14153_v6 = vpack.c.bf16 %v906_v62, %v903_v61  ;;  %v896_v61 = vld [vmem:[#allocation11 + $0x58] sm:$0xff]  ;;  %v14199_v62 = vpack.c.bf16 %v931_v51, %v928_v50  ;;  %v14208_v9 = vpack.c.bf16 %v930_v3, %v927_v1 }
  0xb3   :  { %11093 = vmatpush1.bf16.msra.mxu1 %v14083_v23  ;;  %v14203_v8 = vpack.c.bf16 %v896_v61, %v893_v59  ;;  %v920_v36 = vld [vmem:[#allocation11 + $0x118] sm:$0xff] }
  0xb4   :  { %9170 = vmatmul.mubr.msk.f32.vlgmr.msra.gmra.mrb[10].mxu0 %vm423_vm1, %v13958_v25  ;;  %v696_v25 = vld [vmem:[%s17084_s8 + $0x88] sm:$0xff]  ;;  %11119 = vmatprep.subr.bf16.mxu1 %v14093_v26 }
  0xb5   :  { %11096 = vmatpush3.bf16.msra.mxu0 %v14055_v10  ;;  %654 = vmatprep.mubr.f32.mxu0 %v17107_v0  ;;  %v14098_v33 = vpack.c.bf16 %v696_v25, %v693_v24  ;;  %v14169_v24 = vpack.c.bf16 %v912_v17, %v909_v15  ;;  %v723_v25 = vld [vmem:[%s17084_s8 + $0x160] sm:$0xff]  ;;  %v902_v17 = vld [vmem:[#allocation11 + $0x88] sm:$0xff] }
  0xb6   :  { %11097 = vmatprep.subr.bf16.mxu0 %v17117_v12  ;;  %809 = vmatmul.mubr.f32.vlgmr.msra.gmra.mrb[2].mxu1 %v17107_v0  ;;  %v899_v15 = vld [vmem:[#allocation11 + $0x70] sm:$0xff] }
  0xb7   :  { %11121 = vmatpush1.bf16.msra.mxu1 %v14103_v34  ;;  %1014 = vmatprep.mubr.f32.mxu1 %v17107_v0  ;;  %v14213_v18 = vpack.c.bf16 %v902_v17, %v899_v15 }
  0xb8   :  { %9171 = vmatmul.mubr.msk.f32.gmra.mrb[12].mxu0 %vm423_vm1, %v13984_v38  ;;  %v891_v38 = vld [vmem:[#allocation11 + $0x30] sm:$0xff]  ;;  %11123 = vmatprep.subr.bf16.mxu1 %v14113_v37 }
  0xb9   :  { %11099 = vmatpush3.bf16.msra.mxu0 %v14079_v22  ;;  %9848 = vmatprep.mubr.msk.f32.mxu0 %vm13638_vm2, %v17107_v0  ;;  %v14120_v44 = vpack.c.bf16 %v894_v39, %v891_v38  ;;  %v14182_v38 = vpack.c.bf16 %v726_v28, %v723_v25  ;;  %v14185_v39 = vpack.c.bf16 %v918_v31, %v915_v30  ;;  %v908_v25 = vld [vmem:[#allocation11 + $0xb8] sm:$0xff]  ;;  %v911_v30 = vld [vmem:[#allocation11 + $0xd0] sm:$0xff]  ;;  %v914_v31 = vld [vmem:[#allocation11 + $0xe8] sm:$0xff] }
  0xba   :  { %11100 = vmatprep.subr.bf16.mxu0 %v17117_v12  ;;  %v14220_v28 = vpack.c.bf16 %v908_v25, %v905_v20  ;;  %v14227_v35 = vpack.c.bf16 %v914_v31, %v911_v30 }
  0xbb   :  { %11125 = vmatpush1.bf16.msra.mxu1 %v14120_v44 }
  0xbc   :  { %11127 = vmatprep.subr.bf16.mxu1 %v14130_v48 }
  0xbd   :  { %11102 = vmatpush3.bf16.msra.mxu0 %v14098_v33 }
  0xbe   :  { %11103 = vmatprep.subr.bf16.mxu0 %v17117_v12 }
  0xbf   :  { %11129 = vmatpush1.bf16.msra.mxu1 %v14137_v55 }
  0xc0   :  { %11131 = vmatprep.subr.bf16.mxu1 %v14147_v60 }
  0xc1   :  { %11105 = vmatpush3.bf16.msra.mxu0 %v14117_v43 }
  0xc2   :  { %11106 = vmatprep.subr.bf16.mxu0 %v17117_v12 }
  0xc3   :  { %11133 = vmatpush1.bf16.msra.mxu1 %v14153_v6 }
  0xc4   :  { %11135 = vmatprep.subr.bf16.mxu1 %v14163_v13 }
  0xc5   :  { %11108 = vmatpush3.bf16.msra.mxu0 %v14134_v54 }
  0xc6   :  { %11109 = vmatprep.subr.bf16.mxu0 %v17117_v12 }
  0xc7   :  { %11137 = vmatpush1.bf16.msra.mxu1 %v14169_v24 }
  0xc8   :  { %11139 = vmatprep.subr.bf16.mxu1 %v14179_v29 }
  0xc9   :  { %11111 = vmatpush3.bf16.msra.mxu0 %v14150_v5 }
  0xca   :  { %11112 = vmatprep.subr.bf16.mxu0 %v17117_v12 }
  0xcb   :  { %11141 = vmatpush1.bf16.msra.mxu1 %v14185_v39 }
  0xcc   :  { %11143 = vmatprep.subr.bf16.mxu1 %v14189_v46 }
  0xcd   :  { %11114 = vmatpush3.bf16.msra.mxu0 %v14166_v21 }
  0xce   :  { %11115 = vmatprep.subr.bf16.mxu0 %v17117_v12 }
  0xcf   :  { %11145 = vmatpush1.bf16.msra.mxu1 %v14195_v58 }
  0xd0   :  { %11147 = vmatprep.subr.bf16.mxu1 %v14199_v62 }
  0xd1   :  { %11117 = vmatpush3.bf16.msra.mxu0 %v14182_v38 }
  0xd2   :  { %11150 = vmatprep.subr.bf16.mxu0 %v17117_v12 }
  0xd3   :  { %11149 = vmatpush1.bf16.msra.mxu1 %v14208_v9 }
  0xd4   :  { %9849 = vmatmul.mubr.f32.vlgmr.msra.gmra.mrb[14].mxu0 %v17107_v0  ;;  %11175 = vmatprep.subr.bf16.mxu1 %v13899_v56  ;;  %v917_v56 = vld [vmem:[#allocation11 + $0x100] sm:$0xff] }
  0xd5   :  { %11152 = vmatpush3.bf16.msra.mxu0 %v14192_v53  ;;  %9883 = vmatprep.mubr.msk.f32.mxu0 %vm13638_vm2, %v17107_v0  ;;  %v14233_v41 = vpack.c.bf16 %v920_v36, %v917_v56 }
  0xd6   :  { %11153 = vmatprep.subr.bf16.mxu0 %v17117_v12  ;;  %1015 = vmatmul.mubr.f32.vlgmr.msra.gmra.mrb[4].mxu1 %v17107_v0 }
  0xd7   :  { %11177 = vmatpush1.bf16.msra.mxu1 %v13916_v2  ;;  %1279 = vmatprep.mubr.f32.mxu1 %v17107_v0  ;;  %v923_v2 = vld [vmem:[#allocation11 + $0x130] sm:$0xff] }
  0xd8   :  { %11179 = vmatprep.subr.bf16.mxu1 %v13922_v7  ;;  %v926_v7 = vld [vmem:[#allocation11 + $0x148] sm:$0xff] }
  0xd9   :  { %11155 = vmatpush3.bf16.msra.mxu0 %v14203_v8  ;;  %v14239_v42 = vpack.c.bf16 %v926_v7, %v923_v2 }
  0xda   :  { %11156 = vmatprep.subr.bf16.mxu0 %v17117_v12 }
  0xdb   :  { %11181 = vmatpush1.bf16.msra.mxu1 %v13936_v14  ;;  %v929_v14 = vld [vmem:[#allocation11 + $0x160] sm:$0xff] }
  0xdc   :  { %11183 = vmatprep.subr.bf16.mxu1 %v13942_v19  ;;  %v932_v19 = vld [vmem:[#allocation11 + $0x178] sm:$0xff] }
  0xdd   :  { %11158 = vmatpush3.bf16.msra.mxu0 %v14213_v18  ;;  %v14245_v47 = vpack.c.bf16 %v932_v19, %v929_v14 }
  0xde   :  { %11159 = vmatprep.subr.bf16.mxu0 %v17117_v12 }
  0xdf   :  { %11185 = vmatpush1.bf16.msra.mxu1 %v13961_v27  ;;  %v337_v27 = vlaneseq }
  0xe0   :  { %11187 = vmatprep.subr.bf16.mxu1 %v13967_v32 }
  0xe1   :  { %11161 = vmatpush3.bf16.msra.mxu0 %v14220_v28  ;;  %v14277_v32 = vshrl.u32 %v337_v27, 7 }
  0xe2   :  { %11162 = vmatprep.subr.bf16.mxu0 %v17117_v12 }
  0xe3   :  { %11189 = vmatpush1.bf16.msra.mxu1 %v13987_v40  ;;  %17153 = vst [vmem:[#allocation23_spill] sm:$0xff] %v14277_v32  ;;  %v17105_v17 = vsub.s32 4, %v14277_v32  ;;  %v17104_v25 = vsub.s32 5, %v14277_v32 }
  0xe4   :  { %11191 = vmatprep.subr.bf16.mxu1 %v13993_v45 }
  0xe5   :  { %11164 = vmatpush3.bf16.msra.mxu0 %v14227_v35 }
  0xe6   :  { %11165 = vmatprep.subr.bf16.mxu0 %v17117_v12 }
  0xe7   :  { %11193 = vmatpush1.bf16.msra.mxu1 %v14008_v52 }
  0xe8   :  { %11195 = vmatprep.subr.bf16.mxu1 %v14011_v57 }
  0xe9   :  { %11167 = vmatpush3.bf16.msra.mxu0 %v14233_v41 }
  0xea   :  { %11168 = vmatprep.subr.bf16.mxu0 %v17117_v12 }
  0xeb   :  { %11197 = vmatpush1.bf16.msra.mxu1 %v14029_v63 }
  0xec   :  { %11199 = vmatprep.subr.bf16.mxu1 %v14038_v4  ;;  %v391_v4 = vld [vmem:[%s17083_s7] sm:$0x3f] }
  0xed   :  { %11170 = vmatpush3.bf16.msra.mxu0 %v14239_v42  ;;  %v412_v36 = vrot.slane %v391_v4, %v17105_v17  ;;  %v416_v7 = vrot.slane %v391_v4, %v17104_v25  ;;  %v1876_v25 = vld [vmem:[#allocation11 + $0xe8] sm:$0xff]  ;;  %v1878_v17 = vld [vmem:[#allocation11 + $0xf8] sm:$0xff] }
  0xee   :  { %11171 = vmatprep.subr.bf16.mxu0 %v17117_v12 }
  0xef   :  { %11201 = vmatpush1.bf16.msra.mxu1 %v14058_v11  ;;  %v1850_v11 = vld [vmem:[#allocation11 + $0x18] sm:$0xff] }
  0xf0   :  { %11203 = vmatprep.subr.bf16.mxu1 %v14068_v16  ;;  %v14298_v16 = vsub.s32 1, %v14277_v32 }
  0xf1   :  { %11173 = vmatpush3.bf16.msra.mxu0 %v14245_v47 }
  0xf2   :  { %11206 = vmatprep.subr.bf16.mxu0 %v17117_v12 }
  0xf3   :  { %11205 = vmatpush1.bf16.msra.mxu1 %v14083_v23  ;;  %v400_v23 = vrot.slane %v391_v4, %v14298_v16 }
  0xf4   :  { %9884 = vmatmul.mubr.f32.vlgmr.msra.gmra.mrb[16].mxu0 %v17107_v0  ;;  %11231 = vmatprep.subr.bf16.mxu1 %v14093_v26 }
  0xf5   :  { %11208 = vmatpush3.bf16.msra.mxu0 %v14055_v10  ;;  %9918 = vmatprep.mubr.msk.f32.mxu0 %vm13638_vm2, %v17107_v0  ;;  %v14293_v10 = vsub.s32 0, %v14277_v32 }
  0xf6   :  { %11209 = vmatprep.subr.bf16.mxu0 %v17117_v12 }
  0xf9   :  { %11211 = vmatpush3.bf16.msra.mxu0 %v14079_v22  ;;  %v396_v22 = vrot.slane %v391_v4, %v14293_v10 }
  0xfa   :  { %11212 = vmatprep.subr.bf16.mxu0 %v17117_v12 }
  0xfd   :  { %11214 = vmatpush3.bf16.msra.mxu0 %v14098_v33 }
  0xfe   :  { %11215 = vmatprep.subr.bf16.mxu0 %v17117_v12 }
 0x101   :  { %11217 = vmatpush3.bf16.msra.mxu0 %v14117_v43 }
 0x102   :  { %11218 = vmatprep.subr.bf16.mxu0 %v17117_v12 }
 0x105   :  { %11220 = vmatpush3.bf16.msra.mxu0 %v14134_v54  ;;  %v14303_v54 = vsub.s32 2, %v14277_v32 }
 0x106   :  { %11221 = vmatprep.subr.bf16.mxu0 %v17117_v12 }
 0x107   :  { %v404_v51 = vrot.slane %v391_v4, %v14303_v54 }
 0x109   :  { %11223 = vmatpush3.bf16.msra.mxu0 %v14150_v5 }
 0x10a   :  { %11224 = vmatprep.subr.bf16.mxu0 %v17117_v12 }
 0x10d   :  { %11226 = vmatpush3.bf16.msra.mxu0 %v14166_v21  ;;  %v17106_v21 = vsub.s32 3, %v14277_v32  ;;  %v1888_v32 = vld [vmem:[#allocation11 + $0x148] sm:$0xff] }
 0x10e   :  { %11227 = vmatprep.subr.bf16.mxu0 %v17117_v12 }
 0x10f   :  { %v408_v61 = vrot.slane %v391_v4, %v17106_v21  ;;  %v1879_v21 = vld [vmem:[#allocation11 + $0x100] sm:$0xff] }
 0x111   :  { %11229 = vmatpush3.bf16.msra.mxu0 %v14182_v38 }
 0x112   :  { %11262 = vmatprep.subr.bf16.mxu0 %v17117_v12 }
 0x169   :  { %v14281_v45 = vpop.f32.mrb[0].mxu1 }
 0x16a   :  { %17155 = vst [vmem:[#allocation25_spill] sm:$0xff] %v14281_v45  ;;  %v14287_v63 = vpop.f32.mrb[1].mxu1 }
 0x16b   :  { %17157 = vst [vmem:[#allocation27_spill] sm:$0xff] %v14287_v63  ;;  %v1884_v63 = vld [vmem:[#allocation11 + $0x128] sm:$0xff] }
 0x16f   :  { %v14279_v40 = vpop.f32.mrb[0].mxu0 }
 0x170   :  { %17154 = vst [vmem:[#allocation24_spill] sm:$0xff] %v14279_v40  ;;  %v14283_v52 = vpop.f32.mrb[1].mxu0 }
 0x171   :  { %17156 = vst [vmem:[#allocation26_spill] sm:$0xff] %v14283_v52 }
 0x177   :  { %v496_v26 = vpop.f32.mrb[2].mxu0 }
 0x178   :  { %v497_v33 = vadd.f32 %v496_v26, %v396_v22  ;;  %v498_v43 = vpop.f32.mrb[3].mxu0 }
 0x179   :  { %v499_v5 = vadd.f32 %v498_v43, %v400_v23 }
 0x17a   :  { %661 = vst [vmem:[#allocation2] sm:$0xff] %v497_v33 }
 0x17b   :  { %662 = vst [vmem:[#allocation2 + $0x8] sm:$0xff] %v499_v5  ;;  %v502_v38 = vpop.f32.mrb[4].mxu0 }
 0x17c   :  { %v503_v49 = vadd.f32 %v502_v38, %v396_v22  ;;  %v504_v50 = vpop.f32.mrb[5].mxu0 }
 0x17d   :  { %v505_v59 = vadd.f32 %v504_v50, %v400_v23  ;;  %v727_v23 = vld [vmem:[%s17086_s10] sm:$0x7] }
 0x17e   :  { %667 = vst [vmem:[#allocation2 + $0x30] sm:$0xff] %v503_v49  ;;  %v732_v5 = vrot.slane %v727_v23, %v14293_v10  ;;  %v736_v4 = vrot.slane %v727_v23, %v14298_v16 }
 0x17f   :  { %668 = vst [vmem:[#allocation2 + $0x38] sm:$0xff] %v505_v59  ;;  %v573_v1 = vpop.f32.mrb[6].mxu0 }
 0x180   :  { %v574_v3 = vadd.f32 %v573_v1, %v404_v51  ;;  %v575_v15 = vpop.f32.mrb[7].mxu0 }
 0x181   :  { %v576_v20 = vadd.f32 %v575_v15, %v408_v61  ;;  %v673_v59 = vld [vmem:[#allocation2] sm:$0x3] }
 0x182   :  { %663 = vst [vmem:[#allocation2 + $0x10] sm:$0xff] %v574_v3  ;;  %v674_v15 = vld [vmem:[#allocation2 + $0x8] sm:$0x3] }
 0x183   :  { %664 = vst [vmem:[#allocation2 + $0x18] sm:$0xff] %v576_v20  ;;  %v579_v30 = vpop.f32.mrb[8].mxu0 }
 0x184   :  { %v580_v31 = vadd.f32 %v579_v30, %v404_v51  ;;  %v581_v56 = vpop.f32.mrb[9].mxu0 }
 0x185   :  { %v582_v2 = vadd.f32 %v581_v56, %v408_v61 }
 0x186   :  { %669 = vst [vmem:[#allocation2 + $0x40] sm:$0xff] %v580_v31 }
 0x187   :  { %670 = vst [vmem:[#allocation2 + $0x48] sm:$0xff] %v582_v2  ;;  %v650_v14 = vpop.f32.mrb[10].mxu0 }
 0x188   :  { %v651_v19 = vadd.f32 %v650_v14, %v412_v36  ;;  %v652_v27 = vpop.f32.mrb[11].mxu0 }
 0x189   :  { %v653_v22 = vadd.f32 %v652_v27, %v416_v7  ;;  %v810_v49 = vpop.f32.mrb[2].mxu1 }
 0x18a   :  { %665 = vst [vmem:[#allocation2 + $0x20] sm:$0xff] %v651_v19  ;;  %v811_v50 = vadd.f32 %v810_v49, %v732_v5  ;;  %v812_v51 = vpop.f32.mrb[3].mxu1  ;;  %v933_v19 = vld [vmem:[%s17087_s11] sm:$0x7] }
 0x18b   :  { %666 = vst [vmem:[#allocation2 + $0x28] sm:$0xff] %v653_v22  ;;  %v656_v26 = vpop.f32.mrb[12].mxu0  ;;  %v813_v61 = vadd.f32 %v812_v51, %v736_v4 }
 0x18c   :  { %v657_v33 = vadd.f32 %v656_v26, %v412_v36  ;;  %v658_v43 = vpop.f32.mrb[13].mxu0  ;;  %v1091_v1 = vadd.f32 %v811_v50, %v673_v59  ;;  %v740_v36 = vrot.slane %v727_v23, %v14303_v54  ;;  %v938_v26 = vrot.slane %v933_v19, %v14293_v10 }
 0x18d   :  { %v659_v38 = vadd.f32 %v658_v43, %v416_v7  ;;  %v1098_v20 = vadd.f32 %v813_v61, %v674_v15  ;;  %v942_v43 = vrot.slane %v933_v19, %v14298_v16 }
 0x18e   :  { %671 = vst [vmem:[#allocation2 + $0x50] sm:$0xff] %v657_v33  ;;  %v9172_v3 = vmul.f32 -1.442695, %v1091_v1  ;;  %v676_v61 = vld [vmem:[#allocation2 + $0x48] sm:$0xc0] }
 0x18f   :  { %672 = vst [vmem:[#allocation2 + $0x58] sm:$0xff] %v659_v38  ;;  %v9173_v30 = vmul.f32 -1.442695, %v1098_v20  ;;  %v675_v38 = vld [vmem:[#allocation2 + $0x10] sm:$0x3] }
 0x190   :  { %13140 = vpow2.f32 %v9172_v3 }
 0x191   :  { %13142 = vpow2.f32 %v9173_v30 }
 0x195   :  { %v677_v20 = vld [vmem:[#allocation2 + $0x50] sm:$0xc0] }
 0x19a   :  { %v13141_v31 = vpop.eup %13140 }
 0x19b   :  { %v1095_v56 = vadd.f32 1.0, %v13141_v31  ;;  %v13143_v7 = vpop.eup %13142 }
 0x19c   :  { %v1102_v27 = vadd.f32 1.0, %v13143_v7 }
 0x19d   :  { %13144 = vrcp.f32 %v1095_v56 }
 0x19e   :  { %13146 = vrcp.f32 %v1102_v27 }
 0x1a7   :  { %v881_v2 = vpop.f32.mrb[14].mxu0  ;;  %v13145_v33 = vpop.eup %13144 }
 0x1a8   :  { %v9850_v14 = vpop.f32.mrb[15].mxu0  ;;  %v882_v22 = vadd.f32 %v881_v2, %v740_v36  ;;  %v13147_v31 = vpop.eup %13146 }
 0x1a9   :  { %v1016_v4 = vpop.f32.mrb[4].mxu1  ;;  %v1108_v36 = vsub.f32 1.0, %v13147_v31  ;;  %v1110_v14 = vmul.f32 0.0, %v13147_v31  ;;  %v1653_v31 = vld [vmem:[%s17084_s8 + $0x78] sm:$0xff] }
 0x1aa   :  { %v1105_v5 = vmul.f32 %v13145_v33, %v882_v22  ;;  %v1017_v23 = vadd.f32 %v1016_v4, %v938_v26  ;;  %v1018_v50 = vpop.f32.mrb[5].mxu1  ;;  %v946_v33 = vrot.slane %v933_v19, %v14303_v54  ;;  %v1648_v4 = vld [vmem:[%s17084_s8 + $0x50] sm:$0xff] }
 0x1ab   :  { %v1019_v51 = vadd.f32 %v1018_v50, %v942_v43  ;;  %v1647_v50 = vld [vmem:[%s17084_s8 + $0x48] sm:$0xff] }
 0x1ac   :  { %v1106_v49 = vadd.f32 %v1105_v5, %v675_v38  ;;  %v1113_v59 = vrot.slane %v1017_v23, 2  ;;  %v1645_v38 = vld [vmem:[%s17084_s8 + $0x38] sm:$0xff]  ;;  %v1644_v23 = vld [vmem:[%s17084_s8 + $0x30] sm:$0xff] }
 0x1ad   :  { %v1123_v1 = vrot.slane %v1019_v51, 2  ;;  %v1646_v51 = vld [vmem:[%s17084_s8 + $0x40] sm:$0xff] }
 0x1ae   :  { %13148 = vtanh.f32 %v1106_v49  ;;  %v1115_v3 = vadd.f32 %v1113_v59, %v676_v61  ;;  %v14406_v49 = vpack.c.bf16 %v1648_v4, %v1645_v38  ;;  %v14418_v59 = vpack.c.bf16 %v1647_v50, %v1644_v23  ;;  %v1649_v61 = vld [vmem:[%s17084_s8 + $0x58] sm:$0xff]  ;;  %v1675_v4 = vld [vmem:[%s17084_s8 + $0x128] sm:$0xff]  ;;  %v1678_v23 = vld [vmem:[%s17084_s8 + $0x140] sm:$0xff] }
 0x1af   :  { %v1125_v30 = vadd.f32 %v1123_v1, %v677_v20  ;;  %v14424_v1 = vpack.c.bf16 %v1649_v61, %v1646_v51  ;;  %v14546_v50 = vpack.c.bf16 %v1678_v23, %v1675_v4  ;;  %v1674_v51 = vld [vmem:[%s17084_s8 + $0x120] sm:$0xff]  ;;  %v1677_v61 = vld [vmem:[%s17084_s8 + $0x138] sm:$0xff] }
 0x1b0   :  { %v9174_v15 = vmul.f32 -1.442695, %v1115_v3  ;;  %v1651_v3 = vld [vmem:[%s17084_s8 + $0x68] sm:$0xff] }
 0x1b1   :  { %v9175_v56 = vmul.f32 -1.442695, %v1125_v30  ;;  %v1650_v30 = vld [vmem:[%s17084_s8 + $0x60] sm:$0xff] }
 0x1b2   :  { %13150 = vpow2.f32 %v9174_v15  ;;  %v1654_v15 = vld [vmem:[%s17084_s8 + $0x80] sm:$0xff] }
 0x1b3   :  { %13152 = vpow2.f32 %v9175_v56  ;;  %v14434_v20 = vpack.c.bf16 %v1654_v15, %v1651_v3  ;;  %v1652_v56 = vld [vmem:[%s17084_s8 + $0x70] sm:$0xff]  ;;  %v14558_v15 = vpack.c.bf16 %v1677_v61, %v1674_v51  ;;  %v1144_v51 = vld [vmem:[#allocation2] sm:$0xc] }
 0x1b4   :  { %v1676_v3 = vld [vmem:[%s17084_s8 + $0x130] sm:$0xff] }
 0x1b8   :  { %v13149_v2 = vpop.eup %13148 }
 0x1b9   :  { %v1109_v7 = vmul.f32 %v13149_v2, %v1108_v36  ;;  %v14446_v36 = vpack.c.bf16 %v1653_v31, %v1650_v30  ;;  %v1655_v2 = vld [vmem:[%s17084_s8 + $0x88] sm:$0xff] }
 0x1ba   :  { %v1679_v30 = vld [vmem:[%s17084_s8 + $0x148] sm:$0xff] }
 0x1bb   :  { %v14326_v27 = vadd.f32 %v1110_v14, %v1109_v7  ;;  %v14452_v7 = vpack.c.bf16 %v1655_v2, %v1652_v56  ;;  %v1657_v14 = vld [vmem:[%s17084_s8 + $0x98] sm:$0xff]  ;;  %v14564_v31 = vpack.c.bf16 %v1679_v30, %v1676_v3  ;;  %v1684_v2 = vld [vmem:[%s17084_s8 + $0x170] sm:$0xff]  ;;  %v1145_v30 = vld [vmem:[#allocation2 + $0x8] sm:$0xc] }
 0x1bc   :  { %v13151_v22 = vpop.eup %13150  ;;  %v1681_v56 = vld [vmem:[%s17084_s8 + $0x158] sm:$0xff] }
 0x1bd   :  { %1142 = vst [vmem:[#allocation3] sm:$0x3] %v14326_v27  ;;  %1280 = vmatmul.mubr.f32.vlgmr.msra.gmra.mrb[6].mxu1 %v14326_v27  ;;  %9919 = vmatmul.mubr.f32.vlgmr.msra.gmra.mrb[18].mxu0 %v14326_v27  ;;  %v1119_v26 = vadd.f32 1.0, %v13151_v22  ;;  %v1660_v22 = vld [vmem:[%s17084_s8 + $0xb0] sm:$0xff] }
 0x1be   :  { %11233 = vmatpush1.bf16.msra.mxu1 %v14103_v34  ;;  %11264 = vmatpush3.bf16.msra.mxu0 %v14192_v53  ;;  %v13153_v53 = vpop.eup %13152 }
 0x1bf   :  { %11235 = vmatprep.subr.bf16.mxu1 %v14113_v37  ;;  %11265 = vmatprep.subr.bf16.mxu0 %v17117_v12  ;;  %13154 = vrcp.f32 %v1119_v26  ;;  %v1129_v19 = vadd.f32 1.0, %v13153_v53  ;;  %v14462_v26 = vpack.c.bf16 %v1660_v22, %v1657_v14  ;;  %v1661_v53 = vld [vmem:[%s17084_s8 + $0xb8] sm:$0xff]  ;;  %v14574_v14 = vpack.c.bf16 %v1684_v2, %v1681_v56  ;;  %v1680_v22 = vld [vmem:[%s17084_s8 + $0x150] sm:$0xff] }
 0x1c0   :  { %1488 = vmatprep.mubr.f32.mxu1 %v17107_v0  ;;  %9953 = vmatprep.mubr.msk.f32.mxu0 %vm13638_vm2, %v17107_v0 }
 0x1c1   :  { %13156 = vrcp.f32 %v1129_v19 }
 0x1c2   :  { %11237 = vmatpush1.bf16.msra.mxu1 %v14120_v44  ;;  %11267 = vmatpush3.bf16.msra.mxu0 %v14203_v8 }
 0x1c3   :  { %11239 = vmatprep.subr.bf16.mxu1 %v14130_v48  ;;  %11268 = vmatprep.subr.bf16.mxu0 %v17117_v12 }
 0x1c6   :  { %11241 = vmatpush1.bf16.msra.mxu1 %v14137_v55  ;;  %11270 = vmatpush3.bf16.msra.mxu0 %v14213_v18  ;;  %v678_v55 = vld [vmem:[#allocation2 + $0x58] sm:$0xc0]  ;;  %v1638_v18 = vld [vmem:[%s17084_s8] sm:$0xff] }
 0x1c7   :  { %v1087_v43 = vpop.f32.mrb[16].mxu0  ;;  %11243 = vmatprep.subr.bf16.mxu1 %v14147_v60  ;;  %11271 = vmatprep.subr.bf16.mxu0 %v17117_v12 }
 0x1c8   :  { %v9885_v34 = vpop.f32.mrb[17].mxu0  ;;  %v1088_v37 = vadd.f32 %v1087_v43, %v946_v33  ;;  %v1656_v33 = vld [vmem:[%s17084_s8 + $0x90] sm:$0xff]  ;;  %v1659_v43 = vld [vmem:[%s17084_s8 + $0xa8] sm:$0xff] }
 0x1c9   :  { %v13155_v44 = vpop.eup %13154  ;;  %v1658_v34 = vld [vmem:[%s17084_s8 + $0xa0] sm:$0xff] }
 0x1ca   :  { %v1133_v5 = vrot.slane %v1088_v37, 2  ;;  %11245 = vmatpush1.bf16.msra.mxu1 %v14153_v6  ;;  %11273 = vmatpush3.bf16.msra.mxu0 %v14220_v28  ;;  %v1641_v28 = vld [vmem:[%s17084_s8 + $0x18] sm:$0xff]  ;;  %v14474_v37 = vpack.c.bf16 %v1659_v43, %v1656_v33  ;;  %v14480_v19 = vpack.c.bf16 %v1661_v53, %v1658_v34  ;;  %v1683_v33 = vld [vmem:[%s17084_s8 + $0x168] sm:$0xff]  ;;  %v1682_v43 = vld [vmem:[%s17084_s8 + $0x160] sm:$0xff] }
 0x1cb   :  { %11247 = vmatprep.subr.bf16.mxu1 %v14163_v13  ;;  %11274 = vmatprep.subr.bf16.mxu0 %v17117_v12  ;;  %v13157_v60 = vpop.eup %13156  ;;  %v14586_v34 = vpack.c.bf16 %v1683_v33, %v1680_v22  ;;  %v1685_v53 = vld [vmem:[%s17084_s8 + $0x178] sm:$0xff] }
 0x1cc   :  { %v1135_v48 = vmul.f32 %v13155_v44, %v1133_v5  ;;  %v1138_v6 = vsub.f32 1.0, %v13157_v60  ;;  %v1663_v5 = vld [vmem:[%s17084_s8 + $0xc8] sm:$0xff]  ;;  %v1666_v44 = vld [vmem:[%s17084_s8 + $0xe0] sm:$0xff] }
 0x1ce   :  { %v1136_v8 = vadd.f32 %v1135_v48, %v678_v55  ;;  %11249 = vmatpush1.bf16.msra.mxu1 %v14169_v24  ;;  %11276 = vmatpush3.bf16.msra.mxu0 %v14227_v35  ;;  %v1640_v35 = vld [vmem:[%s17084_s8 + $0x10] sm:$0xff]  ;;  %v14490_v48 = vpack.c.bf16 %v1666_v44, %v1663_v5  ;;  %v1662_v55 = vld [vmem:[%s17084_s8 + $0xc0] sm:$0xff]  ;;  %v14592_v5 = vpack.c.bf16 %v1685_v53, %v1682_v43  ;;  %v1848_v44 = vld [vmem:[#allocation11 + $0x8] sm:$0xff] }
 0x1cf   :  { %11251 = vmatprep.subr.bf16.mxu1 %v14179_v29  ;;  %11277 = vmatprep.subr.bf16.mxu0 %v17117_v12  ;;  %v1140_v29 = vmul.f32 0.0, %v13157_v60  ;;  %v1664_v60 = vld [vmem:[%s17084_s8 + $0xd0] sm:$0xff] }
 0x1d0   :  { %13158 = vtanh.f32 %v1136_v8  ;;  %v1665_v8 = vld [vmem:[%s17084_s8 + $0xd8] sm:$0xff] }
 0x1d2   :  { %11253 = vmatpush1.bf16.msra.mxu1 %v14185_v39  ;;  %11279 = vmatpush3.bf16.msra.mxu0 %v14233_v41  ;;  %v14390_v41 = vpack.c.bf16 %v1641_v28, %v1638_v18  ;;  %v1671_v18 = vld [vmem:[%s17084_s8 + $0x108] sm:$0xff]  ;;  %v1670_v28 = vld [vmem:[%s17084_s8 + $0x100] sm:$0xff] }
 0x1d3   :  { %11255 = vmatprep.subr.bf16.mxu1 %v14189_v46  ;;  %11280 = vmatprep.subr.bf16.mxu0 %v17117_v12 }
 0x1d6   :  { %11257 = vmatpush1.bf16.msra.mxu1 %v14195_v58  ;;  %11282 = vmatpush3.bf16.msra.mxu0 %v14239_v42  ;;  %v1639_v58 = vld [vmem:[%s17084_s8 + $0x8] sm:$0xff] }
 0x1d7   :  { %11259 = vmatprep.subr.bf16.mxu1 %v14199_v62  ;;  %11283 = vmatprep.subr.bf16.mxu0 %v17117_v12  ;;  %v1642_v62 = vld [vmem:[%s17084_s8 + $0x20] sm:$0xff]  ;;  %v1643_v42 = vld [vmem:[%s17084_s8 + $0x28] sm:$0xff] }
 0x1da   :  { %v13159_v13 = vpop.eup %13158  ;;  %11261 = vmatpush1.bf16.msra.mxu1 %v14208_v9  ;;  %11285 = vmatpush3.bf16.msra.mxu0 %v14245_v47  ;;  %v14379_v9 = vpack.c.bf16 %v1642_v62, %v1639_v58  ;;  %v14396_v47 = vpack.c.bf16 %v1643_v42, %v1640_v35  ;;  %v1668_v62 = vld [vmem:[%s17084_s8 + $0xf0] sm:$0xff]  ;;  %v1673_v42 = vld [vmem:[%s17084_s8 + $0x118] sm:$0xff] }
 0x1db   :  { %v1139_v24 = vmul.f32 %v13159_v13, %v1138_v6  ;;  %11318 = vmatprep.subr.bf16.mxu0 %v17117_v12  ;;  %v14502_v6 = vpack.c.bf16 %v1665_v8, %v1662_v55  ;;  %v1667_v13 = vld [vmem:[%s17084_s8 + $0xe8] sm:$0xff]  ;;  %v14530_v35 = vpack.c.bf16 %v1671_v18, %v1668_v62  ;;  %v14536_v38 = vpack.c.bf16 %v1673_v42, %v1670_v28  ;;  %v1851_v55 = vld [vmem:[#allocation11 + $0x20] sm:$0xff] }
 0x1dc   :  { %11287 = vmatprep.subr.bf16.mxu1 %v14379_v9  ;;  %v14597_v8 = vpack.c.bf16 %v1851_v55, %v1848_v44 }
 0x1dd   :  { %v14366_v39 = vadd.f32 %v1140_v29, %v1139_v24  ;;  %v14508_v24 = vpack.c.bf16 %v1667_v13, %v1664_v60  ;;  %v1669_v29 = vld [vmem:[%s17084_s8 + $0xf8] sm:$0xff]  ;;  %v1198_v60 = vld [vmem:[%s17086_s10] sm:$0x7] }
 0x1de   :  { %v1203_v13 = vrot.slane %v1198_v60, %v14293_v10  ;;  %v1211_v55 = vrot.slane %v1198_v60, %v14303_v54 }
 0x1df   :  { %1143 = vst [vmem:[#allocation3 + $0x18] sm:$0xc0] %v14366_v39  ;;  %v1422_v46 = vrot.slane %v14366_v39, 6 }
 0x1e1   :  { %1489 = vmatmul.mubr.f32.vlgmr.msra.gmra.mrb[8].mxu1 %v1422_v46  ;;  %9954 = vmatmul.mubr.f32.vlgmr.msra.gmra.mrb[20].mxu0 %v1422_v46  ;;  %v1672_v46 = vld [vmem:[%s17084_s8 + $0x110] sm:$0xff] }
 0x1e2   :  { %1770 = vmatprep.mubr.f32.mxu1 %v17107_v0  ;;  %9988 = vmatprep.mubr.msk.f32.mxu0 %vm13638_vm2, %v17107_v0  ;;  %v14518_v58 = vpack.c.bf16 %v1672_v46, %v1669_v29  ;;  %v1207_v29 = vrot.slane %v1198_v60, %v14298_v16 }
 0x1e3   :  { %11289 = vmatpush1.bf16.msra.mxu1 %v14390_v41  ;;  %11320 = vmatpush3.bf16.msra.mxu0 %v14396_v47 }
 0x1e4   :  { %11321 = vmatprep.subr.bf16.mxu0 %v17117_v12  ;;  %11291 = vmatprep.subr.bf16.mxu1 %v14406_v49 }
 0x1e7   :  { %11293 = vmatpush1.bf16.msra.mxu1 %v14418_v59  ;;  %11323 = vmatpush3.bf16.msra.mxu0 %v14424_v1 }
 0x1e8   :  { %11324 = vmatprep.subr.bf16.mxu0 %v17117_v12  ;;  %11295 = vmatprep.subr.bf16.mxu1 %v14434_v20 }
 0x1eb   :  { %11297 = vmatpush1.bf16.msra.mxu1 %v14446_v36  ;;  %11326 = vmatpush3.bf16.msra.mxu0 %v14452_v7 }
 0x1ec   :  { %11327 = vmatprep.subr.bf16.mxu0 %v17117_v12  ;;  %11299 = vmatprep.subr.bf16.mxu1 %v14462_v26 }
 0x1ef   :  { %11301 = vmatpush1.bf16.msra.mxu1 %v14474_v37  ;;  %11329 = vmatpush3.bf16.msra.mxu0 %v14480_v19 }
 0x1f0   :  { %11330 = vmatprep.subr.bf16.mxu0 %v17117_v12  ;;  %11303 = vmatprep.subr.bf16.mxu1 %v14490_v48 }
 0x1f3   :  { %11305 = vmatpush1.bf16.msra.mxu1 %v14502_v6  ;;  %11332 = vmatpush3.bf16.msra.mxu0 %v14508_v24 }
 0x1f4   :  { %11333 = vmatprep.subr.bf16.mxu0 %v17117_v12  ;;  %11307 = vmatprep.subr.bf16.mxu1 %v14518_v58 }
 0x1f7   :  { %11309 = vmatpush1.bf16.msra.mxu1 %v14530_v35  ;;  %11335 = vmatpush3.bf16.msra.mxu0 %v14536_v38 }
 0x1f8   :  { %11336 = vmatprep.subr.bf16.mxu0 %v17117_v12  ;;  %11311 = vmatprep.subr.bf16.mxu1 %v14546_v50 }
 0x1fb   :  { %11313 = vmatpush1.bf16.msra.mxu1 %v14558_v15  ;;  %11338 = vmatpush3.bf16.msra.mxu0 %v14564_v31 }
 0x1fc   :  { %11339 = vmatprep.subr.bf16.mxu0 %v17117_v12  ;;  %11315 = vmatprep.subr.bf16.mxu1 %v14574_v14 }
 0x1ff   :  { %11317 = vmatpush1.bf16.msra.mxu1 %v14586_v34  ;;  %11341 = vmatpush3.bf16.msra.mxu0 %v14592_v5 }
 0x200   :  { %11374 = vmatprep.subr.bf16.mxu0 %v17117_v12  ;;  %11343 = vmatprep.subr.bf16.mxu1 %v14597_v8 }
 0x290   :  { %v1281_v46 = vpop.f32.mrb[6].mxu1  ;;  %v1352_v62 = vpop.f32.mrb[18].mxu0 }
 0x291   :  { %v1282_v18 = vadd.f32 %v1281_v46, %v1203_v13  ;;  %v1283_v28 = vpop.f32.mrb[7].mxu1  ;;  %v9920_v42 = vpop.f32.mrb[19].mxu0  ;;  %v1353_v13 = vadd.f32 %v1352_v62, %v1211_v55  ;;  %v1148_v55 = vld [vmem:[#allocation2 + $0x50] sm:$0x30] }
 0x292   :  { %v1284_v4 = vadd.f32 %v1283_v28, %v1207_v29  ;;  %v14609_v29 = vld [vmem:[%s17087_s11] sm:$0x7]  ;;  %v1594_v28 = vrot.slane %v14326_v27, 6 }
 0x293   :  { %v1566_v23 = vrot.slane %v1282_v18, 6  ;;  %v1586_v46 = vrot.slane %v1353_v13, 6  ;;  %v1413_v60 = vrot.slane %v14609_v29, %v14298_v16 }
 0x294   :  { %v1576_v61 = vrot.slane %v1284_v4, 6 }
 0x295   :  { %v1568_v3 = vadd.f32 %v1566_v23, %v1144_v51  ;;  %v1409_v23 = vrot.slane %v14609_v29, %v14293_v10  ;;  %v1146_v51 = vld [vmem:[#allocation2 + $0x10] sm:$0xc] }
 0x296   :  { %v1578_v56 = vadd.f32 %v1576_v61, %v1145_v30 }
 0x297   :  { %v9176_v2 = vmul.f32 -1.442695, %v1568_v3 }
 0x298   :  { %v9177_v22 = vmul.f32 -1.442695, %v1578_v56 }
 0x299   :  { %13160 = vpow2.f32 %v9176_v2 }
 0x29a   :  { %13162 = vpow2.f32 %v9177_v22 }
 0x2a3   :  { %v13161_v33 = vpop.eup %13160 }
 0x2a4   :  { %v13163_v43 = vpop.eup %13162  ;;  %v1572_v53 = vadd.f32 1.0, %v13161_v33 }
 0x2a5   :  { %v1582_v44 = vadd.f32 1.0, %v13163_v43  ;;  %v1147_v43 = vld [vmem:[#allocation2 + $0x48] sm:$0x30] }
 0x2a6   :  { %13164 = vrcp.f32 %v1572_v53 }
 0x2a7   :  { %13166 = vrcp.f32 %v1582_v44 }
 0x2b0   :  { %v13165_v18 = vpop.eup %13164 }
 0x2b1   :  { %v13167_v42 = vpop.eup %13166  ;;  %v1588_v4 = vmul.f32 %v13165_v18, %v1586_v46 }
 0x2b2   :  { %v1596_v61 = vmul.f32 %v13167_v42, %v1594_v28  ;;  %v1591_v28 = vsub.f32 1.0, %v13167_v42 }
 0x2b3   :  { %v1589_v62 = vadd.f32 %v1588_v4, %v1146_v51  ;;  %v1847_v51 = vld [vmem:[#allocation11] sm:$0xff] }
 0x2b4   :  { %v1490_v3 = vpop.f32.mrb[8].mxu1  ;;  %v14616_v30 = vpop.f32.mrb[20].mxu0 }
 0x2b5   :  { %13168 = vtanh.f32 %v1589_v62  ;;  %v1491_v56 = vadd.f32 %v1490_v3, %v1409_v23  ;;  %v1492_v2 = vpop.f32.mrb[9].mxu1  ;;  %v9955_v22 = vpop.f32.mrb[21].mxu0  ;;  %v1849_v62 = vld [vmem:[#allocation11 + $0x10] sm:$0xff]  ;;  %v1852_v23 = vld [vmem:[#allocation11 + $0x28] sm:$0xff]  ;;  %v1854_v3 = vld [vmem:[#allocation11 + $0x38] sm:$0xff] }
 0x2b6   :  { %v1493_v33 = vadd.f32 %v1492_v2, %v1413_v60  ;;  %v1857_v22 = vld [vmem:[#allocation11 + $0x50] sm:$0xff]  ;;  %v14622_v2 = vpack.c.bf16 %v1852_v23, %v1849_v62  ;;  %v1864_v23 = vld [vmem:[#allocation11 + $0x88] sm:$0xff] }
 0x2b7   :  { %v1599_v27 = vrot.slane %v1491_v56, 4  ;;  %v14620_v56 = vpack.c.bf16 %v1850_v11, %v1847_v51  ;;  %v14626_v42 = vpack.c.bf16 %v1857_v22, %v1854_v3  ;;  %v1862_v51 = vld [vmem:[#allocation11 + $0x78] sm:$0xff]  ;;  %v1861_v62 = vld [vmem:[#allocation11 + $0x70] sm:$0xff] }
 0x2b8   :  { %v1609_v53 = vrot.slane %v1493_v33, 4  ;;  %v1853_v33 = vld [vmem:[#allocation11 + $0x30] sm:$0xff]  ;;  %v1866_v22 = vld [vmem:[#allocation11 + $0x98] sm:$0xff] }
 0x2b9   :  { %v1601_v44 = vadd.f32 %v1599_v27, %v1147_v43  ;;  %v1856_v43 = vld [vmem:[#allocation11 + $0x48] sm:$0xff] }
 0x2ba   :  { %v1611_v13 = vadd.f32 %v1609_v53, %v1148_v55  ;;  %v1855_v53 = vld [vmem:[#allocation11 + $0x40] sm:$0xff]  ;;  %v1860_v55 = vld [vmem:[#allocation11 + $0x68] sm:$0xff]  ;;  %v14630_v11 = vpack.c.bf16 %v1856_v43, %v1853_v33  ;;  %v1417_v33 = vrot.slane %v14609_v29, %v14303_v54 }
 0x2bb   :  { %v9178_v46 = vmul.f32 -1.442695, %v1601_v44  ;;  %v1858_v44 = vld [vmem:[#allocation11 + $0x58] sm:$0xff]  ;;  %v1872_v29 = vld [vmem:[#allocation11 + $0xc8] sm:$0xff] }
 0x2bc   :  { %v9179_v18 = vmul.f32 -1.442695, %v1611_v13  ;;  %v1863_v13 = vld [vmem:[#allocation11 + $0x80] sm:$0xff] }
 0x2bd   :  { %13170 = vpow2.f32 %v9178_v46  ;;  %v1859_v46 = vld [vmem:[#allocation11 + $0x60] sm:$0xff] }
 0x2be   :  { %13172 = vpow2.f32 %v9179_v18  ;;  %v14645_v43 = vpack.c.bf16 %v1862_v51, %v1859_v46 }
 0x2bf   :  { %v13169_v4 = vpop.eup %13168 }
 0x2c0   :  { %v1592_v57 = vmul.f32 %v13169_v4, %v1591_v28  ;;  %v14636_v4 = vpack.c.bf16 %v1863_v13, %v1860_v55  ;;  %v1868_v13 = vld [vmem:[#allocation11 + $0xa8] sm:$0xff] }
 0x2c2   :  { %v14618_v60 = vadd.f32 %v1596_v61, %v1592_v57  ;;  %v14632_v61 = vpack.c.bf16 %v1858_v44, %v1855_v53  ;;  %v14647_v53 = vpack.c.bf16 %v1864_v23, %v1861_v62  ;;  %v1865_v44 = vld [vmem:[#allocation11 + $0x90] sm:$0xff]  ;;  %v1871_v62 = vld [vmem:[#allocation11 + $0xc0] sm:$0xff] }
 0x2c3   :  { %v14656_v46 = vpack.c.bf16 %v1868_v13, %v1865_v44 }
 0x2c4   :  { %1630 = vst [vmem:[#allocation3] sm:$0xc] %v14618_v60  ;;  %v1704_v27 = vrot.slane %v14618_v60, 2 }
 0x2c6   :  { %1771 = vmatmul.mubr.f32.vlgmr.msra.gmra.mrb[10].mxu1 %v1704_v27  ;;  %9989 = vmatmul.mubr.f32.vlgmr.msra.gmra.mrb[22].mxu0 %v1704_v27  ;;  %v1869_v27 = vld [vmem:[#allocation11 + $0xb0] sm:$0xff] }
 0x2c7   :  { %v13171_v57 = vpop.eup %13170  ;;  %11345 = vmatpush1.bf16.msra.mxu1 %v14620_v56  ;;  %11376 = vmatpush3.bf16.msra.mxu0 %v14622_v2  ;;  %v14651_v55 = vpack.c.bf16 %v1869_v27, %v1866_v22  ;;  %v1874_v22 = vld [vmem:[#allocation11 + $0xd8] sm:$0xff]  ;;  %v1873_v27 = vld [vmem:[#allocation11 + $0xd0] sm:$0xff] }
 0x2c8   :  { %v13173_v18 = vpop.eup %13172  ;;  %v1605_v28 = vadd.f32 1.0, %v13171_v57  ;;  %11347 = vmatprep.subr.bf16.mxu1 %v14626_v42  ;;  %11377 = vmatprep.subr.bf16.mxu0 %v17117_v12  ;;  %v1867_v57 = vld [vmem:[#allocation11 + $0xa0] sm:$0xff]  ;;  %v14666_v44 = vpack.c.bf16 %v1874_v22, %v1871_v62  ;;  %v14668_v13 = vpack.c.bf16 %v1876_v25, %v1873_v27  ;;  %v1149_v22 = vld [vmem:[#allocation2 + $0x58] sm:$0x30] }
 0x2c9   :  { %v1615_v3 = vadd.f32 1.0, %v13173_v18  ;;  %1979 = vmatprep.mubr.f32.mxu1 %v17107_v0  ;;  %10023 = vmatprep.mubr.msk.f32.mxu0 %vm13638_vm2, %v17107_v0  ;;  %v1870_v18 = vld [vmem:[#allocation11 + $0xb8] sm:$0xff]  ;;  %v1887_v62 = vld [vmem:[#allocation11 + $0x140] sm:$0xff] }
 0x2ca   :  { %13174 = vrcp.f32 %v1605_v28  ;;  %v1875_v28 = vld [vmem:[#allocation11 + $0xe0] sm:$0xff]  ;;  %v14658_v51 = vpack.c.bf16 %v1870_v18, %v1867_v57  ;;  %v1877_v57 = vld [vmem:[#allocation11 + $0xf0] sm:$0xff]  ;;  %v1882_v0 = vld [vmem:[#allocation11 + $0x118] sm:$0xff] }
 0x2cb   :  { %13176 = vrcp.f32 %v1615_v3  ;;  %11349 = vmatpush1.bf16.msra.mxu1 %v14630_v11  ;;  %11379 = vmatpush3.bf16.msra.mxu0 %v14632_v61  ;;  %v1562_v3 = vadd.f32 %v14616_v30, %v1417_v33  ;;  %v14662_v23 = vpack.c.bf16 %v1875_v28, %v1872_v29  ;;  %v1881_v30 = vld [vmem:[#allocation11 + $0x110] sm:$0xff]  ;;  %v1880_v28 = vld [vmem:[#allocation11 + $0x108] sm:$0xff] }
 0x2cc   :  { %11351 = vmatprep.subr.bf16.mxu1 %v14636_v4  ;;  %11380 = vmatprep.subr.bf16.mxu0 %v17117_v12  ;;  %v14672_v29 = vpack.c.bf16 %v1881_v30, %v1878_v17  ;;  %v14677_v52 = vpack.c.bf16 %v1880_v28, %v1877_v57  ;;  %v14679_v17 = vpack.c.bf16 %v1882_v0, %v1879_v21  ;;  %v1883_v30 = vld [vmem:[#allocation11 + $0x120] sm:$0xff]  ;;  %v1889_v21 = vld [vmem:[#allocation11 + $0x150] sm:$0xff]  ;;  %v1892_v28 = vld [vmem:[#allocation11 + $0x168] sm:$0xff] }
 0x2cd   :  { %v1619_v33 = vrot.slane %v1562_v3, 4  ;;  %v1626_v3 = vrot.slane %v14366_v39, 2  ;;  %v14683_v39 = vpack.c.bf16 %v1887_v62, %v1884_v63  ;;  %v1891_v62 = vld [vmem:[#allocation11 + $0x160] sm:$0xff] }
 0x2cf   :  { %11353 = vmatpush1.bf16.msra.mxu1 %v14645_v43  ;;  %11382 = vmatpush3.bf16.msra.mxu0 %v14647_v53 }
 0x2d0   :  { %11355 = vmatprep.subr.bf16.mxu1 %v14651_v55  ;;  %11383 = vmatprep.subr.bf16.mxu0 %v17117_v12 }
 0x2d3   :  { %11357 = vmatpush1.bf16.msra.mxu1 %v14656_v46  ;;  %11385 = vmatpush3.bf16.msra.mxu0 %v14658_v51 }
 0x2d4   :  { %v13175_v18 = vpop.eup %13174  ;;  %11359 = vmatprep.subr.bf16.mxu1 %v14662_v23  ;;  %11386 = vmatprep.subr.bf16.mxu0 %v17117_v12 }
 0x2d5   :  { %v13177_v45 = vpop.eup %13176  ;;  %v1621_v40 = vmul.f32 %v13175_v18, %v1619_v33  ;;  %v1886_v33 = vld [vmem:[#allocation11 + $0x138] sm:$0xff]  ;;  %v1885_v18 = vld [vmem:[#allocation11 + $0x130] sm:$0xff] }
 0x2d6   :  { %v1628_v25 = vmul.f32 %v13177_v45, %v1626_v3  ;;  %v1893_v3 = vld [vmem:[#allocation11 + $0x170] sm:$0xff]  ;;  %v14687_v57 = vpack.c.bf16 %v1886_v33, %v1883_v30  ;;  %v14689_v0 = vpack.c.bf16 %v1888_v32, %v1885_v18  ;;  %v1624_v32 = vsub.f32 1.0, %v13177_v45 }
 0x2d7   :  { %v1622_v27 = vadd.f32 %v1621_v40, %v1149_v22  ;;  %11361 = vmatpush1.bf16.msra.mxu1 %v14666_v44  ;;  %11388 = vmatpush3.bf16.msra.mxu0 %v14668_v13  ;;  %v1890_v40 = vld [vmem:[#allocation11 + $0x158] sm:$0xff]  ;;  %v17158_v45 = vmov 0.0  }
 0x2d8   :  { %11363 = vmatprep.subr.bf16.mxu1 %v14672_v29  ;;  %11389 = vmatprep.subr.bf16.mxu0 %v17117_v12  ;;  %v14693_v63 = vpack.c.bf16 %v1893_v3, %v1890_v40  ;;  %v1894_v22 = vld [vmem:[#allocation11 + $0x178] sm:$0xff] }
 0x2d9   :  { %13178 = vtanh.f32 %v1622_v27  ;;  %v14697_v27 = vpack.c.bf16 %v1892_v28, %v1889_v21  ;;  %v14699_v30 = vpack.c.bf16 %v1894_v22, %v1891_v62  ;;  %v2084_v21 = vrot.slane %v14618_v60, 6 }
 0x2db   :  { %11365 = vmatpush1.bf16.msra.mxu1 %v14677_v52  ;;  %11391 = vmatpush3.bf16.msra.mxu0 %v14679_v17 }
 0x2dc   :  { %11367 = vmatprep.subr.bf16.mxu1 %v14683_v39  ;;  %11392 = vmatprep.subr.bf16.mxu0 %v17117_v12 }
 0x2df   :  { %11369 = vmatpush1.bf16.msra.mxu1 %v14687_v57  ;;  %11394 = vmatpush3.bf16.msra.mxu0 %v14689_v0 }
 0x2e0   :  { %11371 = vmatprep.subr.bf16.mxu1 %v14693_v63  ;;  %11395 = vmatprep.subr.bf16.mxu0 %v17117_v12 }
 0x2e3   :  { %v13179_v33 = vpop.eup %13178  ;;  %11373 = vmatpush1.bf16.msra.mxu1 %v14697_v27  ;;  %11397 = vmatpush3.bf16.msra.mxu0 %v14699_v30 }
 0x2e4   :  { %v1625_v18 = vmul.f32 %v13179_v33, %v1624_v32  ;;  %11399 = vmatprep.subr.bf16.mxu1 %v14379_v9  ;;  %11430 = vmatprep.subr.bf16.mxu0 %v17117_v12  ;;  %v1686_v9 = vld [vmem:[%s17086_s10] sm:$0x7]  ;;  %v1634_v32 = vld [vmem:[#allocation2 + $0x10] sm:$0x30] }
 0x2e6   :  { %v14707_v40 = vadd.f32 %v1628_v25, %v1625_v18 }
 0x2e8   :  { %1631 = vst [vmem:[#allocation3 + $0x18] sm:$0x30] %v14707_v40  ;;  %v1913_v3 = vrot.slane %v14707_v40, 4 }
 0x2ea   :  { %1980 = vmatmul.mubr.f32.vlgmr.msra.gmra.mrb[12].mxu1 %v1913_v3  ;;  %10024 = vmatmul.mubr.f32.vlgmr.msra.gmra.mrb[24].mxu0 %v1913_v3 }
 0x2eb   :  { %11401 = vmatpush1.bf16.msra.mxu1 %v14390_v41  ;;  %11432 = vmatpush3.bf16.msra.mxu0 %v14396_v47  ;;  %v1691_v41 = vrot.slane %v1686_v9, %v14293_v10  ;;  %v1695_v47 = vrot.slane %v1686_v9, %v14298_v16 }
 0x2ec   :  { %11403 = vmatprep.subr.bf16.mxu1 %v14406_v49  ;;  %11433 = vmatprep.subr.bf16.mxu0 %v17117_v12 }
 0x2ed   :  { %2260 = vmatprep.mubr.f32.mxu1 %v17158_v45  ;;  %10058 = vmatprep.mubr.msk.f32.mxu0 %vm13638_vm2, %v17158_v45 }
 0x2ef   :  { %11405 = vmatpush1.bf16.msra.mxu1 %v14418_v59  ;;  %11435 = vmatpush3.bf16.msra.mxu0 %v14424_v1 }
 0x2f0   :  { %11407 = vmatprep.subr.bf16.mxu1 %v14434_v20  ;;  %11436 = vmatprep.subr.bf16.mxu0 %v17117_v12 }
 0x2f3   :  { %11409 = vmatpush1.bf16.msra.mxu1 %v14446_v36  ;;  %11438 = vmatpush3.bf16.msra.mxu0 %v14452_v7 }
 0x2f4   :  { %11411 = vmatprep.subr.bf16.mxu1 %v14462_v26  ;;  %11439 = vmatprep.subr.bf16.mxu0 %v17117_v12 }
 0x2f7   :  { %11413 = vmatpush1.bf16.msra.mxu1 %v14474_v37  ;;  %11441 = vmatpush3.bf16.msra.mxu0 %v14480_v19  ;;  %v1632_v37 = vld [vmem:[#allocation2] sm:$0x30] }
 0x2f8   :  { %11415 = vmatprep.subr.bf16.mxu1 %v14490_v48  ;;  %11442 = vmatprep.subr.bf16.mxu0 %v17117_v12 }
 0x2fb   :  { %11417 = vmatpush1.bf16.msra.mxu1 %v14502_v6  ;;  %11444 = vmatpush3.bf16.msra.mxu0 %v14508_v24  ;;  %v1633_v6 = vld [vmem:[#allocation2 + $0x8] sm:$0x30] }
 0x2fc   :  { %11419 = vmatprep.subr.bf16.mxu1 %v14518_v58  ;;  %11445 = vmatprep.subr.bf16.mxu0 %v17117_v12 }
 0x2ff   :  { %11421 = vmatpush1.bf16.msra.mxu1 %v14530_v35  ;;  %11447 = vmatpush3.bf16.msra.mxu0 %v14536_v38 }
 0x300   :  { %11423 = vmatprep.subr.bf16.mxu1 %v14546_v50  ;;  %11448 = vmatprep.subr.bf16.mxu0 %v17117_v12 }
 0x303   :  { %11425 = vmatpush1.bf16.msra.mxu1 %v14558_v15  ;;  %11450 = vmatpush3.bf16.msra.mxu0 %v14564_v31 }
 0x304   :  { %11427 = vmatprep.subr.bf16.mxu1 %v14574_v14  ;;  %11451 = vmatprep.subr.bf16.mxu0 %v17117_v12  ;;  %v1699_v14 = vrot.slane %v1686_v9, %v14303_v54 }
 0x307   :  { %11429 = vmatpush1.bf16.msra.mxu1 %v14586_v34  ;;  %11453 = vmatpush3.bf16.msra.mxu0 %v14592_v5  ;;  %v1895_v5 = vld [vmem:[%s17087_s11] sm:$0x7] }
 0x308   :  { %11455 = vmatprep.subr.bf16.mxu1 %v14597_v8  ;;  %11486 = vmatprep.subr.bf16.mxu0 %v17117_v12  ;;  %v1900_v22 = vrot.slane %v1895_v5, %v14293_v10  ;;  %v1904_v33 = vrot.slane %v1895_v5, %v14298_v16 }
 0x399   :  { %v1772_v49 = vpop.f32.mrb[10].mxu1  ;;  %v1843_v59 = vpop.f32.mrb[22].mxu0 }
 0x39a   :  { %v1773_v1 = vadd.f32 %v1772_v49, %v1691_v41  ;;  %v1774_v20 = vpop.f32.mrb[11].mxu1  ;;  %v9990_v36 = vpop.f32.mrb[23].mxu0  ;;  %v1844_v34 = vadd.f32 %v1843_v59, %v1699_v14 }
 0x39b   :  { %v1775_v7 = vadd.f32 %v1774_v20, %v1695_v47  ;;  %v1635_v36 = vld [vmem:[#allocation2 + $0x48] sm:$0xc] }
 0x39c   :  { %v2057_v26 = vrot.slane %v1773_v1, 4  ;;  %v2077_v8 = vrot.slane %v1844_v34, 4  ;;  %v1908_v34 = vrot.slane %v1895_v5, %v14303_v54 }
 0x39d   :  { %v2067_v19 = vrot.slane %v1775_v7, 4 }
 0x39e   :  { %v2059_v48 = vadd.f32 %v2057_v26, %v1632_v37  ;;  %v1636_v26 = vld [vmem:[#allocation2 + $0x50] sm:$0xc] }
 0x39f   :  { %v2069_v24 = vadd.f32 %v2067_v19, %v1633_v6 }
 0x3a0   :  { %v9180_v58 = vmul.f32 -1.442695, %v2059_v48 }
 0x3a1   :  { %v9181_v35 = vmul.f32 -1.442695, %v2069_v24 }
 0x3a2   :  { %13180 = vpow2.f32 %v9180_v58 }
 0x3a3   :  { %13182 = vpow2.f32 %v9181_v35 }
 0x3ac   :  { %v13181_v38 = vpop.eup %13180 }
 0x3ad   :  { %v13183_v50 = vpop.eup %13182  ;;  %v2063_v15 = vadd.f32 1.0, %v13181_v38 }
 0x3ae   :  { %v2073_v31 = vadd.f32 1.0, %v13183_v50 }
 0x3af   :  { %13184 = vrcp.f32 %v2063_v15 }
 0x3b0   :  { %13186 = vrcp.f32 %v2073_v31 }
 0x3b9   :  { %v13185_v25 = vpop.eup %13184 }
 0x3ba   :  { %v13187_v28 = vpop.eup %13186  ;;  %v2079_v62 = vmul.f32 %v13185_v25, %v2077_v8  ;;  %v2613_v25 = vld [vmem:[%s17084_s8 + $0x30] sm:$0xff] }
 0x3bb   :  { %v2086_v18 = vmul.f32 %v13187_v28, %v2084_v21  ;;  %v2082_v6 = vsub.f32 1.0, %v13187_v28  ;;  %v2616_v21 = vld [vmem:[%s17084_s8 + $0x48] sm:$0xff]  ;;  %v2615_v28 = vld [vmem:[%s17084_s8 + $0x40] sm:$0xff] }
 0x3bc   :  { %v2080_v3 = vadd.f32 %v2079_v62, %v1634_v32  ;;  %v14850_v62 = vpack.c.bf16 %v2616_v21, %v2613_v25  ;;  %v2649_v21 = vld [vmem:[%s17084_s8 + $0x150] sm:$0xff] }
 0x3bd   :  { %v1981_v9 = vpop.f32.mrb[12].mxu1  ;;  %v2052_v41 = vpop.f32.mrb[24].mxu0 }
 0x3be   :  { %13188 = vtanh.f32 %v2080_v3  ;;  %v1982_v47 = vadd.f32 %v1981_v9, %v1900_v22  ;;  %v1983_v49 = vpop.f32.mrb[13].mxu1  ;;  %v10025_v59 = vpop.f32.mrb[25].mxu0  ;;  %v2618_v22 = vld [vmem:[%s17084_s8 + $0x58] sm:$0xff]  ;;  %v2619_v9 = vld [vmem:[%s17084_s8 + $0x60] sm:$0xff] }
 0x3bf   :  { %v1984_v1 = vadd.f32 %v1983_v49, %v1904_v33  ;;  %v14856_v32 = vpack.c.bf16 %v2618_v22, %v2615_v28  ;;  %v2620_v33 = vld [vmem:[%s17084_s8 + $0x68] sm:$0xff]  ;;  %v2651_v22 = vld [vmem:[%s17084_s8 + $0x160] sm:$0xff] }
 0x3c0   :  { %v2089_v20 = vrot.slane %v1982_v47, 6  ;;  %v2621_v47 = vld [vmem:[%s17084_s8 + $0x70] sm:$0xff]  ;;  %v2624_v59 = vld [vmem:[%s17084_s8 + $0x88] sm:$0xff] }
 0x3c1   :  { %v2099_v7 = vrot.slane %v1984_v1, 6  ;;  %v14884_v1 = vpack.c.bf16 %v2624_v59, %v2621_v47  ;;  %v2652_v28 = vld [vmem:[%s17084_s8 + $0x168] sm:$0xff]  ;;  %v2820_v47 = vld [vmem:[#allocation11 + $0x20] sm:$0xff] }
 0x3c2   :  { %v2091_v60 = vadd.f32 %v2089_v20, %v1635_v36  ;;  %v2626_v20 = vld [vmem:[%s17084_s8 + $0x98] sm:$0xff]  ;;  %v2629_v36 = vld [vmem:[%s17084_s8 + $0xb0] sm:$0xff] }
 0x3c3   :  { %v2101_v37 = vadd.f32 %v2099_v7, %v1636_v26  ;;  %v14894_v7 = vpack.c.bf16 %v2629_v36, %v2626_v20  ;;  %v2628_v26 = vld [vmem:[%s17084_s8 + $0xa8] sm:$0xff]  ;;  %v2176_v20 = vld [vmem:[%s17086_s10] sm:$0x7] }
 0x3c4   :  { %v9182_v19 = vmul.f32 -1.442695, %v2091_v60  ;;  %v2625_v60 = vld [vmem:[%s17084_s8 + $0x90] sm:$0xff]  ;;  %v2181_v36 = vrot.slane %v2176_v20, %v14293_v10 }
 0x3c5   :  { %v9183_v48 = vmul.f32 -1.442695, %v2101_v37  ;;  %v2627_v37 = vld [vmem:[%s17084_s8 + $0xa0] sm:$0xff] }
 0x3c6   :  { %13190 = vpow2.f32 %v9182_v19  ;;  %v14906_v19 = vpack.c.bf16 %v2628_v26, %v2625_v60  ;;  %v2185_v60 = vrot.slane %v2176_v20, %v14298_v16 }
 0x3c7   :  { %13192 = vpow2.f32 %v9183_v48  ;;  %v2630_v48 = vld [vmem:[%s17084_s8 + $0xb8] sm:$0xff] }
 0x3c8   :  { %v13189_v24 = vpop.eup %13188 }
 0x3c9   :  { %v2083_v58 = vmul.f32 %v13189_v24, %v2082_v6  ;;  %v14912_v6 = vpack.c.bf16 %v2630_v48, %v2627_v37  ;;  %v2632_v24 = vld [vmem:[%s17084_s8 + $0xc8] sm:$0xff] }
 0x3cb   :  { %v14758_v35 = vadd.f32 %v2086_v18, %v2083_v58  ;;  %v2623_v18 = vld [vmem:[%s17084_s8 + $0x80] sm:$0xff] }
 0x3cc   :  { %v14866_v3 = vpack.c.bf16 %v2623_v18, %v2620_v33  ;;  %v2635_v58 = vld [vmem:[%s17084_s8 + $0xe0] sm:$0xff]  ;;  %v15018_v33 = vpack.c.bf16 %v2652_v28, %v2649_v21  ;;  %v2654_v18 = vld [vmem:[%s17084_s8 + $0x178] sm:$0xff] }
 0x3cd   :  { %2120 = vst [vmem:[#allocation3] sm:$0x30] %v14758_v35  ;;  %v2194_v38 = vrot.slane %v14758_v35, 4  ;;  %v2574_v21 = vrot.slane %v14758_v35, 6 }
 0x3cf   :  { %2261 = vmatmul.mubr.f32.vlgmr.msra.gmra.mrb[14].mxu1 %v2194_v38  ;;  %10059 = vmatmul.mubr.f32.vlgmr.msra.gmra.mrb[26].mxu0 %v2194_v38  ;;  %v14922_v38 = vpack.c.bf16 %v2635_v58, %v2632_v24 }
 0x3d0   :  { %v13191_v50 = vpop.eup %13190  ;;  %11457 = vmatpush1.bf16.msra.mxu1 %v14620_v56  ;;  %11488 = vmatpush3.bf16.msra.mxu0 %v14622_v2  ;;  %v2053_v56 = vadd.f32 %v2052_v41, %v1908_v34  ;;  %v2622_v41 = vld [vmem:[%s17084_s8 + $0x78] sm:$0xff]  ;;  %v2636_v34 = vld [vmem:[%s17084_s8 + $0xe8] sm:$0xff] }
 0x3d1   :  { %v13193_v15 = vpop.eup %13192  ;;  %v2095_v31 = vadd.f32 1.0, %v13191_v50  ;;  %11459 = vmatprep.subr.bf16.mxu1 %v14626_v42  ;;  %11489 = vmatprep.subr.bf16.mxu0 %v17117_v12  ;;  %v14878_v49 = vpack.c.bf16 %v2622_v41, %v2619_v9  ;;  %v2631_v50 = vld [vmem:[%s17084_s8 + $0xc0] sm:$0xff]  ;;  %v15024_v9 = vpack.c.bf16 %v2654_v18, %v2651_v22  ;;  %v2817_v41 = vld [vmem:[#allocation11 + $0x8] sm:$0xff] }
 0x3d2   :  { %v2105_v14 = vadd.f32 1.0, %v13193_v15  ;;  %2469 = vmatprep.mubr.f32.mxu1 %v17158_v45  ;;  %10093 = vmatprep.mubr.msk.f32.mxu0 %vm13638_vm2, %v17158_v45  ;;  %v2109_v2 = vrot.slane %v2053_v56, 6  ;;  %v2634_v15 = vld [vmem:[%s17084_s8 + $0xd8] sm:$0xff]  ;;  %v15028_v59 = vpack.c.bf16 %v2820_v47, %v2817_v41  ;;  %v2124_v41 = vld [vmem:[#allocation2 + $0x10] sm:$0xc0] }
 0x3d3   :  { %13194 = vrcp.f32 %v2095_v31  ;;  %v2633_v31 = vld [vmem:[%s17084_s8 + $0xd0] sm:$0xff] }
 0x3d4   :  { %13196 = vrcp.f32 %v2105_v14  ;;  %11461 = vmatpush1.bf16.msra.mxu1 %v14630_v11  ;;  %11491 = vmatpush3.bf16.msra.mxu0 %v14632_v61  ;;  %v2116_v11 = vrot.slane %v14707_v40, 2  ;;  %v2617_v40 = vld [vmem:[%s17084_s8 + $0x50] sm:$0xff]  ;;  %v14934_v14 = vpack.c.bf16 %v2634_v15, %v2631_v50  ;;  %v14940_v56 = vpack.c.bf16 %v2636_v34, %v2633_v31  ;;  %v2122_v31 = vld [vmem:[#allocation2] sm:$0xc0] }
 0x3d5   :  { %11463 = vmatprep.subr.bf16.mxu1 %v14636_v4  ;;  %11492 = vmatprep.subr.bf16.mxu0 %v17117_v12 }
 0x3d8   :  { %11465 = vmatpush1.bf16.msra.mxu1 %v14645_v43  ;;  %11494 = vmatpush3.bf16.msra.mxu0 %v14647_v53  ;;  %v1637_v43 = vld [vmem:[#allocation2 + $0x58] sm:$0xc] }
 0x3d9   :  { %11467 = vmatprep.subr.bf16.mxu1 %v14651_v55  ;;  %11495 = vmatprep.subr.bf16.mxu0 %v17117_v12 }
 0x3dc   :  { %11469 = vmatpush1.bf16.msra.mxu1 %v14656_v46  ;;  %11497 = vmatpush3.bf16.msra.mxu0 %v14658_v51 }
 0x3dd   :  { %v13195_v42 = vpop.eup %13194  ;;  %11471 = vmatprep.subr.bf16.mxu1 %v14662_v23  ;;  %11498 = vmatprep.subr.bf16.mxu0 %v17117_v12 }
 0x3de   :  { %v13197_v61 = vpop.eup %13196  ;;  %v2111_v4 = vmul.f32 %v13195_v42, %v2109_v2  ;;  %v2638_v2 = vld [vmem:[%s17084_s8 + $0xf8] sm:$0xff]  ;;  %v2641_v42 = vld [vmem:[%s17084_s8 + $0x110] sm:$0xff] }
 0x3df   :  { %v2118_v53 = vmul.f32 %v13197_v61, %v2116_v11  ;;  %v2114_v55 = vsub.f32 1.0, %v13197_v61  ;;  %v14950_v11 = vpack.c.bf16 %v2641_v42, %v2638_v2  ;;  %v2637_v61 = vld [vmem:[%s17084_s8 + $0xf0] sm:$0xff]  ;;  %v2123_v42 = vld [vmem:[#allocation2 + $0x8] sm:$0xc0] }
 0x3e0   :  { %v2112_v5 = vadd.f32 %v2111_v4, %v1637_v43  ;;  %11473 = vmatpush1.bf16.msra.mxu1 %v14666_v44  ;;  %11500 = vmatpush3.bf16.msra.mxu0 %v14668_v13  ;;  %v2608_v44 = vld [vmem:[%s17084_s8 + $0x8] sm:$0xff]  ;;  %v2611_v13 = vld [vmem:[%s17084_s8 + $0x20] sm:$0xff] }
 0x3e1   :  { %11475 = vmatprep.subr.bf16.mxu1 %v14672_v29  ;;  %11501 = vmatprep.subr.bf16.mxu0 %v17117_v12  ;;  %v14811_v29 = vpack.c.bf16 %v2611_v13, %v2608_v44  ;;  %v2640_v4 = vld [vmem:[%s17084_s8 + $0x108] sm:$0xff]  ;;  %v2639_v43 = vld [vmem:[%s17084_s8 + $0x100] sm:$0xff]  ;;  %v2646_v13 = vld [vmem:[%s17084_s8 + $0x138] sm:$0xff] }
 0x3e2   :  { %13198 = vtanh.f32 %v2112_v5  ;;  %v2642_v5 = vld [vmem:[%s17084_s8 + $0x118] sm:$0xff]  ;;  %v2643_v44 = vld [vmem:[%s17084_s8 + $0x120] sm:$0xff] }
 0x3e4   :  { %11477 = vmatpush1.bf16.msra.mxu1 %v14677_v52  ;;  %11503 = vmatpush3.bf16.msra.mxu0 %v14679_v17  ;;  %v2607_v17 = vld [vmem:[%s17084_s8] sm:$0xff] }
 0x3e5   :  { %11479 = vmatprep.subr.bf16.mxu1 %v14683_v39  ;;  %11504 = vmatprep.subr.bf16.mxu0 %v17117_v12  ;;  %v2610_v39 = vld [vmem:[%s17084_s8 + $0x18] sm:$0xff] }
 0x3e8   :  { %11481 = vmatpush1.bf16.msra.mxu1 %v14687_v57  ;;  %11506 = vmatpush3.bf16.msra.mxu0 %v14689_v0  ;;  %v2609_v57 = vld [vmem:[%s17084_s8 + $0x10] sm:$0xff]  ;;  %v14822_v0 = vpack.c.bf16 %v2610_v39, %v2607_v17  ;;  %v14990_v39 = vpack.c.bf16 %v2646_v13, %v2643_v44  ;;  %v2189_v13 = vrot.slane %v2176_v20, %v14303_v54 }
 0x3e9   :  { %11483 = vmatprep.subr.bf16.mxu1 %v14693_v63  ;;  %11507 = vmatprep.subr.bf16.mxu0 %v17117_v12  ;;  %v2612_v63 = vld [vmem:[%s17084_s8 + $0x28] sm:$0xff]  ;;  %v2645_v17 = vld [vmem:[%s17084_s8 + $0x130] sm:$0xff] }
 0x3ec   :  { %v13199_v46 = vpop.eup %13198  ;;  %11485 = vmatpush1.bf16.msra.mxu1 %v14697_v27  ;;  %11509 = vmatpush3.bf16.msra.mxu0 %v14699_v30  ;;  %v14828_v27 = vpack.c.bf16 %v2612_v63, %v2609_v57  ;;  %v2614_v30 = vld [vmem:[%s17084_s8 + $0x38] sm:$0xff]  ;;  %v2648_v57 = vld [vmem:[%s17084_s8 + $0x148] sm:$0xff] }
 0x3ed   :  { %v2115_v52 = vmul.f32 %v13199_v46, %v2114_v55  ;;  %11542 = vmatprep.subr.bf16.mxu0 %v17117_v12  ;;  %11511 = vmatprep.subr.bf16.mxu1 %v14811_v29  ;;  %v14838_v8 = vpack.c.bf16 %v2617_v40, %v2614_v30  ;;  %v14968_v55 = vpack.c.bf16 %v2642_v5, %v2639_v43  ;;  %v2644_v46 = vld [vmem:[%s17084_s8 + $0x128] sm:$0xff]  ;;  %v2650_v30 = vld [vmem:[%s17084_s8 + $0x158] sm:$0xff]  ;;  %v2653_v40 = vld [vmem:[%s17084_s8 + $0x170] sm:$0xff] }
 0x3ee   :  { %v14996_v63 = vpack.c.bf16 %v2648_v57, %v2645_v17  ;;  %v15006_v25 = vpack.c.bf16 %v2653_v40, %v2650_v30  ;;  %v15041_v57 = vld [vmem:[%s17087_s11] sm:$0x7] }
 0x3ef   :  { %v2119_v51 = vadd.f32 %v2118_v53, %v2115_v52  ;;  %v14962_v53 = vpack.c.bf16 %v2640_v4, %v2637_v61  ;;  %v2647_v52 = vld [vmem:[%s17084_s8 + $0x140] sm:$0xff]  ;;  %v2390_v18 = vrot.slane %v15041_v57, %v14293_v10  ;;  %v2394_v47 = vrot.slane %v15041_v57, %v14298_v16 }
 0x3f1   :  { %2121 = vst [vmem:[#allocation3 + $0x18] sm:$0xc] %v2119_v51  ;;  %v14798_v23 = vrot.slane %v2119_v51, 2  ;;  %v14978_v51 = vpack.c.bf16 %v2647_v52, %v2644_v46 }
 0x3f3   :  { %2470 = vmatmul.mubr.f32.vlgmr.msra.gmra.mrb[16].mxu1 %v14798_v23  ;;  %10094 = vmatmul.mubr.f32.vlgmr.msra.gmra.mrb[28].mxu0 %v14798_v23 }
 0x3f4   :  { %2739 = vmatprep.mubr.f32.mxu1 %v17158_v45  ;;  %10128 = vmatprep.mubr.msk.f32.mxu0 %vm13638_vm2, %v17158_v45 }
 0x3f5   :  { %11513 = vmatpush1.bf16.msra.mxu1 %v14822_v0  ;;  %11544 = vmatpush3.bf16.msra.mxu0 %v14828_v27 }
 0x3f6   :  { %11545 = vmatprep.subr.bf16.mxu0 %v17117_v12  ;;  %11515 = vmatprep.subr.bf16.mxu1 %v14838_v8 }
 0x3f9   :  { %11517 = vmatpush1.bf16.msra.mxu1 %v14850_v62  ;;  %11547 = vmatpush3.bf16.msra.mxu0 %v14856_v32 }
 0x3fa   :  { %11548 = vmatprep.subr.bf16.mxu0 %v17117_v12  ;;  %11519 = vmatprep.subr.bf16.mxu1 %v14866_v3 }
 0x3fd   :  { %11521 = vmatpush1.bf16.msra.mxu1 %v14878_v49  ;;  %11550 = vmatpush3.bf16.msra.mxu0 %v14884_v1 }
 0x3fe   :  { %11551 = vmatprep.subr.bf16.mxu0 %v17117_v12  ;;  %11523 = vmatprep.subr.bf16.mxu1 %v14894_v7 }
 0x401   :  { %11525 = vmatpush1.bf16.msra.mxu1 %v14906_v19  ;;  %11553 = vmatpush3.bf16.msra.mxu0 %v14912_v6 }
 0x402   :  { %11554 = vmatprep.subr.bf16.mxu0 %v17117_v12  ;;  %11527 = vmatprep.subr.bf16.mxu1 %v14922_v38 }
 0x405   :  { %11529 = vmatpush1.bf16.msra.mxu1 %v14934_v14  ;;  %11556 = vmatpush3.bf16.msra.mxu0 %v14940_v56 }
 0x406   :  { %11557 = vmatprep.subr.bf16.mxu0 %v17117_v12  ;;  %11531 = vmatprep.subr.bf16.mxu1 %v14950_v11 }
 0x409   :  { %11533 = vmatpush1.bf16.msra.mxu1 %v14962_v53  ;;  %11559 = vmatpush3.bf16.msra.mxu0 %v14968_v55 }
 0x40a   :  { %11560 = vmatprep.subr.bf16.mxu0 %v17117_v12  ;;  %11535 = vmatprep.subr.bf16.mxu1 %v14978_v51 }
 0x40d   :  { %11537 = vmatpush1.bf16.msra.mxu1 %v14990_v39  ;;  %11562 = vmatpush3.bf16.msra.mxu0 %v14996_v63 }
 0x40e   :  { %11563 = vmatprep.subr.bf16.mxu0 %v17117_v12  ;;  %11539 = vmatprep.subr.bf16.mxu1 %v15006_v25 }
 0x411   :  { %11541 = vmatpush1.bf16.msra.mxu1 %v15018_v33  ;;  %11565 = vmatpush3.bf16.msra.mxu0 %v15024_v9 }
 0x412   :  { %11598 = vmatprep.subr.bf16.mxu0 %v17117_v12  ;;  %11567 = vmatprep.subr.bf16.mxu1 %v15028_v59 }
 0x4a2   :  { %v2262_v26 = vpop.f32.mrb[14].mxu1  ;;  %v2333_v37 = vpop.f32.mrb[26].mxu0 }
 0x4a3   :  { %v2263_v48 = vadd.f32 %v2262_v26, %v2181_v36  ;;  %v2264_v24 = vpop.f32.mrb[15].mxu1  ;;  %v10060_v58 = vpop.f32.mrb[27].mxu0  ;;  %v2334_v17 = vadd.f32 %v2333_v37, %v2189_v13  ;;  %v2826_v13 = vld [vmem:[#allocation11 + $0x50] sm:$0xff] }
 0x4a4   :  { %v2265_v50 = vadd.f32 %v2264_v24, %v2185_v60  ;;  %v2125_v58 = vld [vmem:[#allocation2 + $0x48] sm:$0x3] }
 0x4a5   :  { %v2547_v15 = vrot.slane %v2263_v48, 2  ;;  %v2567_v30 = vrot.slane %v2334_v17, 2 }
 0x4a6   :  { %v2557_v34 = vrot.slane %v2265_v50, 2 }
 0x4a7   :  { %v2549_v2 = vadd.f32 %v2547_v15, %v2122_v31  ;;  %v2126_v31 = vld [vmem:[#allocation2 + $0x50] sm:$0x3] }
 0x4a8   :  { %v2559_v61 = vadd.f32 %v2557_v34, %v2123_v42 }
 0x4a9   :  { %v9184_v4 = vmul.f32 -1.442695, %v2549_v2 }
 0x4aa   :  { %v9185_v43 = vmul.f32 -1.442695, %v2559_v61 }
 0x4ab   :  { %13200 = vpow2.f32 %v9184_v4  ;;  %v2816_v4 = vld [vmem:[#allocation11] sm:$0xff] }
 0x4ac   :  { %13202 = vpow2.f32 %v9185_v43 }
 0x4b5   :  { %v13201_v5 = vpop.eup %13200 }
 0x4b6   :  { %v13203_v46 = vpop.eup %13202  ;;  %v2553_v52 = vadd.f32 1.0, %v13201_v5  ;;  %v2819_v5 = vld [vmem:[#allocation11 + $0x18] sm:$0xff] }
 0x4b7   :  { %v2563_v44 = vadd.f32 1.0, %v13203_v46  ;;  %v2818_v46 = vld [vmem:[#allocation11 + $0x10] sm:$0xff] }
 0x4b8   :  { %13204 = vrcp.f32 %v2553_v52  ;;  %v2821_v52 = vld [vmem:[#allocation11 + $0x28] sm:$0xff] }
 0x4b9   :  { %13206 = vrcp.f32 %v2563_v44  ;;  %v2823_v44 = vld [vmem:[#allocation11 + $0x38] sm:$0xff] }
 0x4c2   :  { %v13205_v40 = vpop.eup %13204 }
 0x4c3   :  { %v13207_v28 = vpop.eup %13206  ;;  %v2569_v22 = vmul.f32 %v13205_v40, %v2567_v30  ;;  %v15050_v30 = vpack.c.bf16 %v2819_v5, %v2816_v4  ;;  %v15052_v40 = vpack.c.bf16 %v2821_v52, %v2818_v46  ;;  %v2834_v4 = vld [vmem:[#allocation11 + $0x90] sm:$0xff]  ;;  %v2837_v46 = vld [vmem:[#allocation11 + $0xa8] sm:$0xff]  ;;  %v2836_v52 = vld [vmem:[#allocation11 + $0xa0] sm:$0xff] }
 0x4c4   :  { %v2576_v20 = vmul.f32 %v13207_v28, %v2574_v21  ;;  %v2572_v42 = vsub.f32 1.0, %v13207_v28  ;;  %v2822_v21 = vld [vmem:[#allocation11 + $0x30] sm:$0xff]  ;;  %v2825_v28 = vld [vmem:[#allocation11 + $0x48] sm:$0xff] }
 0x4c5   :  { %v2570_v36 = vadd.f32 %v2569_v22, %v2124_v41  ;;  %v2824_v41 = vld [vmem:[#allocation11 + $0x40] sm:$0xff] }
 0x4c6   :  { %v2471_v60 = vpop.f32.mrb[16].mxu1  ;;  %v15048_v26 = vpop.f32.mrb[28].mxu0 }
 0x4c7   :  { %13208 = vtanh.f32 %v2570_v36  ;;  %v2472_v37 = vadd.f32 %v2471_v60, %v2390_v18  ;;  %v2473_v48 = vpop.f32.mrb[17].mxu1  ;;  %v10095_v24 = vpop.f32.mrb[29].mxu0  ;;  %v15056_v18 = vpack.c.bf16 %v2826_v13, %v2823_v44  ;;  %v2829_v60 = vld [vmem:[#allocation11 + $0x68] sm:$0xff]  ;;  %v2839_v44 = vld [vmem:[#allocation11 + $0xb8] sm:$0xff]  ;;  %v2398_v13 = vrot.slane %v15041_v57, %v14303_v54  ;;  %v2842_v57 = vld [vmem:[#allocation11 + $0xd0] sm:$0xff] }
 0x4c8   :  { %v2474_v35 = vadd.f32 %v2473_v48, %v2394_v47  ;;  %v2827_v47 = vld [vmem:[#allocation11 + $0x58] sm:$0xff] }
 0x4c9   :  { %v2578_v50 = vadd.f32 %v2472_v37, %v2125_v58  ;;  %v2832_v37 = vld [vmem:[#allocation11 + $0x80] sm:$0xff]  ;;  %v15064_v24 = vpack.c.bf16 %v2827_v47, %v2824_v41  ;;  %v15087_v41 = vpack.c.bf16 %v2837_v46, %v2834_v4  ;;  %v15089_v47 = vpack.c.bf16 %v2839_v44, %v2836_v52  ;;  %v2846_v46 = vld [vmem:[#allocation11 + $0xf0] sm:$0xff]  ;;  %v2849_v52 = vld [vmem:[#allocation11 + $0x108] sm:$0xff] }
 0x4ca   :  { %v2585_v34 = vadd.f32 %v2474_v35, %v2126_v31  ;;  %v2828_v58 = vld [vmem:[#allocation11 + $0x60] sm:$0xff]  ;;  %v15068_v35 = vpack.c.bf16 %v2832_v37, %v2829_v60  ;;  %v2833_v31 = vld [vmem:[#allocation11 + $0x88] sm:$0xff]  ;;  %v2843_v37 = vld [vmem:[#allocation11 + $0xd8] sm:$0xff] }
 0x4cb   :  { %v9186_v15 = vmul.f32 -1.442695, %v2578_v50  ;;  %v2831_v50 = vld [vmem:[#allocation11 + $0x78] sm:$0xff]  ;;  %v2848_v44 = vld [vmem:[#allocation11 + $0x100] sm:$0xff] }
 0x4cc   :  { %v9187_v2 = vmul.f32 -1.442695, %v2585_v34  ;;  %v2835_v34 = vld [vmem:[#allocation11 + $0x98] sm:$0xff] }
 0x4cd   :  { %13210 = vpow2.f32 %v9186_v15  ;;  %v2830_v15 = vld [vmem:[#allocation11 + $0x70] sm:$0xff] }
 0x4ce   :  { %13212 = vpow2.f32 %v9187_v2  ;;  %v2838_v2 = vld [vmem:[#allocation11 + $0xb0] sm:$0xff] }
 0x4cf   :  { %v15081_v5 = vpack.c.bf16 %v2838_v2, %v2835_v34  ;;  %v2127_v34 = vld [vmem:[#allocation2 + $0x58] sm:$0x3] }
 0x4d1   :  { %v13209_v61 = vpop.eup %13208 }
 0x4d2   :  { %v2573_v43 = vmul.f32 %v13209_v61, %v2572_v42  ;;  %v15075_v42 = vpack.c.bf16 %v2831_v50, %v2828_v58  ;;  %v15077_v61 = vpack.c.bf16 %v2833_v31, %v2830_v15  ;;  %v2543_v58 = vadd.f32 %v15048_v26, %v2398_v13  ;;  %v2847_v50 = vld [vmem:[#allocation11 + $0xf8] sm:$0xff]  ;;  %v2850_v15 = vld [vmem:[#allocation11 + $0x110] sm:$0xff] }
 0x4d3   :  { %v15104_v26 = vpack.c.bf16 %v2850_v15, %v2847_v50  ;;  %v2851_v13 = vld [vmem:[#allocation11 + $0x118] sm:$0xff]  ;;  %v2854_v50 = vld [vmem:[#allocation11 + $0x130] sm:$0xff]  ;;  %v2857_v15 = vld [vmem:[#allocation11 + $0x148] sm:$0xff] }
 0x4d4   :  { %v2577_v17 = vadd.f32 %v2576_v20, %v2573_v43  ;;  %v15062_v20 = vpack.c.bf16 %v2825_v28, %v2822_v21  ;;  %v2844_v21 = vld [vmem:[#allocation11 + $0xe0] sm:$0xff] }
 0x4d6   :  { %2599 = vst [vmem:[#allocation3] sm:$0xc0] %v2577_v17  ;;  %v15054_v22 = vrot.slane %v2577_v17, 6  ;;  %v2841_v17 = vld [vmem:[#allocation11 + $0xc8] sm:$0xff] }
 0x4d7   :  { %v13211_v36 = vpop.eup %13210  ;;  %v15093_v60 = vpack.c.bf16 %v2844_v21, %v2841_v17  ;;  %v2853_v21 = vld [vmem:[#allocation11 + $0x128] sm:$0xff] }
 0x4d8   :  { %v2582_v48 = vadd.f32 1.0, %v13211_v36  ;;  %2740 = vmatmul.mubr.f32.vlgmr.msra.gmra.mrb[18].mxu1 %v15054_v22  ;;  %10129 = vmatmul.mubr.f32.vlgmr.msra.gmra.mrb[30].mxu0 %v15054_v22  ;;  %v13213_v43 = vpop.eup %13212  ;;  %v2840_v36 = vld [vmem:[#allocation11 + $0xc0] sm:$0xff] }
 0x4d9   :  { %11569 = vmatpush1.bf16.msra.mxu1 %v15050_v30  ;;  %11600 = vmatpush3.bf16.msra.mxu0 %v15052_v40  ;;  %v2589_v28 = vadd.f32 1.0, %v13213_v43  ;;  %v15098_v4 = vpack.c.bf16 %v2843_v37, %v2840_v36  ;;  %v15108_v36 = vpack.c.bf16 %v2849_v52, %v2846_v46  ;;  %v15110_v37 = vpack.c.bf16 %v2851_v13, %v2848_v44  ;;  %v2858_v52 = vld [vmem:[#allocation11 + $0x150] sm:$0xff]  ;;  %v2861_v13 = vld [vmem:[#allocation11 + $0x168] sm:$0xff] }
 0x4da   :  { %13214 = vrcp.f32 %v2582_v48  ;;  %11571 = vmatprep.subr.bf16.mxu1 %v15056_v18  ;;  %11601 = vmatprep.subr.bf16.mxu0 %v17117_v12  ;;  %v2845_v48 = vld [vmem:[#allocation11 + $0xe8] sm:$0xff]  ;;  %v15120_v46 = vpack.c.bf16 %v2857_v15, %v2854_v50 }
 0x4db   :  { %2945 = vmatprep.mubr.f32.mxu1 %v17158_v45  ;;  %10163 = vmatprep.mubr.msk.f32.mxu0 %vm13638_vm2, %v17158_v45  ;;  %13216 = vrcp.f32 %v2589_v28  ;;  %v15100_v43 = vpack.c.bf16 %v2845_v48, %v2842_v57  ;;  %v2856_v28 = vld [vmem:[#allocation11 + $0x140] sm:$0xff]  ;;  %17159 = vst [vmem:[#allocation28_spill] sm:$0xff] %v15110_v37 }
 0x4dc   :  { %v2852_v57 = vld [vmem:[#allocation11 + $0x120] sm:$0xff]  ;;  %v15114_v48 = vpack.c.bf16 %v2856_v28, %v2853_v21  ;;  %v2863_v21 = vld [vmem:[#allocation11 + $0x178] sm:$0xff] }
 0x4dd   :  { %11573 = vmatpush1.bf16.msra.mxu1 %v15062_v20  ;;  %11603 = vmatpush3.bf16.msra.mxu0 %v15064_v24 }
 0x4de   :  { %11575 = vmatprep.subr.bf16.mxu1 %v15068_v35  ;;  %11604 = vmatprep.subr.bf16.mxu0 %v17117_v12 }
 0x4e1   :  { %11577 = vmatpush1.bf16.msra.mxu1 %v15075_v42  ;;  %11606 = vmatpush3.bf16.msra.mxu0 %v15077_v61 }
 0x4e2   :  { %11579 = vmatprep.subr.bf16.mxu1 %v15081_v5  ;;  %11607 = vmatprep.subr.bf16.mxu0 %v17117_v12 }
 0x4e4   :  { %v13215_v31 = vpop.eup %13214 }
 0x4e5   :  { %v2592_v2 = vmul.f32 %v13215_v31, %v2543_v58  ;;  %11581 = vmatpush1.bf16.msra.mxu1 %v15087_v41  ;;  %11609 = vmatpush3.bf16.msra.mxu0 %v15089_v47  ;;  %v2855_v58 = vld [vmem:[#allocation11 + $0x138] sm:$0xff]  ;;  %v13217_v28 = vpop.eup %13216 }
 0x4e6   :  { %11583 = vmatprep.subr.bf16.mxu1 %v15093_v60  ;;  %11610 = vmatprep.subr.bf16.mxu0 %v17117_v12  ;;  %v2859_v31 = vld [vmem:[#allocation11 + $0x158] sm:$0xff] }
 0x4e7   :  { %v2593_v17 = vadd.f32 %v2592_v2, %v2127_v34  ;;  %v2862_v34 = vld [vmem:[#allocation11 + $0x170] sm:$0xff]  ;;  %v15118_v2 = vpack.c.bf16 %v2855_v58, %v2852_v57  ;;  %v2595_v58 = vsub.f32 1.0, %v13217_v28 }
 0x4e8   :  { %v15124_v44 = vpack.c.bf16 %v2862_v34, %v2859_v31  ;;  %v2597_v31 = vmul.f32 %v13217_v28, %v14798_v23  ;;  %v2655_v23 = vld [vmem:[%s17086_s10] sm:$0x7] }
 0x4e9   :  { %13218 = vtanh.f32 %v2593_v17  ;;  %11585 = vmatpush1.bf16.msra.mxu1 %v15098_v4  ;;  %11612 = vmatpush3.bf16.msra.mxu0 %v15100_v43  ;;  %v2860_v17 = vld [vmem:[#allocation11 + $0x160] sm:$0xff] }
 0x4ea   :  { %11587 = vmatprep.subr.bf16.mxu1 %v15104_v26  ;;  %11613 = vmatprep.subr.bf16.mxu0 %v17117_v12  ;;  %v15130_v57 = vpack.c.bf16 %v2863_v21, %v2860_v17 }
 0x4ed   :  { %11589 = vmatpush1.bf16.msra.mxu1 %v15108_v36  ;;  %11615 = vmatpush3.bf16.msra.mxu0 %v15110_v37  ;;  %v15128_v37 = vpack.c.bf16 %v2861_v13, %v2858_v52  ;;  %v2603_v52 = vld [vmem:[#allocation2 + $0x40] sm:$0x3] }
 0x4ee   :  { %11591 = vmatprep.subr.bf16.mxu1 %v15114_v48  ;;  %11616 = vmatprep.subr.bf16.mxu0 %v17117_v12 }
 0x4f1   :  { %11593 = vmatpush1.bf16.msra.mxu1 %v15118_v2  ;;  %11618 = vmatpush3.bf16.msra.mxu0 %v15120_v46 }
 0x4f2   :  { %11595 = vmatprep.subr.bf16.mxu1 %v15124_v44  ;;  %11619 = vmatprep.subr.bf16.mxu0 %v17117_v12 }
 0x4f3   :  { %v13219_v50 = vpop.eup %13218 }
 0x4f4   :  { %v2596_v15 = vmul.f32 %v13219_v50, %v2595_v58 }
 0x4f5   :  { %11597 = vmatpush1.bf16.msra.mxu1 %v15128_v37  ;;  %11621 = vmatpush3.bf16.msra.mxu0 %v15130_v57 }
 0x4f6   :  { %v15137_v34 = vadd.f32 %v2597_v31, %v2596_v15  ;;  %11623 = vmatprep.subr.bf16.mxu1 %v14811_v29  ;;  %11654 = vmatprep.subr.bf16.mxu0 %v17117_v12  ;;  %v2660_v29 = vrot.slane %v2655_v23, %v14293_v10 }
 0x4f8   :  { %2600 = vst [vmem:[#allocation3 + $0x18] sm:$0x3] %v15137_v34  ;;  %2946 = vmatmul.mubr.f32.vlgmr.msra.gmra.mrb[20].mxu1 %v15137_v34  ;;  %10164 = vmatmul.mubr.f32.vlgmr.msra.gmra.mrb[32].mxu0 %v15137_v34 }
 0x4f9   :  { %11625 = vmatpush1.bf16.msra.mxu1 %v14822_v0  ;;  %11656 = vmatpush3.bf16.msra.mxu0 %v14828_v27  ;;  %v2664_v0 = vrot.slane %v2655_v23, %v14298_v16 }
 0x4fa   :  { %11627 = vmatprep.subr.bf16.mxu1 %v14838_v8  ;;  %11657 = vmatprep.subr.bf16.mxu0 %v17117_v12 }
 0x4fb   :  { %3213 = vmatprep.mubr.f32.mxu1 %v17158_v45  ;;  %10198 = vmatprep.mubr.msk.f32.mxu0 %vm13638_vm2, %v17158_v45 }
 0x4fd   :  { %11629 = vmatpush1.bf16.msra.mxu1 %v14850_v62  ;;  %11659 = vmatpush3.bf16.msra.mxu0 %v14856_v32 }
 0x4fe   :  { %11631 = vmatprep.subr.bf16.mxu1 %v14866_v3  ;;  %11660 = vmatprep.subr.bf16.mxu0 %v17117_v12 }
 0x501   :  { %11633 = vmatpush1.bf16.msra.mxu1 %v14878_v49  ;;  %11662 = vmatpush3.bf16.msra.mxu0 %v14884_v1  ;;  %v2601_v49 = vld [vmem:[#allocation2 + $0x30] sm:$0x3] }
 0x502   :  { %11635 = vmatprep.subr.bf16.mxu1 %v14894_v7  ;;  %11663 = vmatprep.subr.bf16.mxu0 %v17117_v12 }
 0x505   :  { %11637 = vmatpush1.bf16.msra.mxu1 %v14906_v19  ;;  %11665 = vmatpush3.bf16.msra.mxu0 %v14912_v6  ;;  %v2602_v6 = vld [vmem:[#allocation2 + $0x38] sm:$0x3] }
 0x506   :  { %11639 = vmatprep.subr.bf16.mxu1 %v14922_v38  ;;  %11666 = vmatprep.subr.bf16.mxu0 %v17117_v12 }
 0x509   :  { %11641 = vmatpush1.bf16.msra.mxu1 %v14934_v14  ;;  %11668 = vmatpush3.bf16.msra.mxu0 %v14940_v56 }
 0x50a   :  { %11643 = vmatprep.subr.bf16.mxu1 %v14950_v11  ;;  %11669 = vmatprep.subr.bf16.mxu0 %v17117_v12 }
 0x50d   :  { %11645 = vmatpush1.bf16.msra.mxu1 %v14962_v53  ;;  %11671 = vmatpush3.bf16.msra.mxu0 %v14968_v55  ;;  %v2668_v55 = vrot.slane %v2655_v23, %v14303_v54  ;;  %v2604_v23 = vld [vmem:[#allocation2 + $0x18] sm:$0xc0] }
 0x50e   :  { %11647 = vmatprep.subr.bf16.mxu1 %v14978_v51  ;;  %11672 = vmatprep.subr.bf16.mxu0 %v17117_v12  ;;  %v2864_v51 = vld [vmem:[%s17087_s11] sm:$0x7] }
 0x511   :  { %11649 = vmatpush1.bf16.msra.mxu1 %v14990_v39  ;;  %11674 = vmatpush3.bf16.msra.mxu0 %v14996_v63 }
 0x512   :  { %11651 = vmatprep.subr.bf16.mxu1 %v15006_v25  ;;  %11675 = vmatprep.subr.bf16.mxu0 %v17117_v12  ;;  %v2869_v25 = vrot.slane %v2864_v51, %v14293_v10 }
 0x515   :  { %11653 = vmatpush1.bf16.msra.mxu1 %v15018_v33  ;;  %11677 = vmatpush3.bf16.msra.mxu0 %v15024_v9  ;;  %v2873_v9 = vrot.slane %v2864_v51, %v14298_v16 }
 0x516   :  { %11679 = vmatprep.subr.bf16.mxu1 %v15028_v59  ;;  %11710 = vmatprep.subr.bf16.mxu0 %v17117_v12 }
 0x5ab   :  { %v2741_v27 = vpop.f32.mrb[18].mxu1  ;;  %v2812_v8 = vpop.f32.mrb[30].mxu0 }
 0x5ac   :  { %v2742_v62 = vadd.f32 %v2741_v27, %v2660_v29  ;;  %v2743_v32 = vpop.f32.mrb[19].mxu1  ;;  %v10130_v3 = vpop.f32.mrb[31].mxu0  ;;  %v2813_v63 = vadd.f32 %v2812_v8, %v2668_v55  ;;  %v2605_v27 = vld [vmem:[#allocation2 + $0x20] sm:$0xc0]  ;;  %v3579_v55 = vld [vmem:[%s17084_s8 + $0x38] sm:$0xff] }
 0x5ad   :  { %v2744_v1 = vadd.f32 %v2743_v32, %v2664_v0 }
 0x5ae   :  { %v3022_v7 = vadd.f32 %v2742_v62, %v2601_v49 }
 0x5af   :  { %v3029_v38 = vadd.f32 %v2744_v1, %v2602_v6 }
 0x5b0   :  { %v9188_v19 = vmul.f32 -1.442695, %v3022_v7 }
 0x5b1   :  { %v9189_v14 = vmul.f32 -1.442695, %v3029_v38 }
 0x5b2   :  { %13220 = vpow2.f32 %v9188_v19 }
 0x5b3   :  { %13222 = vpow2.f32 %v9189_v14 }
 0x5bc   :  { %v13221_v56 = vpop.eup %13220 }
 0x5bd   :  { %v3026_v11 = vadd.f32 1.0, %v13221_v56  ;;  %v13223_v53 = vpop.eup %13222 }
 0x5be   :  { %v3033_v39 = vadd.f32 1.0, %v13223_v53 }
 0x5bf   :  { %13224 = vrcp.f32 %v3026_v11  ;;  %v2877_v11 = vrot.slane %v2864_v51, %v14303_v54  ;;  %v3582_v51 = vld [vmem:[%s17084_s8 + $0x50] sm:$0xff] }
 0x5c0   :  { %13226 = vrcp.f32 %v3033_v39  ;;  %v15272_v39 = vpack.c.bf16 %v3582_v51, %v3579_v55  ;;  %v3615_v55 = vld [vmem:[%s17084_s8 + $0x158] sm:$0xff]  ;;  %v3618_v51 = vld [vmem:[%s17084_s8 + $0x170] sm:$0xff] }
 0x5c9   :  { %v13225_v33 = vpop.eup %13224 }
 0x5ca   :  { %v3036_v59 = vmul.f32 %v13225_v33, %v2813_v63  ;;  %v13227_v3 = vpop.eup %13226  ;;  %v3578_v63 = vld [vmem:[%s17084_s8 + $0x30] sm:$0xff]  ;;  %v3580_v33 = vld [vmem:[%s17084_s8 + $0x40] sm:$0xff] }
 0x5cb   :  { %v2947_v13 = vpop.f32.mrb[20].mxu1  ;;  %v3018_v17 = vpop.f32.mrb[32].mxu0  ;;  %v3039_v49 = vsub.f32 1.0, %v13227_v3  ;;  %v3041_v19 = vmul.f32 %v13227_v3, %v15054_v22 }
 0x5cc   :  { %v3037_v21 = vadd.f32 %v3036_v59, %v2603_v52  ;;  %v2948_v28 = vadd.f32 %v2947_v13, %v2869_v25  ;;  %v2949_v58 = vpop.f32.mrb[21].mxu1  ;;  %v10165_v50 = vpop.f32.mrb[33].mxu0  ;;  %v3581_v25 = vld [vmem:[%s17084_s8 + $0x48] sm:$0xff]  ;;  %v3583_v59 = vld [vmem:[%s17084_s8 + $0x58] sm:$0xff] }
 0x5cd   :  { %v2950_v15 = vadd.f32 %v2949_v58, %v2873_v9  ;;  %v15284_v9 = vpack.c.bf16 %v3581_v25, %v3578_v63  ;;  %v15290_v52 = vpack.c.bf16 %v3583_v59, %v3580_v33  ;;  %v3585_v13 = vld [vmem:[%s17084_s8 + $0x68] sm:$0xff]  ;;  %v3587_v58 = vld [vmem:[%s17084_s8 + $0x78] sm:$0xff]  ;;  %v3586_v50 = vld [vmem:[%s17084_s8 + $0x70] sm:$0xff]  ;;  %v15440_v63 = vpack.c.bf16 %v3618_v51, %v3615_v55 }
 0x5ce   :  { %13228 = vtanh.f32 %v3037_v21  ;;  %v3044_v31 = vrot.slane %v2948_v28, 2  ;;  %v3584_v28 = vld [vmem:[%s17084_s8 + $0x60] sm:$0xff]  ;;  %v3614_v25 = vld [vmem:[%s17084_s8 + $0x150] sm:$0xff]  ;;  %v3617_v33 = vld [vmem:[%s17084_s8 + $0x168] sm:$0xff] }
 0x5cf   :  { %v3054_v29 = vrot.slane %v2950_v15, 2  ;;  %v15312_v15 = vpack.c.bf16 %v3587_v58, %v3584_v28  ;;  %v3616_v59 = vld [vmem:[%s17084_s8 + $0x160] sm:$0xff]  ;;  %v3782_v58 = vld [vmem:[#allocation11 + $0x8] sm:$0xff] }
 0x5d0   :  { %v3046_v0 = vadd.f32 %v3044_v31, %v2604_v23  ;;  %v3589_v31 = vld [vmem:[%s17084_s8 + $0x88] sm:$0xff] }
 0x5d1   :  { %v3056_v8 = vadd.f32 %v3054_v29, %v2605_v27  ;;  %v15318_v23 = vpack.c.bf16 %v3589_v31, %v3586_v50  ;;  %v3591_v29 = vld [vmem:[%s17084_s8 + $0x98] sm:$0xff]  ;;  %v3785_v50 = vld [vmem:[#allocation11 + $0x20] sm:$0xff] }
 0x5d2   :  { %v9190_v62 = vmul.f32 -1.442695, %v3046_v0  ;;  %v3594_v0 = vld [vmem:[%s17084_s8 + $0xb0] sm:$0xff]  ;;  %v15463_v31 = vpack.c.bf16 %v3785_v50, %v3782_v58  ;;  %v3080_v58 = vld [vmem:[#allocation2 + $0x40] sm:$0xc] }
 0x5d3   :  { %v9191_v32 = vmul.f32 -1.442695, %v3056_v8  ;;  %v15328_v27 = vpack.c.bf16 %v3594_v0, %v3591_v29  ;;  %v3590_v8 = vld [vmem:[%s17084_s8 + $0x90] sm:$0xff]  ;;  %v3132_v29 = vld [vmem:[%s17086_s10] sm:$0x7] }
 0x5d4   :  { %13230 = vpow2.f32 %v9190_v62  ;;  %v3593_v62 = vld [vmem:[%s17084_s8 + $0xa8] sm:$0xff]  ;;  %v3137_v0 = vrot.slane %v3132_v29, %v14293_v10 }
 0x5d5   :  { %13232 = vpow2.f32 %v9191_v32  ;;  %v3592_v32 = vld [vmem:[%s17084_s8 + $0xa0] sm:$0xff]  ;;  %v15340_v3 = vpack.c.bf16 %v3593_v62, %v3590_v8  ;;  %v3141_v8 = vrot.slane %v3132_v29, %v14298_v16 }
 0x5d8   :  { %v13229_v1 = vpop.eup %13228 }
 0x5d9   :  { %v3040_v7 = vmul.f32 %v13229_v1, %v3039_v49  ;;  %v3595_v49 = vld [vmem:[%s17084_s8 + $0xb8] sm:$0xff] }
 0x5da   :  { %v15346_v1 = vpack.c.bf16 %v3595_v49, %v3592_v32 }
 0x5db   :  { %v15191_v6 = vadd.f32 %v3041_v19, %v3040_v7  ;;  %v3597_v7 = vld [vmem:[%s17084_s8 + $0xc8] sm:$0xff]  ;;  %v3600_v19 = vld [vmem:[%s17084_s8 + $0xe0] sm:$0xff] }
 0x5dd   :  { %3076 = vst [vmem:[#allocation3 + $0x10] sm:$0x3] %v15191_v6  ;;  %3214 = vmatmul.mubr.f32.vlgmr.msra.gmra.mrb[22].mxu1 %v15191_v6  ;;  %10199 = vmatmul.mubr.f32.vlgmr.msra.gmra.mrb[34].mxu0 %v15191_v6 }
 0x5de   :  { %v13231_v38 = vpop.eup %13230  ;;  %11681 = vmatpush1.bf16.msra.mxu1 %v15050_v30  ;;  %11712 = vmatpush3.bf16.msra.mxu0 %v15052_v40  ;;  %v3019_v30 = vadd.f32 %v3018_v17, %v2877_v11  ;;  %v3588_v17 = vld [vmem:[%s17084_s8 + $0x80] sm:$0xff] }
 0x5df   :  { %v13233_v14 = vpop.eup %13232  ;;  %v3050_v56 = vadd.f32 1.0, %v13231_v38  ;;  %11683 = vmatprep.subr.bf16.mxu1 %v15056_v18  ;;  %11713 = vmatprep.subr.bf16.mxu0 %v17117_v12  ;;  %v15300_v21 = vpack.c.bf16 %v3588_v17, %v3585_v13  ;;  %v15356_v38 = vpack.c.bf16 %v3600_v19, %v3597_v7  ;;  %v15452_v13 = vpack.c.bf16 %v3617_v33, %v3614_v25  ;;  %v3619_v17 = vld [vmem:[%s17084_s8 + $0x178] sm:$0xff] }
 0x5e0   :  { %v3060_v22 = vadd.f32 1.0, %v13233_v14  ;;  %3422 = vmatprep.mubr.f32.mxu1 %v17158_v45  ;;  %10233 = vmatprep.mubr.msk.f32.mxu0 %vm13638_vm2, %v17158_v45  ;;  %v3064_v40 = vrot.slane %v3019_v30, 2  ;;  %v3596_v14 = vld [vmem:[%s17084_s8 + $0xc0] sm:$0xff]  ;;  %v3601_v30 = vld [vmem:[%s17084_s8 + $0xe8] sm:$0xff]  ;;  %v15458_v28 = vpack.c.bf16 %v3619_v17, %v3616_v59  ;;  %v3528_v25 = vrot.slane %v15191_v6, 6 }
 0x5e1   :  { %13234 = vrcp.f32 %v3050_v56  ;;  %v3599_v56 = vld [vmem:[%s17084_s8 + $0xd8] sm:$0xff] }
 0x5e2   :  { %13236 = vrcp.f32 %v3060_v22  ;;  %11685 = vmatpush1.bf16.msra.mxu1 %v15062_v20  ;;  %11715 = vmatpush3.bf16.msra.mxu0 %v15064_v24  ;;  %v3072_v20 = vrot.slane %v15137_v34, 2  ;;  %v3598_v22 = vld [vmem:[%s17084_s8 + $0xd0] sm:$0xff]  ;;  %v15368_v11 = vpack.c.bf16 %v3599_v56, %v3596_v14 }
 0x5e3   :  { %11687 = vmatprep.subr.bf16.mxu1 %v15068_v35  ;;  %11716 = vmatprep.subr.bf16.mxu0 %v17117_v12 }
 0x5e6   :  { %11689 = vmatpush1.bf16.msra.mxu1 %v15075_v42  ;;  %11718 = vmatpush3.bf16.msra.mxu0 %v15077_v61  ;;  %v2606_v42 = vld [vmem:[#allocation2 + $0x28] sm:$0xc0] }
 0x5e7   :  { %11691 = vmatprep.subr.bf16.mxu1 %v15081_v5  ;;  %11719 = vmatprep.subr.bf16.mxu0 %v17117_v12  ;;  %v17160_v5 = vld [vmem:[#allocation28_spill] sm:$0xff] }
 0x5ea   :  { %11693 = vmatpush1.bf16.msra.mxu1 %v15087_v41  ;;  %11721 = vmatpush3.bf16.msra.mxu0 %v15089_v47 }
 0x5eb   :  { %v13235_v18 = vpop.eup %13234  ;;  %11695 = vmatprep.subr.bf16.mxu1 %v15093_v60  ;;  %11722 = vmatprep.subr.bf16.mxu0 %v17117_v12 }
 0x5ec   :  { %v13237_v24 = vpop.eup %13236  ;;  %v3066_v35 = vmul.f32 %v13235_v18, %v3064_v40  ;;  %v15374_v40 = vpack.c.bf16 %v3601_v30, %v3598_v22  ;;  %v3603_v18 = vld [vmem:[%s17084_s8 + $0xf8] sm:$0xff]  ;;  %v3078_v22 = vld [vmem:[#allocation2 + $0x30] sm:$0xc] }
 0x5ed   :  { %v3074_v61 = vmul.f32 %v13237_v24, %v3072_v20  ;;  %v3069_v41 = vsub.f32 1.0, %v13237_v24  ;;  %v3606_v20 = vld [vmem:[%s17084_s8 + $0x110] sm:$0xff] }
 0x5ee   :  { %v3067_v53 = vadd.f32 %v3066_v35, %v2606_v42  ;;  %11697 = vmatpush1.bf16.msra.mxu1 %v15098_v4  ;;  %11724 = vmatpush3.bf16.msra.mxu0 %v15100_v43  ;;  %v15384_v24 = vpack.c.bf16 %v3606_v20, %v3603_v18  ;;  %v3602_v35 = vld [vmem:[%s17084_s8 + $0xf0] sm:$0xff]  ;;  %v3605_v42 = vld [vmem:[%s17084_s8 + $0x108] sm:$0xff]  ;;  %v3079_v20 = vld [vmem:[#allocation2 + $0x38] sm:$0xc] }
 0x5ef   :  { %11699 = vmatprep.subr.bf16.mxu1 %v15104_v26  ;;  %11725 = vmatprep.subr.bf16.mxu0 %v17117_v12  ;;  %v3573_v26 = vld [vmem:[%s17084_s8 + $0x8] sm:$0xff] }
 0x5f0   :  { %13238 = vtanh.f32 %v3067_v53  ;;  %v15396_v53 = vpack.c.bf16 %v3605_v42, %v3602_v35 }
 0x5f2   :  { %11701 = vmatpush1.bf16.msra.mxu1 %v15108_v36  ;;  %11727 = vmatpush3.bf16.msra.mxu0 %v17160_v5  ;;  %v3576_v36 = vld [vmem:[%s17084_s8 + $0x20] sm:$0xff]  ;;  %v3607_v5 = vld [vmem:[%s17084_s8 + $0x118] sm:$0xff] }
 0x5f3   :  { %11703 = vmatprep.subr.bf16.mxu1 %v15114_v48  ;;  %11728 = vmatprep.subr.bf16.mxu0 %v17117_v12  ;;  %v3572_v48 = vld [vmem:[%s17084_s8] sm:$0xff] }
 0x5f6   :  { %11705 = vmatpush1.bf16.msra.mxu1 %v15118_v2  ;;  %11730 = vmatpush3.bf16.msra.mxu0 %v15120_v46  ;;  %v3575_v2 = vld [vmem:[%s17084_s8 + $0x18] sm:$0xff]  ;;  %v3574_v46 = vld [vmem:[%s17084_s8 + $0x10] sm:$0xff] }
 0x5f7   :  { %11707 = vmatprep.subr.bf16.mxu1 %v15124_v44  ;;  %11731 = vmatprep.subr.bf16.mxu0 %v17117_v12  ;;  %v15256_v44 = vpack.c.bf16 %v3575_v2, %v3572_v48  ;;  %v3610_v48 = vld [vmem:[%s17084_s8 + $0x130] sm:$0xff] }
 0x5fa   :  { %v13239_v47 = vpop.eup %13238  ;;  %11709 = vmatpush1.bf16.msra.mxu1 %v15128_v37  ;;  %11733 = vmatpush3.bf16.msra.mxu0 %v15130_v57  ;;  %v15245_v37 = vpack.c.bf16 %v3576_v36, %v3573_v26  ;;  %v3577_v57 = vld [vmem:[%s17084_s8 + $0x28] sm:$0xff]  ;;  %v3608_v26 = vld [vmem:[%s17084_s8 + $0x120] sm:$0xff]  ;;  %v3611_v36 = vld [vmem:[%s17084_s8 + $0x138] sm:$0xff] }
 0x5fb   :  { %v3070_v60 = vmul.f32 %v13239_v47, %v3069_v41  ;;  %11766 = vmatprep.subr.bf16.mxu0 %v17117_v12  ;;  %v15262_v34 = vpack.c.bf16 %v3577_v57, %v3574_v46  ;;  %v3609_v47 = vld [vmem:[%s17084_s8 + $0x128] sm:$0xff]  ;;  %v15424_v2 = vpack.c.bf16 %v3611_v36, %v3608_v26  ;;  %v3145_v36 = vrot.slane %v3132_v29, %v14303_v54 }
 0x5fc   :  { %11735 = vmatprep.subr.bf16.mxu1 %v15245_v37  ;;  %v3613_v46 = vld [vmem:[%s17084_s8 + $0x148] sm:$0xff] }
 0x5fd   :  { %v15232_v4 = vadd.f32 %v3074_v61, %v3070_v60  ;;  %v3604_v61 = vld [vmem:[%s17084_s8 + $0x100] sm:$0xff]  ;;  %v15430_v57 = vpack.c.bf16 %v3613_v46, %v3610_v48 }
 0x5fe   :  { %v15402_v41 = vpack.c.bf16 %v3607_v5, %v3604_v61  ;;  %v3612_v60 = vld [vmem:[%s17084_s8 + $0x140] sm:$0xff] }
 0x5ff   :  { %3077 = vst [vmem:[#allocation3 + $0x8] sm:$0xc0] %v15232_v4  ;;  %v3356_v43 = vrot.slane %v15232_v4, 6  ;;  %v15475_v46 = vld [vmem:[%s17087_s11] sm:$0x7] }
 0x600   :  { %v3343_v17 = vrot.slane %v15475_v46, %v14293_v10  ;;  %v3347_v50 = vrot.slane %v15475_v46, %v14298_v16 }
 0x601   :  { %3423 = vmatmul.mubr.f32.vlgmr.msra.gmra.mrb[24].mxu1 %v3356_v43  ;;  %10234 = vmatmul.mubr.f32.vlgmr.msra.gmra.mrb[36].mxu0 %v3356_v43  ;;  %v15412_v43 = vpack.c.bf16 %v3612_v60, %v3609_v47 }
 0x602   :  { %3704 = vmatprep.mubr.f32.mxu1 %v17158_v45  ;;  %10268 = vmatprep.mubr.msk.f32.mxu0 %vm13638_vm2, %v17158_v45 }
 0x603   :  { %11737 = vmatpush1.bf16.msra.mxu1 %v15256_v44  ;;  %11768 = vmatpush3.bf16.msra.mxu0 %v15262_v34 }
 0x604   :  { %11769 = vmatprep.subr.bf16.mxu0 %v17117_v12  ;;  %11739 = vmatprep.subr.bf16.mxu1 %v15272_v39 }
 0x607   :  { %11741 = vmatpush1.bf16.msra.mxu1 %v15284_v9  ;;  %11771 = vmatpush3.bf16.msra.mxu0 %v15290_v52 }
 0x608   :  { %11772 = vmatprep.subr.bf16.mxu0 %v17117_v12  ;;  %11743 = vmatprep.subr.bf16.mxu1 %v15300_v21 }
 0x60b   :  { %11745 = vmatpush1.bf16.msra.mxu1 %v15312_v15  ;;  %11774 = vmatpush3.bf16.msra.mxu0 %v15318_v23 }
 0x60c   :  { %11775 = vmatprep.subr.bf16.mxu0 %v17117_v12  ;;  %11747 = vmatprep.subr.bf16.mxu1 %v15328_v27 }
 0x60f   :  { %11749 = vmatpush1.bf16.msra.mxu1 %v15340_v3  ;;  %11777 = vmatpush3.bf16.msra.mxu0 %v15346_v1 }
 0x610   :  { %11778 = vmatprep.subr.bf16.mxu0 %v17117_v12  ;;  %11751 = vmatprep.subr.bf16.mxu1 %v15356_v38 }
 0x613   :  { %11753 = vmatpush1.bf16.msra.mxu1 %v15368_v11  ;;  %11780 = vmatpush3.bf16.msra.mxu0 %v15374_v40 }
 0x614   :  { %11781 = vmatprep.subr.bf16.mxu0 %v17117_v12  ;;  %11755 = vmatprep.subr.bf16.mxu1 %v15384_v24 }
 0x617   :  { %11757 = vmatpush1.bf16.msra.mxu1 %v15396_v53  ;;  %11783 = vmatpush3.bf16.msra.mxu0 %v15402_v41 }
 0x618   :  { %11784 = vmatprep.subr.bf16.mxu0 %v17117_v12  ;;  %11759 = vmatprep.subr.bf16.mxu1 %v15412_v43 }
 0x61b   :  { %11761 = vmatpush1.bf16.msra.mxu1 %v15424_v2  ;;  %11786 = vmatpush3.bf16.msra.mxu0 %v15430_v57 }
 0x61c   :  { %11787 = vmatprep.subr.bf16.mxu0 %v17117_v12  ;;  %11763 = vmatprep.subr.bf16.mxu1 %v15440_v63 }
 0x61f   :  { %11765 = vmatpush1.bf16.msra.mxu1 %v15452_v13  ;;  %11789 = vmatpush3.bf16.msra.mxu0 %v15458_v28 }
 0x620   :  { %11822 = vmatprep.subr.bf16.mxu0 %v17117_v12  ;;  %11791 = vmatprep.subr.bf16.mxu1 %v15463_v31 }
 0x6b0   :  { %v3215_v62 = vpop.f32.mrb[22].mxu1  ;;  %v3286_v32 = vpop.f32.mrb[34].mxu0 }
 0x6b1   :  { %v3216_v49 = vadd.f32 %v3215_v62, %v3137_v0  ;;  %v3217_v7 = vpop.f32.mrb[23].mxu1  ;;  %v10200_v19 = vpop.f32.mrb[35].mxu0  ;;  %v3287_v48 = vadd.f32 %v3286_v32, %v3145_v36  ;;  %v3786_v36 = vld [vmem:[#allocation11 + $0x28] sm:$0xff] }
 0x6b2   :  { %v3218_v14 = vadd.f32 %v3217_v7, %v3141_v8 }
 0x6b3   :  { %v3500_v56 = vrot.slane %v3216_v49, 6  ;;  %v3520_v55 = vrot.slane %v3287_v48, 6  ;;  %v3788_v48 = vld [vmem:[#allocation11 + $0x38] sm:$0xff] }
 0x6b4   :  { %v3510_v30 = vrot.slane %v3218_v14, 6  ;;  %v3081_v14 = vld [vmem:[#allocation2 + $0x18] sm:$0x30] }
 0x6b5   :  { %v3502_v18 = vadd.f32 %v3500_v56, %v3078_v22 }
 0x6b6   :  { %v3512_v35 = vadd.f32 %v3510_v30, %v3079_v20  ;;  %v3082_v30 = vld [vmem:[#allocation2 + $0x20] sm:$0x30] }
 0x6b7   :  { %v9192_v42 = vmul.f32 -1.442695, %v3502_v18 }
 0x6b8   :  { %v9193_v61 = vmul.f32 -1.442695, %v3512_v35 }
 0x6b9   :  { %13240 = vpow2.f32 %v9192_v42 }
 0x6ba   :  { %13242 = vpow2.f32 %v9193_v61 }
 0x6c3   :  { %v13241_v5 = vpop.eup %13240 }
 0x6c4   :  { %v13243_v47 = vpop.eup %13242  ;;  %v3506_v60 = vadd.f32 1.0, %v13241_v5  ;;  %v3781_v5 = vld [vmem:[#allocation11] sm:$0xff] }
 0x6c5   :  { %v3516_v26 = vadd.f32 1.0, %v13243_v47 }
 0x6c6   :  { %13244 = vrcp.f32 %v3506_v60  ;;  %v3784_v60 = vld [vmem:[#allocation11 + $0x18] sm:$0xff] }
 0x6c7   :  { %13246 = vrcp.f32 %v3516_v26  ;;  %v3783_v26 = vld [vmem:[#allocation11 + $0x10] sm:$0xff] }
 0x6d0   :  { %v13245_v51 = vpop.eup %13244 }
 0x6d1   :  { %v13247_v33 = vpop.eup %13246  ;;  %v3522_v59 = vmul.f32 %v13245_v51, %v3520_v55  ;;  %v3791_v55 = vld [vmem:[#allocation11 + $0x50] sm:$0xff] }
 0x6d2   :  { %v3530_v29 = vmul.f32 %v13247_v33, %v3528_v25  ;;  %v3525_v42 = vsub.f32 1.0, %v13247_v33  ;;  %v15486_v25 = vpack.c.bf16 %v3784_v60, %v3781_v5  ;;  %v15492_v33 = vpack.c.bf16 %v3791_v55, %v3788_v48  ;;  %v3802_v48 = vld [vmem:[#allocation11 + $0xa8] sm:$0xff]  ;;  %v3801_v55 = vld [vmem:[#allocation11 + $0xa0] sm:$0xff] }
 0x6d3   :  { %v3523_v0 = vadd.f32 %v3522_v59, %v3080_v58  ;;  %v15488_v59 = vpack.c.bf16 %v3786_v36, %v3783_v26  ;;  %v3351_v5 = vrot.slane %v15475_v46, %v14303_v54  ;;  %v3799_v26 = vld [vmem:[#allocation11 + $0x90] sm:$0xff]  ;;  %v3806_v46 = vld [vmem:[#allocation11 + $0xc8] sm:$0xff] }
 0x6d4   :  { %v3424_v8 = vpop.f32.mrb[24].mxu1  ;;  %v15482_v62 = vpop.f32.mrb[36].mxu0 }
 0x6d5   :  { %13248 = vtanh.f32 %v3523_v0  ;;  %v3425_v32 = vadd.f32 %v3424_v8, %v3343_v17  ;;  %v3426_v49 = vpop.f32.mrb[25].mxu1  ;;  %v10235_v7 = vpop.f32.mrb[37].mxu0  ;;  %v3787_v17 = vld [vmem:[#allocation11 + $0x30] sm:$0xff]  ;;  %v3789_v0 = vld [vmem:[#allocation11 + $0x40] sm:$0xff]  ;;  %v3792_v8 = vld [vmem:[#allocation11 + $0x58] sm:$0xff] }
 0x6d6   :  { %v3427_v19 = vadd.f32 %v3426_v49, %v3347_v50  ;;  %v3790_v50 = vld [vmem:[#allocation11 + $0x48] sm:$0xff]  ;;  %v3797_v49 = vld [vmem:[#allocation11 + $0x80] sm:$0xff] }
 0x6d7   :  { %v3533_v6 = vrot.slane %v3425_v32, 4  ;;  %v3794_v32 = vld [vmem:[#allocation11 + $0x68] sm:$0xff]  ;;  %v15496_v7 = vpack.c.bf16 %v3790_v50, %v3787_v17  ;;  %v3804_v17 = vld [vmem:[#allocation11 + $0xb8] sm:$0xff]  ;;  %v3496_v50 = vadd.f32 %v15482_v62, %v3351_v5  ;;  %v3815_v62 = vld [vmem:[#allocation11 + $0x110] sm:$0xff] }
 0x6d8   :  { %v3543_v56 = vrot.slane %v3427_v19, 4  ;;  %v15498_v19 = vpack.c.bf16 %v3792_v8, %v3789_v0  ;;  %v15522_v0 = vpack.c.bf16 %v3802_v48, %v3799_v26  ;;  %v15524_v8 = vpack.c.bf16 %v3804_v17, %v3801_v55  ;;  %v3814_v5 = vld [vmem:[#allocation11 + $0x108] sm:$0xff]  ;;  %v3813_v26 = vld [vmem:[#allocation11 + $0x100] sm:$0xff]  ;;  %v3816_v48 = vld [vmem:[#allocation11 + $0x118] sm:$0xff] }
 0x6d9   :  { %v3535_v22 = vadd.f32 %v3533_v6, %v3081_v14  ;;  %v3793_v6 = vld [vmem:[#allocation11 + $0x60] sm:$0xff]  ;;  %v3560_v55 = vrot.slane %v15232_v4, 2 }
 0x6da   :  { %v3545_v18 = vadd.f32 %v3543_v56, %v3082_v30  ;;  %v3796_v30 = vld [vmem:[#allocation11 + $0x78] sm:$0xff] }
 0x6db   :  { %v9194_v20 = vmul.f32 -1.442695, %v3535_v22  ;;  %v15502_v22 = vpack.c.bf16 %v3797_v49, %v3794_v32  ;;  %v3805_v32 = vld [vmem:[#allocation11 + $0xc0] sm:$0xff] }
 0x6dc   :  { %v9195_v35 = vmul.f32 -1.442695, %v3545_v18  ;;  %v3795_v18 = vld [vmem:[#allocation11 + $0x70] sm:$0xff] }
 0x6dd   :  { %13250 = vpow2.f32 %v9194_v20  ;;  %v3798_v20 = vld [vmem:[#allocation11 + $0x88] sm:$0xff] }
 0x6de   :  { %13252 = vpow2.f32 %v9195_v35  ;;  %v15513_v60 = vpack.c.bf16 %v3798_v20, %v3795_v18 }
 0x6df   :  { %v13249_v61 = vpop.eup %13248 }
 0x6e0   :  { %v3526_v47 = vmul.f32 %v13249_v61, %v3525_v42  ;;  %v3800_v42 = vld [vmem:[#allocation11 + $0x98] sm:$0xff]  ;;  %v3803_v61 = vld [vmem:[#allocation11 + $0xb0] sm:$0xff] }
 0x6e1   :  { %v15517_v36 = vpack.c.bf16 %v3803_v61, %v3800_v42 }
 0x6e2   :  { %v15484_v51 = vadd.f32 %v3530_v29, %v3526_v47  ;;  %v15511_v47 = vpack.c.bf16 %v3796_v30, %v3793_v6  ;;  %v3807_v6 = vld [vmem:[#allocation11 + $0xd0] sm:$0xff]  ;;  %v3553_v30 = vrot.slane %v3496_v50, 4  ;;  %v3821_v50 = vld [vmem:[#allocation11 + $0x140] sm:$0xff] }
 0x6e4   :  { %3564 = vst [vmem:[#allocation3 + $0x10] sm:$0xc] %v15484_v51  ;;  %v3638_v58 = vrot.slane %v15484_v51, 2 }
 0x6e6   :  { %3705 = vmatmul.mubr.f32.vlgmr.msra.gmra.mrb[26].mxu1 %v3638_v58  ;;  %10269 = vmatmul.mubr.f32.vlgmr.msra.gmra.mrb[38].mxu0 %v3638_v58  ;;  %v3809_v58 = vld [vmem:[#allocation11 + $0xe0] sm:$0xff] }
 0x6e7   :  { %v13251_v29 = vpop.eup %13250  ;;  %11793 = vmatpush1.bf16.msra.mxu1 %v15486_v25  ;;  %11824 = vmatpush3.bf16.msra.mxu0 %v15488_v59  ;;  %v15528_v49 = vpack.c.bf16 %v3809_v58, %v3806_v46  ;;  %v3818_v58 = vld [vmem:[#allocation11 + $0x128] sm:$0xff] }
 0x6e8   :  { %v13253_v14 = vpop.eup %13252  ;;  %v3539_v56 = vadd.f32 1.0, %v13251_v29  ;;  %11795 = vmatprep.subr.bf16.mxu1 %v15492_v33  ;;  %11825 = vmatprep.subr.bf16.mxu0 %v17117_v12  ;;  %v3808_v29 = vld [vmem:[#allocation11 + $0xd8] sm:$0xff]  ;;  %v15549_v4 = vpack.c.bf16 %v3821_v50, %v3818_v58  ;;  %v3826_v58 = vld [vmem:[#allocation11 + $0x168] sm:$0xff]  ;;  %v3825_v50 = vld [vmem:[#allocation11 + $0x160] sm:$0xff] }
 0x6e9   :  { %v3549_v35 = vadd.f32 1.0, %v13253_v14  ;;  %3913 = vmatprep.mubr.f32.mxu1 %v17158_v45  ;;  %10303 = vmatprep.mubr.msk.f32.mxu0 %vm13638_vm2, %v17158_v45  ;;  %17161 = vst [vmem:[#allocation28_spill] sm:$0xff] %v15528_v49  ;;  %v3810_v14 = vld [vmem:[#allocation11 + $0xe8] sm:$0xff]  ;;  %v15532_v18 = vpack.c.bf16 %v3808_v29, %v3805_v32  ;;  %v3083_v32 = vld [vmem:[#allocation2 + $0x28] sm:$0x30] }
 0x6ea   :  { %13254 = vrcp.f32 %v3539_v56  ;;  %v3812_v56 = vld [vmem:[#allocation11 + $0xf8] sm:$0xff]  ;;  %v15534_v20 = vpack.c.bf16 %v3810_v14, %v3807_v6 }
 0x6eb   :  { %13256 = vrcp.f32 %v3549_v35  ;;  %11797 = vmatpush1.bf16.msra.mxu1 %v15496_v7  ;;  %11827 = vmatpush3.bf16.msra.mxu0 %v15498_v19  ;;  %v3811_v35 = vld [vmem:[#allocation11 + $0xf0] sm:$0xff]  ;;  %v15538_v61 = vpack.c.bf16 %v3815_v62, %v3812_v56  ;;  %v15545_v56 = vpack.c.bf16 %v3816_v48, %v3813_v26  ;;  %v3817_v62 = vld [vmem:[#allocation11 + $0x120] sm:$0xff] }
 0x6ec   :  { %11799 = vmatprep.subr.bf16.mxu1 %v15502_v22  ;;  %11828 = vmatprep.subr.bf16.mxu0 %v17117_v12  ;;  %v15543_v14 = vpack.c.bf16 %v3814_v5, %v3811_v35  ;;  %v3823_v26 = vld [vmem:[#allocation11 + $0x150] sm:$0xff] }
 0x6ef   :  { %11801 = vmatpush1.bf16.msra.mxu1 %v15511_v47  ;;  %11830 = vmatpush3.bf16.msra.mxu0 %v15513_v60 }
 0x6f0   :  { %11803 = vmatprep.subr.bf16.mxu1 %v15517_v36  ;;  %11831 = vmatprep.subr.bf16.mxu0 %v17117_v12 }
 0x6f3   :  { %11805 = vmatpush1.bf16.msra.mxu1 %v15522_v0  ;;  %11833 = vmatpush3.bf16.msra.mxu0 %v15524_v8 }
 0x6f4   :  { %v13255_v42 = vpop.eup %13254  ;;  %11807 = vmatprep.subr.bf16.mxu1 %v15528_v49  ;;  %11834 = vmatprep.subr.bf16.mxu0 %v17117_v12  ;;  %v3822_v49 = vld [vmem:[#allocation11 + $0x148] sm:$0xff] }
 0x6f5   :  { %v13257_v17 = vpop.eup %13256  ;;  %v3555_v46 = vmul.f32 %v13255_v42, %v3553_v30  ;;  %v3820_v30 = vld [vmem:[#allocation11 + $0x138] sm:$0xff]  ;;  %v3819_v42 = vld [vmem:[#allocation11 + $0x130] sm:$0xff] }
 0x6f6   :  { %v3562_v29 = vmul.f32 %v13257_v17, %v3560_v55  ;;  %v3824_v55 = vld [vmem:[#allocation11 + $0x158] sm:$0xff]  ;;  %v15553_v35 = vpack.c.bf16 %v3820_v30, %v3817_v62  ;;  %v15555_v5 = vpack.c.bf16 %v3822_v49, %v3819_v42  ;;  %v3558_v49 = vsub.f32 1.0, %v13257_v17 }
 0x6f7   :  { %v3556_v6 = vadd.f32 %v3555_v46, %v3083_v32  ;;  %11809 = vmatpush1.bf16.msra.mxu1 %v15532_v18  ;;  %11836 = vmatpush3.bf16.msra.mxu0 %v15534_v20  ;;  %v3827_v46 = vld [vmem:[#allocation11 + $0x170] sm:$0xff]  ;;  %v3828_v32 = vld [vmem:[#allocation11 + $0x178] sm:$0xff] }
 0x6f8   :  { %11811 = vmatprep.subr.bf16.mxu1 %v15538_v61  ;;  %11837 = vmatprep.subr.bf16.mxu0 %v17117_v12  ;;  %v15559_v48 = vpack.c.bf16 %v3827_v46, %v3824_v55  ;;  %v15565_v62 = vpack.c.bf16 %v3828_v32, %v3825_v50  ;;  %v3568_v32 = vld [vmem:[#allocation2 + $0x40] sm:$0x30] }
 0x6f9   :  { %13258 = vtanh.f32 %v3556_v6  ;;  %v15563_v6 = vpack.c.bf16 %v3826_v58, %v3823_v26 }
 0x6fb   :  { %11813 = vmatpush1.bf16.msra.mxu1 %v15543_v14  ;;  %11839 = vmatpush3.bf16.msra.mxu0 %v15545_v56 }
 0x6fc   :  { %11815 = vmatprep.subr.bf16.mxu1 %v15549_v4  ;;  %11840 = vmatprep.subr.bf16.mxu0 %v17117_v12 }
 0x6ff   :  { %11817 = vmatpush1.bf16.msra.mxu1 %v15553_v35  ;;  %11842 = vmatpush3.bf16.msra.mxu0 %v15555_v5 }
 0x700   :  { %11819 = vmatprep.subr.bf16.mxu1 %v15559_v48  ;;  %11843 = vmatprep.subr.bf16.mxu0 %v17117_v12 }
 0x703   :  { %v13259_v30 = vpop.eup %13258  ;;  %11821 = vmatpush1.bf16.msra.mxu1 %v15563_v6  ;;  %11845 = vmatpush3.bf16.msra.mxu0 %v15565_v62 }
 0x704   :  { %v3559_v42 = vmul.f32 %v13259_v30, %v3558_v49  ;;  %11847 = vmatprep.subr.bf16.mxu1 %v15245_v37  ;;  %11878 = vmatprep.subr.bf16.mxu0 %v17117_v12  ;;  %v3620_v37 = vld [vmem:[%s17086_s10] sm:$0x7] }
 0x706   :  { %v15573_v55 = vadd.f32 %v3562_v29, %v3559_v42  ;;  %v4018_v29 = vrot.slane %v15484_v51, 6 }
 0x708   :  { %3565 = vst [vmem:[#allocation3 + $0x8] sm:$0x30] %v15573_v55  ;;  %v3847_v46 = vrot.slane %v15573_v55, 4 }
 0x70a   :  { %3914 = vmatmul.mubr.f32.vlgmr.msra.gmra.mrb[28].mxu1 %v3847_v46  ;;  %10304 = vmatmul.mubr.f32.vlgmr.msra.gmra.mrb[40].mxu0 %v3847_v46 }
 0x70b   :  { %11849 = vmatpush1.bf16.msra.mxu1 %v15256_v44  ;;  %11880 = vmatpush3.bf16.msra.mxu0 %v15262_v34  ;;  %v3625_v44 = vrot.slane %v3620_v37, %v14293_v10  ;;  %v3629_v34 = vrot.slane %v3620_v37, %v14298_v16 }
 0x70c   :  { %11851 = vmatprep.subr.bf16.mxu1 %v15272_v39  ;;  %11881 = vmatprep.subr.bf16.mxu0 %v17117_v12 }
 0x70d   :  { %4194 = vmatprep.mubr.f32.mxu1 %v17158_v45  ;;  %10338 = vmatprep.mubr.msk.f32.mxu0 %vm13638_vm2, %v17158_v45 }
 0x70f   :  { %11853 = vmatpush1.bf16.msra.mxu1 %v15284_v9  ;;  %11883 = vmatpush3.bf16.msra.mxu0 %v15290_v52 }
 0x710   :  { %11855 = vmatprep.subr.bf16.mxu1 %v15300_v21  ;;  %11884 = vmatprep.subr.bf16.mxu0 %v17117_v12 }
 0x713   :  { %11857 = vmatpush1.bf16.msra.mxu1 %v15312_v15  ;;  %11886 = vmatpush3.bf16.msra.mxu0 %v15318_v23 }
 0x714   :  { %11859 = vmatprep.subr.bf16.mxu1 %v15328_v27  ;;  %11887 = vmatprep.subr.bf16.mxu0 %v17117_v12 }
 0x717   :  { %11861 = vmatpush1.bf16.msra.mxu1 %v15340_v3  ;;  %11889 = vmatpush3.bf16.msra.mxu0 %v15346_v1  ;;  %v3566_v3 = vld [vmem:[#allocation2 + $0x30] sm:$0x30] }
 0x718   :  { %11863 = vmatprep.subr.bf16.mxu1 %v15356_v38  ;;  %11890 = vmatprep.subr.bf16.mxu0 %v17117_v12 }
 0x71b   :  { %11865 = vmatpush1.bf16.msra.mxu1 %v15368_v11  ;;  %11892 = vmatpush3.bf16.msra.mxu0 %v15374_v40  ;;  %v3567_v11 = vld [vmem:[#allocation2 + $0x38] sm:$0x30] }
 0x71c   :  { %11867 = vmatprep.subr.bf16.mxu1 %v15384_v24  ;;  %11893 = vmatprep.subr.bf16.mxu0 %v17117_v12 }
 0x71f   :  { %11869 = vmatpush1.bf16.msra.mxu1 %v15396_v53  ;;  %11895 = vmatpush3.bf16.msra.mxu0 %v15402_v41 }
 0x720   :  { %11871 = vmatprep.subr.bf16.mxu1 %v15412_v43  ;;  %11896 = vmatprep.subr.bf16.mxu0 %v17117_v12 }
 0x723   :  { %11873 = vmatpush1.bf16.msra.mxu1 %v15424_v2  ;;  %11898 = vmatpush3.bf16.msra.mxu0 %v15430_v57 }
 0x724   :  { %11875 = vmatprep.subr.bf16.mxu1 %v15440_v63  ;;  %11899 = vmatprep.subr.bf16.mxu0 %v17117_v12  ;;  %v3633_v63 = vrot.slane %v3620_v37, %v14303_v54 }
 0x727   :  { %11877 = vmatpush1.bf16.msra.mxu1 %v15452_v13  ;;  %11901 = vmatpush3.bf16.msra.mxu0 %v15458_v28  ;;  %v3829_v28 = vld [vmem:[%s17087_s11] sm:$0x7] }
 0x728   :  { %11903 = vmatprep.subr.bf16.mxu1 %v15463_v31  ;;  %11934 = vmatprep.subr.bf16.mxu0 %v17117_v12  ;;  %v3834_v50 = vrot.slane %v3829_v28, %v14293_v10  ;;  %v3838_v49 = vrot.slane %v3829_v28, %v14298_v16 }
 0x7b9   :  { %v3706_v39 = vpop.f32.mrb[26].mxu1  ;;  %v3777_v9 = vpop.f32.mrb[38].mxu0 }
 0x7ba   :  { %v3707_v52 = vadd.f32 %v3706_v39, %v3625_v44  ;;  %v3708_v21 = vpop.f32.mrb[27].mxu1  ;;  %v10270_v15 = vpop.f32.mrb[39].mxu0  ;;  %v3778_v13 = vadd.f32 %v3777_v9, %v3633_v63  ;;  %v3842_v63 = vrot.slane %v3829_v28, %v14303_v54 }
 0x7bb   :  { %v3709_v23 = vadd.f32 %v3708_v21, %v3629_v34  ;;  %v3569_v21 = vld [vmem:[#allocation2 + $0x18] sm:$0xc] }
 0x7bc   :  { %v3991_v27 = vrot.slane %v3707_v52, 4  ;;  %v4011_v31 = vrot.slane %v3778_v13, 4  ;;  %v3571_v13 = vld [vmem:[#allocation2 + $0x28] sm:$0xc] }
 0x7bd   :  { %v4001_v1 = vrot.slane %v3709_v23, 4  ;;  %v3570_v23 = vld [vmem:[#allocation2 + $0x20] sm:$0xc] }
 0x7be   :  { %v3993_v38 = vadd.f32 %v3991_v27, %v3566_v3 }
 0x7bf   :  { %v4003_v40 = vadd.f32 %v4001_v1, %v3567_v11 }
 0x7c0   :  { %v9196_v24 = vmul.f32 -1.442695, %v3993_v38 }
 0x7c1   :  { %v9197_v53 = vmul.f32 -1.442695, %v4003_v40 }
 0x7c2   :  { %13260 = vpow2.f32 %v9196_v24 }
 0x7c3   :  { %13262 = vpow2.f32 %v9197_v53 }
 0x7cc   :  { %v13261_v41 = vpop.eup %13260 }
 0x7cd   :  { %v13263_v43 = vpop.eup %13262  ;;  %v3997_v2 = vadd.f32 1.0, %v13261_v41 }
 0x7ce   :  { %v4007_v57 = vadd.f32 1.0, %v13263_v43 }
 0x7cf   :  { %13264 = vrcp.f32 %v3997_v2 }
 0x7d0   :  { %13266 = vrcp.f32 %v4007_v57 }
 0x7d9   :  { %v13265_v17 = vpop.eup %13264 }
 0x7da   :  { %v13267_v26 = vpop.eup %13266  ;;  %v4013_v58 = vmul.f32 %v13265_v17, %v4011_v31  ;;  %v4541_v31 = vld [vmem:[#allocation12 + $0x10] sm:$0xff] }
 0x7db   :  { %v4020_v30 = vmul.f32 %v13267_v26, %v4018_v29  ;;  %v4016_v38 = vsub.f32 1.0, %v13267_v26  ;;  %v4552_v29 = vld [vmem:[#allocation12 + $0x68] sm:$0xff]  ;;  %v4558_v26 = vld [vmem:[#allocation12 + $0x98] sm:$0xff] }
 0x7dc   :  { %v4014_v42 = vadd.f32 %v4013_v58, %v3568_v32  ;;  %v4554_v58 = vld [vmem:[#allocation12 + $0x78] sm:$0xff]  ;;  %v4560_v32 = vld [vmem:[#allocation12 + $0xa8] sm:$0xff] }
 0x7dd   :  { %v3915_v46 = vpop.f32.mrb[28].mxu1  ;;  %v3986_v37 = vpop.f32.mrb[40].mxu0 }
 0x7de   :  { %13268 = vtanh.f32 %v4014_v42  ;;  %v3916_v44 = vadd.f32 %v3915_v46, %v3834_v50  ;;  %v3917_v34 = vpop.f32.mrb[29].mxu1  ;;  %v10305_v39 = vpop.f32.mrb[41].mxu0  ;;  %v11962_v50 = vpack.c.bf16 %v4558_v26, %v4552_v29  ;;  %v12026_v42 = vpack.c.bf16 %v4560_v32, %v4554_v58  ;;  %v4601_v29 = vld [vmem:[#allocation12 + $0x1f0] sm:$0xff]  ;;  %v4607_v26 = vld [vmem:[#allocation12 + $0x220] sm:$0xff]  ;;  %v4618_v32 = vld [vmem:[#allocation12 + $0x278] sm:$0xff] }
 0x7df   :  { %v3918_v9 = vadd.f32 %v3917_v34, %v3838_v49  ;;  %v4551_v49 = vld [vmem:[#allocation12 + $0x60] sm:$0xff]  ;;  %v4564_v39 = vld [vmem:[#allocation12 + $0xc8] sm:$0xff]  ;;  %v12044_v58 = vpack.c.bf16 %v4607_v26, %v4601_v29  ;;  %v4665_v29 = vld [vmem:[#allocation12 + $0x3f0] sm:$0xff] }
 0x7e0   :  { %v4023_v52 = vrot.slane %v3916_v44, 6  ;;  %v4559_v44 = vld [vmem:[#allocation12 + $0xa0] sm:$0xff] }
 0x7e1   :  { %v4033_v15 = vrot.slane %v3918_v9, 6  ;;  %v4570_v9 = vld [vmem:[#allocation12 + $0xf8] sm:$0xff] }
 0x7e2   :  { %v4025_v51 = vadd.f32 %v4023_v52, %v3569_v21  ;;  %v4566_v52 = vld [vmem:[#allocation12 + $0xd8] sm:$0xff]  ;;  %v11966_v21 = vpack.c.bf16 %v4570_v9, %v4564_v39  ;;  %v4613_v39 = vld [vmem:[#allocation12 + $0x250] sm:$0xff]  ;;  %v4619_v9 = vld [vmem:[#allocation12 + $0x280] sm:$0xff] }
 0x7e3   :  { %v4035_v27 = vadd.f32 %v4033_v15, %v3570_v23  ;;  %v4572_v15 = vld [vmem:[#allocation12 + $0x108] sm:$0xff]  ;;  %v4569_v23 = vld [vmem:[#allocation12 + $0xf0] sm:$0xff] }
 0x7e4   :  { %v9198_v3 = vmul.f32 -1.442695, %v4025_v51  ;;  %v4563_v51 = vld [vmem:[#allocation12 + $0xc0] sm:$0xff] }
 0x7e5   :  { %v9199_v1 = vmul.f32 -1.442695, %v4035_v27  ;;  %v12030_v27 = vpack.c.bf16 %v4572_v15, %v4566_v52  ;;  %v12048_v52 = vpack.c.bf16 %v4619_v9, %v4613_v39  ;;  %v4630_v15 = vld [vmem:[#allocation12 + $0x2d8] sm:$0xff]  ;;  %v4677_v39 = vld [vmem:[#allocation12 + $0x450] sm:$0xff] }
 0x7e6   :  { %13270 = vpow2.f32 %v9198_v3  ;;  %v11968_v3 = vpack.c.bf16 %v4569_v23, %v4563_v51  ;;  %v4626_v51 = vld [vmem:[#allocation12 + $0x2b8] sm:$0xff] }
 0x7e7   :  { %13272 = vpow2.f32 %v9199_v1  ;;  %v4565_v1 = vld [vmem:[#allocation12 + $0xd0] sm:$0xff] }
 0x7e8   :  { %v13269_v11 = vpop.eup %13268 }
 0x7e9   :  { %v4017_v40 = vmul.f32 %v13269_v11, %v4016_v38  ;;  %v4571_v38 = vld [vmem:[#allocation12 + $0x100] sm:$0xff] }
 0x7ea   :  { %v12032_v11 = vpack.c.bf16 %v4571_v38, %v4565_v1  ;;  %v4629_v1 = vld [vmem:[#allocation12 + $0x2d0] sm:$0xff] }
 0x7eb   :  { %v15624_v24 = vadd.f32 %v4020_v30, %v4017_v40  ;;  %v4557_v30 = vld [vmem:[#allocation12 + $0x90] sm:$0xff]  ;;  %v4576_v40 = vld [vmem:[#allocation12 + $0x128] sm:$0xff] }
 0x7ec   :  { %v11964_v46 = vpack.c.bf16 %v4557_v30, %v4551_v49  ;;  %v4614_v49 = vld [vmem:[#allocation12 + $0x258] sm:$0xff] }
 0x7ed   :  { %4054 = vst [vmem:[#allocation3 + $0x10] sm:$0x30] %v15624_v24  ;;  %v4128_v53 = vrot.slane %v15624_v24, 4 }
 0x7ef   :  { %4195 = vmatmul.mubr.f32.vlgmr.msra.gmra.mrb[30].mxu1 %v4128_v53  ;;  %10339 = vmatmul.mubr.f32.vlgmr.msra.gmra.mrb[42].mxu0 %v4128_v53  ;;  %v4582_v53 = vld [vmem:[#allocation12 + $0x158] sm:$0xff] }
 0x7f0   :  { %v13271_v41 = vpop.eup %13270  ;;  %11905 = vmatpush1.bf16.msra.mxu1 %v15486_v25  ;;  %11936 = vmatpush3.bf16.msra.mxu0 %v15488_v59  ;;  %v3987_v25 = vadd.f32 %v3986_v37, %v3842_v63  ;;  %v4553_v37 = vld [vmem:[#allocation12 + $0x70] sm:$0xff] }
 0x7f1   :  { %v13273_v43 = vpop.eup %13272  ;;  %v4029_v2 = vadd.f32 1.0, %v13271_v41  ;;  %11907 = vmatprep.subr.bf16.mxu1 %v15492_v33  ;;  %11937 = vmatprep.subr.bf16.mxu0 %v17117_v12  ;;  %v12028_v34 = vpack.c.bf16 %v4559_v44, %v4553_v37  ;;  %v4578_v41 = vld [vmem:[#allocation12 + $0x138] sm:$0xff]  ;;  %v4581_v63 = vld [vmem:[#allocation12 + $0x150] sm:$0xff] }
 0x7f2   :  { %v4039_v57 = vadd.f32 1.0, %v13273_v43  ;;  %4403 = vmatprep.mubr.f32.mxu1 %v17158_v45  ;;  %10373 = vmatprep.mubr.msk.f32.mxu0 %vm13638_vm2, %v17158_v45  ;;  %v4043_v59 = vrot.slane %v3987_v25, 6  ;;  %v11970_v43 = vpack.c.bf16 %v4582_v53, %v4576_v40  ;;  %v4617_v37 = vld [vmem:[#allocation12 + $0x270] sm:$0xff]  ;;  %v4631_v53 = vld [vmem:[#allocation12 + $0x2e0] sm:$0xff] }
 0x7f3   :  { %13274 = vrcp.f32 %v4029_v2  ;;  %v4584_v2 = vld [vmem:[#allocation12 + $0x168] sm:$0xff]  ;;  %v4625_v40 = vld [vmem:[#allocation12 + $0x2b0] sm:$0xff] }
 0x7f4   :  { %13276 = vrcp.f32 %v4039_v57  ;;  %11909 = vmatpush1.bf16.msra.mxu1 %v15496_v7  ;;  %11939 = vmatpush3.bf16.msra.mxu0 %v15498_v19  ;;  %v17162_v7 = vld [vmem:[#allocation28_spill] sm:$0xff]  ;;  %v4050_v19 = vrot.slane %v15573_v55, 2  ;;  %v4575_v57 = vld [vmem:[#allocation12 + $0x120] sm:$0xff]  ;;  %v12034_v25 = vpack.c.bf16 %v4584_v2, %v4578_v41  ;;  %v12052_v41 = vpack.c.bf16 %v4631_v53, %v4625_v40  ;;  %v4642_v2 = vld [vmem:[#allocation12 + $0x338] sm:$0xff] }
 0x7f5   :  { %11911 = vmatprep.subr.bf16.mxu1 %v15502_v22  ;;  %11940 = vmatprep.subr.bf16.mxu0 %v17117_v12  ;;  %v4689_v40 = vld [vmem:[#allocation12 + $0x4b0] sm:$0xff] }
 0x7f8   :  { %11913 = vmatpush1.bf16.msra.mxu1 %v15511_v47  ;;  %11942 = vmatpush3.bf16.msra.mxu0 %v15513_v60 }
 0x7f9   :  { %11915 = vmatprep.subr.bf16.mxu1 %v15517_v36  ;;  %11943 = vmatprep.subr.bf16.mxu0 %v17117_v12 }
 0x7fc   :  { %11917 = vmatpush1.bf16.msra.mxu1 %v15522_v0  ;;  %11945 = vmatpush3.bf16.msra.mxu0 %v15524_v8 }
 0x7fd   :  { %v13275_v33 = vpop.eup %13274  ;;  %11919 = vmatprep.subr.bf16.mxu1 %v17162_v7  ;;  %11946 = vmatprep.subr.bf16.mxu0 %v17117_v12  ;;  %v4583_v7 = vld [vmem:[#allocation12 + $0x160] sm:$0xff] }
 0x7fe   :  { %v13277_v22 = vpop.eup %13276  ;;  %v4045_v47 = vmul.f32 %v13275_v33, %v4043_v59  ;;  %v11972_v59 = vpack.c.bf16 %v4581_v63, %v4575_v57  ;;  %v4577_v33 = vld [vmem:[#allocation12 + $0x130] sm:$0xff]  ;;  %v4638_v57 = vld [vmem:[#allocation12 + $0x318] sm:$0xff] }
 0x7ff   :  { %v4052_v60 = vmul.f32 %v13277_v22, %v4050_v19  ;;  %v4048_v36 = vsub.f32 1.0, %v13277_v22  ;;  %v12036_v19 = vpack.c.bf16 %v4583_v7, %v4577_v33  ;;  %v4588_v22 = vld [vmem:[#allocation12 + $0x188] sm:$0xff]  ;;  %v4641_v33 = vld [vmem:[#allocation12 + $0x330] sm:$0xff] }
 0x800   :  { %v4046_v28 = vadd.f32 %v4045_v47, %v3571_v13  ;;  %11921 = vmatpush1.bf16.msra.mxu1 %v15532_v18  ;;  %11948 = vmatpush3.bf16.msra.mxu0 %v15534_v20  ;;  %v4594_v47 = vld [vmem:[#allocation12 + $0x1b8] sm:$0xff] }
 0x801   :  { %11923 = vmatprep.subr.bf16.mxu1 %v15538_v61  ;;  %11949 = vmatprep.subr.bf16.mxu0 %v17117_v12  ;;  %v4540_v61 = vld [vmem:[#allocation12 + $0x8] sm:$0xff]  ;;  %v4590_v13 = vld [vmem:[#allocation12 + $0x198] sm:$0xff] }
 0x802   :  { %13278 = vtanh.f32 %v4046_v28  ;;  %v4596_v28 = vld [vmem:[#allocation12 + $0x1c8] sm:$0xff] }
 0x804   :  { %11925 = vmatpush1.bf16.msra.mxu1 %v15543_v14  ;;  %11951 = vmatpush3.bf16.msra.mxu0 %v15545_v56  ;;  %v4546_v14 = vld [vmem:[#allocation12 + $0x38] sm:$0xff] }
 0x805   :  { %11927 = vmatprep.subr.bf16.mxu1 %v15549_v4  ;;  %11952 = vmatprep.subr.bf16.mxu0 %v17117_v12  ;;  %v4542_v56 = vld [vmem:[#allocation12 + $0x18] sm:$0xff]  ;;  %v11958_v4 = vpack.c.bf16 %v4546_v14, %v4540_v61  ;;  %v4589_v61 = vld [vmem:[#allocation12 + $0x190] sm:$0xff]  ;;  %v4595_v14 = vld [vmem:[#allocation12 + $0x1c0] sm:$0xff] }
 0x808   :  { %11929 = vmatpush1.bf16.msra.mxu1 %v15553_v35  ;;  %11954 = vmatpush3.bf16.msra.mxu0 %v15555_v5  ;;  %v4548_v35 = vld [vmem:[#allocation12 + $0x48] sm:$0xff]  ;;  %v4539_v5 = vld [vmem:[#allocation12] sm:$0xff] }
 0x809   :  { %11931 = vmatprep.subr.bf16.mxu1 %v15559_v48  ;;  %11955 = vmatprep.subr.bf16.mxu0 %v17117_v12  ;;  %v4545_v48 = vld [vmem:[#allocation12 + $0x30] sm:$0xff]  ;;  %v12022_v55 = vpack.c.bf16 %v4548_v35, %v4542_v56  ;;  %v12040_v56 = vpack.c.bf16 %v4595_v14, %v4589_v61  ;;  %v4606_v35 = vld [vmem:[#allocation12 + $0x218] sm:$0xff] }
 0x80a   :  { %v4653_v61 = vld [vmem:[#allocation12 + $0x390] sm:$0xff] }
 0x80c   :  { %v13279_v0 = vpop.eup %13278  ;;  %11933 = vmatpush1.bf16.msra.mxu1 %v15563_v6  ;;  %11957 = vmatpush3.bf16.msra.mxu0 %v15565_v62  ;;  %v11960_v6 = vpack.c.bf16 %v4545_v48, %v4539_v5  ;;  %v4547_v62 = vld [vmem:[#allocation12 + $0x40] sm:$0xff]  ;;  %v4602_v5 = vld [vmem:[#allocation12 + $0x1f8] sm:$0xff] }
 0x80d   :  { %v4049_v8 = vmul.f32 %v13279_v0, %v4048_v36  ;;  %11959 = vmatprep.subr.bf16.mxu1 %v11958_v4  ;;  %v12024_v17 = vpack.c.bf16 %v4547_v62, %v4541_v31  ;;  %12023 = vmatprep.subr.bf16.mxu0 %v12022_v55  ;;  %v4587_v36 = vld [vmem:[#allocation12 + $0x180] sm:$0xff]  ;;  %v4593_v0 = vld [vmem:[#allocation12 + $0x1b0] sm:$0xff]  ;;  %v4600_v4 = vld [vmem:[#allocation12 + $0x1e8] sm:$0xff] }
 0x80e   :  { %v11978_v48 = vpack.c.bf16 %v4606_v35, %v4600_v4  ;;  %v4608_v55 = vld [vmem:[#allocation12 + $0x228] sm:$0xff]  ;;  %v4605_v31 = vld [vmem:[#allocation12 + $0x210] sm:$0xff]  ;;  %v4655_v35 = vld [vmem:[#allocation12 + $0x3a0] sm:$0xff] }
 0x80f   :  { %v4053_v18 = vadd.f32 %v4052_v60, %v4049_v8  ;;  %v11974_v60 = vpack.c.bf16 %v4594_v47, %v4588_v22  ;;  %v12038_v8 = vpack.c.bf16 %v4596_v28, %v4590_v13  ;;  %v12042_v62 = vpack.c.bf16 %v4608_v55, %v4602_v5  ;;  %v4637_v22 = vld [vmem:[#allocation12 + $0x310] sm:$0xff]  ;;  %v4643_v47 = vld [vmem:[#allocation12 + $0x340] sm:$0xff]  ;;  %v4654_v28 = vld [vmem:[#allocation12 + $0x398] sm:$0xff] }
 0x810   :  { %v12056_v13 = vpack.c.bf16 %v4643_v47, %v4637_v22  ;;  %v4649_v4 = vld [vmem:[#allocation12 + $0x370] sm:$0xff]  ;;  %v4666_v55 = vld [vmem:[#allocation12 + $0x3f8] sm:$0xff] }
 0x811   :  { %4055 = vst [vmem:[#allocation3 + $0x8] sm:$0xc] %v4053_v18  ;;  %v15663_v20 = vrot.slane %v4053_v18, 2  ;;  %v11976_v18 = vpack.c.bf16 %v4593_v0, %v4587_v36  ;;  %v4650_v36 = vld [vmem:[#allocation12 + $0x378] sm:$0xff]  ;;  %v12060_v5 = vpack.c.bf16 %v4655_v35, %v4649_v4  ;;  %v4701_v22 = vld [vmem:[#allocation12 + $0x510] sm:$0xff] }
 0x812   :  { %v4713_v4 = vld [vmem:[#allocation12 + $0x570] sm:$0xff] }
 0x813   :  { %4404 = vmatmul.mubr.f32.vlgmr.msra.gmra.mrb[32].mxu1 %v15663_v20  ;;  %10374 = vmatmul.mubr.f32.vlgmr.msra.gmra.mrb[44].mxu0 %v15663_v20 }
 0x814   :  { %11961 = vmatpush1.bf16.msra.mxu1 %v11960_v6  ;;  %12025 = vmatpush1.bf16.msra.mxu0 %v12024_v17  ;;  %v4599_v6 = vld [vmem:[#allocation12 + $0x1e0] sm:$0xff] }
 0x815   :  { %11963 = vmatprep.subr.bf16.mxu1 %v11962_v50  ;;  %12027 = vmatprep.subr.bf16.mxu0 %v12026_v42  ;;  %v11980_v17 = vpack.c.bf16 %v4605_v31, %v4599_v6  ;;  %v4612_v50 = vld [vmem:[#allocation12 + $0x248] sm:$0xff]  ;;  %v4662_v6 = vld [vmem:[#allocation12 + $0x3d8] sm:$0xff] }
 0x816   :  { %v11982_v30 = vpack.c.bf16 %v4618_v32, %v4612_v50  ;;  %v4620_v42 = vld [vmem:[#allocation12 + $0x288] sm:$0xff]  ;;  %v4661_v50 = vld [vmem:[#allocation12 + $0x3d0] sm:$0xff]  ;;  %v4667_v32 = vld [vmem:[#allocation12 + $0x400] sm:$0xff] }
 0x817   :  { %v12046_v44 = vpack.c.bf16 %v4620_v42, %v4614_v49  ;;  %v12064_v49 = vpack.c.bf16 %v4667_v32, %v4661_v50  ;;  %v4678_v42 = vld [vmem:[#allocation12 + $0x458] sm:$0xff]  ;;  %v4725_v50 = vld [vmem:[#allocation12 + $0x5d0] sm:$0xff] }
 0x818   :  { %11965 = vmatpush1.bf16.msra.mxu1 %v11964_v46  ;;  %12029 = vmatpush1.bf16.msra.mxu0 %v12028_v34  ;;  %v4611_v46 = vld [vmem:[#allocation12 + $0x240] sm:$0xff] }
 0x819   :  { %11967 = vmatprep.subr.bf16.mxu1 %v11966_v21  ;;  %12031 = vmatprep.subr.bf16.mxu0 %v12030_v27  ;;  %v11984_v34 = vpack.c.bf16 %v4617_v37, %v4611_v46  ;;  %v4624_v21 = vld [vmem:[#allocation12 + $0x2a8] sm:$0xff]  ;;  %v4674_v46 = vld [vmem:[#allocation12 + $0x438] sm:$0xff] }
 0x81a   :  { %v11986_v23 = vpack.c.bf16 %v4630_v15, %v4624_v21  ;;  %v4632_v27 = vld [vmem:[#allocation12 + $0x2e8] sm:$0xff]  ;;  %v4673_v21 = vld [vmem:[#allocation12 + $0x430] sm:$0xff]  ;;  %v4679_v15 = vld [vmem:[#allocation12 + $0x460] sm:$0xff] }
 0x81b   :  { %v12050_v38 = vpack.c.bf16 %v4632_v27, %v4626_v51  ;;  %v12068_v51 = vpack.c.bf16 %v4679_v15, %v4673_v21  ;;  %v4690_v27 = vld [vmem:[#allocation12 + $0x4b8] sm:$0xff]  ;;  %v4110_v21 = vld [vmem:[%s17086_s10] sm:$0x7] }
 0x81c   :  { %11969 = vmatpush1.bf16.msra.mxu1 %v11968_v3  ;;  %12033 = vmatpush1.bf16.msra.mxu0 %v12032_v11  ;;  %v4623_v3 = vld [vmem:[#allocation12 + $0x2a0] sm:$0xff]  ;;  %v4115_v15 = vrot.slane %v4110_v21, %v14293_v10 }
 0x81d   :  { %11971 = vmatprep.subr.bf16.mxu1 %v11970_v43  ;;  %12035 = vmatprep.subr.bf16.mxu0 %v12034_v25  ;;  %v11988_v11 = vpack.c.bf16 %v4629_v1, %v4623_v3  ;;  %v4636_v43 = vld [vmem:[#allocation12 + $0x308] sm:$0xff]  ;;  %v4686_v3 = vld [vmem:[#allocation12 + $0x498] sm:$0xff] }
 0x81e   :  { %v11990_v63 = vpack.c.bf16 %v4642_v2, %v4636_v43  ;;  %v4644_v25 = vld [vmem:[#allocation12 + $0x348] sm:$0xff]  ;;  %v4685_v43 = vld [vmem:[#allocation12 + $0x490] sm:$0xff]  ;;  %v4691_v2 = vld [vmem:[#allocation12 + $0x4c0] sm:$0xff] }
 0x81f   :  { %v12054_v7 = vpack.c.bf16 %v4644_v25, %v4638_v57  ;;  %v12072_v57 = vpack.c.bf16 %v4691_v2, %v4685_v43  ;;  %v4702_v25 = vld [vmem:[#allocation12 + $0x518] sm:$0xff]  ;;  %v4057_v2 = vld [vmem:[#allocation2 + $0x38] sm:$0xc0] }
 0x820   :  { %11973 = vmatpush1.bf16.msra.mxu1 %v11972_v59  ;;  %12037 = vmatpush1.bf16.msra.mxu0 %v12036_v19  ;;  %v4635_v59 = vld [vmem:[#allocation12 + $0x300] sm:$0xff] }
 0x821   :  { %11975 = vmatprep.subr.bf16.mxu1 %v11974_v60  ;;  %12039 = vmatprep.subr.bf16.mxu0 %v12038_v8  ;;  %v11992_v19 = vpack.c.bf16 %v4641_v33, %v4635_v59  ;;  %v4648_v60 = vld [vmem:[#allocation12 + $0x368] sm:$0xff]  ;;  %v4698_v59 = vld [vmem:[#allocation12 + $0x4f8] sm:$0xff] }
 0x822   :  { %v11994_v0 = vpack.c.bf16 %v4654_v28, %v4648_v60  ;;  %v4656_v8 = vld [vmem:[#allocation12 + $0x3a8] sm:$0xff]  ;;  %v4697_v60 = vld [vmem:[#allocation12 + $0x4f0] sm:$0xff]  ;;  %v4703_v28 = vld [vmem:[#allocation12 + $0x520] sm:$0xff] }
 0x823   :  { %v12058_v14 = vpack.c.bf16 %v4656_v8, %v4650_v36  ;;  %v12076_v36 = vpack.c.bf16 %v4703_v28, %v4697_v60  ;;  %v4714_v8 = vld [vmem:[#allocation12 + $0x578] sm:$0xff] }
 0x824   :  { %11977 = vmatpush1.bf16.msra.mxu1 %v11976_v18  ;;  %12041 = vmatpush1.bf16.msra.mxu0 %v12040_v56  ;;  %v4647_v18 = vld [vmem:[#allocation12 + $0x360] sm:$0xff] }
 0x825   :  { %11979 = vmatprep.subr.bf16.mxu1 %v11978_v48  ;;  %12043 = vmatprep.subr.bf16.mxu0 %v12042_v62  ;;  %v11996_v56 = vpack.c.bf16 %v4653_v61, %v4647_v18  ;;  %v4660_v48 = vld [vmem:[#allocation12 + $0x3c8] sm:$0xff]  ;;  %v4710_v18 = vld [vmem:[#allocation12 + $0x558] sm:$0xff] }
 0x826   :  { %v11998_v31 = vpack.c.bf16 %v4666_v55, %v4660_v48  ;;  %v4668_v62 = vld [vmem:[#allocation12 + $0x408] sm:$0xff]  ;;  %v4709_v48 = vld [vmem:[#allocation12 + $0x550] sm:$0xff]  ;;  %v4715_v55 = vld [vmem:[#allocation12 + $0x580] sm:$0xff] }
 0x827   :  { %v12062_v26 = vpack.c.bf16 %v4668_v62, %v4662_v6  ;;  %v12080_v6 = vpack.c.bf16 %v4715_v55, %v4709_v48  ;;  %v4726_v62 = vld [vmem:[#allocation12 + $0x5d8] sm:$0xff] }
 0x828   :  { %11981 = vmatpush1.bf16.msra.mxu1 %v11980_v17  ;;  %12045 = vmatpush1.bf16.msra.mxu0 %v12044_v58  ;;  %v4659_v17 = vld [vmem:[#allocation12 + $0x3c0] sm:$0xff] }
 0x829   :  { %11983 = vmatprep.subr.bf16.mxu1 %v11982_v30  ;;  %12047 = vmatprep.subr.bf16.mxu0 %v12046_v44  ;;  %v12000_v58 = vpack.c.bf16 %v4665_v29, %v4659_v17  ;;  %v4672_v30 = vld [vmem:[#allocation12 + $0x428] sm:$0xff]  ;;  %v4722_v17 = vld [vmem:[#allocation12 + $0x5b8] sm:$0xff] }
 0x82a   :  { %v12002_v37 = vpack.c.bf16 %v4678_v42, %v4672_v30  ;;  %v4680_v44 = vld [vmem:[#allocation12 + $0x468] sm:$0xff]  ;;  %v4721_v30 = vld [vmem:[#allocation12 + $0x5b0] sm:$0xff]  ;;  %v4727_v42 = vld [vmem:[#allocation12 + $0x5e0] sm:$0xff] }
 0x82b   :  { %v12066_v9 = vpack.c.bf16 %v4680_v44, %v4674_v46  ;;  %v12084_v46 = vpack.c.bf16 %v4727_v42, %v4721_v30  ;;  %v4550_v44 = vld [vmem:[#allocation12 + $0x58] sm:$0xff] }
 0x82c   :  { %11985 = vmatpush1.bf16.msra.mxu1 %v11984_v34  ;;  %12049 = vmatpush1.bf16.msra.mxu0 %v12048_v52  ;;  %v4671_v34 = vld [vmem:[#allocation12 + $0x420] sm:$0xff] }
 0x82d   :  { %11987 = vmatprep.subr.bf16.mxu1 %v11986_v23  ;;  %12051 = vmatprep.subr.bf16.mxu0 %v12050_v38  ;;  %v12004_v52 = vpack.c.bf16 %v4677_v39, %v4671_v34  ;;  %v4684_v23 = vld [vmem:[#allocation12 + $0x488] sm:$0xff] }
 0x82e   :  { %v12006_v1 = vpack.c.bf16 %v4690_v27, %v4684_v23  ;;  %v4692_v38 = vld [vmem:[#allocation12 + $0x4c8] sm:$0xff] }
 0x82f   :  { %v12070_v53 = vpack.c.bf16 %v4692_v38, %v4686_v3  ;;  %v5013_v34 = vld [vmem:[#allocation14 + $0x8] sm:$0xff] }
 0x830   :  { %11989 = vmatpush1.bf16.msra.mxu1 %v11988_v11  ;;  %12053 = vmatpush1.bf16.msra.mxu0 %v12052_v41  ;;  %v4683_v11 = vld [vmem:[#allocation12 + $0x480] sm:$0xff] }
 0x831   :  { %11991 = vmatprep.subr.bf16.mxu1 %v11990_v63  ;;  %12055 = vmatprep.subr.bf16.mxu0 %v12054_v7  ;;  %v12008_v41 = vpack.c.bf16 %v4689_v40, %v4683_v11  ;;  %v4696_v63 = vld [vmem:[#allocation12 + $0x4e8] sm:$0xff] }
 0x832   :  { %v12010_v33 = vpack.c.bf16 %v4702_v25, %v4696_v63  ;;  %v4704_v7 = vld [vmem:[#allocation12 + $0x528] sm:$0xff] }
 0x833   :  { %v12074_v47 = vpack.c.bf16 %v4704_v7, %v4698_v59 }
 0x834   :  { %11993 = vmatpush1.bf16.msra.mxu1 %v11992_v19  ;;  %12057 = vmatpush1.bf16.msra.mxu0 %v12056_v13  ;;  %v4695_v19 = vld [vmem:[#allocation12 + $0x4e0] sm:$0xff] }
 0x835   :  { %11995 = vmatprep.subr.bf16.mxu1 %v11994_v0  ;;  %12059 = vmatprep.subr.bf16.mxu0 %v12058_v14  ;;  %v12012_v13 = vpack.c.bf16 %v4701_v22, %v4695_v19  ;;  %v4708_v0 = vld [vmem:[#allocation12 + $0x548] sm:$0xff]  ;;  %v4123_v22 = vrot.slane %v4110_v21, %v14303_v54 }
 0x836   :  { %v12014_v61 = vpack.c.bf16 %v4714_v8, %v4708_v0  ;;  %v4716_v14 = vld [vmem:[#allocation12 + $0x588] sm:$0xff] }
 0x837   :  { %v12078_v35 = vpack.c.bf16 %v4716_v14, %v4710_v18 }
 0x838   :  { %11997 = vmatpush1.bf16.msra.mxu1 %v11996_v56  ;;  %12061 = vmatpush1.bf16.msra.mxu0 %v12060_v5  ;;  %v4707_v56 = vld [vmem:[#allocation12 + $0x540] sm:$0xff] }
 0x839   :  { %11999 = vmatprep.subr.bf16.mxu1 %v11998_v31  ;;  %12063 = vmatprep.subr.bf16.mxu0 %v12062_v26  ;;  %v12016_v5 = vpack.c.bf16 %v4713_v4, %v4707_v56  ;;  %v4720_v31 = vld [vmem:[#allocation12 + $0x5a8] sm:$0xff] }
 0x83a   :  { %v12018_v29 = vpack.c.bf16 %v4726_v62, %v4720_v31  ;;  %v4728_v26 = vld [vmem:[#allocation12 + $0x5e8] sm:$0xff] }
 0x83b   :  { %v12082_v32 = vpack.c.bf16 %v4728_v26, %v4722_v17  ;;  %v4059_v31 = vld [vmem:[#allocation2 + $0x18] sm:$0x3] }
 0x83c   :  { %12001 = vmatpush1.bf16.msra.mxu1 %v12000_v58  ;;  %12065 = vmatpush1.bf16.msra.mxu0 %v12064_v49  ;;  %v4719_v58 = vld [vmem:[#allocation12 + $0x5a0] sm:$0xff] }
 0x83d   :  { %12003 = vmatprep.subr.bf16.mxu1 %v12002_v37  ;;  %12067 = vmatprep.subr.bf16.mxu0 %v12066_v9  ;;  %v12020_v49 = vpack.c.bf16 %v4725_v50, %v4719_v58  ;;  %v4544_v37 = vld [vmem:[#allocation12 + $0x28] sm:$0xff]  ;;  %v5016_v9 = vld [vmem:[#allocation14 + $0x20] sm:$0xff] }
 0x83e   :  { %v12086_v39 = vpack.c.bf16 %v4550_v44, %v4544_v37 }
 0x840   :  { %12005 = vmatpush1.bf16.msra.mxu1 %v12004_v52  ;;  %12069 = vmatpush1.bf16.msra.mxu0 %v12068_v51  ;;  %v15667_v52 = vpack.c.bf16 %v5016_v9, %v5013_v34  ;;  %v4119_v51 = vrot.slane %v4110_v21, %v14298_v16 }
 0x841   :  { %12007 = vmatprep.subr.bf16.mxu1 %v12006_v1  ;;  %12071 = vmatprep.subr.bf16.mxu0 %v12070_v53  ;;  %v4056_v53 = vld [vmem:[#allocation2 + $0x30] sm:$0xc0] }
 0x844   :  { %12009 = vmatpush1.bf16.msra.mxu1 %v12008_v41  ;;  %12073 = vmatpush1.bf16.msra.mxu0 %v12072_v57 }
 0x845   :  { %12011 = vmatprep.subr.bf16.mxu1 %v12010_v33  ;;  %12075 = vmatprep.subr.bf16.mxu0 %v12074_v47 }
 0x848   :  { %12013 = vmatpush1.bf16.msra.mxu1 %v12012_v13  ;;  %12077 = vmatpush1.bf16.msra.mxu0 %v12076_v36  ;;  %v4319_v13 = vld [vmem:[%s17087_s11] sm:$0x7]  ;;  %v4508_v36 = vrot.slane %v15624_v24, 6 }
 0x849   :  { %12015 = vmatprep.subr.bf16.mxu1 %v12014_v61  ;;  %12079 = vmatprep.subr.bf16.mxu0 %v12078_v35  ;;  %v4324_v18 = vrot.slane %v4319_v13, %v14293_v10  ;;  %v4058_v61 = vld [vmem:[#allocation2 + $0x40] sm:$0xc0]  ;;  %v4328_v56 = vrot.slane %v4319_v13, %v14298_v16  ;;  %v4060_v24 = vld [vmem:[#allocation2 + $0x20] sm:$0x3]  ;;  %v4332_v44 = vrot.slane %v4319_v13, %v14303_v54  ;;  %v5021_v13 = vld [vmem:[#allocation14 + $0x48] sm:$0xff] }
 0x84c   :  { %12017 = vmatpush1.bf16.msra.mxu1 %v12016_v5  ;;  %12081 = vmatpush1.bf16.msra.mxu0 %v12080_v6 }
 0x84d   :  { %12019 = vmatprep.subr.bf16.mxu1 %v12018_v29  ;;  %12083 = vmatprep.subr.bf16.mxu0 %v12082_v32 }
 0x850   :  { %12021 = vmatpush1.bf16.msra.mxu1 %v12020_v49  ;;  %12085 = vmatpush1.bf16.msra.mxu0 %v12084_v46 }
 0x851   :  { %12087 = vmatprep.subr.bf16.mxu1 %v12086_v39  ;;  %12151 = vmatprep.subr.bf16.mxu0 %v15667_v52 }
 0x8c2   :  { %v4196_v23 = vpop.f32.mrb[30].mxu1  ;;  %v4267_v27 = vpop.f32.mrb[42].mxu0 }
 0x8c3   :  { %v4197_v3 = vadd.f32 %v4196_v23, %v4115_v15  ;;  %v4198_v1 = vpop.f32.mrb[31].mxu1  ;;  %v10340_v38 = vpop.f32.mrb[43].mxu0  ;;  %v4268_v47 = vadd.f32 %v4267_v27, %v4123_v22  ;;  %v4061_v15 = vld [vmem:[#allocation2 + $0x28] sm:$0x3] }
 0x8c4   :  { %v4199_v11 = vadd.f32 %v4198_v1, %v4119_v51 }
 0x8c5   :  { %v4481_v40 = vrot.slane %v4197_v3, 2  ;;  %v4501_v60 = vrot.slane %v4268_v47, 2  ;;  %v5018_v47 = vld [vmem:[#allocation14 + $0x30] sm:$0xff] }
 0x8c6   :  { %v4491_v41 = vrot.slane %v4199_v11, 2 }
 0x8c7   :  { %v4483_v43 = vadd.f32 %v4481_v40, %v4056_v53  ;;  %v4543_v40 = vld [vmem:[#allocation12 + $0x20] sm:$0xff]  ;;  %v4549_v53 = vld [vmem:[#allocation12 + $0x50] sm:$0xff] }
 0x8c8   :  { %v4493_v57 = vadd.f32 %v4491_v41, %v4057_v2  ;;  %v5012_v41 = vld [vmem:[#allocation14] sm:$0xff]  ;;  %v4556_v2 = vld [vmem:[#allocation12 + $0x88] sm:$0xff] }
 0x8c9   :  { %v9200_v63 = vmul.f32 -1.442695, %v4483_v43  ;;  %v5015_v43 = vld [vmem:[#allocation14 + $0x18] sm:$0xff] }
 0x8ca   :  { %v9201_v25 = vmul.f32 -1.442695, %v4493_v57  ;;  %v4562_v57 = vld [vmem:[#allocation12 + $0xb8] sm:$0xff] }
 0x8cb   :  { %13280 = vpow2.f32 %v9200_v63  ;;  %v5019_v63 = vld [vmem:[#allocation14 + $0x38] sm:$0xff] }
 0x8cc   :  { %13282 = vpow2.f32 %v9201_v25  ;;  %v5022_v25 = vld [vmem:[#allocation14 + $0x50] sm:$0xff] }
 0x8d5   :  { %v13281_v59 = vpop.eup %13280 }
 0x8d6   :  { %v13283_v33 = vpop.eup %13282  ;;  %v4487_v7 = vadd.f32 1.0, %v13281_v59  ;;  %v12088_v59 = vpack.c.bf16 %v4549_v53, %v4543_v40  ;;  %v5043_v40 = vld [vmem:[#allocation14 + $0xf8] sm:$0xff]  ;;  %v5046_v53 = vld [vmem:[#allocation14 + $0x110] sm:$0xff] }
 0x8d7   :  { %v4497_v19 = vadd.f32 1.0, %v13283_v33  ;;  %v15684_v33 = vpack.c.bf16 %v5015_v43, %v5012_v41 }
 0x8d8   :  { %13284 = vrcp.f32 %v4487_v7  ;;  %v4555_v7 = vld [vmem:[#allocation12 + $0x80] sm:$0xff] }
 0x8d9   :  { %13286 = vrcp.f32 %v4497_v19  ;;  %v4561_v19 = vld [vmem:[#allocation12 + $0xb0] sm:$0xff] }
 0x8e2   :  { %v13285_v28 = vpop.eup %13284 }
 0x8e3   :  { %v13287_v0 = vpop.eup %13286  ;;  %v4503_v8 = vmul.f32 %v13285_v28, %v4501_v60  ;;  %v12090_v60 = vpack.c.bf16 %v4562_v57, %v4556_v2  ;;  %v15688_v28 = vpack.c.bf16 %v5022_v25, %v5019_v63  ;;  %v4603_v2 = vld [vmem:[#allocation12 + $0x200] sm:$0xff]  ;;  %v4609_v57 = vld [vmem:[#allocation12 + $0x230] sm:$0xff]  ;;  %v15723_v25 = vpack.c.bf16 %v5046_v53, %v5043_v40 }
 0x8e4   :  { %v4510_v14 = vmul.f32 %v13287_v0, %v4508_v36  ;;  %v4506_v58 = vsub.f32 1.0, %v13287_v0  ;;  %v4568_v36 = vld [vmem:[#allocation12 + $0xe8] sm:$0xff]  ;;  %v4574_v0 = vld [vmem:[#allocation12 + $0x118] sm:$0xff]  ;;  %v4651_v40 = vld [vmem:[#allocation12 + $0x380] sm:$0xff] }
 0x8e5   :  { %v4504_v4 = vadd.f32 %v4503_v8, %v4058_v61  ;;  %v15692_v8 = vld [vmem:[#allocation3 + $0x18] sm:$0xff]  ;;  %v5028_v61 = vld [vmem:[#allocation14 + $0x80] sm:$0xff] }
 0x8e6   :  { %v4405_v35 = vpop.f32.mrb[32].mxu1  ;;  %v4476_v5 = vpop.f32.mrb[44].mxu0 }
 0x8e7   :  { %13288 = vtanh.f32 %v4504_v4  ;;  %v4406_v48 = vadd.f32 %v4405_v35, %v4324_v18  ;;  %v4407_v55 = vpop.f32.mrb[33].mxu1  ;;  %v10375_v6 = vpop.f32.mrb[45].mxu0  ;;  %v4477_v39 = vadd.f32 %v4476_v5, %v4332_v44  ;;  %v5025_v18 = vld [vmem:[#allocation14 + $0x68] sm:$0xff]  ;;  %v4567_v4 = vld [vmem:[#allocation12 + $0xe0] sm:$0xff]  ;;  %v4573_v35 = vld [vmem:[#allocation12 + $0x110] sm:$0xff] }
 0x8e8   :  { %v4408_v62 = vadd.f32 %v4407_v55, %v4328_v56  ;;  %v15695_v56 = vpack.c.bf16 %v5021_v13, %v5018_v47  ;;  %v5024_v5 = vld [vmem:[#allocation14 + $0x60] sm:$0xff]  ;;  %v5027_v55 = vld [vmem:[#allocation14 + $0x78] sm:$0xff]  ;;  %v4580_v6 = vld [vmem:[#allocation12 + $0x148] sm:$0xff] }
 0x8e9   :  { %v4512_v17 = vadd.f32 %v4406_v48, %v4059_v31  ;;  %v12094_v48 = vpack.c.bf16 %v4574_v0, %v4568_v36  ;;  %v4586_v31 = vld [vmem:[#allocation12 + $0x178] sm:$0xff]  ;;  %v5049_v47 = vld [vmem:[#allocation14 + $0x128] sm:$0xff]  ;;  %v5052_v13 = vld [vmem:[#allocation14 + $0x140] sm:$0xff] }
 0x8ea   :  { %v4519_v26 = vadd.f32 %v4408_v62, %v4060_v24  ;;  %v5034_v24 = vld [vmem:[#allocation14 + $0xb0] sm:$0xff]  ;;  %v4598_v44 = vld [vmem:[#allocation12 + $0x1d8] sm:$0xff]  ;;  %v4615_v0 = vld [vmem:[#allocation12 + $0x260] sm:$0xff] }
 0x8eb   :  { %v9202_v29 = vmul.f32 -1.442695, %v4512_v17  ;;  %v15702_v17 = vpack.c.bf16 %v5028_v61, %v5025_v18  ;;  %v4621_v18 = vld [vmem:[#allocation12 + $0x290] sm:$0xff] }
 0x8ec   :  { %v9203_v50 = vmul.f32 -1.442695, %v4519_v26  ;;  %v12096_v26 = vpack.c.bf16 %v4573_v35, %v4567_v4  ;;  %v5048_v4 = vld [vmem:[#allocation14 + $0x120] sm:$0xff]  ;;  %v5051_v35 = vld [vmem:[#allocation14 + $0x138] sm:$0xff] }
 0x8ed   :  { %13290 = vpow2.f32 %v9202_v29  ;;  %v5031_v29 = vld [vmem:[#allocation14 + $0x98] sm:$0xff] }
 0x8ee   :  { %13292 = vpow2.f32 %v9203_v50  ;;  %v4579_v50 = vld [vmem:[#allocation12 + $0x140] sm:$0xff] }
 0x8f1   :  { %v13289_v32 = vpop.eup %13288 }
 0x8f2   :  { %v4507_v49 = vmul.f32 %v13289_v32, %v4506_v58  ;;  %v15707_v58 = vpack.c.bf16 %v5027_v55, %v5024_v5  ;;  %v4585_v32 = vld [vmem:[#allocation12 + $0x170] sm:$0xff]  ;;  %v4628_v5 = vld [vmem:[#allocation12 + $0x2c8] sm:$0xff]  ;;  %v5055_v55 = vld [vmem:[#allocation14 + $0x158] sm:$0xff] }
 0x8f4   :  { %v4511_v30 = vadd.f32 %v4510_v14, %v4507_v49  ;;  %v12092_v14 = vpack.c.bf16 %v4561_v19, %v4555_v7  ;;  %v12098_v49 = vpack.c.bf16 %v4586_v31, %v4580_v6  ;;  %v5045_v7 = vld [vmem:[#allocation14 + $0x108] sm:$0xff]  ;;  %v5058_v6 = vld [vmem:[#allocation14 + $0x170] sm:$0xff]  ;;  %v12112_v31 = vpack.c.bf16 %v4621_v18, %v4615_v0 }
 0x8f5   :  { %v4616_v19 = vld [vmem:[#allocation12 + $0x268] sm:$0xff] }
 0x8f6   :  { %4533 = vst [vmem:[#allocation3 + $0x10] sm:$0xc0] %v4511_v30  ;;  %v15709_v30 = vpack.c.bf16 %v5034_v24, %v5031_v29  ;;  %v15732_v29 = vpack.c.bf16 %v5051_v35, %v5048_v4  ;;  %v4627_v24 = vld [vmem:[#allocation12 + $0x2c0] sm:$0xff]  ;;  %v5029_v0 = vld [vmem:[#allocation14 + $0x88] sm:$0xff] }
 0x8f7   :  { %v13291_v42 = vpop.eup %13290  ;;  %v4676_v18 = vld [vmem:[#allocation12 + $0x448] sm:$0xff] }
 0x8f8   :  { %v4516_v46 = vadd.f32 1.0, %v13291_v42  ;;  %v13293_v37 = vpop.eup %13292  ;;  %v5030_v42 = vld [vmem:[#allocation14 + $0x90] sm:$0xff] }
 0x8f9   :  { %v4523_v34 = vadd.f32 1.0, %v13293_v37  ;;  %v4592_v37 = vld [vmem:[#allocation12 + $0x1a8] sm:$0xff] }
 0x8fa   :  { %13294 = vrcp.f32 %v4516_v46  ;;  %v5033_v46 = vld [vmem:[#allocation14 + $0xa8] sm:$0xff] }
 0x8fb   :  { %13296 = vrcp.f32 %v4523_v34  ;;  %v5037_v34 = vld [vmem:[#allocation14 + $0xc8] sm:$0xff] }
 0x8fd   :  { %v15700_v62 = vld [vmem:[#allocation3 + $0x10] sm:$0xff] }
 0x904   :  { %v13295_v9 = vpop.eup %13294 }
 0x905   :  { %v4526_v21 = vmul.f32 %v13295_v9, %v4477_v39  ;;  %v13297_v23 = vpop.eup %13296  ;;  %v5040_v39 = vld [vmem:[#allocation14 + $0xe0] sm:$0xff]  ;;  %v12100_v9 = vpack.c.bf16 %v4585_v32, %v4579_v50  ;;  %v15735_v50 = vpack.c.bf16 %v5058_v6, %v5055_v55  ;;  %v4633_v32 = vld [vmem:[#allocation12 + $0x2f0] sm:$0xff] }
 0x906   :  { %v4529_v27 = vsub.f32 1.0, %v13297_v23  ;;  %v4531_v38 = vmul.f32 %v13297_v23, %v15663_v20  ;;  %v15686_v20 = vld [vmem:[#allocation3] sm:$0xff]  ;;  %v12102_v23 = vpack.c.bf16 %v4598_v44, %v4592_v37  ;;  %v4646_v37 = vld [vmem:[#allocation12 + $0x358] sm:$0xff]  ;;  %v12116_v44 = vpack.c.bf16 %v4633_v32, %v4627_v24  ;;  %v5032_v6 = vld [vmem:[#allocation14 + $0xa0] sm:$0xff] }
 0x907   :  { %v4527_v51 = vadd.f32 %v4526_v21, %v4061_v15  ;;  %v15714_v21 = vpack.c.bf16 %v5033_v46, %v5030_v42  ;;  %v4591_v15 = vld [vmem:[#allocation12 + $0x1a0] sm:$0xff]  ;;  %v5057_v42 = vld [vmem:[#allocation14 + $0x168] sm:$0xff]  ;;  %v4681_v55 = vld [vmem:[#allocation12 + $0x470] sm:$0xff] }
 0x908   :  { %v4640_v46 = vld [vmem:[#allocation12 + $0x328] sm:$0xff] }
 0x909   :  { %13298 = vtanh.f32 %v4527_v51  ;;  %v4597_v51 = vld [vmem:[#allocation12 + $0x1d0] sm:$0xff]  ;;  %v4688_v24 = vld [vmem:[#allocation12 + $0x4a8] sm:$0xff] }
 0x90a   :  { %v12104_v41 = vpack.c.bf16 %v4597_v51, %v4591_v15  ;;  %v4645_v15 = vld [vmem:[#allocation12 + $0x350] sm:$0xff] }
 0x90b   :  { %v5014_v51 = vld [vmem:[#allocation14 + $0x10] sm:$0xff] }
 0x913   :  { %v13299_v3 = vpop.eup %13298 }
 0x914   :  { %v4530_v1 = vmul.f32 %v13299_v3, %v4529_v27  ;;  %v15717_v27 = vpack.c.bf16 %v5040_v39, %v5037_v34  ;;  %v5036_v3 = vld [vmem:[#allocation14 + $0xc0] sm:$0xff] }
 0x915   :  { %v4639_v39 = vld [vmem:[#allocation12 + $0x320] sm:$0xff] }
 0x916   :  { %v4532_v11 = vadd.f32 %v4531_v38, %v4530_v1  ;;  %v5039_v1 = vld [vmem:[#allocation14 + $0xd8] sm:$0xff]  ;;  %v4604_v38 = vld [vmem:[#allocation12 + $0x208] sm:$0xff] }
 0x917   :  { %v15720_v43 = vpack.c.bf16 %v5039_v1, %v5036_v3  ;;  %v4652_v3 = vld [vmem:[#allocation12 + $0x388] sm:$0xff]  ;;  %v4658_v1 = vld [vmem:[#allocation12 + $0x3b8] sm:$0xff] }
 0x918   :  { %4534 = vst [vmem:[#allocation3 + $0x8] sm:$0x3] %v4532_v11  ;;  %v4610_v11 = vld [vmem:[#allocation12 + $0x238] sm:$0xff]  ;;  %v12122_v53 = vpack.c.bf16 %v4658_v1, %v4652_v3  ;;  %v4699_v3 = vld [vmem:[#allocation12 + $0x500] sm:$0xff] }
 0x919   :  { %v12106_v63 = vpack.c.bf16 %v4610_v11, %v4604_v38  ;;  %v12120_v38 = vpack.c.bf16 %v4645_v15, %v4639_v39  ;;  %v5041_v39 = vld [vmem:[#allocation14 + $0xe8] sm:$0xff]  ;;  %v4706_v15 = vld [vmem:[#allocation12 + $0x538] sm:$0xff] }
 0x91f   :  { %v4536_v22 = vld [vmem:[#allocation3 + $0x8] sm:$0xff] }
 0x920   :  { %4827 = vmatprep.mubr.f32.mxu1 %v4536_v22  ;;  %4904 = vmatprep.mubr.f32.mxu0 %v4536_v22 }
 0x921   :  { %4828 = vmatmul.mubr.f32.vlgmr.msra.gmra.mrb[34].mxu1 %v15686_v20  ;;  %4905 = vmatmul.mubr.f32.vlgmr.msra.gmra.mrb[46].mxu0 %v15686_v20 }
 0x922   :  { %12089 = vmatpush1.bf16.msra.mxu1 %v12088_v59  ;;  %12153 = vmatpush1.bf16.msra.mxu0 %v15684_v33  ;;  %v5042_v59 = vld [vmem:[#allocation14 + $0xf0] sm:$0xff] }
 0x923   :  { %4833 = vmatprep.mubr.f32.mxu1 %v15692_v8  ;;  %4910 = vmatprep.mubr.f32.mxu0 %v15692_v8  ;;  %v15726_v36 = vpack.c.bf16 %v5045_v7, %v5042_v59  ;;  %v4670_v59 = vld [vmem:[#allocation12 + $0x418] sm:$0xff] }
 0x924   :  { %12091 = vmatprep.subr.bf16.mxu1 %v12090_v60  ;;  %12155 = vmatprep.subr.bf16.mxu0 %v15688_v28  ;;  %v12108_v60 = vpack.c.bf16 %v4609_v57, %v4603_v2  ;;  %v5020_v2 = vld [vmem:[#allocation14 + $0x40] sm:$0xff]  ;;  %v5023_v57 = vld [vmem:[#allocation14 + $0x58] sm:$0xff] }
 0x925   :  { %4834 = vmatmul.mubr.f32.gmra.mrb[36].mxu1 %v15700_v62  ;;  %4911 = vmatmul.mubr.f32.gmra.mrb[48].mxu0 %v15700_v62 }
 0x926   :  { %12093 = vmatpush1.bf16.msra.mxu1 %v12092_v14  ;;  %12157 = vmatpush1.bf16.msra.mxu0 %v15695_v56  ;;  %v15729_v14 = vpack.c.bf16 %v5052_v13, %v5049_v47  ;;  %v4669_v13 = vld [vmem:[#allocation12 + $0x410] sm:$0xff] }
 0x927   :  { %4981 = vmatprep.mubr.f32.mxu1 %v4536_v22  ;;  %12095 = vmatprep.subr.bf16.mxu1 %v12094_v48  ;;  %v4622_v22 = vld [vmem:[#allocation12 + $0x298] sm:$0xff] }
 0x928   :  { %12159 = vmatprep.subr.bf16.mxu0 %v15702_v17  ;;  %5141 = vmatprep.mubr.f32.mxu0 %v17158_v45  ;;  %v12110_v61 = vpack.c.bf16 %v4622_v22, %v4616_v19  ;;  %v4634_v48 = vld [vmem:[#allocation12 + $0x2f8] sm:$0xff]  ;;  %v15747_v19 = vpack.c.bf16 %v5023_v57, %v5020_v2  ;;  %v4663_v22 = vld [vmem:[#allocation12 + $0x3e0] sm:$0xff] }
 0x929   :  { %v12128_v4 = vpack.c.bf16 %v4669_v13, %v4663_v22  ;;  %v4718_v2 = vld [vmem:[#allocation12 + $0x598] sm:$0xff]  ;;  %v4717_v22 = vld [vmem:[#allocation12 + $0x590] sm:$0xff]  ;;  %v5053_v13 = vld [vmem:[#allocation14 + $0x148] sm:$0xff] }
 0x92a   :  { %12097 = vmatpush1.bf16.msra.mxu1 %v12096_v26  ;;  %12161 = vmatpush1.bf16.msra.mxu0 %v15707_v58  ;;  %v12114_v26 = vpack.c.bf16 %v4634_v48, %v4628_v5  ;;  %v4675_v5 = vld [vmem:[#allocation12 + $0x440] sm:$0xff] }
 0x92b   :  { %12099 = vmatprep.subr.bf16.mxu1 %v12098_v49  ;;  %12163 = vmatprep.subr.bf16.mxu0 %v15709_v30  ;;  %v5054_v49 = vld [vmem:[#allocation14 + $0x150] sm:$0xff]  ;;  %v12132_v32 = vpack.c.bf16 %v4681_v55, %v4675_v5  ;;  %v5056_v55 = vld [vmem:[#allocation14 + $0x160] sm:$0xff] }
 0x92c   :  { %v15738_v34 = vpack.c.bf16 %v5057_v42, %v5054_v49  ;;  %v4687_v42 = vld [vmem:[#allocation12 + $0x4a0] sm:$0xff] }
 0x92e   :  { %12101 = vmatpush1.bf16.msra.mxu1 %v12100_v9  ;;  %12165 = vmatpush1.bf16.msra.mxu0 %v15714_v21  ;;  %v12118_v9 = vpack.c.bf16 %v4646_v37, %v4640_v46  ;;  %v4693_v37 = vld [vmem:[#allocation12 + $0x4d0] sm:$0xff] }
 0x92f   :  { %12103 = vmatprep.subr.bf16.mxu1 %v12102_v23  ;;  %12167 = vmatprep.subr.bf16.mxu0 %v15717_v27  ;;  %v5017_v23 = vld [vmem:[#allocation14 + $0x28] sm:$0xff] }
 0x930   :  { %v15742_v11 = vpack.c.bf16 %v5017_v23, %v5014_v51  ;;  %v12136_v51 = vpack.c.bf16 %v4693_v37, %v4687_v42  ;;  %v5221_v37 = vld [vmem:[#allocation15 + $0x18] sm:$0xff] }
 0x932   :  { %12105 = vmatpush1.bf16.msra.mxu1 %v12104_v41  ;;  %12169 = vmatpush1.bf16.msra.mxu0 %v15720_v43  ;;  %v4657_v41 = vld [vmem:[#allocation12 + $0x3b0] sm:$0xff] }
 0x933   :  { %12107 = vmatprep.subr.bf16.mxu1 %v12106_v63  ;;  %12171 = vmatprep.subr.bf16.mxu0 %v15723_v25  ;;  %v4664_v63 = vld [vmem:[#allocation12 + $0x3e8] sm:$0xff]  ;;  %v12124_v7 = vpack.c.bf16 %v4657_v41, %v4651_v40  ;;  %v5044_v40 = vld [vmem:[#allocation14 + $0x100] sm:$0xff] }
 0x934   :  { %v12126_v47 = vpack.c.bf16 %v4670_v59, %v4664_v63  ;;  %v4712_v41 = vld [vmem:[#allocation12 + $0x568] sm:$0xff]  ;;  %v4711_v59 = vld [vmem:[#allocation12 + $0x560] sm:$0xff] }
 0x936   :  { %12109 = vmatpush1.bf16.msra.mxu1 %v12108_v60  ;;  %12173 = vmatpush1.bf16.msra.mxu0 %v15726_v36  ;;  %v5026_v60 = vld [vmem:[#allocation14 + $0x70] sm:$0xff] }
 0x937   :  { %12111 = vmatprep.subr.bf16.mxu1 %v12110_v61  ;;  %12175 = vmatprep.subr.bf16.mxu0 %v15729_v14  ;;  %v4682_v61 = vld [vmem:[#allocation12 + $0x478] sm:$0xff]  ;;  %v15753_v35 = vpack.c.bf16 %v5029_v0, %v5026_v60  ;;  %v4724_v60 = vld [vmem:[#allocation12 + $0x5c8] sm:$0xff] }
 0x938   :  { %v12130_v48 = vpack.c.bf16 %v4682_v61, %v4676_v18  ;;  %v4730_v0 = vld [vmem:[#allocation12 + $0x5f8] sm:$0xff]  ;;  %v12144_v18 = vpack.c.bf16 %v4717_v22, %v4711_v59  ;;  %v5230_v22 = vld [vmem:[#allocation15 + $0x60] sm:$0xff] }
 0x939   :  { %v12146_v5 = vpack.c.bf16 %v4730_v0, %v4724_v60  ;;  %v5232_v0 = vld [vmem:[#allocation15 + $0x70] sm:$0xff] }
 0x93a   :  { %12113 = vmatpush1.bf16.msra.mxu1 %v12112_v31  ;;  %12177 = vmatpush1.bf16.msra.mxu0 %v15732_v29  ;;  %v5035_v31 = vld [vmem:[#allocation14 + $0xb8] sm:$0xff] }
 0x93b   :  { %12115 = vmatprep.subr.bf16.mxu1 %v12114_v26  ;;  %12179 = vmatprep.subr.bf16.mxu0 %v15735_v50  ;;  %v4694_v26 = vld [vmem:[#allocation12 + $0x4d8] sm:$0xff]  ;;  %v15757_v49 = vpack.c.bf16 %v5035_v31, %v5032_v6  ;;  %v5219_v31 = vld [vmem:[#allocation15 + $0x8] sm:$0xff] }
 0x93c   :  { %v12134_v46 = vpack.c.bf16 %v4694_v26, %v4688_v24  ;;  %v5059_v6 = vld [vmem:[#allocation14 + $0x178] sm:$0xff]  ;;  %v5222_v24 = vld [vmem:[#allocation15 + $0x20] sm:$0xff] }
 0x93d   :  { %v15776_v42 = vpack.c.bf16 %v5222_v24, %v5219_v31  ;;  %v5246_v31 = vld [vmem:[#allocation15 + $0xe0] sm:$0xff]  ;;  %v5241_v24 = vld [vmem:[#allocation15 + $0xb8] sm:$0xff] }
 0x93e   :  { %12117 = vmatpush1.bf16.msra.mxu1 %v12116_v44  ;;  %12181 = vmatpush1.bf16.msra.mxu0 %v15738_v34  ;;  %v5038_v44 = vld [vmem:[#allocation14 + $0xd0] sm:$0xff] }
 0x93f   :  { %12119 = vmatprep.subr.bf16.mxu1 %v12118_v9  ;;  %12182 = vmatprep.subr.bf16.mxu0 %v17117_v12  ;;  %v4700_v9 = vld [vmem:[#allocation12 + $0x508] sm:$0xff]  ;;  %v15761_v23 = vpack.c.bf16 %v5041_v39, %v5038_v44  ;;  %v5225_v44 = vld [vmem:[#allocation15 + $0x38] sm:$0xff]  ;;  %v5228_v39 = vld [vmem:[#allocation15 + $0x50] sm:$0xff] }
 0x940   :  { %v12138_v1 = vpack.c.bf16 %v4706_v15, %v4700_v9  ;;  %v5220_v9 = vld [vmem:[#allocation15 + $0x10] sm:$0xff]  ;;  %v5223_v15 = vld [vmem:[#allocation15 + $0x28] sm:$0xff] }
 0x941   :  { %5142 = vmatmul.mubr.f32.vlgmr.msra.gmra.mrb[50].mxu0 %v17158_v45 }
 0x942   :  { %12121 = vmatpush1.bf16.msra.mxu1 %v12120_v38  ;;  %12184 = vmatpush3.bf16.msra.mxu0 %v15742_v11  ;;  %v4705_v38 = vld [vmem:[#allocation12 + $0x530] sm:$0xff] }
 0x943   :  { %12123 = vmatprep.subr.bf16.mxu1 %v12122_v53  ;;  %12185 = vmatprep.subr.bf16.mxu0 %v17117_v12  ;;  %v5047_v53 = vld [vmem:[#allocation14 + $0x118] sm:$0xff]  ;;  %v12140_v57 = vpack.c.bf16 %v4705_v38, %v4699_v3  ;;  %v15782_v3 = vpack.c.bf16 %v5228_v39, %v5225_v44  ;;  %v5227_v38 = vld [vmem:[#allocation15 + $0x48] sm:$0xff] }
 0x944   :  { %10408 = vmatprep.mubr.msk.f32.mxu0 %vm13638_vm2, %v17158_v45  ;;  %v15765_v63 = vpack.c.bf16 %v5047_v53, %v5044_v40  ;;  %v5231_v40 = vld [vmem:[#allocation15 + $0x68] sm:$0xff]  ;;  %v15785_v53 = vpack.c.bf16 %v5223_v15, %v5220_v9  ;;  %v5245_v44 = vld [vmem:[#allocation15 + $0xd8] sm:$0xff]  ;;  %v5252_v15 = vld [vmem:[#allocation15 + $0x110] sm:$0xff] }
 0x945   :  { %v5249_v39 = vld [vmem:[#allocation15 + $0xf8] sm:$0xff] }
 0x946   :  { %12125 = vmatpush1.bf16.msra.mxu1 %v12124_v7  ;;  %12187 = vmatpush3.bf16.msra.mxu0 %v15747_v19  ;;  %v12142_v7 = vpack.c.bf16 %v4718_v2, %v4712_v41  ;;  %v5234_v41 = vld [vmem:[#allocation15 + $0x80] sm:$0xff] }
 0x947   :  { %12127 = vmatprep.subr.bf16.mxu1 %v12126_v47  ;;  %12188 = vmatprep.subr.bf16.mxu0 %v17117_v12  ;;  %v5050_v47 = vld [vmem:[#allocation14 + $0x130] sm:$0xff]  ;;  %v5226_v2 = vld [vmem:[#allocation15 + $0x40] sm:$0xff] }
 0x948   :  { %v15769_v61 = vpack.c.bf16 %v5053_v13, %v5050_v47  ;;  %v5233_v47 = vld [vmem:[#allocation15 + $0x78] sm:$0xff] }
 0x949   :  { %v5237_v13 = vld [vmem:[#allocation15 + $0x98] sm:$0xff] }
 0x94a   :  { %12129 = vmatpush1.bf16.msra.mxu1 %v12128_v4  ;;  %12190 = vmatpush3.bf16.msra.mxu0 %v15753_v35  ;;  %v4723_v4 = vld [vmem:[#allocation12 + $0x5c0] sm:$0xff] }
 0x94b   :  { %12131 = vmatprep.subr.bf16.mxu1 %v12130_v48  ;;  %12191 = vmatprep.subr.bf16.mxu0 %v17117_v12  ;;  %v4729_v48 = vld [vmem:[#allocation12 + $0x5f0] sm:$0xff] }
 0x94c   :  { %v12148_v26 = vpack.c.bf16 %v4729_v48, %v4723_v4  ;;  %v5239_v48 = vld [vmem:[#allocation15 + $0xa8] sm:$0xff] }
 0x94e   :  { %12133 = vmatpush1.bf16.msra.mxu1 %v12132_v32  ;;  %12193 = vmatpush3.bf16.msra.mxu0 %v15757_v49  ;;  %v15773_v32 = vpack.c.bf16 %v5059_v6, %v5056_v55  ;;  %v5243_v55 = vld [vmem:[#allocation15 + $0xc8] sm:$0xff] }
 0x94f   :  { %12135 = vmatprep.subr.bf16.mxu1 %v12134_v46  ;;  %12194 = vmatprep.subr.bf16.mxu0 %v17117_v12  ;;  %v5218_v46 = vld [vmem:[#allocation15] sm:$0xff] }
 0x952   :  { %12137 = vmatpush1.bf16.msra.mxu1 %v12136_v51  ;;  %12196 = vmatpush3.bf16.msra.mxu0 %v15761_v23  ;;  %v15779_v51 = vpack.c.bf16 %v5221_v37, %v5218_v46  ;;  %v15818_v46 = vpack.c.bf16 %v5246_v31, %v5243_v55  ;;  %v5242_v37 = vld [vmem:[#allocation15 + $0xc0] sm:$0xff]  ;;  %v5257_v55 = vld [vmem:[#allocation15 + $0x138] sm:$0xff] }
 0x953   :  { %12139 = vmatprep.subr.bf16.mxu1 %v12138_v1  ;;  %12197 = vmatprep.subr.bf16.mxu0 %v17117_v12  ;;  %v5224_v1 = vld [vmem:[#allocation15 + $0x30] sm:$0xff]  ;;  %v5261_v31 = vld [vmem:[#allocation15 + $0x158] sm:$0xff] }
 0x954   :  { %v15791_v59 = vpack.c.bf16 %v5227_v38, %v5224_v1  ;;  %v5244_v1 = vld [vmem:[#allocation15 + $0xd0] sm:$0xff]  ;;  %v5247_v38 = vld [vmem:[#allocation15 + $0xe8] sm:$0xff] }
 0x956   :  { %12141 = vmatpush1.bf16.msra.mxu1 %v12140_v57  ;;  %12199 = vmatpush3.bf16.msra.mxu0 %v15765_v63  ;;  %v5229_v57 = vld [vmem:[#allocation15 + $0x58] sm:$0xff] }
 0x957   :  { %12143 = vmatprep.subr.bf16.mxu1 %v12142_v7  ;;  %12200 = vmatprep.subr.bf16.mxu0 %v17117_v12  ;;  %v15794_v7 = vpack.c.bf16 %v5234_v41, %v5231_v40  ;;  %v15797_v60 = vpack.c.bf16 %v5229_v57, %v5226_v2  ;;  %v15825_v40 = vpack.c.bf16 %v5245_v44, %v5242_v37  ;;  %v5248_v2 = vld [vmem:[#allocation15 + $0xf0] sm:$0xff]  ;;  %v5251_v57 = vld [vmem:[#allocation15 + $0x108] sm:$0xff] }
 0x958   :  { %v15828_v41 = vpack.c.bf16 %v5252_v15, %v5249_v39  ;;  %v5256_v37 = vld [vmem:[#allocation15 + $0x130] sm:$0xff]  ;;  %v5259_v44 = vld [vmem:[#allocation15 + $0x148] sm:$0xff] }
 0x95a   :  { %12145 = vmatpush1.bf16.msra.mxu1 %v12144_v18  ;;  %12202 = vmatpush3.bf16.msra.mxu0 %v15769_v61  ;;  %v15804_v18 = vpack.c.bf16 %v5233_v47, %v5230_v22  ;;  %v5255_v22 = vld [vmem:[#allocation15 + $0x128] sm:$0xff]  ;;  %v15831_v47 = vpack.c.bf16 %v5247_v38, %v5244_v1  ;;  %v5260_v1 = vld [vmem:[#allocation15 + $0x150] sm:$0xff] }
 0x95b   :  { %12147 = vmatprep.subr.bf16.mxu1 %v12146_v5  ;;  %12203 = vmatprep.subr.bf16.mxu0 %v17117_v12  ;;  %v5236_v5 = vld [vmem:[#allocation15 + $0x90] sm:$0xff]  ;;  %v5263_v38 = vld [vmem:[#allocation15 + $0x168] sm:$0xff] }
 0x95e   :  { %12149 = vmatpush1.bf16.msra.mxu1 %v12148_v26  ;;  %12205 = vmatpush3.bf16.msra.mxu0 %v15773_v32  ;;  %v15815_v26 = vpack.c.bf16 %v5239_v48, %v5236_v5  ;;  %v5254_v48 = vld [vmem:[#allocation15 + $0x120] sm:$0xff] }
 0x95f   :  { %12207 = vmatprep.subr.bf16.mxu1 %v15776_v42  ;;  %12238 = vmatprep.subr.bf16.mxu0 %v17117_v12  ;;  %v15845_v39 = vpack.c.bf16 %v5257_v55, %v5254_v48 }
 0x961   :  { %4982 = vmatmul.mubr.f32.vlgmr.msra.gmra.mrb[38].mxu1 %v15686_v20  ;;  %10409 = vmatmul.mubr.f32.vlgmr.msra.gmra.mrb[52].mxu0 %v17158_v45  ;;  %v5240_v20 = vld [vmem:[#allocation15 + $0xb0] sm:$0xff] }
 0x962   :  { %4987 = vmatprep.mubr.f32.mxu1 %v15692_v8  ;;  %12209 = vmatpush1.bf16.msra.mxu1 %v15779_v51  ;;  %v5235_v8 = vld [vmem:[#allocation15 + $0x88] sm:$0xff]  ;;  %v15808_v4 = vpack.c.bf16 %v5240_v20, %v5237_v13  ;;  %v5258_v13 = vld [vmem:[#allocation15 + $0x140] sm:$0xff] }
 0x963   :  { %12211 = vmatprep.subr.bf16.mxu1 %v15782_v3  ;;  %12240 = vmatpush3.bf16.msra.mxu0 %v15785_v53  ;;  %v15811_v6 = vpack.c.bf16 %v5235_v8, %v5232_v0  ;;  %v5250_v20 = vld [vmem:[#allocation15 + $0x100] sm:$0xff]  ;;  %v5253_v0 = vld [vmem:[#allocation15 + $0x118] sm:$0xff]  ;;  %v15835_v8 = vpack.c.bf16 %v5251_v57, %v5248_v2  ;;  %v15838_v5 = vpack.c.bf16 %v5258_v13, %v5255_v22 }
 0x964   :  { %12241 = vmatprep.subr.bf16.mxu0 %v17117_v12  ;;  %10443 = vmatprep.mubr.msk.f32.mxu0 %vm13638_vm2, %v17158_v45  ;;  %v15851_v2 = vpack.c.bf16 %v5259_v44, %v5256_v37  ;;  %v5262_v57 = vld [vmem:[#allocation15 + $0x160] sm:$0xff]  ;;  %v5265_v22 = vld [vmem:[#allocation15 + $0x178] sm:$0xff]  ;;  %v15855_v13 = vpack.c.bf16 %v5263_v38, %v5260_v1 }
 0x965   :  { %4988 = vmatmul.mubr.f32.gmra.mrb[40].mxu1 %v15700_v62  ;;  %v5238_v62 = vld [vmem:[#allocation15 + $0xa0] sm:$0xff] }
 0x966   :  { %12213 = vmatpush1.bf16.msra.mxu1 %v15791_v59  ;;  %5347 = vmatprep.mubr.f32.mxu1 %v17158_v45  ;;  %v15821_v9 = vpack.c.bf16 %v5241_v24, %v5238_v62  ;;  %v15841_v62 = vpack.c.bf16 %v5253_v0, %v5250_v20  ;;  %v5264_v24 = vld [vmem:[#allocation15 + $0x170] sm:$0xff]  ;;  %v15859_v20 = vpack.c.bf16 %v5265_v22, %v5262_v57 }
 0x967   :  { %12215 = vmatprep.subr.bf16.mxu1 %v15794_v7  ;;  %12243 = vmatpush3.bf16.msra.mxu0 %v15797_v60  ;;  %v15848_v15 = vpack.c.bf16 %v5264_v24, %v5261_v31 }
 0x968   :  { %12244 = vmatprep.subr.bf16.mxu0 %v17117_v12 }
 0x96a   :  { %12217 = vmatpush1.bf16.msra.mxu1 %v15804_v18 }
 0x96b   :  { %12219 = vmatprep.subr.bf16.mxu1 %v15808_v4  ;;  %12246 = vmatpush3.bf16.msra.mxu0 %v15811_v6 }
 0x96c   :  { %12247 = vmatprep.subr.bf16.mxu0 %v17117_v12 }
 0x96e   :  { %12221 = vmatpush1.bf16.msra.mxu1 %v15815_v26 }
 0x96f   :  { %12223 = vmatprep.subr.bf16.mxu1 %v15818_v46  ;;  %12249 = vmatpush3.bf16.msra.mxu0 %v15821_v9 }
 0x970   :  { %12250 = vmatprep.subr.bf16.mxu0 %v17117_v12 }
 0x972   :  { %12225 = vmatpush1.bf16.msra.mxu1 %v15825_v40 }
 0x973   :  { %12227 = vmatprep.subr.bf16.mxu1 %v15828_v41  ;;  %12252 = vmatpush3.bf16.msra.mxu0 %v15831_v47 }
 0x974   :  { %12253 = vmatprep.subr.bf16.mxu0 %v17117_v12 }
 0x976   :  { %12229 = vmatpush1.bf16.msra.mxu1 %v15835_v8 }
 0x977   :  { %12231 = vmatprep.subr.bf16.mxu1 %v15838_v5  ;;  %12255 = vmatpush3.bf16.msra.mxu0 %v15841_v62 }
 0x978   :  { %12256 = vmatprep.subr.bf16.mxu0 %v17117_v12 }
 0x97a   :  { %12233 = vmatpush1.bf16.msra.mxu1 %v15845_v39 }
 0x97b   :  { %12235 = vmatprep.subr.bf16.mxu1 %v15848_v15  ;;  %12258 = vmatpush3.bf16.msra.mxu0 %v15851_v2 }
 0x97c   :  { %12259 = vmatprep.subr.bf16.mxu0 %v17117_v12 }
 0x97e   :  { %12237 = vmatpush1.bf16.msra.mxu1 %v15855_v13 }
 0x97f   :  { %12261 = vmatpush3.bf16.msra.mxu0 %v15859_v20  ;;  %12263 = vmatprep.subr.bf16.mxu1 %v15667_v52  ;;  %v4731_v52 = vld [vmem:[%s17089_s13] sm:$0x3f] }
 0x980   :  { %12294 = vmatprep.subr.bf16.mxu0 %v17117_v12 }
 0x981   :  { %5348 = vmatmul.mubr.f32.vlgmr.msra.gmra.mrb[42].mxu1 %v17158_v45 }
 0x982   :  { %10444 = vmatmul.mubr.f32.vlgmr.msra.gmra.mrb[54].mxu0 %v17158_v45  ;;  %12265 = vmatpush1.bf16.msra.mxu1 %v15684_v33  ;;  %v4736_v33 = vrot.slane %v4731_v52, %v14293_v10 }
 0x983   :  { %12296 = vmatpush3.bf16.msra.mxu0 %v15742_v11  ;;  %12267 = vmatprep.subr.bf16.mxu1 %v15688_v28  ;;  %v4744_v28 = vrot.slane %v4731_v52, %v14303_v54 }
 0x984   :  { %12297 = vmatprep.subr.bf16.mxu0 %v17117_v12  ;;  %5612 = vmatprep.mubr.f32.mxu1 %v17158_v45 }
 0x985   :  { %10478 = vmatprep.mubr.msk.f32.mxu0 %vm13638_vm2, %v17158_v45 }
 0x986   :  { %12269 = vmatpush1.bf16.msra.mxu1 %v15695_v56  ;;  %v4740_v56 = vrot.slane %v4731_v52, %v14298_v16 }
 0x987   :  { %12299 = vmatpush3.bf16.msra.mxu0 %v15747_v19  ;;  %12271 = vmatprep.subr.bf16.mxu1 %v15702_v17  ;;  %v17163_v17 = vld [vmem:[#allocation23_spill] sm:$0xff] }
 0x988   :  { %12300 = vmatprep.subr.bf16.mxu0 %v17117_v12 }
 0x98a   :  { %12273 = vmatpush1.bf16.msra.mxu1 %v15707_v58  ;;  %v17164_v58 = vsub.s32 3, %v17163_v17 }
 0x98b   :  { %12302 = vmatpush3.bf16.msra.mxu0 %v15753_v35  ;;  %12275 = vmatprep.subr.bf16.mxu1 %v15709_v30 }
 0x98c   :  { %12303 = vmatprep.subr.bf16.mxu0 %v17117_v12  ;;  %v4748_v30 = vrot.slane %v4731_v52, %v17164_v58  ;;  %v17165_v58 = vsub.s32 4, %v17163_v17 }
 0x98e   :  { %12277 = vmatpush1.bf16.msra.mxu1 %v15714_v21 }
 0x98f   :  { %12305 = vmatpush3.bf16.msra.mxu0 %v15757_v49  ;;  %12279 = vmatprep.subr.bf16.mxu1 %v15717_v27 }
 0x990   :  { %12306 = vmatprep.subr.bf16.mxu0 %v17117_v12 }
 0x992   :  { %12281 = vmatpush1.bf16.msra.mxu1 %v15720_v43 }
 0x993   :  { %12308 = vmatpush3.bf16.msra.mxu0 %v15761_v23  ;;  %12283 = vmatprep.subr.bf16.mxu1 %v15723_v25 }
 0x994   :  { %12309 = vmatprep.subr.bf16.mxu0 %v17117_v12 }
 0x996   :  { %12285 = vmatpush1.bf16.msra.mxu1 %v15726_v36 }
 0x997   :  { %12311 = vmatpush3.bf16.msra.mxu0 %v15765_v63  ;;  %12287 = vmatprep.subr.bf16.mxu1 %v15729_v14 }
 0x998   :  { %12312 = vmatprep.subr.bf16.mxu0 %v17117_v12 }
 0x99a   :  { %12289 = vmatpush1.bf16.msra.mxu1 %v15732_v29 }
 0x99b   :  { %12314 = vmatpush3.bf16.msra.mxu0 %v15769_v61  ;;  %12291 = vmatprep.subr.bf16.mxu1 %v15735_v50 }
 0x99c   :  { %12315 = vmatprep.subr.bf16.mxu0 %v17117_v12 }
 0x99e   :  { %12293 = vmatpush1.bf16.msra.mxu1 %v15738_v34 }
 0x99f   :  { %12317 = vmatpush3.bf16.msra.mxu0 %v15773_v32  ;;  %12319 = vmatprep.subr.bf16.mxu1 %v15776_v42  ;;  %v5060_v32 = vld [vmem:[%s17092_s16] sm:$0x7] }
 0x9a0   :  { %12350 = vmatprep.subr.bf16.mxu0 %v17117_v12  ;;  %v5065_v42 = vrot.slane %v5060_v32, %v14293_v10  ;;  %v5069_v24 = vrot.slane %v5060_v32, %v14298_v16 }
 0x9f4   :  { %v4829_v21 = vpop.f32.mrb[34].mxu1  ;;  %v4906_v27 = vpop.f32.mrb[46].mxu0 }
 0x9f5   :  { %v4830_v43 = vadd.f32 %v4829_v21, %v4736_v33  ;;  %v4907_v25 = vadd.f32 %v4906_v27, %v4744_v28  ;;  %v4831_v36 = vpop.f32.mrb[35].mxu1  ;;  %v4908_v14 = vpop.f32.mrb[47].mxu0  ;;  %v5073_v21 = vrot.slane %v5060_v32, %v14303_v54  ;;  %v17166_v27 = vsub.s32 5, %v17163_v17 }
 0x9f6   :  { %v4832_v29 = vadd.f32 %v4831_v36, %v4740_v56  ;;  %v4909_v50 = vadd.f32 %v4908_v14, %v4748_v30 }
 0x9f7   :  { %4994 = vst [vmem:[#allocation2] sm:$0xff] %v4830_v43  ;;  %4996 = vst [vmem:[#allocation2 + $0x10] sm:$0xff] %v4907_v25  ;;  %v4756_v43 = vrot.slane %v4731_v52, %v17166_v27  ;;  %v5972_v27 = vld [vmem:[#allocation14 + $0x8] sm:$0xff] }
 0x9f8   :  { %4995 = vst [vmem:[#allocation2 + $0x8] sm:$0xff] %v4832_v29  ;;  %4997 = vst [vmem:[#allocation2 + $0x18] sm:$0xff] %v4909_v50  ;;  %v4835_v34 = vpop.f32.mrb[36].mxu1  ;;  %v4912_v11 = vpop.f32.mrb[48].mxu0 }
 0x9f9   :  { %v4836_v19 = vadd.f32 %v4835_v34, %v4736_v33  ;;  %v4913_v35 = vadd.f32 %v4912_v11, %v4744_v28  ;;  %v4837_v49 = vpop.f32.mrb[37].mxu1  ;;  %v4914_v23 = vpop.f32.mrb[49].mxu0 }
 0x9fa   :  { %v4838_v63 = vadd.f32 %v4837_v49, %v4740_v56  ;;  %v4915_v61 = vadd.f32 %v4914_v23, %v4748_v30  ;;  %v4752_v30 = vrot.slane %v4731_v52, %v17165_v58 }
 0x9fb   :  { %5000 = vst [vmem:[#allocation2 + $0x30] sm:$0xff] %v4836_v19  ;;  %5002 = vst [vmem:[#allocation2 + $0x40] sm:$0xff] %v4913_v35 }
 0x9fc   :  { %5001 = vst [vmem:[#allocation2 + $0x38] sm:$0xff] %v4838_v63  ;;  %5003 = vst [vmem:[#allocation2 + $0x48] sm:$0xff] %v4915_v61 }
 0x9fe   :  { %v5006_v31 = vld [vmem:[#allocation2] sm:$0x3]  ;;  %v5008_v23 = vld [vmem:[#allocation2 + $0x10] sm:$0x3] }
 0x9ff   :  { %v5007_v38 = vld [vmem:[#allocation2 + $0x8] sm:$0x3] }
 0xa14   :  { %v5143_v0 = vpop.f32.mrb[50].mxu0 }
 0xa15   :  { %v5144_v48 = vadd.f32 %v5143_v0, %v5065_v42  ;;  %v5145_v55 = vpop.f32.mrb[51].mxu0 }
 0xa16   :  { %v5146_v1 = vadd.f32 %v5145_v55, %v5069_v24 }
 0xa17   :  { %v5424_v37 = vadd.f32 %v5144_v48, %v5006_v31 }
 0xa18   :  { %v5431_v57 = vadd.f32 %v5146_v1, %v5007_v38 }
 0xa19   :  { %v9204_v44 = vmul.f32 -1.442695, %v5424_v37  ;;  %v5266_v37 = vld [vmem:[%s17093_s17] sm:$0x7] }
 0xa1a   :  { %v9205_v22 = vmul.f32 -1.442695, %v5431_v57  ;;  %v5009_v57 = vld [vmem:[#allocation2 + $0x48] sm:$0xc0] }
 0xa1b   :  { %13300 = vpow2.f32 %v9204_v44 }
 0xa1c   :  { %13302 = vpow2.f32 %v9205_v22 }
 0xa25   :  { %v13301_v33 = vpop.eup %13300 }
 0xa26   :  { %v5428_v28 = vadd.f32 1.0, %v13301_v33  ;;  %v13303_v56 = vpop.eup %13302 }
 0xa27   :  { %v5435_v25 = vadd.f32 1.0, %v13303_v56 }
 0xa28   :  { %13304 = vrcp.f32 %v5428_v28 }
 0xa29   :  { %13306 = vrcp.f32 %v5435_v25 }
 0xa32   :  { %v13305_v19 = vpop.eup %13304 }
 0xa33   :  { %v13307_v52 = vpop.eup %13306 }
 0xa34   :  { %v4983_v36 = vpop.f32.mrb[38].mxu1  ;;  %v5214_v14 = vpop.f32.mrb[52].mxu0  ;;  %v5441_v0 = vsub.f32 1.0, %v13307_v52  ;;  %v5443_v31 = vmul.f32 0.0, %v13307_v52  ;;  %v5984_v52 = vld [vmem:[#allocation14 + $0x68] sm:$0xff] }
 0xa35   :  { %v4984_v29 = vadd.f32 %v4983_v36, %v4752_v30  ;;  %v5215_v50 = vadd.f32 %v5214_v14, %v5073_v21  ;;  %v4985_v34 = vpop.f32.mrb[39].mxu1  ;;  %v10410_v11 = vpop.f32.mrb[53].mxu0  ;;  %v5971_v36 = vld [vmem:[#allocation14] sm:$0xff]  ;;  %v5974_v14 = vld [vmem:[#allocation14 + $0x18] sm:$0xff] }
 0xa36   :  { %v4986_v35 = vadd.f32 %v4985_v34, %v4756_v43  ;;  %v5976_v34 = vld [vmem:[#allocation14 + $0x28] sm:$0xff] }
 0xa37   :  { %4998 = vst [vmem:[#allocation2 + $0x20] sm:$0xff] %v4984_v29  ;;  %v5438_v49 = vmul.f32 %v13305_v19, %v5215_v50  ;;  %v5973_v29 = vld [vmem:[#allocation14 + $0x10] sm:$0xff]  ;;  %v15975_v50 = vpack.c.bf16 %v5974_v14, %v5971_v36  ;;  %v5978_v19 = vld [vmem:[#allocation14 + $0x38] sm:$0xff]  ;;  %v6012_v14 = vld [vmem:[#allocation14 + $0x148] sm:$0xff] }
 0xa38   :  { %4999 = vst [vmem:[#allocation2 + $0x28] sm:$0xff] %v4986_v35  ;;  %v4989_v63 = vpop.f32.mrb[40].mxu1  ;;  %v15978_v11 = vpack.c.bf16 %v5976_v34, %v5973_v29  ;;  %v5981_v35 = vld [vmem:[#allocation14 + $0x50] sm:$0xff]  ;;  %v6014_v29 = vld [vmem:[#allocation14 + $0x158] sm:$0xff] }
 0xa39   :  { %v5439_v61 = vadd.f32 %v5438_v49, %v5008_v23  ;;  %v4990_v32 = vadd.f32 %v4989_v63, %v4752_v30  ;;  %v4991_v42 = vpop.f32.mrb[41].mxu1  ;;  %v15982_v49 = vpack.c.bf16 %v5981_v35, %v5978_v19  ;;  %v5977_v23 = vld [vmem:[#allocation14 + $0x30] sm:$0xff]  ;;  %v5980_v63 = vld [vmem:[#allocation14 + $0x48] sm:$0xff] }
 0xa3a   :  { %v4992_v17 = vadd.f32 %v4991_v42, %v4756_v43  ;;  %v5975_v43 = vld [vmem:[#allocation14 + $0x20] sm:$0xff]  ;;  %v5982_v42 = vld [vmem:[#allocation14 + $0x58] sm:$0xff]  ;;  %v6009_v36 = vld [vmem:[#allocation14 + $0x130] sm:$0xff] }
 0xa3b   :  { %13308 = vtanh.f32 %v5439_v61  ;;  %5004 = vst [vmem:[#allocation2 + $0x50] sm:$0xff] %v4990_v32  ;;  %v15973_v25 = vpack.c.bf16 %v5975_v43, %v5972_v27  ;;  %v5979_v61 = vld [vmem:[#allocation14 + $0x40] sm:$0xff]  ;;  %v15985_v32 = vpack.c.bf16 %v5980_v63, %v5977_v23  ;;  %v6010_v43 = vld [vmem:[#allocation14 + $0x138] sm:$0xff]  ;;  %v6017_v34 = vld [vmem:[#allocation14 + $0x170] sm:$0xff]  ;;  %v16037_v35 = vpack.c.bf16 %v6012_v14, %v6009_v36 }
 0xa3c   :  { %5005 = vst [vmem:[#allocation2 + $0x58] sm:$0xff] %v4992_v17  ;;  %v15988_v17 = vpack.c.bf16 %v5982_v42, %v5979_v61  ;;  %v6007_v27 = vld [vmem:[#allocation14 + $0x120] sm:$0xff]  ;;  %v16039_v23 = vpack.c.bf16 %v6017_v34, %v6014_v29  ;;  %v6013_v63 = vld [vmem:[#allocation14 + $0x150] sm:$0xff]  ;;  %v6016_v61 = vld [vmem:[#allocation14 + $0x168] sm:$0xff] }
 0xa3d   :  { %v16033_v19 = vpack.c.bf16 %v6010_v43, %v6007_v27  ;;  %v6015_v42 = vld [vmem:[#allocation14 + $0x160] sm:$0xff] }
 0xa45   :  { %v13309_v48 = vpop.eup %13308 }
 0xa46   :  { %v5442_v55 = vmul.f32 %v13309_v48, %v5441_v0  ;;  %v5987_v0 = vld [vmem:[#allocation14 + $0x80] sm:$0xff] }
 0xa47   :  { %v15992_v48 = vpack.c.bf16 %v5987_v0, %v5984_v52  ;;  %v6018_v52 = vld [vmem:[#allocation14 + $0x178] sm:$0xff]  ;;  %v16043_v0 = vpack.c.bf16 %v6016_v61, %v6013_v63 }
 0xa48   :  { %v15921_v24 = vadd.f32 %v5443_v31, %v5442_v55  ;;  %v5983_v55 = vld [vmem:[#allocation14 + $0x60] sm:$0xff]  ;;  %v5986_v31 = vld [vmem:[#allocation14 + $0x78] sm:$0xff] }
 0xa4a   :  { %5475 = vst [vmem:[#allocation4 - $0x1] sm:$0x2] %v15921_v24  ;;  %5613 = vmatmul.mubr.f32.vlgmr.msra.gmra.mrb[44].mxu1 %v15921_v24  ;;  %10479 = vmatmul.mubr.f32.vlgmr.msra.gmra.mrb[56].mxu0 %v15921_v24  ;;  %v5927_v34 = vrot.slane %v15921_v24, 6 }
 0xa4b   :  { %12321 = vmatpush1.bf16.msra.mxu1 %v15779_v51  ;;  %12352 = vmatpush3.bf16.msra.mxu0 %v15785_v53  ;;  %v5271_v51 = vrot.slane %v5266_v37, %v14293_v10 }
 0xa4c   :  { %12323 = vmatprep.subr.bf16.mxu1 %v15782_v3  ;;  %12353 = vmatprep.subr.bf16.mxu0 %v17117_v12  ;;  %v5275_v3 = vrot.slane %v5266_v37, %v14298_v16 }
 0xa4d   :  { %5821 = vmatprep.mubr.f32.mxu1 %v17158_v45  ;;  %10513 = vmatprep.mubr.msk.f32.mxu0 %vm13638_vm2, %v17158_v45 }
 0xa4f   :  { %12325 = vmatpush1.bf16.msra.mxu1 %v15791_v59  ;;  %12355 = vmatpush3.bf16.msra.mxu0 %v15797_v60 }
 0xa50   :  { %12327 = vmatprep.subr.bf16.mxu1 %v15794_v7  ;;  %12356 = vmatprep.subr.bf16.mxu0 %v17117_v12 }
 0xa53   :  { %12329 = vmatpush1.bf16.msra.mxu1 %v15804_v18  ;;  %12358 = vmatpush3.bf16.msra.mxu0 %v15811_v6  ;;  %v5010_v6 = vld [vmem:[#allocation2 + $0x50] sm:$0xc0] }
 0xa54   :  { %v5349_v53 = vpop.f32.mrb[42].mxu1  ;;  %12331 = vmatprep.subr.bf16.mxu1 %v15808_v4  ;;  %12359 = vmatprep.subr.bf16.mxu0 %v17117_v12 }
 0xa55   :  { %v5350_v59 = vadd.f32 %v5349_v53, %v5271_v51  ;;  %v5351_v44 = vpop.f32.mrb[43].mxu1  ;;  %v5420_v60 = vpop.f32.mrb[54].mxu0  ;;  %v15995_v51 = vpack.c.bf16 %v5986_v31, %v5983_v55  ;;  %v16047_v55 = vpack.c.bf16 %v6018_v52, %v6015_v42  ;;  %v6181_v31 = vld [vmem:[#allocation15 + $0x8] sm:$0xff]  ;;  %v5479_v42 = vld [vmem:[#allocation2 + $0x10] sm:$0xc] }
 0xa56   :  { %v5352_v1 = vadd.f32 %v5351_v44, %v5275_v3  ;;  %v10445_v7 = vpop.f32.mrb[55].mxu0  ;;  %v5988_v3 = vld [vmem:[#allocation14 + $0x88] sm:$0xff]  ;;  %v5993_v44 = vld [vmem:[#allocation14 + $0xb0] sm:$0xff] }
 0xa57   :  { %v5446_v38 = vrot.slane %v5350_v59, 2  ;;  %12333 = vmatpush1.bf16.msra.mxu1 %v15815_v26  ;;  %12361 = vmatpush3.bf16.msra.mxu0 %v15821_v9  ;;  %v5990_v59 = vld [vmem:[#allocation14 + $0x98] sm:$0xff]  ;;  %v5992_v7 = vld [vmem:[#allocation14 + $0xa8] sm:$0xff] }
 0xa58   :  { %v5456_v22 = vrot.slane %v5352_v1, 2  ;;  %12335 = vmatprep.subr.bf16.mxu1 %v15818_v46  ;;  %12362 = vmatprep.subr.bf16.mxu0 %v17117_v12  ;;  %v5989_v1 = vld [vmem:[#allocation14 + $0x90] sm:$0xff] }
 0xa59   :  { %v5448_v18 = vadd.f32 %v5446_v38, %v5009_v57  ;;  %v5991_v38 = vld [vmem:[#allocation14 + $0xa0] sm:$0xff]  ;;  %v16005_v57 = vpack.c.bf16 %v5992_v7, %v5989_v1 }
 0xa5a   :  { %v5458_v33 = vadd.f32 %v5456_v22, %v5010_v6  ;;  %v5994_v22 = vld [vmem:[#allocation14 + $0xb8] sm:$0xff]  ;;  %v5999_v6 = vld [vmem:[#allocation14 + $0xe0] sm:$0xff] }
 0xa5b   :  { %v9206_v4 = vmul.f32 -1.442695, %v5448_v18  ;;  %12337 = vmatpush1.bf16.msra.mxu1 %v15825_v40  ;;  %12364 = vmatpush3.bf16.msra.mxu0 %v15831_v47  ;;  %v5279_v40 = vrot.slane %v5266_v37, %v14303_v54  ;;  %v5985_v37 = vld [vmem:[#allocation14 + $0x70] sm:$0xff]  ;;  %v16008_v18 = vpack.c.bf16 %v5994_v22, %v5991_v38 }
 0xa5c   :  { %12339 = vmatprep.subr.bf16.mxu1 %v15828_v41  ;;  %12365 = vmatprep.subr.bf16.mxu0 %v17117_v12  ;;  %v9207_v26 = vmul.f32 -1.442695, %v5458_v33  ;;  %v15998_v53 = vpack.c.bf16 %v5988_v3, %v5985_v37  ;;  %v6184_v37 = vld [vmem:[#allocation15 + $0x20] sm:$0xff] }
 0xa5d   :  { %13310 = vpow2.f32 %v9206_v4  ;;  %v5421_v41 = vadd.f32 %v5420_v60, %v5279_v40  ;;  %v16002_v60 = vpack.c.bf16 %v5993_v44, %v5990_v59  ;;  %v5996_v4 = vld [vmem:[#allocation14 + $0xc8] sm:$0xff]  ;;  %v16053_v3 = vpack.c.bf16 %v6184_v37, %v6181_v31  ;;  %v5531_v59 = vld [vmem:[%s17092_s16] sm:$0x7] }
 0xa5e   :  { %13312 = vpow2.f32 %v9207_v26  ;;  %v16012_v33 = vpack.c.bf16 %v5999_v6, %v5996_v4  ;;  %v5995_v26 = vld [vmem:[#allocation14 + $0xc0] sm:$0xff]  ;;  %v5536_v44 = vrot.slane %v5531_v59, %v14293_v10  ;;  %v5540_v1 = vrot.slane %v5531_v59, %v14298_v16 }
 0xa5f   :  { %12341 = vmatpush1.bf16.msra.mxu1 %v15835_v8  ;;  %12367 = vmatpush3.bf16.msra.mxu0 %v15841_v62  ;;  %v5544_v43 = vrot.slane %v5531_v59, %v14303_v54  ;;  %v6187_v59 = vld [vmem:[#allocation15 + $0x38] sm:$0xff] }
 0xa60   :  { %12343 = vmatprep.subr.bf16.mxu1 %v15838_v5  ;;  %12368 = vmatprep.subr.bf16.mxu0 %v17117_v12  ;;  %v5466_v5 = vrot.slane %v5421_v41, 2  ;;  %v6000_v41 = vld [vmem:[#allocation14 + $0xe8] sm:$0xff] }
 0xa63   :  { %12345 = vmatpush1.bf16.msra.mxu1 %v15845_v39  ;;  %12370 = vmatpush3.bf16.msra.mxu0 %v15851_v2 }
 0xa64   :  { %12347 = vmatprep.subr.bf16.mxu1 %v15848_v15  ;;  %12371 = vmatprep.subr.bf16.mxu0 %v17117_v12  ;;  %v5011_v15 = vld [vmem:[#allocation2 + $0x58] sm:$0xc0] }
 0xa67   :  { %v13311_v46 = vpop.eup %13310  ;;  %12349 = vmatpush1.bf16.msra.mxu1 %v15855_v13  ;;  %12373 = vmatpush3.bf16.msra.mxu0 %v15859_v20 }
 0xa68   :  { %v5452_v9 = vadd.f32 1.0, %v13311_v46  ;;  %12406 = vmatprep.subr.bf16.mxu0 %v17117_v12  ;;  %v13313_v47 = vpop.eup %13312  ;;  %12375 = vmatprep.subr.bf16.mxu1 %v15973_v25  ;;  %v5998_v46 = vld [vmem:[#allocation14 + $0xd8] sm:$0xff] }
 0xa69   :  { %v5462_v8 = vadd.f32 1.0, %v13313_v47  ;;  %v16015_v40 = vpack.c.bf16 %v5998_v46, %v5995_v26  ;;  %v6002_v47 = vld [vmem:[#allocation14 + $0xf8] sm:$0xff] }
 0xa6a   :  { %13314 = vrcp.f32 %v5452_v9  ;;  %v5997_v9 = vld [vmem:[#allocation14 + $0xd0] sm:$0xff] }
 0xa6b   :  { %13316 = vrcp.f32 %v5462_v8  ;;  %v6005_v8 = vld [vmem:[#allocation14 + $0x110] sm:$0xff] }
 0xa74   :  { %v13315_v62 = vpop.eup %13314 }
 0xa75   :  { %v5468_v39 = vmul.f32 %v13315_v62, %v5466_v5  ;;  %v13317_v28 = vpop.eup %13316  ;;  %v16018_v5 = vpack.c.bf16 %v6000_v41, %v5997_v9  ;;  %v16020_v62 = vpack.c.bf16 %v6005_v8, %v6002_v47  ;;  %v5477_v9 = vld [vmem:[#allocation2] sm:$0xc]  ;;  %v5478_v8 = vld [vmem:[#allocation2 + $0x8] sm:$0xc] }
 0xa76   :  { %v5471_v13 = vsub.f32 1.0, %v13317_v28  ;;  %v5473_v58 = vmul.f32 0.0, %v13317_v28 }
 0xa77   :  { %v5469_v2 = vadd.f32 %v5468_v39, %v5011_v15  ;;  %v6001_v39 = vld [vmem:[#allocation14 + $0xf0] sm:$0xff]  ;;  %v6004_v15 = vld [vmem:[#allocation14 + $0x108] sm:$0xff] }
 0xa78   :  { %v16023_v28 = vpack.c.bf16 %v6004_v15, %v6001_v39 }
 0xa79   :  { %13318 = vtanh.f32 %v5469_v2  ;;  %v6003_v2 = vld [vmem:[#allocation14 + $0x100] sm:$0xff] }
 0xa83   :  { %v13319_v56 = vpop.eup %13318 }
 0xa84   :  { %v5472_v20 = vmul.f32 %v13319_v56, %v5471_v13  ;;  %v6006_v13 = vld [vmem:[#allocation14 + $0x118] sm:$0xff]  ;;  %v6008_v56 = vld [vmem:[#allocation14 + $0x128] sm:$0xff] }
 0xa86   :  { %v15966_v30 = vadd.f32 %v5473_v58, %v5472_v20  ;;  %v6011_v20 = vld [vmem:[#allocation14 + $0x140] sm:$0xff]  ;;  %v16027_v58 = vpack.c.bf16 %v6006_v13, %v6003_v2 }
 0xa88   :  { %5476 = vst [vmem:[#allocation5 + $0x1] sm:$0x40] %v15966_v30  ;;  %v5755_v21 = vrot.slane %v15966_v30, 6 }
 0xa8a   :  { %5822 = vmatmul.mubr.f32.vlgmr.msra.gmra.mrb[46].mxu1 %v5755_v21  ;;  %10514 = vmatmul.mubr.f32.vlgmr.msra.gmra.mrb[58].mxu0 %v5755_v21  ;;  %v16029_v21 = vpack.c.bf16 %v6011_v20, %v6008_v56 }
 0xa8b   :  { %6103 = vmatprep.mubr.f32.mxu1 %v17158_v45  ;;  %10548 = vmatprep.mubr.msk.f32.mxu0 %vm13638_vm2, %v17158_v45 }
 0xa8c   :  { %12377 = vmatpush1.bf16.msra.mxu1 %v15975_v50  ;;  %12408 = vmatpush3.bf16.msra.mxu0 %v15978_v11 }
 0xa8d   :  { %12409 = vmatprep.subr.bf16.mxu0 %v17117_v12  ;;  %12379 = vmatprep.subr.bf16.mxu1 %v15982_v49 }
 0xa90   :  { %12381 = vmatpush1.bf16.msra.mxu1 %v15985_v32  ;;  %12411 = vmatpush3.bf16.msra.mxu0 %v15988_v17 }
 0xa91   :  { %12412 = vmatprep.subr.bf16.mxu0 %v17117_v12  ;;  %12383 = vmatprep.subr.bf16.mxu1 %v15992_v48 }
 0xa94   :  { %12385 = vmatpush1.bf16.msra.mxu1 %v15995_v51  ;;  %12414 = vmatpush3.bf16.msra.mxu0 %v15998_v53 }
 0xa95   :  { %12415 = vmatprep.subr.bf16.mxu0 %v17117_v12  ;;  %12387 = vmatprep.subr.bf16.mxu1 %v16002_v60 }
 0xa98   :  { %12389 = vmatpush1.bf16.msra.mxu1 %v16005_v57  ;;  %12417 = vmatpush3.bf16.msra.mxu0 %v16008_v18 }
 0xa99   :  { %12418 = vmatprep.subr.bf16.mxu0 %v17117_v12  ;;  %12391 = vmatprep.subr.bf16.mxu1 %v16012_v33 }
 0xa9c   :  { %12393 = vmatpush1.bf16.msra.mxu1 %v16015_v40  ;;  %12420 = vmatpush3.bf16.msra.mxu0 %v16018_v5 }
 0xa9d   :  { %12395 = vmatprep.subr.bf16.mxu1 %v16020_v62  ;;  %12421 = vmatprep.subr.bf16.mxu0 %v17117_v12 }
 0xaa0   :  { %12397 = vmatpush1.bf16.msra.mxu1 %v16023_v28  ;;  %12423 = vmatpush3.bf16.msra.mxu0 %v16027_v58 }
 0xaa1   :  { %12399 = vmatprep.subr.bf16.mxu1 %v16029_v21  ;;  %12424 = vmatprep.subr.bf16.mxu0 %v17117_v12 }
 0xaa4   :  { %12401 = vmatpush1.bf16.msra.mxu1 %v16033_v19  ;;  %12426 = vmatpush3.bf16.msra.mxu0 %v16037_v35 }
 0xaa5   :  { %12403 = vmatprep.subr.bf16.mxu1 %v16039_v23  ;;  %12427 = vmatprep.subr.bf16.mxu0 %v17117_v12 }
 0xaa8   :  { %12405 = vmatpush1.bf16.msra.mxu1 %v16043_v0  ;;  %12429 = vmatpush3.bf16.msra.mxu0 %v16047_v55 }
 0xaa9   :  { %12462 = vmatprep.subr.bf16.mxu0 %v17117_v12  ;;  %12431 = vmatprep.subr.bf16.mxu1 %v16053_v3 }
 0xb1d   :  { %v5614_v7 = vpop.f32.mrb[44].mxu1  ;;  %v5685_v38 = vpop.f32.mrb[56].mxu0 }
 0xb1e   :  { %v5615_v22 = vadd.f32 %v5614_v7, %v5536_v44  ;;  %v5616_v4 = vpop.f32.mrb[45].mxu1  ;;  %v10480_v6 = vpop.f32.mrb[57].mxu0  ;;  %v5686_v36 = vadd.f32 %v5685_v38, %v5544_v43 }
 0xb1f   :  { %v5617_v26 = vadd.f32 %v5616_v4, %v5540_v1  ;;  %v6180_v1 = vld [vmem:[#allocation15] sm:$0xff]  ;;  %v6182_v4 = vld [vmem:[#allocation15 + $0x10] sm:$0xff]  ;;  %v6185_v6 = vld [vmem:[#allocation15 + $0x28] sm:$0xff] }
 0xb20   :  { %v5899_v46 = vrot.slane %v5615_v22, 6  ;;  %v5919_v14 = vrot.slane %v5686_v36, 6  ;;  %v6183_v22 = vld [vmem:[#allocation15 + $0x18] sm:$0xff]  ;;  %v16067_v24 = vpack.c.bf16 %v6185_v6, %v6182_v4  ;;  %v6205_v4 = vld [vmem:[#allocation15 + $0xc8] sm:$0xff]  ;;  %v6208_v6 = vld [vmem:[#allocation15 + $0xe0] sm:$0xff] }
 0xb21   :  { %v5909_v41 = vrot.slane %v5617_v26, 6  ;;  %v6190_v26 = vld [vmem:[#allocation15 + $0x50] sm:$0xff]  ;;  %v6195_v36 = vld [vmem:[#allocation15 + $0x78] sm:$0xff] }
 0xb22   :  { %v5901_v47 = vadd.f32 %v5899_v46, %v5477_v9  ;;  %v16065_v46 = vpack.c.bf16 %v6183_v22, %v6180_v1  ;;  %v6186_v9 = vld [vmem:[#allocation15 + $0x30] sm:$0xff]  ;;  %v6200_v1 = vld [vmem:[#allocation15 + $0xa0] sm:$0xff] }
 0xb23   :  { %v5911_v39 = vadd.f32 %v5909_v41, %v5478_v8  ;;  %v6189_v8 = vld [vmem:[#allocation15 + $0x48] sm:$0xff] }
 0xb24   :  { %v9208_v15 = vmul.f32 -1.442695, %v5901_v47  ;;  %v16071_v47 = vpack.c.bf16 %v6190_v26, %v6187_v59 }
 0xb25   :  { %v9209_v2 = vmul.f32 -1.442695, %v5911_v39  ;;  %v6188_v39 = vld [vmem:[#allocation15 + $0x40] sm:$0xff] }
 0xb26   :  { %13320 = vpow2.f32 %v9208_v15  ;;  %v6191_v15 = vld [vmem:[#allocation15 + $0x58] sm:$0xff] }
 0xb27   :  { %13322 = vpow2.f32 %v9209_v2  ;;  %v6193_v2 = vld [vmem:[#allocation15 + $0x68] sm:$0xff] }
 0xb30   :  { %v13321_v13 = vpop.eup %13320 }
 0xb31   :  { %v13323_v56 = vpop.eup %13322  ;;  %v5905_v20 = vadd.f32 1.0, %v13321_v13  ;;  %v6196_v13 = vld [vmem:[#allocation15 + $0x80] sm:$0xff] }
 0xb32   :  { %v5915_v27 = vadd.f32 1.0, %v13323_v56  ;;  %v16075_v56 = vpack.c.bf16 %v6189_v8, %v6186_v9  ;;  %v16081_v43 = vpack.c.bf16 %v6196_v13, %v6193_v2  ;;  %v6207_v2 = vld [vmem:[#allocation15 + $0xd8] sm:$0xff]  ;;  %v6206_v13 = vld [vmem:[#allocation15 + $0xd0] sm:$0xff] }
 0xb33   :  { %13324 = vrcp.f32 %v5905_v20  ;;  %v16077_v20 = vpack.c.bf16 %v6191_v15, %v6188_v39  ;;  %v16115_v15 = vpack.c.bf16 %v6208_v6, %v6205_v4  ;;  %v6210_v4 = vld [vmem:[#allocation15 + $0xf0] sm:$0xff] }
 0xb34   :  { %13326 = vrcp.f32 %v5915_v27  ;;  %v6192_v27 = vld [vmem:[#allocation15 + $0x60] sm:$0xff] }
 0xb3d   :  { %v13325_v29 = vpop.eup %13324 }
 0xb3e   :  { %v13327_v63 = vpop.eup %13326  ;;  %v5921_v61 = vmul.f32 %v13325_v29, %v5919_v14  ;;  %v6194_v14 = vld [vmem:[#allocation15 + $0x70] sm:$0xff]  ;;  %v6197_v29 = vld [vmem:[#allocation15 + $0x88] sm:$0xff] }
 0xb3f   :  { %v5929_v52 = vmul.f32 %v13327_v63, %v5927_v34  ;;  %v5924_v37 = vsub.f32 1.0, %v13327_v63  ;;  %v6199_v34 = vld [vmem:[#allocation15 + $0x98] sm:$0xff]  ;;  %v6202_v63 = vld [vmem:[#allocation15 + $0xb0] sm:$0xff] }
 0xb40   :  { %v5922_v31 = vadd.f32 %v5921_v61, %v5479_v42  ;;  %v16089_v61 = vld [vmem:[%s17093_s17] sm:$0x7]  ;;  %v16093_v42 = vpack.c.bf16 %v6195_v36, %v6192_v27  ;;  %v6209_v27 = vld [vmem:[#allocation15 + $0xe8] sm:$0xff] }
 0xb41   :  { %v5742_v22 = vrot.slane %v16089_v61, %v14293_v10  ;;  %v5746_v59 = vrot.slane %v16089_v61, %v14298_v16 }
 0xb42   :  { %13328 = vtanh.f32 %v5922_v31  ;;  %v6198_v31 = vld [vmem:[#allocation15 + $0x90] sm:$0xff] }
 0xb4c   :  { %v13329_v44 = vpop.eup %13328 }
 0xb4d   :  { %v5925_v7 = vmul.f32 %v13329_v44, %v5924_v37  ;;  %v16099_v37 = vpack.c.bf16 %v6202_v63, %v6199_v34  ;;  %v6201_v44 = vld [vmem:[#allocation15 + $0xa8] sm:$0xff]  ;;  %v6211_v34 = vld [vmem:[#allocation15 + $0xf8] sm:$0xff]  ;;  %v6214_v63 = vld [vmem:[#allocation15 + $0x110] sm:$0xff] }
 0xb4e   :  { %v16107_v26 = vpack.c.bf16 %v6201_v44, %v6198_v31  ;;  %v5480_v44 = vld [vmem:[#allocation2 + $0x48] sm:$0x30] }
 0xb4f   :  { %v16063_v38 = vadd.f32 %v5929_v52, %v5925_v7  ;;  %v16095_v52 = vpack.c.bf16 %v6197_v29, %v6194_v14  ;;  %17168 = vst [vmem:[#allocation23_spill] sm:$0xff] %v16099_v37  ;;  %v6203_v7 = vld [vmem:[#allocation15 + $0xb8] sm:$0xff] }
 0xb50   :  { %17169 = vst [vmem:[#allocation29_spill] sm:$0xff] %v16107_v26  ;;  %v16109_v9 = vpack.c.bf16 %v6203_v7, %v6200_v1 }
 0xb51   :  { %5963 = vst [vmem:[#allocation4 - $0x2] sm:$0x8] %v16063_v38  ;;  %v6037_v41 = vrot.slane %v16063_v38, 2  ;;  %17167 = vst [vmem:[#allocation28_spill] sm:$0xff] %v16095_v52 }
 0xb52   :  { %17170 = vst [vmem:[#allocation30_spill] sm:$0xff] %v16109_v9 }
 0xb53   :  { %6104 = vmatmul.mubr.f32.vlgmr.msra.gmra.mrb[48].mxu1 %v6037_v41  ;;  %10549 = vmatmul.mubr.f32.vlgmr.msra.gmra.mrb[60].mxu0 %v6037_v41  ;;  %v6204_v41 = vld [vmem:[#allocation15 + $0xc0] sm:$0xff] }
 0xb54   :  { %12433 = vmatpush1.bf16.msra.mxu1 %v16065_v46  ;;  %12464 = vmatpush3.bf16.msra.mxu0 %v16067_v24  ;;  %v16119_v7 = vpack.c.bf16 %v6207_v2, %v6204_v41 }
 0xb55   :  { %12435 = vmatprep.subr.bf16.mxu1 %v16071_v47  ;;  %12465 = vmatprep.subr.bf16.mxu0 %v17117_v12 }
 0xb56   :  { %6312 = vmatprep.mubr.f32.mxu1 %v17158_v45  ;;  %10583 = vmatprep.mubr.msk.f32.mxu0 %vm13638_vm2, %v17158_v45 }
 0xb58   :  { %12437 = vmatpush1.bf16.msra.mxu1 %v16075_v56  ;;  %12467 = vmatpush3.bf16.msra.mxu0 %v16077_v20 }
 0xb59   :  { %12439 = vmatprep.subr.bf16.mxu1 %v16081_v43  ;;  %12468 = vmatprep.subr.bf16.mxu0 %v17117_v12 }
 0xb5c   :  { %12441 = vmatpush1.bf16.msra.mxu1 %v16093_v42  ;;  %12470 = vmatpush3.bf16.msra.mxu0 %v16095_v52  ;;  %v6220_v52 = vld [vmem:[#allocation15 + $0x140] sm:$0xff] }
 0xb5d   :  { %v5823_v8 = vpop.f32.mrb[46].mxu1  ;;  %v16111_v39 = vpop.f32.mrb[58].mxu0  ;;  %12443 = vmatprep.subr.bf16.mxu1 %v16099_v37  ;;  %12471 = vmatprep.subr.bf16.mxu0 %v17117_v12  ;;  %v16121_v12 = vpack.c.bf16 %v6209_v27, %v6206_v13  ;;  %v5481_v37 = vld [vmem:[#allocation2 + $0x50] sm:$0x30] }
 0xb5e   :  { %v5824_v36 = vadd.f32 %v5823_v8, %v5742_v22  ;;  %v5825_v14 = vpop.f32.mrb[47].mxu1  ;;  %v10515_v29 = vpop.f32.mrb[59].mxu0  ;;  %v17171_v22 = vmov 0.0|0.0   ;;  %v16125_v8 = vpack.c.bf16 %v6214_v63, %v6211_v34  ;;  %v6216_v27 = vld [vmem:[#allocation15 + $0x120] sm:$0xff] }
 0xb5f   :  { %v5826_v31 = vadd.f32 %v5825_v14, %v5746_v59  ;;  %v6213_v29 = vld [vmem:[#allocation15 + $0x108] sm:$0xff]  ;;  %v6212_v59 = vld [vmem:[#allocation15 + $0x100] sm:$0xff]  ;;  %v6215_v14 = vld [vmem:[#allocation15 + $0x118] sm:$0xff] }
 0xb60   :  { %v5932_v1 = vrot.slane %v5824_v36, 4  ;;  %12445 = vmatpush1.bf16.msra.mxu1 %v16107_v26  ;;  %12473 = vmatpush3.bf16.msra.mxu0 %v16109_v9  ;;  %v6217_v26 = vld [vmem:[#allocation15 + $0x128] sm:$0xff]  ;;  %v16129_v2 = vpack.c.bf16 %v6213_v29, %v6210_v4  ;;  %v16131_v13 = vpack.c.bf16 %v6215_v14, %v6212_v59  ;;  %v6222_v29 = vld [vmem:[#allocation15 + $0x150] sm:$0xff]  ;;  %v6224_v59 = vld [vmem:[#allocation15 + $0x160] sm:$0xff] }
 0xb61   :  { %v5942_v6 = vrot.slane %v5826_v31, 4  ;;  %12447 = vmatprep.subr.bf16.mxu1 %v16115_v15  ;;  %12474 = vmatprep.subr.bf16.mxu0 %v17171_v22  ;;  %v16135_v63 = vpack.c.bf16 %v6220_v52, %v6217_v26  ;;  %v6219_v31 = vld [vmem:[#allocation15 + $0x138] sm:$0xff]  ;;  %v6225_v26 = vld [vmem:[#allocation15 + $0x168] sm:$0xff] }
 0xb62   :  { %v5934_v36 = vadd.f32 %v5932_v1, %v5480_v44  ;;  %v6218_v44 = vld [vmem:[#allocation15 + $0x130] sm:$0xff]  ;;  %v6223_v1 = vld [vmem:[#allocation15 + $0x158] sm:$0xff]  ;;  %v16139_v4 = vpack.c.bf16 %v6219_v31, %v6216_v27 }
 0xb63   :  { %v5944_v9 = vadd.f32 %v5942_v6, %v5481_v37  ;;  %v6221_v37 = vld [vmem:[#allocation15 + $0x148] sm:$0xff]  ;;  %v6226_v6 = vld [vmem:[#allocation15 + $0x170] sm:$0xff]  ;;  %v6227_v14 = vld [vmem:[#allocation15 + $0x178] sm:$0xff] }
 0xb64   :  { %v9210_v41 = vmul.f32 -1.442695, %v5934_v36  ;;  %12449 = vmatpush1.bf16.msra.mxu1 %v16119_v7  ;;  %12476 = vmatpush3.bf16.msra.mxu0 %v16121_v12  ;;  %v16145_v52 = vpack.c.bf16 %v6226_v6, %v6223_v1  ;;  %v16149_v36 = vpack.c.bf16 %v6225_v26, %v6222_v29  ;;  %v5959_v26 = vrot.slane %v15966_v30, 2  ;;  %v6019_v30 = vld [vmem:[%s17092_s16] sm:$0x7] }
 0xb65   :  { %v9211_v34 = vmul.f32 -1.442695, %v5944_v9  ;;  %12451 = vmatprep.subr.bf16.mxu1 %v16125_v8  ;;  %12477 = vmatprep.subr.bf16.mxu0 %v17171_v22  ;;  %v16141_v9 = vpack.c.bf16 %v6221_v37, %v6218_v44  ;;  %v5750_v37 = vrot.slane %v16089_v61, %v14303_v54 }
 0xb66   :  { %13330 = vpow2.f32 %v9210_v41  ;;  %17172 = vst [vmem:[#allocation31_spill] sm:$0xff] %v16145_v52  ;;  %17173 = vst [vmem:[#allocation32_spill] sm:$0xff] %v16149_v36  ;;  %v16151_v41 = vpack.c.bf16 %v6227_v14, %v6224_v59 }
 0xb67   :  { %13332 = vpow2.f32 %v9211_v34  ;;  %v5895_v1 = vadd.f32 %v16111_v39, %v5750_v37  ;;  %v6417_v39 = vrot.slane %v16063_v38, 6  ;;  %v6228_v38 = vld [vmem:[%s17093_s17] sm:$0x7] }
 0xb68   :  { %12453 = vmatpush1.bf16.msra.mxu1 %v16129_v2  ;;  %12479 = vmatpush3.bf16.msra.mxu0 %v16131_v13  ;;  %17174 = vst [vmem:[#allocation33_spill] sm:$0xff] %v16151_v41 }
 0xb69   :  { %12455 = vmatprep.subr.bf16.mxu1 %v16135_v63  ;;  %12480 = vmatprep.subr.bf16.mxu0 %v17171_v22  ;;  %v5952_v6 = vrot.slane %v5895_v1, 4 }
 0xb6c   :  { %12457 = vmatpush1.bf16.msra.mxu1 %v16139_v4  ;;  %12482 = vmatpush3.bf16.msra.mxu0 %v16141_v9 }
 0xb6d   :  { %12459 = vmatprep.subr.bf16.mxu1 %v16145_v52  ;;  %12483 = vmatprep.subr.bf16.mxu0 %v17171_v22 }
 0xb70   :  { %v13331_v27 = vpop.eup %13330  ;;  %12461 = vmatpush1.bf16.msra.mxu1 %v16149_v36  ;;  %12485 = vmatpush3.bf16.msra.mxu0 %v16151_v41  ;;  %v5482_v41 = vld [vmem:[#allocation2 + $0x58] sm:$0x30] }
 0xb71   :  { %v13333_v34 = vpop.eup %13332  ;;  %v5938_v31 = vadd.f32 1.0, %v13331_v27  ;;  %12487 = vmatprep.subr.bf16.mxu1 %v15973_v25  ;;  %12518 = vmatprep.subr.bf16.mxu0 %v17171_v22 }
 0xb72   :  { %v5948_v44 = vadd.f32 1.0, %v13333_v34 }
 0xb73   :  { %13334 = vrcp.f32 %v5938_v31 }
 0xb74   :  { %13336 = vrcp.f32 %v5948_v44 }
 0xb7d   :  { %v13335_v29 = vpop.eup %13334 }
 0xb7e   :  { %v13337_v59 = vpop.eup %13336  ;;  %v5954_v14 = vmul.f32 %v13335_v29, %v5952_v6 }
 0xb7f   :  { %v5961_v27 = vmul.f32 %v13337_v59, %v5959_v26  ;;  %v5957_v25 = vsub.f32 1.0, %v13337_v59 }
 0xb80   :  { %v5955_v36 = vadd.f32 %v5954_v14, %v5482_v41  ;;  %v5967_v41 = vld [vmem:[#allocation2 + $0x10] sm:$0x30] }
 0xb82   :  { %13338 = vtanh.f32 %v5955_v36 }
 0xb8c   :  { %v13339_v52 = vpop.eup %13338 }
 0xb8d   :  { %v5958_v34 = vmul.f32 %v13339_v52, %v5957_v25  ;;  %v17176_v25 = vld [vmem:[#allocation23_spill] sm:$0xff] }
 0xb8f   :  { %v16163_v31 = vadd.f32 %v5961_v27, %v5958_v34 }
 0xb91   :  { %5964 = vst [vmem:[#allocation5 + $0x2] sm:$0x10] %v16163_v31  ;;  %v6246_v61 = vrot.slane %v16163_v31, 4 }
 0xb93   :  { %6313 = vmatmul.mubr.f32.vlgmr.msra.gmra.mrb[50].mxu1 %v6246_v61  ;;  %10584 = vmatmul.mubr.f32.vlgmr.msra.gmra.mrb[62].mxu0 %v6246_v61 }
 0xb94   :  { %12489 = vmatpush1.bf16.msra.mxu1 %v15975_v50  ;;  %12520 = vmatpush3.bf16.msra.mxu0 %v15978_v11  ;;  %v6024_v50 = vrot.slane %v6019_v30, %v14293_v10  ;;  %v6028_v11 = vrot.slane %v6019_v30, %v14298_v16 }
 0xb95   :  { %12491 = vmatprep.subr.bf16.mxu1 %v15982_v49  ;;  %12521 = vmatprep.subr.bf16.mxu0 %v17171_v22 }
 0xb96   :  { %6593 = vmatprep.mubr.f32.mxu1 %v17158_v45  ;;  %10618 = vmatprep.mubr.msk.f32.mxu0 %vm13638_vm2, %v17158_v45 }
 0xb98   :  { %12493 = vmatpush1.bf16.msra.mxu1 %v15985_v32  ;;  %12523 = vmatpush3.bf16.msra.mxu0 %v15988_v17 }
 0xb99   :  { %12495 = vmatprep.subr.bf16.mxu1 %v15992_v48  ;;  %12524 = vmatprep.subr.bf16.mxu0 %v17171_v22 }
 0xb9c   :  { %12497 = vmatpush1.bf16.msra.mxu1 %v15995_v51  ;;  %12526 = vmatpush3.bf16.msra.mxu0 %v15998_v53 }
 0xb9d   :  { %12499 = vmatprep.subr.bf16.mxu1 %v16002_v60  ;;  %12527 = vmatprep.subr.bf16.mxu0 %v17171_v22 }
 0xba0   :  { %12501 = vmatpush1.bf16.msra.mxu1 %v16005_v57  ;;  %12529 = vmatpush3.bf16.msra.mxu0 %v16008_v18  ;;  %v5965_v57 = vld [vmem:[#allocation2] sm:$0x30] }
 0xba1   :  { %12503 = vmatprep.subr.bf16.mxu1 %v16012_v33  ;;  %12530 = vmatprep.subr.bf16.mxu0 %v17171_v22 }
 0xba4   :  { %12505 = vmatpush1.bf16.msra.mxu1 %v16015_v40  ;;  %12532 = vmatpush3.bf16.msra.mxu0 %v16018_v5  ;;  %v5966_v40 = vld [vmem:[#allocation2 + $0x8] sm:$0x30] }
 0xba5   :  { %12507 = vmatprep.subr.bf16.mxu1 %v16020_v62  ;;  %12533 = vmatprep.subr.bf16.mxu0 %v17171_v22 }
 0xba8   :  { %12509 = vmatpush1.bf16.msra.mxu1 %v16023_v28  ;;  %12535 = vmatpush3.bf16.msra.mxu0 %v16027_v58 }
 0xba9   :  { %12511 = vmatprep.subr.bf16.mxu1 %v16029_v21  ;;  %12536 = vmatprep.subr.bf16.mxu0 %v17171_v22 }
 0xbac   :  { %12513 = vmatpush1.bf16.msra.mxu1 %v16033_v19  ;;  %12538 = vmatpush3.bf16.msra.mxu0 %v16037_v35 }
 0xbad   :  { %12515 = vmatprep.subr.bf16.mxu1 %v16039_v23  ;;  %12539 = vmatprep.subr.bf16.mxu0 %v17171_v22  ;;  %v6032_v23 = vrot.slane %v6019_v30, %v14303_v54  ;;  %v17177_v30 = vld [vmem:[#allocation29_spill] sm:$0xff] }
 0xbb0   :  { %12517 = vmatpush1.bf16.msra.mxu1 %v16043_v0  ;;  %12541 = vmatpush3.bf16.msra.mxu0 %v16047_v55 }
 0xbb1   :  { %12543 = vmatprep.subr.bf16.mxu1 %v16053_v3  ;;  %12574 = vmatprep.subr.bf16.mxu0 %v17171_v22 }
 0xc26   :  { %v6105_v49 = vpop.f32.mrb[48].mxu1  ;;  %v6176_v32 = vpop.f32.mrb[60].mxu0 }
 0xc27   :  { %v6106_v17 = vadd.f32 %v6105_v49, %v6024_v50  ;;  %v6107_v48 = vpop.f32.mrb[49].mxu1  ;;  %v10550_v51 = vpop.f32.mrb[61].mxu0  ;;  %v6177_v0 = vadd.f32 %v6176_v32, %v6032_v23  ;;  %v17178_v50 = vld [vmem:[#allocation30_spill] sm:$0xff] }
 0xc28   :  { %v6108_v53 = vadd.f32 %v6107_v48, %v6028_v11  ;;  %v5968_v11 = vld [vmem:[#allocation2 + $0x48] sm:$0xc]  ;;  %v5969_v32 = vld [vmem:[#allocation2 + $0x50] sm:$0xc] }
 0xc29   :  { %v6390_v60 = vrot.slane %v6106_v17, 4  ;;  %v6410_v55 = vrot.slane %v6177_v0, 4  ;;  %v6944_v23 = vld [vmem:[#allocation14 + $0x20] sm:$0xff] }
 0xc2a   :  { %v6400_v18 = vrot.slane %v6108_v53, 4 }
 0xc2b   :  { %v6392_v33 = vadd.f32 %v6390_v60, %v5965_v57  ;;  %v6449_v57 = vrot.slane %v16163_v31, 2  ;;  %v6941_v31 = vld [vmem:[#allocation14 + $0x8] sm:$0xff] }
 0xc2c   :  { %v6402_v5 = vadd.f32 %v6400_v18, %v5966_v40  ;;  %v5970_v40 = vld [vmem:[#allocation2 + $0x58] sm:$0xc]  ;;  %v16261_v0 = vpack.c.bf16 %v6944_v23, %v6941_v31  ;;  %v6976_v31 = vld [vmem:[#allocation14 + $0x120] sm:$0xff]  ;;  %v6979_v23 = vld [vmem:[#allocation14 + $0x138] sm:$0xff] }
 0xc2d   :  { %v9212_v62 = vmul.f32 -1.442695, %v6392_v33 }
 0xc2e   :  { %v9213_v28 = vmul.f32 -1.442695, %v6402_v5 }
 0xc2f   :  { %13340 = vpow2.f32 %v9212_v62 }
 0xc30   :  { %13342 = vpow2.f32 %v9213_v28 }
 0xc39   :  { %v13341_v58 = vpop.eup %13340 }
 0xc3a   :  { %v13343_v21 = vpop.eup %13342  ;;  %v6396_v19 = vadd.f32 1.0, %v13341_v58 }
 0xc3b   :  { %v6406_v35 = vadd.f32 1.0, %v13343_v21 }
 0xc3c   :  { %13344 = vrcp.f32 %v6396_v19 }
 0xc3d   :  { %13346 = vrcp.f32 %v6406_v35 }
 0xc46   :  { %v13345_v3 = vpop.eup %13344 }
 0xc47   :  { %v13347_v52 = vpop.eup %13346  ;;  %v6412_v36 = vmul.f32 %v13345_v3, %v6410_v55  ;;  %v6940_v55 = vld [vmem:[#allocation14] sm:$0xff]  ;;  %v6943_v3 = vld [vmem:[#allocation14 + $0x18] sm:$0xff] }
 0xc48   :  { %v6419_v44 = vmul.f32 %v13347_v52, %v6417_v39  ;;  %v6415_v1 = vsub.f32 1.0, %v13347_v52  ;;  %v6942_v39 = vld [vmem:[#allocation14 + $0x10] sm:$0xff]  ;;  %v16263_v52 = vpack.c.bf16 %v6943_v3, %v6940_v55  ;;  %v6981_v3 = vld [vmem:[#allocation14 + $0x148] sm:$0xff] }
 0xc49   :  { %v6413_v37 = vadd.f32 %v6412_v36, %v5967_v41  ;;  %v6945_v36 = vld [vmem:[#allocation14 + $0x28] sm:$0xff]  ;;  %v6978_v55 = vld [vmem:[#allocation14 + $0x130] sm:$0xff] }
 0xc4a   :  { %v16266_v41 = vpack.c.bf16 %v6945_v36, %v6942_v39  ;;  %v6983_v39 = vld [vmem:[#allocation14 + $0x158] sm:$0xff]  ;;  %v6986_v36 = vld [vmem:[#allocation14 + $0x170] sm:$0xff] }
 0xc4b   :  { %13348 = vtanh.f32 %v6413_v37  ;;  %v6950_v37 = vld [vmem:[#allocation14 + $0x50] sm:$0xff] }
 0xc55   :  { %v13349_v6 = vpop.eup %13348 }
 0xc56   :  { %v6416_v29 = vmul.f32 %v13349_v6, %v6415_v1  ;;  %v6946_v6 = vld [vmem:[#allocation14 + $0x30] sm:$0xff] }
 0xc58   :  { %v16209_v26 = vadd.f32 %v6419_v44, %v6416_v29  ;;  %v6947_v44 = vld [vmem:[#allocation14 + $0x38] sm:$0xff]  ;;  %v6949_v29 = vld [vmem:[#allocation14 + $0x48] sm:$0xff] }
 0xc59   :  { %v16270_v1 = vpack.c.bf16 %v6950_v37, %v6947_v44  ;;  %v16321_v44 = vpack.c.bf16 %v6979_v23, %v6976_v31  ;;  %v16325_v37 = vpack.c.bf16 %v6981_v3, %v6978_v55 }
 0xc5a   :  { %6453 = vst [vmem:[#allocation4 - $0x3] sm:$0x20] %v16209_v26  ;;  %v6527_v59 = vrot.slane %v16209_v26, 4 }
 0xc5c   :  { %6594 = vmatmul.mubr.f32.vlgmr.msra.gmra.mrb[52].mxu1 %v6527_v59  ;;  %10619 = vmatmul.mubr.f32.vlgmr.msra.gmra.mrb[64].mxu0 %v6527_v59  ;;  %v6948_v59 = vld [vmem:[#allocation14 + $0x40] sm:$0xff] }
 0xc5d   :  { %12545 = vmatpush1.bf16.msra.mxu1 %v16065_v46  ;;  %12576 = vmatpush3.bf16.msra.mxu0 %v16067_v24  ;;  %v6233_v46 = vrot.slane %v6228_v38, %v14293_v10  ;;  %v6237_v24 = vrot.slane %v6228_v38, %v14298_v16 }
 0xc5e   :  { %12547 = vmatprep.subr.bf16.mxu1 %v16071_v47  ;;  %12577 = vmatprep.subr.bf16.mxu0 %v17171_v22  ;;  %v17175_v47 = vld [vmem:[#allocation28_spill] sm:$0xff] }
 0xc5f   :  { %6802 = vmatprep.mubr.f32.mxu1 %v17158_v45  ;;  %10653 = vmatprep.mubr.msk.f32.mxu0 %vm13638_vm2, %v17158_v45 }
 0xc61   :  { %12549 = vmatpush1.bf16.msra.mxu1 %v16075_v56  ;;  %12579 = vmatpush3.bf16.msra.mxu0 %v16077_v20 }
 0xc62   :  { %12551 = vmatprep.subr.bf16.mxu1 %v16081_v43  ;;  %12580 = vmatprep.subr.bf16.mxu0 %v17171_v22 }
 0xc65   :  { %12553 = vmatpush1.bf16.msra.mxu1 %v16093_v42  ;;  %12582 = vmatpush3.bf16.msra.mxu0 %v17175_v47  ;;  %v6953_v47 = vld [vmem:[#allocation14 + $0x68] sm:$0xff] }
 0xc66   :  { %v6314_v14 = vpop.f32.mrb[50].mxu1  ;;  %v6385_v27 = vpop.f32.mrb[62].mxu0  ;;  %12555 = vmatprep.subr.bf16.mxu1 %v17176_v25  ;;  %12583 = vmatprep.subr.bf16.mxu0 %v17171_v22  ;;  %v6952_v25 = vld [vmem:[#allocation14 + $0x60] sm:$0xff] }
 0xc67   :  { %v6315_v56 = vadd.f32 %v6314_v14, %v6233_v46  ;;  %v6316_v20 = vpop.f32.mrb[51].mxu1  ;;  %v10585_v34 = vpop.f32.mrb[63].mxu0  ;;  %v6951_v46 = vld [vmem:[#allocation14 + $0x58] sm:$0xff]  ;;  %v6956_v14 = vld [vmem:[#allocation14 + $0x80] sm:$0xff] }
 0xc68   :  { %v6317_v43 = vadd.f32 %v6316_v20, %v6237_v24  ;;  %v16276_v24 = vpack.c.bf16 %v6951_v46, %v6948_v59  ;;  %v6954_v20 = vld [vmem:[#allocation14 + $0x70] sm:$0xff]  ;;  %v6985_v59 = vld [vmem:[#allocation14 + $0x168] sm:$0xff]  ;;  %v6984_v46 = vld [vmem:[#allocation14 + $0x160] sm:$0xff] }
 0xc69   :  { %v6422_v61 = vrot.slane %v6315_v56, 6  ;;  %12557 = vmatpush1.bf16.msra.mxu1 %v17177_v30  ;;  %12585 = vmatpush3.bf16.msra.mxu0 %v17178_v50  ;;  %v6955_v56 = vld [vmem:[#allocation14 + $0x78] sm:$0xff]  ;;  %v6962_v50 = vld [vmem:[#allocation14 + $0xb0] sm:$0xff] }
 0xc6a   :  { %v6432_v49 = vrot.slane %v6317_v43, 6  ;;  %12559 = vmatprep.subr.bf16.mxu1 %v16115_v15  ;;  %12586 = vmatprep.subr.bf16.mxu0 %v17171_v22  ;;  %v16283_v34 = vpack.c.bf16 %v6955_v56, %v6952_v25  ;;  %v6957_v43 = vld [vmem:[#allocation14 + $0x88] sm:$0xff]  ;;  %v6959_v30 = vld [vmem:[#allocation14 + $0x98] sm:$0xff] }
 0xc6b   :  { %v6424_v42 = vadd.f32 %v6422_v61, %v5968_v11  ;;  %v16286_v61 = vpack.c.bf16 %v6957_v43, %v6954_v20  ;;  %v16290_v11 = vpack.c.bf16 %v6962_v50, %v6959_v30  ;;  %v7150_v56 = vld [vmem:[#allocation15 + $0x8] sm:$0xff]  ;;  %v7153_v20 = vld [vmem:[#allocation15 + $0x20] sm:$0xff]  ;;  %v6509_v30 = vld [vmem:[%s17092_s16] sm:$0x7] }
 0xc6c   :  { %v6434_v17 = vadd.f32 %v6432_v49, %v5969_v32  ;;  %v6958_v49 = vld [vmem:[#allocation14 + $0x90] sm:$0xff]  ;;  %v6960_v32 = vld [vmem:[#allocation14 + $0xa0] sm:$0xff]  ;;  %v16341_v43 = vpack.c.bf16 %v7153_v20, %v7150_v56  ;;  %v6514_v50 = vrot.slane %v6509_v30, %v14293_v10  ;;  %v6522_v23 = vrot.slane %v6509_v30, %v14303_v54 }
 0xc6d   :  { %v9214_v48 = vmul.f32 -1.442695, %v6424_v42  ;;  %12561 = vmatpush1.bf16.msra.mxu1 %v16119_v7  ;;  %12588 = vmatpush3.bf16.msra.mxu0 %v16121_v12  ;;  %v17179_v12 = vld [vmem:[#allocation31_spill] sm:$0xff]  ;;  %v17180_v7 = vld [vmem:[#allocation32_spill] sm:$0xff] }
 0xc6e   :  { %v9215_v51 = vmul.f32 -1.442695, %v6434_v17  ;;  %12563 = vmatprep.subr.bf16.mxu1 %v16125_v8  ;;  %12589 = vmatprep.subr.bf16.mxu0 %v17171_v22  ;;  %v17181_v8 = vld [vmem:[#allocation33_spill] sm:$0xff]  ;;  %v6961_v42 = vld [vmem:[#allocation14 + $0xa8] sm:$0xff] }
 0xc6f   :  { %13350 = vpow2.f32 %v9214_v48  ;;  %v16293_v17 = vpack.c.bf16 %v6961_v42, %v6958_v49  ;;  %v6963_v48 = vld [vmem:[#allocation14 + $0xb8] sm:$0xff]  ;;  %v6518_v49 = vrot.slane %v6509_v30, %v14298_v16 }
 0xc70   :  { %13352 = vpow2.f32 %v9215_v51  ;;  %v16296_v51 = vpack.c.bf16 %v6963_v48, %v6960_v32  ;;  %v7156_v30 = vld [vmem:[#allocation15 + $0x38] sm:$0xff] }
 0xc71   :  { %12565 = vmatpush1.bf16.msra.mxu1 %v16129_v2  ;;  %12591 = vmatpush3.bf16.msra.mxu0 %v16131_v13 }
 0xc72   :  { %12567 = vmatprep.subr.bf16.mxu1 %v16135_v63  ;;  %12592 = vmatprep.subr.bf16.mxu0 %v17171_v22  ;;  %v6241_v63 = vrot.slane %v6228_v38, %v14303_v54  ;;  %v16273_v38 = vpack.c.bf16 %v6949_v29, %v6946_v6  ;;  %v16327_v6 = vpack.c.bf16 %v6986_v36, %v6983_v39  ;;  %v6982_v29 = vld [vmem:[#allocation14 + $0x150] sm:$0xff]  ;;  %v6907_v36 = vrot.slane %v16209_v26, 6 }
 0xc73   :  { %v7155_v26 = vld [vmem:[#allocation15 + $0x30] sm:$0xff] }
 0xc75   :  { %12569 = vmatpush1.bf16.msra.mxu1 %v16139_v4  ;;  %12594 = vmatpush3.bf16.msra.mxu0 %v16141_v9  ;;  %v6386_v4 = vadd.f32 %v6385_v27, %v6241_v63  ;;  %v16280_v27 = vpack.c.bf16 %v6956_v14, %v6953_v47  ;;  %v6987_v47 = vld [vmem:[#allocation14 + $0x178] sm:$0xff]  ;;  %v16331_v14 = vpack.c.bf16 %v6985_v59, %v6982_v29 }
 0xc76   :  { %12571 = vmatprep.subr.bf16.mxu1 %v17179_v12  ;;  %12595 = vmatprep.subr.bf16.mxu0 %v17171_v22  ;;  %v6965_v12 = vld [vmem:[#allocation14 + $0xc8] sm:$0xff]  ;;  %v16335_v25 = vpack.c.bf16 %v6987_v47, %v6984_v46  ;;  %v6457_v46 = vld [vmem:[#allocation2 + $0x10] sm:$0xc0] }
 0xc77   :  { %v6442_v9 = vrot.slane %v6386_v4, 6 }
 0xc79   :  { %v13351_v15 = vpop.eup %13350  ;;  %12573 = vmatpush1.bf16.msra.mxu1 %v17180_v7  ;;  %12597 = vmatpush3.bf16.msra.mxu0 %v17181_v8  ;;  %v6964_v7 = vld [vmem:[#allocation14 + $0xc0] sm:$0xff] }
 0xc7a   :  { %v13353_v2 = vpop.eup %13352  ;;  %v6428_v53 = vadd.f32 1.0, %v13351_v15  ;;  %12630 = vmatprep.subr.bf16.mxu0 %v17171_v22  ;;  %12599 = vmatprep.subr.bf16.mxu1 %v16261_v0  ;;  %v6968_v15 = vld [vmem:[#allocation14 + $0xe0] sm:$0xff] }
 0xc7b   :  { %v6438_v13 = vadd.f32 1.0, %v13353_v2  ;;  %v16300_v8 = vpack.c.bf16 %v6968_v15, %v6965_v12  ;;  %v6967_v2 = vld [vmem:[#allocation14 + $0xd8] sm:$0xff] }
 0xc7c   :  { %13354 = vrcp.f32 %v6428_v53  ;;  %v6966_v53 = vld [vmem:[#allocation14 + $0xd0] sm:$0xff]  ;;  %v16303_v63 = vpack.c.bf16 %v6967_v2, %v6964_v7 }
 0xc7d   :  { %13356 = vrcp.f32 %v6438_v13  ;;  %v6969_v13 = vld [vmem:[#allocation14 + $0xe8] sm:$0xff] }
 0xc7e   :  { %v16305_v4 = vpack.c.bf16 %v6969_v13, %v6966_v53  ;;  %v6455_v53 = vld [vmem:[#allocation2] sm:$0xc0] }
 0xc86   :  { %v13355_v60 = vpop.eup %13354 }
 0xc87   :  { %v13357_v18 = vpop.eup %13356  ;;  %v6444_v33 = vmul.f32 %v13355_v60, %v6442_v9  ;;  %v6971_v9 = vld [vmem:[#allocation14 + $0xf8] sm:$0xff]  ;;  %v6974_v60 = vld [vmem:[#allocation14 + $0x110] sm:$0xff] }
 0xc88   :  { %v6451_v5 = vmul.f32 %v13357_v18, %v6449_v57  ;;  %v6447_v28 = vsub.f32 1.0, %v13357_v18  ;;  %v6970_v57 = vld [vmem:[#allocation14 + $0xf0] sm:$0xff]  ;;  %v16308_v18 = vpack.c.bf16 %v6974_v60, %v6971_v9  ;;  %v6456_v60 = vld [vmem:[#allocation2 + $0x8] sm:$0xc0] }
 0xc89   :  { %v6445_v62 = vadd.f32 %v6444_v33, %v5970_v40  ;;  %v6973_v33 = vld [vmem:[#allocation14 + $0x108] sm:$0xff]  ;;  %v6972_v40 = vld [vmem:[#allocation14 + $0x100] sm:$0xff] }
 0xc8b   :  { %13358 = vtanh.f32 %v6445_v62  ;;  %v16311_v62 = vpack.c.bf16 %v6973_v33, %v6970_v57 }
 0xc95   :  { %v13359_v58 = vpop.eup %13358 }
 0xc96   :  { %v6448_v21 = vmul.f32 %v13359_v58, %v6447_v28  ;;  %v6977_v28 = vld [vmem:[#allocation14 + $0x128] sm:$0xff]  ;;  %v6980_v58 = vld [vmem:[#allocation14 + $0x140] sm:$0xff] }
 0xc98   :  { %v6452_v19 = vadd.f32 %v6451_v5, %v6448_v21  ;;  %v6975_v5 = vld [vmem:[#allocation14 + $0x118] sm:$0xff] }
 0xc99   :  { %v16315_v21 = vpack.c.bf16 %v6975_v5, %v6972_v40 }
 0xc9a   :  { %6454 = vst [vmem:[#allocation5 + $0x3] sm:$0x4] %v6452_v19  ;;  %v16254_v35 = vrot.slane %v6452_v19, 2  ;;  %v16317_v19 = vpack.c.bf16 %v6980_v58, %v6977_v28 }
 0xc9c   :  { %6803 = vmatmul.mubr.f32.vlgmr.msra.gmra.mrb[54].mxu1 %v16254_v35  ;;  %10654 = vmatmul.mubr.f32.vlgmr.msra.gmra.mrb[66].mxu0 %v16254_v35 }
 0xc9d   :  { %7072 = vmatprep.mubr.f32.mxu1 %v17158_v45  ;;  %10688 = vmatprep.mubr.msk.f32.mxu0 %vm13638_vm2, %v17158_v45 }
 0xc9e   :  { %12601 = vmatpush1.bf16.msra.mxu1 %v16263_v52  ;;  %12632 = vmatpush3.bf16.msra.mxu0 %v16266_v41 }
 0xc9f   :  { %12633 = vmatprep.subr.bf16.mxu0 %v17171_v22  ;;  %12603 = vmatprep.subr.bf16.mxu1 %v16270_v1 }
 0xca2   :  { %12605 = vmatpush1.bf16.msra.mxu1 %v16273_v38  ;;  %12635 = vmatpush3.bf16.msra.mxu0 %v16276_v24 }
 0xca3   :  { %12636 = vmatprep.subr.bf16.mxu0 %v17171_v22  ;;  %12607 = vmatprep.subr.bf16.mxu1 %v16280_v27 }
 0xca6   :  { %12609 = vmatpush1.bf16.msra.mxu1 %v16283_v34  ;;  %12638 = vmatpush3.bf16.msra.mxu0 %v16286_v61 }
 0xca7   :  { %12639 = vmatprep.subr.bf16.mxu0 %v17171_v22  ;;  %12611 = vmatprep.subr.bf16.mxu1 %v16290_v11 }
 0xcaa   :  { %12613 = vmatpush1.bf16.msra.mxu1 %v16293_v17  ;;  %12641 = vmatpush3.bf16.msra.mxu0 %v16296_v51 }
 0xcab   :  { %12642 = vmatprep.subr.bf16.mxu0 %v17171_v22  ;;  %12615 = vmatprep.subr.bf16.mxu1 %v16300_v8 }
 0xcae   :  { %12617 = vmatpush1.bf16.msra.mxu1 %v16303_v63  ;;  %12644 = vmatpush3.bf16.msra.mxu0 %v16305_v4 }
 0xcaf   :  { %12619 = vmatprep.subr.bf16.mxu1 %v16308_v18  ;;  %12645 = vmatprep.subr.bf16.mxu0 %v17171_v22 }
 0xcb2   :  { %12621 = vmatpush1.bf16.msra.mxu1 %v16311_v62  ;;  %12647 = vmatpush3.bf16.msra.mxu0 %v16315_v21 }
 0xcb3   :  { %12623 = vmatprep.subr.bf16.mxu1 %v16317_v19  ;;  %12648 = vmatprep.subr.bf16.mxu0 %v17171_v22 }
 0xcb6   :  { %12625 = vmatpush1.bf16.msra.mxu1 %v16321_v44  ;;  %12650 = vmatpush3.bf16.msra.mxu0 %v16325_v37 }
 0xcb7   :  { %12627 = vmatprep.subr.bf16.mxu1 %v16327_v6  ;;  %12651 = vmatprep.subr.bf16.mxu0 %v17171_v22 }
 0xcba   :  { %12629 = vmatpush1.bf16.msra.mxu1 %v16331_v14  ;;  %12653 = vmatpush3.bf16.msra.mxu0 %v16335_v25 }
 0xcbb   :  { %12686 = vmatprep.subr.bf16.mxu0 %v17171_v22  ;;  %12655 = vmatprep.subr.bf16.mxu1 %v16341_v43 }
 0xd2f   :  { %v6595_v42 = vpop.f32.mrb[52].mxu1  ;;  %v6666_v32 = vpop.f32.mrb[64].mxu0 }
 0xd30   :  { %v6596_v48 = vadd.f32 %v6595_v42, %v6514_v50  ;;  %v6597_v12 = vpop.f32.mrb[53].mxu1  ;;  %v10620_v15 = vpop.f32.mrb[65].mxu0  ;;  %v6667_v55 = vadd.f32 %v6666_v32, %v6522_v23 }
 0xd31   :  { %v6598_v7 = vadd.f32 %v6597_v12, %v6518_v49  ;;  %v7149_v49 = vld [vmem:[#allocation15] sm:$0xff]  ;;  %v7151_v12 = vld [vmem:[#allocation15 + $0x10] sm:$0xff]  ;;  %v7154_v15 = vld [vmem:[#allocation15 + $0x28] sm:$0xff] }
 0xd32   :  { %v6880_v2 = vrot.slane %v6596_v48, 2  ;;  %v6900_v3 = vrot.slane %v6667_v55, 2  ;;  %v7152_v48 = vld [vmem:[#allocation15 + $0x18] sm:$0xff] }
 0xd33   :  { %v6890_v13 = vrot.slane %v6598_v7, 2  ;;  %v7159_v7 = vld [vmem:[#allocation15 + $0x50] sm:$0xff]  ;;  %v7164_v55 = vld [vmem:[#allocation15 + $0x78] sm:$0xff] }
 0xd34   :  { %v6882_v9 = vadd.f32 %v6880_v2, %v6455_v53  ;;  %v16351_v2 = vpack.c.bf16 %v7152_v48, %v7149_v49  ;;  %v16353_v53 = vpack.c.bf16 %v7154_v15, %v7151_v12  ;;  %v7169_v49 = vld [vmem:[#allocation15 + $0xa0] sm:$0xff]  ;;  %v7174_v12 = vld [vmem:[#allocation15 + $0xc8] sm:$0xff] }
 0xd35   :  { %v6892_v57 = vadd.f32 %v6890_v13, %v6456_v60  ;;  %v7158_v60 = vld [vmem:[#allocation15 + $0x48] sm:$0xff]  ;;  %v7177_v15 = vld [vmem:[#allocation15 + $0xe0] sm:$0xff] }
 0xd36   :  { %v9216_v33 = vmul.f32 -1.442695, %v6882_v9  ;;  %v16357_v9 = vpack.c.bf16 %v7159_v7, %v7156_v30 }
 0xd37   :  { %v9217_v40 = vmul.f32 -1.442695, %v6892_v57  ;;  %v7157_v57 = vld [vmem:[#allocation15 + $0x40] sm:$0xff] }
 0xd38   :  { %13360 = vpow2.f32 %v9216_v33  ;;  %v7160_v33 = vld [vmem:[#allocation15 + $0x58] sm:$0xff] }
 0xd39   :  { %13362 = vpow2.f32 %v9217_v40  ;;  %v7162_v40 = vld [vmem:[#allocation15 + $0x68] sm:$0xff] }
 0xd42   :  { %v13361_v5 = vpop.eup %13360 }
 0xd43   :  { %v13363_v28 = vpop.eup %13362  ;;  %v6886_v58 = vadd.f32 1.0, %v13361_v5  ;;  %v7165_v5 = vld [vmem:[#allocation15 + $0x80] sm:$0xff] }
 0xd44   :  { %v6896_v31 = vadd.f32 1.0, %v13363_v28  ;;  %v16363_v28 = vpack.c.bf16 %v7158_v60, %v7155_v26  ;;  %v16369_v23 = vpack.c.bf16 %v7165_v5, %v7162_v40  ;;  %v7173_v26 = vld [vmem:[#allocation15 + $0xc0] sm:$0xff]  ;;  %v7176_v40 = vld [vmem:[#allocation15 + $0xd8] sm:$0xff]  ;;  %v7175_v5 = vld [vmem:[#allocation15 + $0xd0] sm:$0xff] }
 0xd45   :  { %13364 = vrcp.f32 %v6886_v58  ;;  %v16365_v58 = vpack.c.bf16 %v7160_v33, %v7157_v57  ;;  %v16403_v33 = vpack.c.bf16 %v7177_v15, %v7174_v12  ;;  %v7179_v12 = vld [vmem:[#allocation15 + $0xf0] sm:$0xff]  ;;  %v7182_v15 = vld [vmem:[#allocation15 + $0x108] sm:$0xff] }
 0xd46   :  { %13366 = vrcp.f32 %v6896_v31  ;;  %v7161_v31 = vld [vmem:[#allocation15 + $0x60] sm:$0xff] }
 0xd4f   :  { %v13365_v39 = vpop.eup %13364 }
 0xd50   :  { %v13367_v29 = vpop.eup %13366  ;;  %v6902_v59 = vmul.f32 %v13365_v39, %v6900_v3  ;;  %v7163_v3 = vld [vmem:[#allocation15 + $0x70] sm:$0xff]  ;;  %v7166_v39 = vld [vmem:[#allocation15 + $0x88] sm:$0xff] }
 0xd51   :  { %v6909_v47 = vmul.f32 %v13367_v29, %v6907_v36  ;;  %v6905_v20 = vsub.f32 1.0, %v13367_v29  ;;  %v7168_v36 = vld [vmem:[#allocation15 + $0x98] sm:$0xff]  ;;  %v7171_v29 = vld [vmem:[#allocation15 + $0xb0] sm:$0xff] }
 0xd52   :  { %v6903_v56 = vadd.f32 %v6902_v59, %v6457_v46  ;;  %v16377_v59 = vld [vmem:[%s17093_s17] sm:$0x7]  ;;  %v16381_v46 = vpack.c.bf16 %v7164_v55, %v7161_v31  ;;  %v7178_v31 = vld [vmem:[#allocation15 + $0xe8] sm:$0xff] }
 0xd53   :  { %v6723_v48 = vrot.slane %v16377_v59, %v14293_v10  ;;  %v6727_v30 = vrot.slane %v16377_v59, %v14298_v16 }
 0xd54   :  { %13368 = vtanh.f32 %v6903_v56  ;;  %v7167_v56 = vld [vmem:[#allocation15 + $0x90] sm:$0xff] }
 0xd5e   :  { %v13369_v50 = vpop.eup %13368 }
 0xd5f   :  { %v6906_v42 = vmul.f32 %v13369_v50, %v6905_v20  ;;  %v16387_v20 = vpack.c.bf16 %v7171_v29, %v7168_v36  ;;  %v7170_v50 = vld [vmem:[#allocation15 + $0xa8] sm:$0xff]  ;;  %v7180_v36 = vld [vmem:[#allocation15 + $0xf8] sm:$0xff]  ;;  %v7183_v29 = vld [vmem:[#allocation15 + $0x110] sm:$0xff] }
 0xd60   :  { %v16395_v7 = vpack.c.bf16 %v7170_v50, %v7167_v56  ;;  %v6458_v56 = vld [vmem:[#allocation2 + $0x48] sm:$0x3] }
 0xd61   :  { %v6910_v32 = vadd.f32 %v6909_v47, %v6906_v42  ;;  %v16383_v47 = vpack.c.bf16 %v7166_v39, %v7163_v3  ;;  %17182 = vst [vmem:[#allocation28_spill] sm:$0xff] %v16387_v20  ;;  %v7172_v42 = vld [vmem:[#allocation15 + $0xb8] sm:$0xff] }
 0xd62   :  { %17183 = vst [vmem:[#allocation23_spill] sm:$0xff] %v16395_v7 }
 0xd63   :  { %6932 = vst [vmem:[#allocation4 - $0x4] sm:$0x80] %v6910_v32  ;;  %v16355_v13 = vrot.slane %v6910_v32, 6  ;;  %v16397_v32 = vpack.c.bf16 %v7172_v42, %v7169_v49  ;;  %v16407_v42 = vpack.c.bf16 %v7176_v40, %v7173_v26  ;;  %v16417_v26 = vpack.c.bf16 %v7182_v15, %v7179_v12 }
 0xd65   :  { %7073 = vmatmul.mubr.f32.vlgmr.msra.gmra.mrb[56].mxu1 %v16355_v13  ;;  %10689 = vmatmul.mubr.f32.vlgmr.msra.gmra.mrb[68].mxu0 %v16355_v13 }
 0xd66   :  { %12657 = vmatpush1.bf16.msra.mxu1 %v16351_v2  ;;  %12688 = vmatpush3.bf16.msra.mxu0 %v16353_v53 }
 0xd67   :  { %12659 = vmatprep.subr.bf16.mxu1 %v16357_v9  ;;  %12689 = vmatprep.subr.bf16.mxu0 %v17171_v22 }
 0xd68   :  { %7278 = vmatprep.mubr.f32.mxu1 %v17158_v45  ;;  %10723 = vmatprep.mubr.msk.f32.mxu0 %vm13638_vm2, %v17158_v45 }
 0xd6a   :  { %12661 = vmatpush1.bf16.msra.mxu1 %v16363_v28  ;;  %12691 = vmatpush3.bf16.msra.mxu0 %v16365_v58 }
 0xd6b   :  { %12663 = vmatprep.subr.bf16.mxu1 %v16369_v23  ;;  %12692 = vmatprep.subr.bf16.mxu0 %v17171_v22 }
 0xd6e   :  { %12665 = vmatpush1.bf16.msra.mxu1 %v16381_v46  ;;  %12694 = vmatpush3.bf16.msra.mxu0 %v16383_v47 }
 0xd6f   :  { %v6804_v60 = vpop.f32.mrb[54].mxu1  ;;  %v16399_v57 = vpop.f32.mrb[66].mxu0  ;;  %12667 = vmatprep.subr.bf16.mxu1 %v16387_v20  ;;  %12695 = vmatprep.subr.bf16.mxu0 %v17171_v22  ;;  %v16409_v20 = vpack.c.bf16 %v7178_v31, %v7175_v5  ;;  %v7185_v5 = vld [vmem:[#allocation15 + $0x120] sm:$0xff] }
 0xd70   :  { %v6805_v55 = vadd.f32 %v6804_v60, %v6723_v48  ;;  %v6806_v3 = vpop.f32.mrb[55].mxu1  ;;  %v10655_v39 = vpop.f32.mrb[67].mxu0  ;;  %v16413_v48 = vpack.c.bf16 %v7183_v29, %v7180_v36  ;;  %v7181_v60 = vld [vmem:[#allocation15 + $0x100] sm:$0xff]  ;;  %v7188_v36 = vld [vmem:[#allocation15 + $0x138] sm:$0xff]  ;;  %v7187_v29 = vld [vmem:[#allocation15 + $0x130] sm:$0xff] }
 0xd71   :  { %v6807_v50 = vadd.f32 %v6806_v3, %v6727_v30  ;;  %v7184_v39 = vld [vmem:[#allocation15 + $0x118] sm:$0xff]  ;;  %v7186_v3 = vld [vmem:[#allocation15 + $0x128] sm:$0xff]  ;;  %v16427_v12 = vpack.c.bf16 %v7188_v36, %v7185_v5 }
 0xd72   :  { %v6911_v49 = vadd.f32 %v6805_v55, %v6458_v56  ;;  %12669 = vmatpush1.bf16.msra.mxu1 %v16395_v7  ;;  %12697 = vmatpush3.bf16.msra.mxu0 %v16397_v32  ;;  %17184 = vst [vmem:[#allocation29_spill] sm:$0xff] %v16413_v48  ;;  %v6459_v55 = vld [vmem:[#allocation2 + $0x50] sm:$0x3]  ;;  %v16419_v40 = vpack.c.bf16 %v7184_v39, %v7181_v60  ;;  %v7191_v60 = vld [vmem:[#allocation15 + $0x150] sm:$0xff] }
 0xd73   :  { %12671 = vmatprep.subr.bf16.mxu1 %v16403_v33  ;;  %12698 = vmatprep.subr.bf16.mxu0 %v17171_v22  ;;  %v7189_v56 = vld [vmem:[#allocation15 + $0x140] sm:$0xff]  ;;  %v6918_v7 = vadd.f32 %v6807_v50, %v6459_v55  ;;  %v7192_v50 = vld [vmem:[#allocation15 + $0x158] sm:$0xff] }
 0xd74   :  { %v9218_v30 = vmul.f32 -1.442695, %v6911_v49  ;;  %v16423_v31 = vpack.c.bf16 %v7189_v56, %v7186_v3  ;;  %v7190_v49 = vld [vmem:[#allocation15 + $0x148] sm:$0xff]  ;;  %v7193_v56 = vld [vmem:[#allocation15 + $0x160] sm:$0xff] }
 0xd75   :  { %v9219_v55 = vmul.f32 -1.442695, %v6918_v7  ;;  %v16429_v15 = vpack.c.bf16 %v7190_v49, %v7187_v29  ;;  %v7194_v3 = vld [vmem:[#allocation15 + $0x168] sm:$0xff] }
 0xd76   :  { %13370 = vpow2.f32 %v9218_v30  ;;  %12673 = vmatpush1.bf16.msra.mxu1 %v16407_v42  ;;  %12700 = vmatpush3.bf16.msra.mxu0 %v16409_v20  ;;  %v7195_v30 = vld [vmem:[#allocation15 + $0x170] sm:$0xff]  ;;  %v16437_v7 = vpack.c.bf16 %v7194_v3, %v7191_v60  ;;  %v6460_v3 = vld [vmem:[#allocation2 + $0x58] sm:$0x3] }
 0xd77   :  { %12675 = vmatprep.subr.bf16.mxu1 %v16413_v48  ;;  %12701 = vmatprep.subr.bf16.mxu0 %v17171_v22  ;;  %v16433_v39 = vpack.c.bf16 %v7195_v30, %v7192_v50  ;;  %v7196_v48 = vld [vmem:[#allocation15 + $0x178] sm:$0xff]  ;;  %13372 = vpow2.f32 %v9219_v55 }
 0xd78   :  { %17186 = vst [vmem:[#allocation31_spill] sm:$0xff] %v16437_v7  ;;  %v16439_v5 = vpack.c.bf16 %v7196_v48, %v7193_v56  ;;  %v6731_v48 = vrot.slane %v16377_v59, %v14303_v54 }
 0xd79   :  { %17185 = vst [vmem:[#allocation30_spill] sm:$0xff] %v16433_v39 }
 0xd7a   :  { %12677 = vmatpush1.bf16.msra.mxu1 %v16417_v26  ;;  %12703 = vmatpush3.bf16.msra.mxu0 %v16419_v40  ;;  %17187 = vst [vmem:[#allocation32_spill] sm:$0xff] %v16439_v5  ;;  %v6876_v30 = vadd.f32 %v16399_v57, %v6731_v48 }
 0xd7b   :  { %12679 = vmatprep.subr.bf16.mxu1 %v16423_v31  ;;  %12704 = vmatprep.subr.bf16.mxu0 %v17171_v22 }
 0xd7e   :  { %12681 = vmatpush1.bf16.msra.mxu1 %v16427_v12  ;;  %12706 = vmatpush3.bf16.msra.mxu0 %v16429_v15 }
 0xd7f   :  { %12683 = vmatprep.subr.bf16.mxu1 %v16433_v39  ;;  %12707 = vmatprep.subr.bf16.mxu0 %v17171_v22 }
 0xd80   :  { %v13371_v36 = vpop.eup %13370 }
 0xd81   :  { %v6915_v29 = vadd.f32 1.0, %v13371_v36  ;;  %v13373_v49 = vpop.eup %13372 }
 0xd82   :  { %12685 = vmatpush1.bf16.msra.mxu1 %v16437_v7  ;;  %12709 = vmatpush3.bf16.msra.mxu0 %v16439_v5  ;;  %v6922_v50 = vadd.f32 1.0, %v13373_v49 }
 0xd83   :  { %13374 = vrcp.f32 %v6915_v29  ;;  %12711 = vmatprep.subr.bf16.mxu1 %v16261_v0  ;;  %12742 = vmatprep.subr.bf16.mxu0 %v17171_v22 }
 0xd84   :  { %13376 = vrcp.f32 %v6922_v50 }
 0xd8d   :  { %v13375_v55 = vpop.eup %13374 }
 0xd8e   :  { %v6925_v60 = vmul.f32 %v13375_v55, %v6876_v30  ;;  %v13377_v36 = vpop.eup %13376  ;;  %v17188_v30 = vld [vmem:[#allocation28_spill] sm:$0xff] }
 0xd8f   :  { %v6928_v5 = vsub.f32 1.0, %v13377_v36  ;;  %v6930_v0 = vmul.f32 %v13377_v36, %v16254_v35  ;;  %v6988_v35 = vld [vmem:[%s17092_s16] sm:$0x7] }
 0xd90   :  { %v6926_v56 = vadd.f32 %v6925_v60, %v6460_v3  ;;  %v17189_v3 = vld [vmem:[#allocation23_spill] sm:$0xff] }
 0xd92   :  { %13378 = vtanh.f32 %v6926_v56  ;;  %v6937_v56 = vld [vmem:[#allocation2 + $0x18] sm:$0xc0] }
 0xd9c   :  { %v13379_v29 = vpop.eup %13378 }
 0xd9d   :  { %v6929_v7 = vmul.f32 %v13379_v29, %v6928_v5 }
 0xd9f   :  { %v16451_v39 = vadd.f32 %v6930_v0, %v6929_v7 }
 0xda1   :  { %6933 = vst [vmem:[#allocation5 + $0x4] sm:$0x1] %v16451_v39  ;;  %7279 = vmatmul.mubr.f32.vlgmr.msra.gmra.mrb[58].mxu1 %v16451_v39  ;;  %10724 = vmatmul.mubr.f32.vlgmr.msra.gmra.mrb[70].mxu0 %v16451_v39 }
 0xda2   :  { %12713 = vmatpush1.bf16.msra.mxu1 %v16263_v52  ;;  %12744 = vmatpush3.bf16.msra.mxu0 %v16266_v41  ;;  %v6993_v52 = vrot.slane %v6988_v35, %v14293_v10  ;;  %v6997_v41 = vrot.slane %v6988_v35, %v14298_v16 }
 0xda3   :  { %12715 = vmatprep.subr.bf16.mxu1 %v16270_v1  ;;  %12745 = vmatprep.subr.bf16.mxu0 %v17171_v22 }
 0xda4   :  { %7546 = vmatprep.mubr.f32.mxu1 %v17158_v45  ;;  %10758 = vmatprep.mubr.msk.f32.mxu0 %vm13638_vm2, %v17158_v45 }
 0xda6   :  { %12717 = vmatpush1.bf16.msra.mxu1 %v16273_v38  ;;  %12747 = vmatpush3.bf16.msra.mxu0 %v16276_v24 }
 0xda7   :  { %12719 = vmatprep.subr.bf16.mxu1 %v16280_v27  ;;  %12748 = vmatprep.subr.bf16.mxu0 %v17171_v22 }
 0xdaa   :  { %12721 = vmatpush1.bf16.msra.mxu1 %v16283_v34  ;;  %12750 = vmatpush3.bf16.msra.mxu0 %v16286_v61  ;;  %v6934_v61 = vld [vmem:[#allocation2 + $0x30] sm:$0x3] }
 0xdab   :  { %12723 = vmatprep.subr.bf16.mxu1 %v16290_v11  ;;  %12751 = vmatprep.subr.bf16.mxu0 %v17171_v22 }
 0xdae   :  { %12725 = vmatpush1.bf16.msra.mxu1 %v16293_v17  ;;  %12753 = vmatpush3.bf16.msra.mxu0 %v16296_v51 }
 0xdaf   :  { %12727 = vmatprep.subr.bf16.mxu1 %v16300_v8  ;;  %12754 = vmatprep.subr.bf16.mxu0 %v17171_v22  ;;  %v6935_v8 = vld [vmem:[#allocation2 + $0x38] sm:$0x3] }
 0xdb2   :  { %12729 = vmatpush1.bf16.msra.mxu1 %v16303_v63  ;;  %12756 = vmatpush3.bf16.msra.mxu0 %v16305_v4 }
 0xdb3   :  { %12731 = vmatprep.subr.bf16.mxu1 %v16308_v18  ;;  %12757 = vmatprep.subr.bf16.mxu0 %v17171_v22 }
 0xdb6   :  { %12733 = vmatpush1.bf16.msra.mxu1 %v16311_v62  ;;  %12759 = vmatpush3.bf16.msra.mxu0 %v16315_v21 }
 0xdb7   :  { %12735 = vmatprep.subr.bf16.mxu1 %v16317_v19  ;;  %12760 = vmatprep.subr.bf16.mxu0 %v17171_v22  ;;  %v7001_v19 = vrot.slane %v6988_v35, %v14303_v54 }
 0xdba   :  { %12737 = vmatpush1.bf16.msra.mxu1 %v16321_v44  ;;  %12762 = vmatpush3.bf16.msra.mxu0 %v16325_v37 }
 0xdbb   :  { %12739 = vmatprep.subr.bf16.mxu1 %v16327_v6  ;;  %12763 = vmatprep.subr.bf16.mxu0 %v17171_v22 }
 0xdbe   :  { %12741 = vmatpush1.bf16.msra.mxu1 %v16331_v14  ;;  %12765 = vmatpush3.bf16.msra.mxu0 %v16335_v25  ;;  %v6936_v25 = vld [vmem:[#allocation2 + $0x40] sm:$0x3] }
 0xdbf   :  { %12767 = vmatprep.subr.bf16.mxu1 %v16341_v43  ;;  %12798 = vmatprep.subr.bf16.mxu0 %v17171_v22 }
 0xe38   :  { %v7074_v1 = vpop.f32.mrb[56].mxu1  ;;  %v7145_v38 = vpop.f32.mrb[68].mxu0 }
 0xe39   :  { %v7075_v24 = vadd.f32 %v7074_v1, %v6993_v52  ;;  %v7076_v27 = vpop.f32.mrb[57].mxu1  ;;  %v10690_v34 = vpop.f32.mrb[69].mxu0  ;;  %v7146_v37 = vadd.f32 %v7145_v38, %v7001_v19  ;;  %v17190_v52 = vld [vmem:[#allocation29_spill] sm:$0xff]  ;;  %v7405_v38 = vrot.slane %v16451_v39, 2  ;;  %v7906_v39 = vld [vmem:[#allocation14 + $0x8] sm:$0xff] }
 0xe3a   :  { %v7077_v11 = vadd.f32 %v7076_v27, %v6997_v41  ;;  %v6939_v34 = vld [vmem:[#allocation2 + $0x28] sm:$0xc0] }
 0xe3b   :  { %v7355_v17 = vadd.f32 %v7075_v24, %v6934_v61  ;;  %v7908_v19 = vld [vmem:[#allocation14 + $0x18] sm:$0xff] }
 0xe3c   :  { %v7362_v63 = vadd.f32 %v7077_v11, %v6935_v8 }
 0xe3d   :  { %v9220_v51 = vmul.f32 -1.442695, %v7355_v17 }
 0xe3e   :  { %v9221_v4 = vmul.f32 -1.442695, %v7362_v63 }
 0xe3f   :  { %13380 = vpow2.f32 %v9220_v51 }
 0xe40   :  { %13382 = vpow2.f32 %v9221_v4 }
 0xe49   :  { %v13381_v18 = vpop.eup %13380 }
 0xe4a   :  { %v7359_v62 = vadd.f32 1.0, %v13381_v18  ;;  %v13383_v21 = vpop.eup %13382  ;;  %v7909_v18 = vld [vmem:[#allocation14 + $0x20] sm:$0xff] }
 0xe4b   :  { %v7366_v44 = vadd.f32 1.0, %v13383_v21  ;;  %v7905_v21 = vld [vmem:[#allocation14] sm:$0xff] }
 0xe4c   :  { %13384 = vrcp.f32 %v7359_v62  ;;  %v16551_v62 = vpack.c.bf16 %v7909_v18, %v7906_v39  ;;  %v7941_v39 = vld [vmem:[#allocation14 + $0x120] sm:$0xff]  ;;  %v7944_v18 = vld [vmem:[#allocation14 + $0x138] sm:$0xff] }
 0xe4d   :  { %13386 = vrcp.f32 %v7366_v44  ;;  %v7907_v44 = vld [vmem:[#allocation14 + $0x10] sm:$0xff] }
 0xe56   :  { %v13385_v6 = vpop.eup %13384 }
 0xe57   :  { %v7369_v14 = vmul.f32 %v13385_v6, %v7146_v37  ;;  %v13387_v59 = vpop.eup %13386  ;;  %v16553_v37 = vpack.c.bf16 %v7908_v19, %v7905_v21  ;;  %v7910_v6 = vld [vmem:[#allocation14 + $0x28] sm:$0xff]  ;;  %v7943_v21 = vld [vmem:[#allocation14 + $0x130] sm:$0xff] }
 0xe58   :  { %v7372_v57 = vsub.f32 1.0, %v13387_v59  ;;  %v7374_v49 = vmul.f32 %v13387_v59, %v16355_v13  ;;  %v7197_v13 = vld [vmem:[%s17093_s17] sm:$0x7]  ;;  %v7946_v19 = vld [vmem:[#allocation14 + $0x148] sm:$0xff] }
 0xe59   :  { %v7370_v43 = vadd.f32 %v7369_v14, %v6936_v25  ;;  %v16556_v14 = vpack.c.bf16 %v7910_v6, %v7907_v44  ;;  %v7912_v25 = vld [vmem:[#allocation14 + $0x38] sm:$0xff]  ;;  %v7951_v6 = vld [vmem:[#allocation14 + $0x170] sm:$0xff] }
 0xe5a   :  { %v7948_v44 = vld [vmem:[#allocation14 + $0x158] sm:$0xff] }
 0xe5b   :  { %13388 = vtanh.f32 %v7370_v43  ;;  %v7915_v43 = vld [vmem:[#allocation14 + $0x50] sm:$0xff] }
 0xe5c   :  { %v16560_v59 = vpack.c.bf16 %v7915_v43, %v7912_v25  ;;  %v16611_v25 = vpack.c.bf16 %v7944_v18, %v7941_v39  ;;  %v16615_v43 = vpack.c.bf16 %v7946_v19, %v7943_v21 }
 0xe65   :  { %v13389_v7 = vpop.eup %13388 }
 0xe66   :  { %v7373_v5 = vmul.f32 %v13389_v7, %v7372_v57  ;;  %v7911_v57 = vld [vmem:[#allocation14 + $0x30] sm:$0xff]  ;;  %v7914_v7 = vld [vmem:[#allocation14 + $0x48] sm:$0xff] }
 0xe68   :  { %v16498_v48 = vadd.f32 %v7374_v49, %v7373_v5  ;;  %v7913_v5 = vld [vmem:[#allocation14 + $0x40] sm:$0xff]  ;;  %v16563_v49 = vpack.c.bf16 %v7914_v7, %v7911_v57  ;;  %v16617_v57 = vpack.c.bf16 %v7951_v6, %v7948_v44  ;;  %v7947_v7 = vld [vmem:[#allocation14 + $0x150] sm:$0xff] }
 0xe6a   :  { %7409 = vst [vmem:[#allocation4 + $0x3] sm:$0x2] %v16498_v48  ;;  %7547 = vmatmul.mubr.f32.vlgmr.msra.gmra.mrb[60].mxu1 %v16498_v48  ;;  %10759 = vmatmul.mubr.f32.vlgmr.msra.gmra.mrb[72].mxu0 %v16498_v48  ;;  %v7861_v6 = vrot.slane %v16498_v48, 6 }
 0xe6b   :  { %12769 = vmatpush1.bf16.msra.mxu1 %v16351_v2  ;;  %12800 = vmatpush3.bf16.msra.mxu0 %v16353_v53  ;;  %v7202_v2 = vrot.slane %v7197_v13, %v14293_v10  ;;  %v7206_v53 = vrot.slane %v7197_v13, %v14298_v16 }
 0xe6c   :  { %12771 = vmatprep.subr.bf16.mxu1 %v16357_v9  ;;  %12801 = vmatprep.subr.bf16.mxu0 %v17171_v22 }
 0xe6d   :  { %7755 = vmatprep.mubr.f32.mxu1 %v17158_v45  ;;  %10793 = vmatprep.mubr.msk.f32.mxu0 %vm13638_vm2, %v17158_v45 }
 0xe6f   :  { %12773 = vmatpush1.bf16.msra.mxu1 %v16363_v28  ;;  %12803 = vmatpush3.bf16.msra.mxu0 %v16365_v58 }
 0xe70   :  { %12775 = vmatprep.subr.bf16.mxu1 %v16369_v23  ;;  %12804 = vmatprep.subr.bf16.mxu0 %v17171_v22 }
 0xe73   :  { %12777 = vmatpush1.bf16.msra.mxu1 %v16381_v46  ;;  %12806 = vmatpush3.bf16.msra.mxu0 %v16383_v47  ;;  %v6938_v47 = vld [vmem:[#allocation2 + $0x20] sm:$0xc0] }
 0xe74   :  { %v7280_v9 = vpop.f32.mrb[58].mxu1  ;;  %v7351_v50 = vpop.f32.mrb[70].mxu0  ;;  %12779 = vmatprep.subr.bf16.mxu1 %v17188_v30  ;;  %12807 = vmatprep.subr.bf16.mxu0 %v17171_v22  ;;  %v7917_v30 = vld [vmem:[#allocation14 + $0x60] sm:$0xff] }
 0xe75   :  { %v7281_v28 = vadd.f32 %v7280_v9, %v7202_v2  ;;  %v7282_v58 = vpop.f32.mrb[59].mxu1  ;;  %v10725_v55 = vpop.f32.mrb[71].mxu0  ;;  %v7921_v9 = vld [vmem:[#allocation14 + $0x80] sm:$0xff] }
 0xe76   :  { %v7283_v23 = vadd.f32 %v7282_v58, %v7206_v53  ;;  %v7918_v53 = vld [vmem:[#allocation14 + $0x68] sm:$0xff]  ;;  %v7919_v58 = vld [vmem:[#allocation14 + $0x70] sm:$0xff] }
 0xe77   :  { %v7377_v60 = vrot.slane %v7281_v28, 2  ;;  %12781 = vmatpush1.bf16.msra.mxu1 %v17189_v3  ;;  %12809 = vmatpush3.bf16.msra.mxu0 %v16397_v32  ;;  %v7920_v28 = vld [vmem:[#allocation14 + $0x78] sm:$0xff] }
 0xe78   :  { %v7387_v36 = vrot.slane %v7283_v23, 2  ;;  %12783 = vmatprep.subr.bf16.mxu1 %v16403_v33  ;;  %12810 = vmatprep.subr.bf16.mxu0 %v17171_v22  ;;  %v17192_v33 = vld [vmem:[#allocation31_spill] sm:$0xff]  ;;  %v16573_v55 = vpack.c.bf16 %v7920_v28, %v7917_v30  ;;  %v7924_v3 = vld [vmem:[#allocation14 + $0x98] sm:$0xff] }
 0xe79   :  { %v7379_v46 = vadd.f32 %v7377_v60, %v6937_v56  ;;  %v7922_v23 = vld [vmem:[#allocation14 + $0x88] sm:$0xff]  ;;  %v7927_v56 = vld [vmem:[#allocation14 + $0xb0] sm:$0xff] }
 0xe7a   :  { %v7389_v29 = vadd.f32 %v7387_v36, %v6938_v47  ;;  %v16576_v60 = vpack.c.bf16 %v7922_v23, %v7919_v58  ;;  %v16580_v36 = vpack.c.bf16 %v7927_v56, %v7924_v3  ;;  %v7926_v47 = vld [vmem:[#allocation14 + $0xa8] sm:$0xff]  ;;  %v8118_v58 = vld [vmem:[#allocation15 + $0x20] sm:$0xff]  ;;  %v7465_v3 = vld [vmem:[%s17092_s16] sm:$0x7] }
 0xe7b   :  { %v9222_v0 = vmul.f32 -1.442695, %v7379_v46  ;;  %12785 = vmatpush1.bf16.msra.mxu1 %v16407_v42  ;;  %12812 = vmatpush3.bf16.msra.mxu0 %v16409_v20  ;;  %v17191_v20 = vld [vmem:[#allocation30_spill] sm:$0xff]  ;;  %v17193_v42 = vld [vmem:[#allocation32_spill] sm:$0xff]  ;;  %v8115_v28 = vld [vmem:[#allocation15 + $0x8] sm:$0xff]  ;;  %v7470_v56 = vrot.slane %v7465_v3, %v14293_v10  ;;  %v7478_v18 = vrot.slane %v7465_v3, %v14303_v54 }
 0xe7c   :  { %v9223_v35 = vmul.f32 -1.442695, %v7389_v29  ;;  %12787 = vmatprep.subr.bf16.mxu1 %v17190_v52  ;;  %12813 = vmatprep.subr.bf16.mxu0 %v17171_v22  ;;  %v7923_v46 = vld [vmem:[#allocation14 + $0x90] sm:$0xff]  ;;  %v7925_v29 = vld [vmem:[#allocation14 + $0xa0] sm:$0xff]  ;;  %v16631_v23 = vpack.c.bf16 %v8118_v58, %v8115_v28 }
 0xe7d   :  { %13390 = vpow2.f32 %v9222_v0  ;;  %v16583_v0 = vpack.c.bf16 %v7926_v47, %v7923_v46  ;;  %v7474_v46 = vrot.slane %v7465_v3, %v14298_v16  ;;  %v8121_v3 = vld [vmem:[#allocation15 + $0x38] sm:$0xff] }
 0xe7e   :  { %13392 = vpow2.f32 %v9223_v35  ;;  %v7928_v35 = vld [vmem:[#allocation14 + $0xb8] sm:$0xff] }
 0xe7f   :  { %12789 = vmatpush1.bf16.msra.mxu1 %v16417_v26  ;;  %12815 = vmatpush3.bf16.msra.mxu0 %v16419_v40  ;;  %v16586_v52 = vpack.c.bf16 %v7928_v35, %v7925_v29 }
 0xe80   :  { %12791 = vmatprep.subr.bf16.mxu1 %v16423_v31  ;;  %12816 = vmatprep.subr.bf16.mxu0 %v17171_v22  ;;  %v7210_v31 = vrot.slane %v7197_v13, %v14303_v54  ;;  %v7916_v13 = vld [vmem:[#allocation14 + $0x58] sm:$0xff] }
 0xe81   :  { %v16566_v2 = vpack.c.bf16 %v7916_v13, %v7913_v5  ;;  %v7950_v5 = vld [vmem:[#allocation14 + $0x168] sm:$0xff]  ;;  %v7949_v13 = vld [vmem:[#allocation14 + $0x160] sm:$0xff] }
 0xe83   :  { %12793 = vmatpush1.bf16.msra.mxu1 %v16427_v12  ;;  %12818 = vmatpush3.bf16.msra.mxu0 %v16429_v15  ;;  %v7352_v12 = vadd.f32 %v7351_v50, %v7210_v31  ;;  %v16570_v50 = vpack.c.bf16 %v7921_v9, %v7918_v53  ;;  %v7952_v53 = vld [vmem:[#allocation14 + $0x178] sm:$0xff]  ;;  %v16621_v9 = vpack.c.bf16 %v7950_v5, %v7947_v7 }
 0xe84   :  { %12795 = vmatprep.subr.bf16.mxu1 %v17191_v20  ;;  %12819 = vmatprep.subr.bf16.mxu0 %v17171_v22  ;;  %v7930_v20 = vld [vmem:[#allocation14 + $0xc8] sm:$0xff]  ;;  %v16625_v30 = vpack.c.bf16 %v7952_v53, %v7949_v13  ;;  %v7413_v13 = vld [vmem:[#allocation2 + $0x40] sm:$0xc] }
 0xe85   :  { %v7397_v15 = vrot.slane %v7352_v12, 2 }
 0xe87   :  { %v13391_v32 = vpop.eup %13390  ;;  %12797 = vmatpush1.bf16.msra.mxu1 %v17192_v33  ;;  %12821 = vmatpush3.bf16.msra.mxu0 %v17193_v42  ;;  %v7929_v33 = vld [vmem:[#allocation14 + $0xc0] sm:$0xff] }
 0xe88   :  { %v13393_v26 = vpop.eup %13392  ;;  %v7383_v41 = vadd.f32 1.0, %v13391_v32  ;;  %12854 = vmatprep.subr.bf16.mxu0 %v17171_v22  ;;  %12823 = vmatprep.subr.bf16.mxu1 %v16551_v62  ;;  %v7933_v32 = vld [vmem:[#allocation14 + $0xe0] sm:$0xff] }
 0xe89   :  { %v7393_v40 = vadd.f32 1.0, %v13393_v26  ;;  %v16590_v42 = vpack.c.bf16 %v7933_v32, %v7930_v20  ;;  %v7932_v26 = vld [vmem:[#allocation14 + $0xd8] sm:$0xff] }
 0xe8a   :  { %13394 = vrcp.f32 %v7383_v41  ;;  %v7931_v41 = vld [vmem:[#allocation14 + $0xd0] sm:$0xff]  ;;  %v16593_v31 = vpack.c.bf16 %v7932_v26, %v7929_v33 }
 0xe8b   :  { %13396 = vrcp.f32 %v7393_v40  ;;  %v7934_v40 = vld [vmem:[#allocation14 + $0xe8] sm:$0xff] }
 0xe8c   :  { %v16595_v12 = vpack.c.bf16 %v7934_v40, %v7931_v41  ;;  %v7411_v41 = vld [vmem:[#allocation2 + $0x30] sm:$0xc] }
 0xe94   :  { %v13395_v1 = vpop.eup %13394 }
 0xe95   :  { %v13397_v24 = vpop.eup %13396  ;;  %v7399_v27 = vmul.f32 %v13395_v1, %v7397_v15  ;;  %v7936_v15 = vld [vmem:[#allocation14 + $0xf8] sm:$0xff]  ;;  %v7939_v1 = vld [vmem:[#allocation14 + $0x110] sm:$0xff] }
 0xe96   :  { %v7407_v61 = vmul.f32 %v13397_v24, %v7405_v38  ;;  %v7402_v17 = vsub.f32 1.0, %v13397_v24  ;;  %v7935_v38 = vld [vmem:[#allocation14 + $0xf0] sm:$0xff]  ;;  %v16598_v24 = vpack.c.bf16 %v7939_v1, %v7936_v15  ;;  %v7412_v1 = vld [vmem:[#allocation2 + $0x38] sm:$0xc] }
 0xe97   :  { %v7400_v11 = vadd.f32 %v7399_v27, %v6939_v34  ;;  %v7938_v27 = vld [vmem:[#allocation14 + $0x108] sm:$0xff]  ;;  %v7937_v34 = vld [vmem:[#allocation14 + $0x100] sm:$0xff] }
 0xe99   :  { %13398 = vtanh.f32 %v7400_v11  ;;  %v16601_v11 = vpack.c.bf16 %v7938_v27, %v7935_v38 }
 0xea3   :  { %v13399_v51 = vpop.eup %13398 }
 0xea4   :  { %v7403_v8 = vmul.f32 %v13399_v51, %v7402_v17  ;;  %v7942_v17 = vld [vmem:[#allocation14 + $0x128] sm:$0xff]  ;;  %v7945_v51 = vld [vmem:[#allocation14 + $0x140] sm:$0xff] }
 0xea6   :  { %v16544_v63 = vadd.f32 %v7407_v61, %v7403_v8  ;;  %v7940_v61 = vld [vmem:[#allocation14 + $0x118] sm:$0xff] }
 0xea7   :  { %v16605_v8 = vpack.c.bf16 %v7940_v61, %v7937_v34 }
 0xea8   :  { %7410 = vst [vmem:[#allocation5 - $0x3] sm:$0x40] %v16544_v63  ;;  %v7689_v4 = vrot.slane %v16544_v63, 6 }
 0xeaa   :  { %7756 = vmatmul.mubr.f32.vlgmr.msra.gmra.mrb[62].mxu1 %v7689_v4  ;;  %10794 = vmatmul.mubr.f32.vlgmr.msra.gmra.mrb[74].mxu0 %v7689_v4  ;;  %v16607_v4 = vpack.c.bf16 %v7945_v51, %v7942_v17 }
 0xeab   :  { %8037 = vmatprep.mubr.f32.mxu1 %v17158_v45  ;;  %10828 = vmatprep.mubr.msk.f32.mxu0 %vm13638_vm2, %v17158_v45 }
 0xeac   :  { %12825 = vmatpush1.bf16.msra.mxu1 %v16553_v37  ;;  %12856 = vmatpush3.bf16.msra.mxu0 %v16556_v14 }
 0xead   :  { %12857 = vmatprep.subr.bf16.mxu0 %v17171_v22  ;;  %12827 = vmatprep.subr.bf16.mxu1 %v16560_v59 }
 0xeb0   :  { %12829 = vmatpush1.bf16.msra.mxu1 %v16563_v49  ;;  %12859 = vmatpush3.bf16.msra.mxu0 %v16566_v2 }
 0xeb1   :  { %12860 = vmatprep.subr.bf16.mxu0 %v17171_v22  ;;  %12831 = vmatprep.subr.bf16.mxu1 %v16570_v50 }
 0xeb4   :  { %12833 = vmatpush1.bf16.msra.mxu1 %v16573_v55  ;;  %12862 = vmatpush3.bf16.msra.mxu0 %v16576_v60 }
 0xeb5   :  { %12863 = vmatprep.subr.bf16.mxu0 %v17171_v22  ;;  %12835 = vmatprep.subr.bf16.mxu1 %v16580_v36 }
 0xeb8   :  { %12837 = vmatpush1.bf16.msra.mxu1 %v16583_v0  ;;  %12865 = vmatpush3.bf16.msra.mxu0 %v16586_v52 }
 0xeb9   :  { %12866 = vmatprep.subr.bf16.mxu0 %v17171_v22  ;;  %12839 = vmatprep.subr.bf16.mxu1 %v16590_v42 }
 0xebc   :  { %12841 = vmatpush1.bf16.msra.mxu1 %v16593_v31  ;;  %12868 = vmatpush3.bf16.msra.mxu0 %v16595_v12 }
 0xebd   :  { %12843 = vmatprep.subr.bf16.mxu1 %v16598_v24  ;;  %12869 = vmatprep.subr.bf16.mxu0 %v17171_v22 }
 0xec0   :  { %12845 = vmatpush1.bf16.msra.mxu1 %v16601_v11  ;;  %12871 = vmatpush3.bf16.msra.mxu0 %v16605_v8 }
 0xec1   :  { %12847 = vmatprep.subr.bf16.mxu1 %v16607_v4  ;;  %12872 = vmatprep.subr.bf16.mxu0 %v17171_v22 }
 0xec4   :  { %12849 = vmatpush1.bf16.msra.mxu1 %v16611_v25  ;;  %12874 = vmatpush3.bf16.msra.mxu0 %v16615_v43 }
 0xec5   :  { %12851 = vmatprep.subr.bf16.mxu1 %v16617_v57  ;;  %12875 = vmatprep.subr.bf16.mxu0 %v17171_v22 }
 0xec8   :  { %12853 = vmatpush1.bf16.msra.mxu1 %v16621_v9  ;;  %12877 = vmatpush3.bf16.msra.mxu0 %v16625_v30 }
 0xec9   :  { %12910 = vmatprep.subr.bf16.mxu0 %v17171_v22  ;;  %12879 = vmatprep.subr.bf16.mxu1 %v16631_v23 }
 0xf3d   :  { %v7548_v47 = vpop.f32.mrb[60].mxu1  ;;  %v7619_v29 = vpop.f32.mrb[72].mxu0 }
 0xf3e   :  { %v7549_v35 = vadd.f32 %v7548_v47, %v7470_v56  ;;  %v7550_v20 = vpop.f32.mrb[61].mxu1  ;;  %v10760_v32 = vpop.f32.mrb[73].mxu0  ;;  %v7620_v21 = vadd.f32 %v7619_v29, %v7478_v18 }
 0xf3f   :  { %v7551_v33 = vadd.f32 %v7550_v20, %v7474_v46  ;;  %v8114_v46 = vld [vmem:[#allocation15] sm:$0xff]  ;;  %v8116_v20 = vld [vmem:[#allocation15 + $0x10] sm:$0xff]  ;;  %v8119_v32 = vld [vmem:[#allocation15 + $0x28] sm:$0xff] }
 0xf40   :  { %v7833_v26 = vrot.slane %v7549_v35, 6  ;;  %v7853_v19 = vrot.slane %v7620_v21, 6  ;;  %v8117_v35 = vld [vmem:[#allocation15 + $0x18] sm:$0xff]  ;;  %v16645_v48 = vpack.c.bf16 %v8119_v32, %v8116_v20  ;;  %v8139_v20 = vld [vmem:[#allocation15 + $0xc8] sm:$0xff]  ;;  %v8142_v32 = vld [vmem:[#allocation15 + $0xe0] sm:$0xff] }
 0xf41   :  { %v7843_v40 = vrot.slane %v7551_v33, 6  ;;  %v8124_v33 = vld [vmem:[#allocation15 + $0x50] sm:$0xff]  ;;  %v8129_v21 = vld [vmem:[#allocation15 + $0x78] sm:$0xff] }
 0xf42   :  { %v7835_v15 = vadd.f32 %v7833_v26, %v7411_v41  ;;  %v16643_v26 = vpack.c.bf16 %v8117_v35, %v8114_v46  ;;  %v8120_v41 = vld [vmem:[#allocation15 + $0x30] sm:$0xff]  ;;  %v8134_v46 = vld [vmem:[#allocation15 + $0xa0] sm:$0xff] }
 0xf43   :  { %v7845_v38 = vadd.f32 %v7843_v40, %v7412_v1  ;;  %v8123_v1 = vld [vmem:[#allocation15 + $0x48] sm:$0xff] }
 0xf44   :  { %v9224_v27 = vmul.f32 -1.442695, %v7835_v15  ;;  %v16649_v15 = vpack.c.bf16 %v8124_v33, %v8121_v3 }
 0xf45   :  { %v9225_v34 = vmul.f32 -1.442695, %v7845_v38  ;;  %v8122_v38 = vld [vmem:[#allocation15 + $0x40] sm:$0xff] }
 0xf46   :  { %13400 = vpow2.f32 %v9224_v27  ;;  %v8125_v27 = vld [vmem:[#allocation15 + $0x58] sm:$0xff] }
 0xf47   :  { %13402 = vpow2.f32 %v9225_v34  ;;  %v8127_v34 = vld [vmem:[#allocation15 + $0x68] sm:$0xff] }
 0xf50   :  { %v13401_v61 = vpop.eup %13400 }
 0xf51   :  { %v13403_v17 = vpop.eup %13402  ;;  %v7839_v51 = vadd.f32 1.0, %v13401_v61  ;;  %v8130_v61 = vld [vmem:[#allocation15 + $0x80] sm:$0xff] }
 0xf52   :  { %v7849_v39 = vadd.f32 1.0, %v13403_v17  ;;  %v16653_v17 = vpack.c.bf16 %v8123_v1, %v8120_v41  ;;  %v16659_v18 = vpack.c.bf16 %v8130_v61, %v8127_v34  ;;  %v8141_v34 = vld [vmem:[#allocation15 + $0xd8] sm:$0xff]  ;;  %v8140_v61 = vld [vmem:[#allocation15 + $0xd0] sm:$0xff] }
 0xf53   :  { %13404 = vrcp.f32 %v7839_v51  ;;  %v16655_v51 = vpack.c.bf16 %v8125_v27, %v8122_v38  ;;  %v16693_v27 = vpack.c.bf16 %v8142_v32, %v8139_v20  ;;  %v8144_v20 = vld [vmem:[#allocation15 + $0xf0] sm:$0xff] }
 0xf54   :  { %13406 = vrcp.f32 %v7849_v39  ;;  %v8126_v39 = vld [vmem:[#allocation15 + $0x60] sm:$0xff] }
 0xf5d   :  { %v13405_v44 = vpop.eup %13404 }
 0xf5e   :  { %v13407_v7 = vpop.eup %13406  ;;  %v7855_v5 = vmul.f32 %v13405_v44, %v7853_v19  ;;  %v8128_v19 = vld [vmem:[#allocation15 + $0x70] sm:$0xff]  ;;  %v8131_v44 = vld [vmem:[#allocation15 + $0x88] sm:$0xff] }
 0xf5f   :  { %v7863_v53 = vmul.f32 %v13407_v7, %v7861_v6  ;;  %v7858_v58 = vsub.f32 1.0, %v13407_v7  ;;  %v8133_v6 = vld [vmem:[#allocation15 + $0x98] sm:$0xff]  ;;  %v8136_v7 = vld [vmem:[#allocation15 + $0xb0] sm:$0xff] }
 0xf60   :  { %v7856_v28 = vadd.f32 %v7855_v5, %v7413_v13  ;;  %v16667_v5 = vld [vmem:[%s17093_s17] sm:$0x7]  ;;  %v16671_v13 = vpack.c.bf16 %v8129_v21, %v8126_v39  ;;  %v8143_v39 = vld [vmem:[#allocation15 + $0xe8] sm:$0xff] }
 0xf61   :  { %v7676_v35 = vrot.slane %v16667_v5, %v14293_v10  ;;  %v7680_v3 = vrot.slane %v16667_v5, %v14298_v16 }
 0xf62   :  { %13408 = vtanh.f32 %v7856_v28  ;;  %17194 = vst [vmem:[#allocation33_spill] sm:$0xff] %v16671_v13  ;;  %v8132_v28 = vld [vmem:[#allocation15 + $0x90] sm:$0xff] }
 0xf6c   :  { %v13409_v56 = vpop.eup %13408 }
 0xf6d   :  { %v7859_v47 = vmul.f32 %v13409_v56, %v7858_v58  ;;  %v16677_v58 = vpack.c.bf16 %v8136_v7, %v8133_v6  ;;  %v8135_v56 = vld [vmem:[#allocation15 + $0xa8] sm:$0xff]  ;;  %v8145_v6 = vld [vmem:[#allocation15 + $0xf8] sm:$0xff]  ;;  %v8148_v7 = vld [vmem:[#allocation15 + $0x110] sm:$0xff] }
 0xf6e   :  { %v16685_v33 = vpack.c.bf16 %v8135_v56, %v8132_v28  ;;  %v7414_v56 = vld [vmem:[#allocation2 + $0x18] sm:$0x30] }
 0xf6f   :  { %v16641_v29 = vadd.f32 %v7863_v53, %v7859_v47  ;;  %v16673_v53 = vpack.c.bf16 %v8131_v44, %v8128_v19  ;;  %17195 = vst [vmem:[#allocation28_spill] sm:$0xff] %v16677_v58  ;;  %v8137_v47 = vld [vmem:[#allocation15 + $0xb8] sm:$0xff] }
 0xf70   :  { %17196 = vst [vmem:[#allocation23_spill] sm:$0xff] %v16685_v33  ;;  %v16687_v41 = vpack.c.bf16 %v8137_v47, %v8134_v46 }
 0xf71   :  { %7897 = vst [vmem:[#allocation4 + $0x2] sm:$0x8] %v16641_v29  ;;  %v7971_v40 = vrot.slane %v16641_v29, 2 }
 0xf72   :  { %17197 = vst [vmem:[#allocation29_spill] sm:$0xff] %v16687_v41 }
 0xf73   :  { %8038 = vmatmul.mubr.f32.vlgmr.msra.gmra.mrb[64].mxu1 %v7971_v40  ;;  %10829 = vmatmul.mubr.f32.vlgmr.msra.gmra.mrb[76].mxu0 %v7971_v40  ;;  %v8138_v40 = vld [vmem:[#allocation15 + $0xc0] sm:$0xff] }
 0xf74   :  { %12881 = vmatpush1.bf16.msra.mxu1 %v16643_v26  ;;  %12912 = vmatpush3.bf16.msra.mxu0 %v16645_v48  ;;  %v16697_v47 = vpack.c.bf16 %v8141_v34, %v8138_v40 }
 0xf75   :  { %12883 = vmatprep.subr.bf16.mxu1 %v16649_v15  ;;  %12913 = vmatprep.subr.bf16.mxu0 %v17171_v22 }
 0xf76   :  { %8246 = vmatprep.mubr.f32.mxu1 %v17158_v45  ;;  %10863 = vmatprep.mubr.msk.f32.mxu0 %vm13638_vm2, %v17158_v45 }
 0xf78   :  { %12885 = vmatpush1.bf16.msra.mxu1 %v16653_v17  ;;  %12915 = vmatpush3.bf16.msra.mxu0 %v16655_v51 }
 0xf79   :  { %12887 = vmatprep.subr.bf16.mxu1 %v16659_v18  ;;  %12916 = vmatprep.subr.bf16.mxu0 %v17171_v22 }
 0xf7c   :  { %12889 = vmatpush1.bf16.msra.mxu1 %v16671_v13  ;;  %12918 = vmatpush3.bf16.msra.mxu0 %v16673_v53  ;;  %v8154_v13 = vld [vmem:[#allocation15 + $0x140] sm:$0xff] }
 0xf7d   :  { %v7757_v1 = vpop.f32.mrb[62].mxu1  ;;  %v16689_v38 = vpop.f32.mrb[74].mxu0  ;;  %12891 = vmatprep.subr.bf16.mxu1 %v16677_v58  ;;  %12919 = vmatprep.subr.bf16.mxu0 %v17171_v22  ;;  %v16699_v58 = vpack.c.bf16 %v8143_v39, %v8140_v61  ;;  %v8150_v39 = vld [vmem:[#allocation15 + $0x120] sm:$0xff] }
 0xf7e   :  { %v7758_v21 = vadd.f32 %v7757_v1, %v7676_v35  ;;  %v7759_v19 = vpop.f32.mrb[63].mxu1  ;;  %v10795_v44 = vpop.f32.mrb[75].mxu0  ;;  %v16703_v35 = vpack.c.bf16 %v8148_v7, %v8145_v6  ;;  %v8147_v1 = vld [vmem:[#allocation15 + $0x108] sm:$0xff] }
 0xf7f   :  { %v7760_v28 = vadd.f32 %v7759_v19, %v7680_v3  ;;  %v8146_v3 = vld [vmem:[#allocation15 + $0x100] sm:$0xff]  ;;  %v8149_v19 = vld [vmem:[#allocation15 + $0x118] sm:$0xff]  ;;  %v7415_v44 = vld [vmem:[#allocation2 + $0x20] sm:$0x30]  ;;  %v16707_v34 = vpack.c.bf16 %v8147_v1, %v8144_v20 }
 0xf80   :  { %v7866_v46 = vrot.slane %v7758_v21, 4  ;;  %12893 = vmatpush1.bf16.msra.mxu1 %v16685_v33  ;;  %12921 = vmatpush3.bf16.msra.mxu0 %v16687_v41  ;;  %v8151_v33 = vld [vmem:[#allocation15 + $0x128] sm:$0xff]  ;;  %v16709_v61 = vpack.c.bf16 %v8149_v19, %v8146_v3  ;;  %v8156_v1 = vld [vmem:[#allocation15 + $0x150] sm:$0xff]  ;;  %v8158_v3 = vld [vmem:[#allocation15 + $0x160] sm:$0xff] }
 0xf81   :  { %v7876_v32 = vrot.slane %v7760_v28, 4  ;;  %12895 = vmatprep.subr.bf16.mxu1 %v16693_v27  ;;  %12922 = vmatprep.subr.bf16.mxu0 %v17171_v22  ;;  %v16713_v7 = vpack.c.bf16 %v8154_v13, %v8151_v33  ;;  %v8153_v28 = vld [vmem:[#allocation15 + $0x138] sm:$0xff]  ;;  %v8159_v33 = vld [vmem:[#allocation15 + $0x168] sm:$0xff] }
 0xf82   :  { %v7868_v21 = vadd.f32 %v7866_v46, %v7414_v56  ;;  %v8152_v56 = vld [vmem:[#allocation15 + $0x130] sm:$0xff]  ;;  %v8155_v46 = vld [vmem:[#allocation15 + $0x148] sm:$0xff]  ;;  %v16717_v20 = vpack.c.bf16 %v8153_v28, %v8150_v39  ;;  %v8161_v19 = vld [vmem:[#allocation15 + $0x178] sm:$0xff] }
 0xf83   :  { %v7878_v41 = vadd.f32 %v7876_v32, %v7415_v44  ;;  %v8157_v32 = vld [vmem:[#allocation15 + $0x158] sm:$0xff]  ;;  %v16727_v44 = vpack.c.bf16 %v8159_v33, %v8156_v1  ;;  %v7893_v33 = vrot.slane %v16544_v63, 2  ;;  %v7953_v63 = vld [vmem:[%s17092_s16] sm:$0x7] }
 0xf84   :  { %v9226_v40 = vmul.f32 -1.442695, %v7868_v21  ;;  %12897 = vmatpush1.bf16.msra.mxu1 %v16697_v47  ;;  %12924 = vmatpush3.bf16.msra.mxu0 %v16699_v58  ;;  %v8160_v21 = vld [vmem:[#allocation15 + $0x170] sm:$0xff] }
 0xf85   :  { %v9227_v6 = vmul.f32 -1.442695, %v7878_v41  ;;  %12899 = vmatprep.subr.bf16.mxu1 %v16703_v35  ;;  %12925 = vmatprep.subr.bf16.mxu0 %v17171_v22  ;;  %v16719_v41 = vpack.c.bf16 %v8155_v46, %v8152_v56  ;;  %v16723_v13 = vpack.c.bf16 %v8160_v21, %v8157_v32  ;;  %17199 = vst [vmem:[#allocation31_spill] sm:$0xff] %v16727_v44 }
 0xf86   :  { %13410 = vpow2.f32 %v9226_v40  ;;  %v16729_v40 = vpack.c.bf16 %v8161_v19, %v8158_v3  ;;  %v7684_v46 = vrot.slane %v16667_v5, %v14303_v54 }
 0xf87   :  { %13412 = vpow2.f32 %v9227_v6  ;;  %17198 = vst [vmem:[#allocation30_spill] sm:$0xff] %v16723_v13 }
 0xf88   :  { %12901 = vmatpush1.bf16.msra.mxu1 %v16707_v34  ;;  %12927 = vmatpush3.bf16.msra.mxu0 %v16709_v61  ;;  %17200 = vst [vmem:[#allocation32_spill] sm:$0xff] %v16729_v40  ;;  %v7829_v32 = vadd.f32 %v16689_v38, %v7684_v46  ;;  %v8351_v38 = vrot.slane %v16641_v29, 6  ;;  %v8162_v29 = vld [vmem:[%s17093_s17] sm:$0x7] }
 0xf89   :  { %12903 = vmatprep.subr.bf16.mxu1 %v16713_v7  ;;  %12928 = vmatprep.subr.bf16.mxu0 %v17171_v22 }
 0xf8a   :  { %v7886_v21 = vrot.slane %v7829_v32, 4 }
 0xf8c   :  { %12905 = vmatpush1.bf16.msra.mxu1 %v16717_v20  ;;  %12930 = vmatpush3.bf16.msra.mxu0 %v16719_v41 }
 0xf8d   :  { %12907 = vmatprep.subr.bf16.mxu1 %v16723_v13  ;;  %12931 = vmatprep.subr.bf16.mxu0 %v17171_v22 }
 0xf90   :  { %v13411_v39 = vpop.eup %13410  ;;  %12909 = vmatpush1.bf16.msra.mxu1 %v16727_v44  ;;  %12933 = vmatpush3.bf16.msra.mxu0 %v16729_v40  ;;  %v7416_v44 = vld [vmem:[#allocation2 + $0x28] sm:$0x30] }
 0xf91   :  { %v13413_v6 = vpop.eup %13412  ;;  %v7872_v28 = vadd.f32 1.0, %v13411_v39  ;;  %12935 = vmatprep.subr.bf16.mxu1 %v16551_v62  ;;  %12966 = vmatprep.subr.bf16.mxu0 %v17171_v22 }
 0xf92   :  { %v7882_v56 = vadd.f32 1.0, %v13413_v6 }
 0xf93   :  { %13414 = vrcp.f32 %v7872_v28 }
 0xf94   :  { %13416 = vrcp.f32 %v7882_v56 }
 0xf9d   :  { %v13415_v1 = vpop.eup %13414 }
 0xf9e   :  { %v13417_v3 = vpop.eup %13416  ;;  %v7888_v19 = vmul.f32 %v13415_v1, %v7886_v21 }
 0xf9f   :  { %v7895_v39 = vmul.f32 %v13417_v3, %v7893_v33  ;;  %v7891_v62 = vsub.f32 1.0, %v13417_v3 }
 0xfa0   :  { %v7889_v40 = vadd.f32 %v7888_v19, %v7416_v44 }
 0xfa2   :  { %13418 = vtanh.f32 %v7889_v40  ;;  %v7901_v40 = vld [vmem:[#allocation2 + $0x40] sm:$0x30] }
 0xfac   :  { %v13419_v13 = vpop.eup %13418 }
 0xfad   :  { %v7892_v6 = vmul.f32 %v13419_v13, %v7891_v62  ;;  %v17202_v62 = vld [vmem:[#allocation28_spill] sm:$0xff] }
 0xfaf   :  { %v16741_v28 = vadd.f32 %v7895_v39, %v7892_v6 }
 0xfb1   :  { %7898 = vst [vmem:[#allocation5 - $0x2] sm:$0x10] %v16741_v28  ;;  %v8180_v5 = vrot.slane %v16741_v28, 4 }
 0xfb3   :  { %8247 = vmatmul.mubr.f32.vlgmr.msra.gmra.mrb[66].mxu1 %v8180_v5  ;;  %10864 = vmatmul.mubr.f32.vlgmr.msra.gmra.mrb[78].mxu0 %v8180_v5 }
 0xfb4   :  { %12937 = vmatpush1.bf16.msra.mxu1 %v16553_v37  ;;  %12968 = vmatpush3.bf16.msra.mxu0 %v16556_v14  ;;  %v7958_v37 = vrot.slane %v7953_v63, %v14293_v10  ;;  %v7962_v14 = vrot.slane %v7953_v63, %v14298_v16 }
 0xfb5   :  { %12939 = vmatprep.subr.bf16.mxu1 %v16560_v59  ;;  %12969 = vmatprep.subr.bf16.mxu0 %v17171_v22 }
 0xfb6   :  { %8527 = vmatprep.mubr.f32.mxu1 %v17158_v45  ;;  %10898 = vmatprep.mubr.msk.f32.mxu0 %vm13638_vm2, %v17158_v45 }
 0xfb8   :  { %12941 = vmatpush1.bf16.msra.mxu1 %v16563_v49  ;;  %12971 = vmatpush3.bf16.msra.mxu0 %v16566_v2 }
 0xfb9   :  { %12943 = vmatprep.subr.bf16.mxu1 %v16570_v50  ;;  %12972 = vmatprep.subr.bf16.mxu0 %v17171_v22 }
 0xfbc   :  { %12945 = vmatpush1.bf16.msra.mxu1 %v16573_v55  ;;  %12974 = vmatpush3.bf16.msra.mxu0 %v16576_v60 }
 0xfbd   :  { %12947 = vmatprep.subr.bf16.mxu1 %v16580_v36  ;;  %12975 = vmatprep.subr.bf16.mxu0 %v17171_v22 }
 0xfc0   :  { %12949 = vmatpush1.bf16.msra.mxu1 %v16583_v0  ;;  %12977 = vmatpush3.bf16.msra.mxu0 %v16586_v52  ;;  %v7899_v0 = vld [vmem:[#allocation2 + $0x30] sm:$0x30] }
 0xfc1   :  { %12951 = vmatprep.subr.bf16.mxu1 %v16590_v42  ;;  %12978 = vmatprep.subr.bf16.mxu0 %v17171_v22 }
 0xfc4   :  { %12953 = vmatpush1.bf16.msra.mxu1 %v16593_v31  ;;  %12980 = vmatpush3.bf16.msra.mxu0 %v16595_v12  ;;  %v7900_v31 = vld [vmem:[#allocation2 + $0x38] sm:$0x30] }
 0xfc5   :  { %12955 = vmatprep.subr.bf16.mxu1 %v16598_v24  ;;  %12981 = vmatprep.subr.bf16.mxu0 %v17171_v22 }
 0xfc8   :  { %12957 = vmatpush1.bf16.msra.mxu1 %v16601_v11  ;;  %12983 = vmatpush3.bf16.msra.mxu0 %v16605_v8 }
 0xfc9   :  { %12959 = vmatprep.subr.bf16.mxu1 %v16607_v4  ;;  %12984 = vmatprep.subr.bf16.mxu0 %v17171_v22 }
 0xfcc   :  { %12961 = vmatpush1.bf16.msra.mxu1 %v16611_v25  ;;  %12986 = vmatpush3.bf16.msra.mxu0 %v16615_v43 }
 0xfcd   :  { %12963 = vmatprep.subr.bf16.mxu1 %v16617_v57  ;;  %12987 = vmatprep.subr.bf16.mxu0 %v17171_v22  ;;  %v7966_v57 = vrot.slane %v7953_v63, %v14303_v54 }
 0xfd0   :  { %12965 = vmatpush1.bf16.msra.mxu1 %v16621_v9  ;;  %12989 = vmatpush3.bf16.msra.mxu0 %v16625_v30 }
 0xfd1   :  { %13022 = vmatprep.subr.bf16.mxu0 %v17171_v22  ;;  %12991 = vmatprep.subr.bf16.mxu1 %v16631_v23 }
0x1046   :  { %v8039_v59 = vpop.f32.mrb[64].mxu1  ;;  %v8110_v49 = vpop.f32.mrb[76].mxu0 }
0x1047   :  { %v8040_v2 = vadd.f32 %v8039_v59, %v7958_v37  ;;  %v8041_v50 = vpop.f32.mrb[65].mxu1  ;;  %v10830_v55 = vpop.f32.mrb[77].mxu0  ;;  %v8111_v9 = vadd.f32 %v8110_v49, %v7966_v57  ;;  %v17204_v37 = vld [vmem:[#allocation23_spill] sm:$0xff]  ;;  %v7903_v49 = vld [vmem:[#allocation2 + $0x20] sm:$0xc] }
0x1048   :  { %v8042_v60 = vadd.f32 %v8041_v50, %v7962_v14  ;;  %v7902_v14 = vld [vmem:[#allocation2 + $0x18] sm:$0xc] }
0x1049   :  { %v8324_v36 = vrot.slane %v8040_v2, 4  ;;  %v8344_v30 = vrot.slane %v8111_v9, 4 }
0x104a   :  { %v8334_v52 = vrot.slane %v8042_v60, 4 }
0x104b   :  { %v8326_v42 = vadd.f32 %v8324_v36, %v7899_v0  ;;  %v8383_v0 = vrot.slane %v16741_v28, 2 }
0x104c   :  { %v8336_v12 = vadd.f32 %v8334_v52, %v7900_v31  ;;  %v7904_v31 = vld [vmem:[#allocation2 + $0x28] sm:$0xc] }
0x104d   :  { %v9228_v24 = vmul.f32 -1.442695, %v8326_v42 }
0x104e   :  { %v9229_v11 = vmul.f32 -1.442695, %v8336_v12 }
0x104f   :  { %13420 = vpow2.f32 %v9228_v24 }
0x1050   :  { %13422 = vpow2.f32 %v9229_v11  ;;  %v335_v11 = vld [vmem:[%s17208_s0] sm:$0x3] }
0x1059   :  { %v13421_v8 = vpop.eup %13420 }
0x105a   :  { %v13423_v4 = vpop.eup %13422  ;;  %v8330_v25 = vadd.f32 1.0, %v13421_v8  ;;  %v344_v8 = vrot.slane %v335_v11, %v14298_v16 }
0x105b   :  { %v8340_v43 = vadd.f32 1.0, %v13423_v4  ;;  %v16840_v4 = vld [vmem:[%s17209_s28] sm:$0x3]  ;;  %s9152_s28 = sshll.u32 %s13639_s29, 4  ;;  %s9153_s28 = int_to_ptr.vmem [resolvable:$true] %s9152_s28 }
0x105c   :  { %13424 = vrcp.f32 %v8330_v25  ;;  %v17210_v25 = vld [vmem:[#allocation26_spill] sm:$0xff]  ;;  %v358_v9 = vrot.slane %v16840_v4, %v14298_v16  ;;  %s13592_s22 = scalar_lea.vmem %s9153_s28, 128  ;;  %p13597_p7 = scmp.lt.s32.totalorder %s9153_s28, %s9153_s28 }
0x105d   :  { %13426 = vrcp.f32 %v8340_v43  ;;  %v17211_v43 = vld [vmem:[#allocation27_spill] sm:$0xff]  ;;  %p13593_p6 = scmp.ne.s32.totalorder %s9153_s28, %s13592_s22  ;;  %p13598_p8 = scmp.lt.s32.totalorder %s13592_s22, %s13592_s22 }
0x105e   :  { %v17212_v28 = vmax.f32 %v17210_v25, %v17211_v43  ;;  %v8895_v43 = vld [vmem:[%s17095_s19 + $0x30] sm:$0xff] }
0x105f   :  { %p13599_p9 = por %p13598_p8, %p13597_p7 }
0x1060   :  { %v348_v57 = vmul.f32 %v344_v8, %v17212_v28  ;;  %v8893_v8 = vld [vmem:[%s17095_s19 + $0x20] sm:$0xff]  ;;  %v8896_v28 = vld [vmem:[%s17095_s19 + $0x38] sm:$0xff] }
0x1061   :  { %p13600_p10 = pnand %p13599_p9, %p13593_p6 }
0x1066   :  { %v13425_v23 = vpop.eup %13424 }
0x1067   :  { %v13427_v13 = vpop.eup %13426  ;;  %v8346_v44 = vmul.f32 %v13425_v23, %v8344_v30 }
0x1068   :  { %v8353_v56 = vmul.f32 %v13427_v13, %v8351_v38  ;;  %v8349_v32 = vsub.f32 1.0, %v13427_v13  ;;  %v8868_v13 = vld [vmem:[%s17094_s18] sm:$0xff] }
0x1069   :  { %v8347_v46 = vadd.f32 %v8346_v44, %v7901_v40  ;;  %v8869_v44 = vld [vmem:[%s17094_s18 + $0x8] sm:$0xff]  ;;  %v362_v40 = vadd.f32 %v358_v9, %v348_v57  ;;  %v13056_v57 = vpack.c.bf16 %v8896_v28, %v8895_v43  ;;  %v8897_v9 = vld [vmem:[%s17095_s19 + $0x40] sm:$0xff] }
0x106b   :  { %13428 = vtanh.f32 %v8347_v46  ;;  %v13071_v46 = vpack.c.bf16 %v8869_v44, %v8868_v13  ;;  %v8900_v13 = vld [vmem:[%s17095_s19 + $0x58] sm:$0xff] }
0x1075   :  { %v13429_v21 = vpop.eup %13428 }
0x1076   :  { %v8350_v1 = vmul.f32 %v13429_v21, %v8349_v32  ;;  %v8870_v21 = vld [vmem:[%s17094_s18 + $0x10] sm:$0xff] }
0x1078   :  { %v16787_v33 = vadd.f32 %v8353_v56, %v8350_v1  ;;  %v8871_v1 = vld [vmem:[%s17094_s18 + $0x18] sm:$0xff] }
0x107a   :  { %8387 = vst [vmem:[#allocation4 + $0x1] sm:$0x20] %v16787_v33  ;;  %v8461_v3 = vrot.slane %v16787_v33, 4 }
0x107c   :  { %8528 = vmatmul.mubr.f32.vlgmr.msra.gmra.mrb[68].mxu1 %v8461_v3  ;;  %10899 = vmatmul.mubr.f32.vlgmr.msra.gmra.mrb[80].mxu0 %v8461_v3  ;;  %v364_v3 = vmax.f32 %v362_v40, 0.0  ;;  %v8901_v40 = vld [vmem:[%s17095_s19 + $0x60] sm:$0xff] }
0x107d   :  { %13024 = vmatpush3.bf16.msra.mxu0 %v16645_v48  ;;  %12993 = vmatpush1.bf16.msra.mxu1 %v16643_v26  ;;  %v8167_v26 = vrot.slane %v8162_v29, %v14293_v10  ;;  %v8171_v48 = vrot.slane %v8162_v29, %v14298_v16 }
0x107e   :  { %13025 = vmatprep.subr.bf16.mxu0 %v17171_v22  ;;  %12995 = vmatprep.subr.bf16.mxu1 %v16649_v15  ;;  %v17201_v15 = vld [vmem:[#allocation33_spill] sm:$0xff] }
0x107f   :  { %8736 = vmatprep.mubr.f32.mxu1 %v17158_v45  ;;  %10933 = vmatprep.mubr.msk.f32.mxu0 %vm13638_vm2, %v17158_v45 }
0x1081   :  { %13027 = vmatpush3.bf16.msra.mxu0 %v16655_v51  ;;  %12997 = vmatpush1.bf16.msra.mxu1 %v16653_v17 }
0x1082   :  { %13028 = vmatprep.subr.bf16.mxu0 %v17171_v22  ;;  %12999 = vmatprep.subr.bf16.mxu1 %v16659_v18  ;;  %v17203_v18 = vld [vmem:[#allocation29_spill] sm:$0xff] }
0x1085   :  { %13030 = vmatpush3.bf16.msra.mxu0 %v16673_v53  ;;  %13001 = vmatpush1.bf16.msra.mxu1 %v17201_v15 }
0x1086   :  { %v8248_v19 = vpop.f32.mrb[66].mxu1  ;;  %v8319_v39 = vpop.f32.mrb[78].mxu0  ;;  %13031 = vmatprep.subr.bf16.mxu0 %v17171_v22  ;;  %13003 = vmatprep.subr.bf16.mxu1 %v17202_v62 }
0x1087   :  { %v8249_v51 = vadd.f32 %v8248_v19, %v8167_v26  ;;  %v8250_v17 = vpop.f32.mrb[67].mxu1  ;;  %v10865_v6 = vpop.f32.mrb[79].mxu0  ;;  %v8872_v26 = vld [vmem:[%s17094_s18 + $0x20] sm:$0xff]  ;;  %v8874_v19 = vld [vmem:[%s17094_s18 + $0x30] sm:$0xff] }
0x1088   :  { %v8251_v5 = vadd.f32 %v8250_v17, %v8171_v48  ;;  %v8873_v48 = vld [vmem:[%s17094_s18 + $0x28] sm:$0xff] }
0x1089   :  { %v8356_v63 = vrot.slane %v8249_v51, 6  ;;  %13033 = vmatpush3.bf16.msra.mxu0 %v17203_v18  ;;  %13005 = vmatpush1.bf16.msra.mxu1 %v17204_v37  ;;  %v13077_v15 = vpack.c.bf16 %v8873_v48, %v8872_v26  ;;  %v8876_v51 = vld [vmem:[%s17094_s18 + $0x40] sm:$0xff]  ;;  %v8877_v17 = vld [vmem:[%s17094_s18 + $0x48] sm:$0xff] }
0x108a   :  { %v8366_v59 = vrot.slane %v8251_v5, 6  ;;  %13034 = vmatprep.subr.bf16.mxu0 %v17171_v22  ;;  %13007 = vmatprep.subr.bf16.mxu1 %v16693_v27  ;;  %v13083_v6 = vpack.c.bf16 %v8877_v17, %v8876_v51  ;;  %v8878_v5 = vld [vmem:[%s17094_s18 + $0x50] sm:$0xff]  ;;  %v8880_v37 = vld [vmem:[%s17094_s18 + $0x60] sm:$0xff] }
0x108b   :  { %v8358_v53 = vadd.f32 %v8356_v63, %v7902_v14  ;;  %v8879_v63 = vld [vmem:[%s17094_s18 + $0x58] sm:$0xff]  ;;  %v8881_v14 = vld [vmem:[%s17094_s18 + $0x68] sm:$0xff] }
0x108c   :  { %v8368_v2 = vadd.f32 %v8366_v59, %v7903_v49  ;;  %v13086_v18 = vpack.c.bf16 %v8879_v63, %v8878_v5  ;;  %v13089_v59 = vpack.c.bf16 %v8881_v14, %v8880_v37  ;;  %v8883_v49 = vld [vmem:[%s17094_s18 + $0x78] sm:$0xff]  ;;  %v8389_v5 = vld [vmem:[#allocation2 + $0x30] sm:$0xc0] }
0x108d   :  { %v9230_v50 = vmul.f32 -1.442695, %v8358_v53  ;;  %13036 = vmatpush3.bf16.msra.mxu0 %v16699_v58  ;;  %13009 = vmatpush1.bf16.msra.mxu1 %v16697_v47  ;;  %v17205_v58 = vld [vmem:[#allocation30_spill] sm:$0xff]  ;;  %v17206_v47 = vld [vmem:[#allocation32_spill] sm:$0xff]  ;;  %v8390_v37 = vld [vmem:[#allocation2 + $0x38] sm:$0xc0] }
0x108e   :  { %v9231_v55 = vmul.f32 -1.442695, %v8368_v2  ;;  %13037 = vmatprep.subr.bf16.mxu0 %v17171_v22  ;;  %13011 = vmatprep.subr.bf16.mxu1 %v16703_v35  ;;  %v17207_v35 = vld [vmem:[#allocation31_spill] sm:$0xff]  ;;  %v8882_v53 = vld [vmem:[%s17094_s18 + $0x70] sm:$0xff] }
0x108f   :  { %13430 = vpow2.f32 %v9230_v50  ;;  %v13092_v2 = vpack.c.bf16 %v8883_v49, %v8882_v53  ;;  %v340_v50 = vrot.slane %v335_v11, %v14293_v10 }
0x1090   :  { %13432 = vpow2.f32 %v9231_v55  ;;  %v8884_v55 = vld [vmem:[%s17094_s18 + $0x80] sm:$0xff] }
0x1091   :  { %13039 = vmatpush3.bf16.msra.mxu0 %v16709_v61  ;;  %13013 = vmatpush1.bf16.msra.mxu1 %v16707_v34 }
0x1092   :  { %13040 = vmatprep.subr.bf16.mxu0 %v17171_v22  ;;  %13015 = vmatprep.subr.bf16.mxu1 %v16713_v7  ;;  %v8175_v7 = vrot.slane %v8162_v29, %v14303_v54  ;;  %v13074_v29 = vpack.c.bf16 %v8871_v1, %v8870_v21  ;;  %v8903_v21 = vld [vmem:[%s17095_s19 + $0x70] sm:$0xff]  ;;  %v8904_v1 = vld [vmem:[%s17095_s19 + $0x78] sm:$0xff] }
0x1095   :  { %13042 = vmatpush3.bf16.msra.mxu0 %v16719_v41  ;;  %13017 = vmatpush1.bf16.msra.mxu1 %v16717_v20  ;;  %v8320_v20 = vadd.f32 %v8319_v39, %v8175_v7  ;;  %v8875_v39 = vld [vmem:[%s17094_s18 + $0x38] sm:$0xff]  ;;  %v8886_v7 = vld [vmem:[%s17094_s18 + $0x90] sm:$0xff] }
0x1096   :  { %13043 = vmatprep.subr.bf16.mxu0 %v17171_v22  ;;  %13019 = vmatprep.subr.bf16.mxu1 %v17205_v58  ;;  %v13080_v62 = vpack.c.bf16 %v8875_v39, %v8874_v19  ;;  %v8885_v58 = vld [vmem:[%s17094_s18 + $0x88] sm:$0xff] }
0x1097   :  { %v8376_v41 = vrot.slane %v8320_v20, 6  ;;  %v8887_v20 = vld [vmem:[%s17094_s18 + $0x98] sm:$0xff] }
0x1099   :  { %v13431_v27 = vpop.eup %13430  ;;  %13045 = vmatpush3.bf16.msra.mxu0 %v17206_v47  ;;  %13021 = vmatpush1.bf16.msra.mxu1 %v17207_v35  ;;  %v17213_v47 = vld [vmem:[#allocation24_spill] sm:$0xff]  ;;  %v17214_v35 = vld [vmem:[#allocation25_spill] sm:$0xff] }
0x109a   :  { %v13433_v61 = vpop.eup %13432  ;;  %v8362_v60 = vadd.f32 1.0, %v13431_v27  ;;  %13070 = vmatprep.subr.bf16.mxu0 %v17171_v22  ;;  %13046 = vmatprep.subr.bf16.mxu1 %v17171_v22  ;;  %v13095_v27 = vpack.c.bf16 %v8885_v58, %v8884_v55 }
0x109b   :  { %v8372_v34 = vadd.f32 1.0, %v13433_v61  ;;  %v17215_v61 = vmax.f32 %v17213_v47, %v17214_v35 }
0x109c   :  { %13434 = vrcp.f32 %v8362_v60 }
0x109d   :  { %13436 = vrcp.f32 %v8372_v34  ;;  %v347_v60 = vmul.f32 %v340_v50, %v17215_v61  ;;  %v354_v34 = vrot.slane %v16840_v4, %v14293_v10  ;;  %v8894_v4 = vld [vmem:[%s17095_s19 + $0x28] sm:$0xff]  ;;  %v8841_v61 = vrot.slane %v16787_v33, 6 }
0x109e   :  { %v13053_v25 = vpack.c.bf16 %v8894_v4, %v8893_v8  ;;  %v9052_v8 = vld [vmem:[%s17096_s20 + $0x18] sm:$0xff] }
0x10a6   :  { %v13435_v36 = vpop.eup %13434 }
0x10a7   :  { %v13437_v52 = vpop.eup %13436  ;;  %v8378_v42 = vmul.f32 %v13435_v36, %v8376_v41  ;;  %v13098_v41 = vpack.c.bf16 %v8887_v20, %v8886_v7  ;;  %v361_v36 = vadd.f32 %v354_v34, %v347_v60  ;;  %v8391_v7 = vld [vmem:[#allocation2 + $0x40] sm:$0xc0] }
0x10a8   :  { %v8385_v12 = vmul.f32 %v13437_v52, %v8383_v0  ;;  %v8381_v30 = vsub.f32 1.0, %v13437_v52  ;;  %v8889_v52 = vld [vmem:[%s17095_s19] sm:$0xff] }
0x10a9   :  { %v8379_v24 = vadd.f32 %v8378_v42, %v7904_v31  ;;  %v363_v0 = vmax.f32 %v361_v36, 0.0  ;;  %v8890_v42 = vld [vmem:[%s17095_s19 + $0x8] sm:$0xff] }
0x10aa   :  { %v13047_v31 = vpack.c.bf16 %v8890_v42, %v8889_v52 }
0x10ab   :  { %13438 = vtanh.f32 %v8379_v24  ;;  %v8892_v24 = vld [vmem:[%s17095_s19 + $0x18] sm:$0xff] }
0x10b5   :  { %v13439_v23 = vpop.eup %13438 }
0x10b6   :  { %v8382_v38 = vmul.f32 %v13439_v23, %v8381_v30  ;;  %v8898_v30 = vld [vmem:[%s17095_s19 + $0x48] sm:$0xff] }
0x10b7   :  { %v13059_v23 = vpack.c.bf16 %v8898_v30, %v8897_v9  ;;  %v9054_v9 = vld [vmem:[%s17096_s20 + $0x28] sm:$0xff] }
0x10b8   :  { %v8386_v56 = vadd.f32 %v8385_v12, %v8382_v38  ;;  %v8891_v12 = vld [vmem:[%s17095_s19 + $0x10] sm:$0xff] }
0x10b9   :  { %v13050_v11 = vpack.c.bf16 %v8892_v24, %v8891_v12  ;;  %v8899_v38 = vld [vmem:[%s17095_s19 + $0x50] sm:$0xff]  ;;  %v9050_v12 = vld [vmem:[%s17096_s20 + $0x8] sm:$0xff]  ;;  %v17001_v24 = vld [vmem:[%s17093_s17] sm:$0x7] }
0x10ba   :  { %8388 = vst [vmem:[#allocation5 - $0x1] sm:$0x4] %v8386_v56  ;;  %v16853_v32 = vrot.slane %v8386_v56, 2  ;;  %v13062_v44 = vpack.c.bf16 %v8900_v13, %v8899_v38  ;;  %v8902_v56 = vld [vmem:[%s17095_s19 + $0x68] sm:$0xff]  ;;  %v8661_v28 = vrot.slane %v17001_v24, %v14298_v16 }
0x10bc   :  { %8737 = vmatmul.mubr.f32.vlgmr.msra.gmra.mrb[70].mxu1 %v16853_v32  ;;  %10934 = vmatmul.mubr.f32.vlgmr.msra.gmra.mrb[82].mxu0 %v16853_v32 }
0x10bd   :  { %13072 = vmatpush1.bf16.msra.mxu0 %v13071_v46  ;;  %9236 = vmatprep.mubr.msk.f32.mxu0 %vm423_vm1, %v364_v3  ;;  %v13065_v46 = vpack.c.bf16 %v8902_v56, %v8901_v40  ;;  %v13068_v3 = vpack.c.bf16 %v8904_v1, %v8903_v21  ;;  %v9056_v56 = vld [vmem:[%s17096_s20 + $0x38] sm:$0xff]  ;;  %v8393_v1 = vld [vmem:[#allocation2 + $0x20] sm:$0x3] }
0x10be   :  { %13073 = vmatprep.subr.bf16.mxu0 %v17171_v22  ;;  %10968 = vmatprep.mubr.msk.f32.mxu1 %vm13638_vm2, %v17158_v45 }
0x10bf   :  { %13048 = vmatpush3.bf16.msra.mxu1 %v13047_v31  ;;  %v9049_v31 = vld [vmem:[%s17096_s20] sm:$0xff] }
0x10c0   :  { %13049 = vmatprep.subr.bf16.mxu1 %v17171_v22  ;;  %v13101_v33 = vpack.c.bf16 %v9050_v12, %v9049_v31  ;;  %v9237_v31 = vld [vmem:[%s17216_s30] ss:$0 sm:$0xff] }
0x10c1   :  { %13075 = vmatpush1.bf16.msra.mxu0 %v13074_v29  ;;  %v8443_v29 = vld [vmem:[%s17092_s16] sm:$0x7] }
0x10c2   :  { %13076 = vmatprep.subr.bf16.mxu0 %v17171_v22  ;;  %v8448_v26 = vrot.slane %v8443_v29, %v14293_v10  ;;  %v8452_v48 = vrot.slane %v8443_v29, %v14298_v16  ;;  %v8456_v58 = vrot.slane %v8443_v29, %v14303_v54  ;;  %v9055_v16 = vld [vmem:[%s17096_s20 + $0x30] sm:$0xff] }
0x10c3   :  { %13051 = vmatpush3.bf16.msra.mxu1 %v13050_v11  ;;  %v9051_v11 = vld [vmem:[%s17096_s20 + $0x10] sm:$0xff] }
0x10c4   :  { %13052 = vmatprep.subr.bf16.mxu1 %v17171_v22  ;;  %v13104_v43 = vpack.c.bf16 %v9052_v8, %v9051_v11 }
0x10c5   :  { %13078 = vmatpush1.bf16.msra.mxu0 %v13077_v15 }
0x10c6   :  { %13079 = vmatprep.subr.bf16.mxu0 %v17171_v22 }
0x10c7   :  { %13054 = vmatpush3.bf16.msra.mxu1 %v13053_v25  ;;  %v8657_v25 = vrot.slane %v17001_v24, %v14293_v10 }
0x10c8   :  { %13055 = vmatprep.subr.bf16.mxu1 %v17171_v22 }
0x10c9   :  { %13081 = vmatpush1.bf16.msra.mxu0 %v13080_v62 }
0x10ca   :  { %13082 = vmatprep.subr.bf16.mxu0 %v17171_v22 }
0x10cb   :  { %13057 = vmatpush3.bf16.msra.mxu1 %v13056_v57  ;;  %v9053_v57 = vld [vmem:[%s17096_s20 + $0x20] sm:$0xff] }
0x10cc   :  { %13058 = vmatprep.subr.bf16.mxu1 %v17171_v22 }
0x10cd   :  { %13084 = vmatpush1.bf16.msra.mxu0 %v13083_v6 }
0x10ce   :  { %13085 = vmatprep.subr.bf16.mxu0 %v17171_v22 }
0x10cf   :  { %13060 = vmatpush3.bf16.msra.mxu1 %v13059_v23 }
0x10d0   :  { %13061 = vmatprep.subr.bf16.mxu1 %v17171_v22 }
0x10d1   :  { %13087 = vmatpush1.bf16.msra.mxu0 %v13086_v18 }
0x10d2   :  { %13088 = vmatprep.subr.bf16.mxu0 %v17171_v22 }
0x10d3   :  { %13063 = vmatpush3.bf16.msra.mxu1 %v13062_v44  ;;  %v8392_v44 = vld [vmem:[#allocation2 + $0x18] sm:$0x3] }
0x10d4   :  { %13064 = vmatprep.subr.bf16.mxu1 %v17171_v22 }
0x10d5   :  { %13090 = vmatpush1.bf16.msra.mxu0 %v13089_v59 }
0x10d6   :  { %13091 = vmatprep.subr.bf16.mxu0 %v17171_v22 }
0x10d7   :  { %13066 = vmatpush3.bf16.msra.mxu1 %v13065_v46 }
0x10d8   :  { %13067 = vmatprep.subr.bf16.mxu1 %v17171_v22 }
0x10d9   :  { %13093 = vmatpush1.bf16.msra.mxu0 %v13092_v2 }
0x10da   :  { %13094 = vmatprep.subr.bf16.mxu0 %v17171_v22 }
0x10db   :  { %13069 = vmatpush3.bf16.msra.mxu1 %v13068_v3  ;;  %v13110_v3 = vpack.c.bf16 %v9056_v56, %v9055_v16 }
0x10dc   :  { %13100 = vmatprep.subr.bf16.mxu1 %v17171_v22 }
0x10dd   :  { %13096 = vmatpush1.bf16.msra.mxu0 %v13095_v27 }
0x10de   :  { %13097 = vmatprep.subr.bf16.mxu0 %v17171_v22 }
0x10e1   :  { %13099 = vmatpush1.bf16.msra.mxu0 %v13098_v41 }
0x10e4   :  { %9043 = vmatmul.mubr.f32.vlgmr.msra.gmra.mrb[84].mxu0 %v363_v0 }
0x114f   :  { %v8529_v15 = vpop.f32.mrb[68].mxu1  ;;  %v8600_v19 = vpop.f32.mrb[80].mxu0 }
0x1150   :  { %v8530_v39 = vadd.f32 %v8529_v15, %v8448_v26  ;;  %v8531_v62 = vpop.f32.mrb[69].mxu1  ;;  %v10900_v51 = vpop.f32.mrb[81].mxu0  ;;  %v8601_v27 = vadd.f32 %v8600_v19, %v8456_v58  ;;  %v9057_v26 = vld [vmem:[%s17096_s20 + $0x40] sm:$0xff] }
0x1151   :  { %v8532_v17 = vadd.f32 %v8531_v62, %v8452_v48  ;;  %v9058_v48 = vld [vmem:[%s17096_s20 + $0x48] sm:$0xff]  ;;  %v9060_v62 = vld [vmem:[%s17096_s20 + $0x58] sm:$0xff] }
0x1152   :  { %v8814_v6 = vrot.slane %v8530_v39, 2  ;;  %v8834_v47 = vrot.slane %v8601_v27, 2  ;;  %v13113_v15 = vpack.c.bf16 %v9058_v48, %v9057_v26  ;;  %v9059_v39 = vld [vmem:[%s17096_s20 + $0x50] sm:$0xff]  ;;  %v8394_v27 = vld [vmem:[#allocation2 + $0x28] sm:$0x3] }
0x1153   :  { %v8824_v63 = vrot.slane %v8532_v17, 2  ;;  %v13116_v51 = vpack.c.bf16 %v9060_v62, %v9059_v39  ;;  %v9061_v17 = vld [vmem:[%s17096_s20 + $0x60] sm:$0xff] }
0x1154   :  { %v8816_v18 = vadd.f32 %v8814_v6, %v8389_v5  ;;  %v9062_v6 = vld [vmem:[%s17096_s20 + $0x68] sm:$0xff] }
0x1155   :  { %v8826_v14 = vadd.f32 %v8824_v63, %v8390_v37  ;;  %v13119_v63 = vpack.c.bf16 %v9062_v6, %v9061_v17  ;;  %v9063_v37 = vld [vmem:[%s17096_s20 + $0x70] sm:$0xff] }
0x1156   :  { %v9232_v59 = vmul.f32 -1.442695, %v8816_v18 }
0x1157   :  { %v9233_v53 = vmul.f32 -1.442695, %v8826_v14  ;;  %v9064_v14 = vld [vmem:[%s17096_s20 + $0x78] sm:$0xff] }
0x1158   :  { %13440 = vpow2.f32 %v9232_v59  ;;  %v13122_v59 = vpack.c.bf16 %v9064_v14, %v9063_v37 }
0x1159   :  { %13442 = vpow2.f32 %v9233_v53 }
0x1162   :  { %v13441_v49 = vpop.eup %13440 }
0x1163   :  { %v13443_v2 = vpop.eup %13442  ;;  %v8820_v50 = vadd.f32 1.0, %v13441_v49  ;;  %v8665_v49 = vrot.slane %v17001_v24, %v14303_v54 }
0x1164   :  { %v8830_v55 = vadd.f32 1.0, %v13443_v2 }
0x1165   :  { %13444 = vrcp.f32 %v8820_v50 }
0x1166   :  { %13446 = vrcp.f32 %v8830_v55 }
0x116f   :  { %v13445_v35 = vpop.eup %13444 }
0x1170   :  { %v13447_v60 = vpop.eup %13446  ;;  %v8836_v34 = vmul.f32 %v13445_v35, %v8834_v47 }
0x1171   :  { %v8843_v20 = vmul.f32 %v13447_v60, %v8841_v61  ;;  %v8839_v36 = vsub.f32 1.0, %v13447_v60 }
0x1172   :  { %v8837_v41 = vadd.f32 %v8836_v34, %v8391_v7 }
0x1174   :  { %13448 = vtanh.f32 %v8837_v41 }
0x117e   :  { %v13449_v0 = vpop.eup %13448 }
0x117f   :  { %v8840_v52 = vmul.f32 %v13449_v0, %v8839_v36 }
0x1181   :  { %v8844_v42 = vadd.f32 %v8843_v20, %v8840_v52 }
0x1183   :  { %8866 = vst [vmem:[#allocation4] sm:$0x80] %v8844_v42 }
0x118a   :  { %v8888_v4 = vld [vmem:[#allocation4] sm:$0xff] }
0x118b   :  { %10969 = vmatmul.mubr.f32.vlgmr.msra.gmra.mrb[72].mxu1 %v8888_v4 }
0x118c   :  { %13102 = vmatpush3.bf16.msra.mxu1 %v13101_v33  ;;  %11003 = vmatprep.mubr.msk.f32.mxu1 %vm13638_vm2, %v17158_v45  ;;  %v13107_v45 = vpack.c.bf16 %v9054_v9, %v9053_v57 }
0x118d   :  { %13103 = vmatprep.subr.bf16.mxu1 %v17171_v22 }
0x118f   :  { %v8738_v30 = vpop.f32.mrb[70].mxu1  ;;  %v8809_v10 = vpop.f32.mrb[82].mxu0 }
0x1190   :  { %v8739_v23 = vadd.f32 %v8738_v30, %v8657_v25  ;;  %v8740_v38 = vpop.f32.mrb[71].mxu1  ;;  %v10935_v13 = vpop.f32.mrb[83].mxu0  ;;  %13105 = vmatpush3.bf16.msra.mxu1 %v13104_v43  ;;  %v8810_v50 = vadd.f32 %v8809_v10, %v8665_v49 }
0x1191   :  { %v8741_v40 = vadd.f32 %v8740_v38, %v8661_v28  ;;  %13106 = vmatprep.subr.bf16.mxu1 %v17171_v22 }
0x1192   :  { %v8845_v46 = vadd.f32 %v8739_v23, %v8392_v44 }
0x1193   :  { %v8852_v29 = vadd.f32 %v8741_v40, %v8393_v1 }
0x1194   :  { %v9234_v21 = vmul.f32 -1.442695, %v8845_v46  ;;  %13108 = vmatpush3.bf16.msra.mxu1 %v13107_v45 }
0x1195   :  { %13109 = vmatprep.subr.bf16.mxu1 %v17171_v22  ;;  %v9235_v19 = vmul.f32 -1.442695, %v8852_v29 }
0x1196   :  { %13450 = vpow2.f32 %v9234_v21 }
0x1197   :  { %13452 = vpow2.f32 %v9235_v19 }
0x1198   :  { %13111 = vmatpush3.bf16.msra.mxu1 %v13110_v3 }
0x1199   :  { %13112 = vmatprep.subr.bf16.mxu1 %v17171_v22 }
0x119c   :  { %13114 = vmatpush3.bf16.msra.mxu1 %v13113_v15 }
0x119d   :  { %13115 = vmatprep.subr.bf16.mxu1 %v17171_v22 }
0x11a0   :  { %v13451_v5 = vpop.eup %13450  ;;  %13117 = vmatpush3.bf16.msra.mxu1 %v13116_v51 }
0x11a1   :  { %v8849_v18 = vadd.f32 1.0, %v13451_v5  ;;  %13118 = vmatprep.subr.bf16.mxu1 %v17171_v22  ;;  %v13453_v53 = vpop.eup %13452 }
0x11a2   :  { %v8856_v2 = vadd.f32 1.0, %v13453_v53 }
0x11a3   :  { %13454 = vrcp.f32 %v8849_v18 }
0x11a4   :  { %13120 = vmatpush3.bf16.msra.mxu1 %v13119_v63  ;;  %13456 = vrcp.f32 %v8856_v2 }
0x11a5   :  { %13121 = vmatprep.subr.bf16.mxu1 %v17171_v22 }
0x11a8   :  { %13123 = vmatpush3.bf16.msra.mxu1 %v13122_v59 }
0x11ad   :  { %v13455_v55 = vpop.eup %13454 }
0x11ae   :  { %v8859_v58 = vmul.f32 %v13455_v55, %v8810_v50  ;;  %v13457_v61 = vpop.eup %13456 }
0x11af   :  { %v8862_v34 = vsub.f32 1.0, %v13457_v61  ;;  %v8864_v22 = vmul.f32 %v13457_v61, %v16853_v32 }
0x11b0   :  { %v8860_v47 = vadd.f32 %v8859_v58, %v8394_v27 }
0x11b2   :  { %13458 = vtanh.f32 %v8860_v47 }
0x11b7   :  { %v9044_v35 = vpop.f32.mrb[84].mxu0 }
0x11b8   :  { %v9046_v60 = vpop.f32.mrb[85].mxu0 }
0x11bc   :  { %v13459_v7 = vpop.eup %13458 }
0x11bd   :  { %v8863_v20 = vmul.f32 %v13459_v7, %v8862_v34 }
0x11bf   :  { %v8865_v41 = vadd.f32 %v8864_v22, %v8863_v20 }
0x11c1   :  { %8867 = vst [vmem:[#allocation5] sm:$0x1] %v8865_v41 }
0x11c8   :  { %v9048_v54 = vld [vmem:[#allocation5] sm:$0xff] }
0x11c9   :  { %11004 = vmatmul.mubr.f32.vlgmr.msra.gmra.mrb[74].mxu1 %v9048_v54 }
0x125e   :  { %v8971_v36 = vpop.f32.mrb[72].mxu1 }
0x125f   :  { %v9045_v0 = vadd.f32 %v9044_v35, %v8971_v36  ;;  %v10970_v52 = vpop.f32.mrb[73].mxu1 }
0x129c   :  { %v9131_v42 = vpop.f32.mrb[74].mxu1 }
0x129d   :  { %v9135_v12 = vadd.f32 %v9131_v42, %v9045_v0  ;;  %v11005_v33 = vpop.f32.mrb[75].mxu1 }
0x129f   :  { %v9143_v24 = vadd.f32 %v9237_v31, %v9135_v12 }
0x12a1   :  { %9145 = vst.msk [vmem:[#allocation17] sm:$0xff] %vm9144_vm3, %v9143_v24 }
0x12a2   :  { %13603 = shalt.err (!%p13600_p10)
}
0x12a3   :  { %s17217_s5 = sld [smem:[#allocation42_spill]] }
0x12a9   :  { %s13604_s24 = scalar_lea.hbm %s17217_s5, 128 }
0x12aa   :  { %p13605_p11 = scmp.ne.s32.totalorder %s17217_s5, %s13604_s24  ;;  %p13608_p12 = scmp.lt.u32.totalorder %s13604_s24, %s17217_s5 }
0x12ac   :  { %p13610_p13 = pnand %p13608_p12, %p13605_p11 }
0x12ae   :  { %13613 = shalt.err (!%p13610_p13)
}
0x12af   :  { %9155 = dma.vmem_to_hbm [thread:$0]  %s9153_s28, 128, %s17217_s5, [#allocation8]  }
0x12b0   :  { %13622 = dma.done.wait [#allocation8], 128  }
0x12b1   :  { %13623 = vsyncadd [#allocation8], 4294967168 }
0x12b2   :  { %9159 = vsyncpa [#allocation7], 1 }
0x12b3   :  { %9160 = vsyncpa [#allocation10], 1 }
0x12b4   :  { %9161 = vsyncpa [#allocation13], 1 }
0x12b5   :  { %9162 = vsyncpa [#allocation16], 1 }
0x12b6   :  { %9163 = vsyncpa [#allocation8], 1 }

</bundles_post_ra>
